<compile_context>
chip_gen: v7x
topology: tpu7x:2x2x1
jax: 0.10.0
libtpu: 0.0.40
codegen_flags: <defaults>
</compile_context>

<pallas_src>
import functools

import jax
import jax.numpy as jnp
from jax.experimental import pallas as pl
from jax.experimental.pallas import tpu as pltpu

CHAN_PAD = 128  # lane-dense channel width for conv outputs / fc2 classes


def _round_up(x, m):
    return (x + m - 1) // m * m


def _row_tile(m, target=512):
    """Row-tile size: full array if small, else `target` (multiple of 8)."""
    return m if m <= target else target


# ----------------------------- Pallas kernels -----------------------------

def _matmul_bias_act_kernel(x_ref, w_ref, b_ref, o_ref, *, apply_relu):
    """Fused (bf16 x bf16 -> f32) matmul + bias (+ ReLU) on the MXU/VPU."""
    acc = jnp.dot(x_ref[...], w_ref[...], preferred_element_type=jnp.float32)
    acc = acc + b_ref[...]          # (1, N) f32 bias broadcast over row tile
    if apply_relu:
        acc = jnp.maximum(acc, 0.0)
    o_ref[...] = acc.astype(o_ref.dtype)


def _max4_kernel(a_ref, b_ref, c_ref, d_ref, o_ref):
    """Elementwise max of the 4 corners of each 2x2 pooling window."""
    o_ref[...] = jnp.maximum(jnp.maximum(a_ref[...], b_ref[...]),
                             jnp.maximum(c_ref[...], d_ref[...]))


# ------------------------------ Pallas wrappers ----------------------------

def linear(x, w, b, *, apply_relu, out_dtype):
    """x: (M, K) bf16, w: (K, N) bf16, b: (1, N) f32 -> (M, N) out_dtype.

    M is tiled (double-buffered pipeline); weights/bias stay VMEM-resident
    across the grid. Grid axis is 'parallel' so v7x can split it across cores.
    """
    M, K = x.shape
    K2, Nout = w.shape
    assert K == K2 and b.shape == (1, Nout)
    TM = _row_tile(M, 512)
    grid = (pl.cdiv(M, TM),)

    flops = 2 * M * K * Nout
    bytes_accessed = (M * K * x.dtype.itemsize + K * Nout * w.dtype.itemsize
                      + Nout * 4 + M * Nout * jnp.dtype(out_dtype).itemsize)

    return pl.pallas_call(
        functools.partial(_matmul_bias_act_kernel, apply_relu=apply_relu),
        grid=grid,
        in_specs=[
            pl.BlockSpec((TM, K), lambda i: (i, 0)),     # row tile, pipelined
            pl.BlockSpec((K, Nout), lambda i: (0, 0)),   # weight resident
            pl.BlockSpec((1, Nout), lambda i: (0, 0)),   # bias resident
        ],
        out_specs=pl.BlockSpec((TM, Nout), lambda i: (i, 0)),
        out_shape=jax.ShapeDtypeStruct((M, Nout), out_dtype),
        compiler_params=pltpu.CompilerParams(dimension_semantics=("parallel",)),
        cost_estimate=pl.CostEstimate(flops=flops, transcendentals=0,
                                      bytes_accessed=bytes_accessed),
    )(x, w, b)


def maxpool_2x2_pad1(x):
    """MaxPool2d(kernel=(2,2), stride=2, padding=1) on NHWC input.

    Input is post-ReLU (>= 0) so zero padding is exact (every window contains
    at least one real element). The kernel sees 4 lane-dense (M, 128) corner
    arrays and reduces them elementwise.
    """
    N, H, W, C = x.shape
    xp = jnp.pad(x, ((0, 0), (1, 1), (1, 1), (0, 0)))   # zero pad (valid: x >= 0)
    OH, OW = (H + 2) // 2, (W + 2) // 2
    M = N * OH * OW
    a = xp[:, 0::2, 0::2, :].reshape(M, C)
    b = xp[:, 0::2, 1::2, :].reshape(M, C)
    c = xp[:, 1::2, 0::2, :].reshape(M, C)
    d = xp[:, 1::2, 1::2, :].reshape(M, C)

    TM = _row_tile(M, 512)
    out = pl.pallas_call(
        _max4_kernel,
        grid=(pl.cdiv(M, TM),),
        in_specs=[pl.BlockSpec((TM, C), lambda i: (i, 0)) for _ in range(4)],
        out_specs=pl.BlockSpec((TM, C), lambda i: (i, 0)),
        out_shape=jax.ShapeDtypeStruct((M, C), x.dtype),
        compiler_params=pltpu.CompilerParams(dimension_semantics=("parallel",)),
    )(a, b, c, d)
    return out.reshape(N, OH, OW, C)


# ------------------------------- glue (JAX) -------------------------------

def im2col(x, kh, kw, pad):
    """x: NHWC -> patches (N*OH*OW, kh*kw*Cin), per-patch order (kh, kw, cin)."""
    # TODO(synk): move patch extraction inside the conv kernel (shifted in-VMEM
    # matmuls) to kill the kh*kw HBM expansion at large batch sizes.
    xp = jnp.pad(x, ((0, 0), (pad, pad), (pad, pad), (0, 0)))
    N, Hp, Wp, C = xp.shape
    OH, OW = Hp - kh + 1, Wp - kw + 1
    cols = []
    for i in range(kh):
        for j in range(kw):
            cols.append(xp[:, i:i + OH, j:j + OW, :])
    p = jnp.stack(cols, axis=3)                  # (N, OH, OW, kh*kw, C)
    return p.reshape(N * OH * OW, kh * kw * C), OH, OW


def conv2d_relu(x, w2d, b2d, pad):
    """x: NHWC bf16. w2d: prepared (K_padded, 128) bf16. relu(conv+bias), fused."""
    N = x.shape[0]
    patches, OH, OW = im2col(x, 5, 5, pad)
    if patches.shape[1] < w2d.shape[0]:          # conv1: K 25 -> 32 (sublane multiple)
        patches = jnp.pad(patches, ((0, 0), (0, w2d.shape[0] - patches.shape[1])))
    y = linear(patches, w2d, b2d, apply_relu=True, out_dtype=jnp.bfloat16)
    return y.reshape(N, OH, OW, w2d.shape[1])


def net_mnist_forward(x_nchw, params, *, num_classes):
    x = jnp.transpose(x_nchw, (0, 2, 3, 1)).astype(jnp.bfloat16)        # NHWC bf16
    x = conv2d_relu(x, params["conv1_w"], params["conv1_b"], pad=1)     # (N,26,26,128)
    x = maxpool_2x2_pad1(x)                                             # (N,14,14,128)
    x = x[:, :, :, :32]                 # drop zero-padded channels: conv2 K stays 800
    x = conv2d_relu(x, params["conv2_w"], params["conv2_b"], pad=1)     # (N,12,12,128)
    x = maxpool_2x2_pad1(x)                                             # (N,7,7,128)
    # NHWC flatten; the NCHW permutation PyTorch implies is pre-folded into fc1_w.
    x = x[:, :, :, :64].reshape(x.shape[0], -1)                         # (N,3136)
    x = linear(x, params["fc1_w"], params["fc1_b"],
               apply_relu=True, out_dtype=jnp.bfloat16)                 # (N,512)
    x = linear(x, params["fc2_w"], params["fc2_b"],
               apply_relu=False, out_dtype=jnp.float32)                 # (N,128)
    return x[:, :num_classes]                                           # (N,num_classes)


# --------------------------- parameter preparation --------------------------

def init_torch_params(key, num_classes):
    """Deterministic synthetic init in PyTorch layouts (Cout,Cin,kh,kw) / (out,in)."""
    ks = jax.random.split(key, 8)

    def u(k, shape, fan_in):
        bound = 1.0 / jnp.sqrt(float(fan_in))
        return jax.random.uniform(k, shape, jnp.float32, -bound, bound)

    return {
        "conv1_w": u(ks[0], (32, 1, 5, 5), 25),
        "conv1_b": u(ks[1], (32,), 25),
        "conv2_w": u(ks[2], (64, 32, 5, 5), 800),
        "conv2_b": u(ks[3], (64,), 800),
        "fc1_w":  u(ks[4], (512, 64 * 7 * 7), 3136),
        "fc1_b":  u(ks[5], (512,), 3136),
        "fc2_w":  u(ks[6], (num_classes, 512), 512),
        "fc2_b":  u(ks[7], (num_classes,), 512),
    }


def prepare_params(tp, num_classes):
    """PyTorch-layout params -> kernel-ready: bf16 matmul weights, lane-dense
    (128) output channels, conv1 K padded to 32, NCHW flatten folded into fc1_w."""
    p = {}
    # conv1: (32,1,5,5) -> (25,32) -> pad K 25->32, Cout 32->128
    w = jnp.transpose(tp["conv1_w"], (2, 3, 1, 0)).reshape(25, 32)
    p["conv1_w"] = jnp.pad(w, ((0, 7), (0, CHAN_PAD - 32))).astype(jnp.bfloat16)
    p["conv1_b"] = jnp.pad(tp["conv1_b"], (0, CHAN_PAD - 32)).reshape(1, CHAN_PAD).astype(jnp.float32)
    # conv2: (64,32,5,5) -> (800,64) -> pad Cout 64->128
    w = jnp.transpose(tp["conv2_w"], (2, 3, 1, 0)).reshape(25 * 32, 64)
    p["conv2_w"] = jnp.pad(w, ((0, 0), (0, CHAN_PAD - 64))).astype(jnp.bfloat16)
    p["conv2_b"] = jnp.pad(tp["conv2_b"], (0, CHAN_PAD - 64)).reshape(1, CHAN_PAD).astype(jnp.float32)
    # fc1: fold the NCHW flatten order into the weight -> rows in (h, w, c) order
    w = tp["fc1_w"].reshape(512, 64, 7, 7)               # (out, c, h, w)
    w = jnp.transpose(w, (2, 3, 1, 0)).reshape(7 * 7 * 64, 512)
    p["fc1_w"] = w.astype(jnp.bfloat16)
    p["fc1_b"] = tp["fc1_b"].reshape(1, 512).astype(jnp.float32)
    # fc2: (nc,512) -> (512,nc) -> pad classes to 128 for a lane-dense output store
    ncp = _round_up(max(num_classes, CHAN_PAD), CHAN_PAD)
    w = jnp.transpose(tp["fc2_w"], (1, 0))
    p["fc2_w"] = jnp.pad(w, ((0, 0), (0, ncp - num_classes))).astype(jnp.bfloat16)
    p["fc2_b"] = jnp.pad(tp["fc2_b"], (0, ncp - num_classes)).reshape(1, ncp).astype(jnp.float32)
    return p


if __name__ == "__main__":
    num_classes = 10
    key = jax.random.PRNGKey(0)
    kx, kp = jax.random.split(key)
    # fc1 expects 64*7*7 features, which pins the spatial size to 28x28 (MNIST).
    x = jax.random.normal(kx, (2, 1, 28, 28), dtype=jnp.float32)
    params = prepare_params(init_torch_params(kp, num_classes), num_classes)

    fwd = jax.jit(functools.partial(net_mnist_forward, num_classes=num_classes))
    out = jax.block_until_ready(fwd(x, params))
    assert out.shape == (2, num_classes) and out.dtype == jnp.float32
    print("KERNEL_OK")
</pallas_src>

<mosaic_0001>
module attributes {stable_mosaic.version = 11 : i64} {
  func.func @_matmul_bias_act_kernel(%arg0: i32, %arg1: memref<512x32xbf16, #tpu.memory_space<vmem>>, %arg2: memref<32x128xbf16, #tpu.memory_space<vmem>>, %arg3: memref<1x128xf32, #tpu.memory_space<vmem>>, %arg4: memref<512x128xbf16, #tpu.memory_space<vmem>>) attributes {dimension_semantics = [#tpu.dimension_semantics<parallel>], iteration_bounds = array<i64: 3>, scalar_prefetch = 0 : i64, scratch_operands = 0 : i64, tpu.core_type = #tpu.core_type<tc>, window_params = [{transform_indices = @transform_0, window_bounds = array<i64: 512, 32>}, {pipeline_mode = #tpu.pipeline_mode<synchronous>, transform_indices = @transform_1, window_bounds = array<i64: 32, 128>}, {pipeline_mode = #tpu.pipeline_mode<synchronous>, transform_indices = @transform_2, window_bounds = array<i64: 1, 128>}, {transform_indices = @transform_3, window_bounds = array<i64: 512, 128>}]} {
    %c0 = arith.constant 0 : index
    %c0_0 = arith.constant 0 : index
    %0 = vector.load %arg1[%c0, %c0_0] : memref<512x32xbf16, #tpu.memory_space<vmem>>, vector<512x32xbf16>
    %c0_1 = arith.constant 0 : index
    %c0_2 = arith.constant 0 : index
    %1 = vector.load %arg2[%c0_1, %c0_2] : memref<32x128xbf16, #tpu.memory_space<vmem>>, vector<32x128xbf16>
    %cst = arith.constant dense<0.000000e+00> : vector<512x128xf32>
    %2 = tpu.matmul %0, %1, %cst {dimension_numbers = #tpu.dot_dimension_numbers<[1], [0], [0], [1], [0, 0, 1, 1], [], []>} : vector<512x32xbf16>, vector<32x128xbf16>, vector<512x128xf32> -> vector<512x128xf32>
    %c0_3 = arith.constant 0 : index
    %c0_4 = arith.constant 0 : index
    %3 = vector.load %arg3[%c0_3, %c0_4] : memref<1x128xf32, #tpu.memory_space<vmem>>, vector<1x128xf32>
    %4 = vector.broadcast %3 : vector<1x128xf32> to vector<512x128xf32>
    %5 = arith.addf %2, %4 : vector<512x128xf32>
    %cst_5 = arith.constant 0.000000e+00 : f32
    %6 = vector.broadcast %cst_5 : f32 to vector<512x128xf32>
    %7 = arith.maximumf %5, %6 : vector<512x128xf32>
    %8 = arith.truncf %7 : vector<512x128xf32> to vector<512x128xbf16>
    %c0_6 = arith.constant 0 : index
    %c0_7 = arith.constant 0 : index
    %9 = vector.load %arg4[%c0_6, %c0_7] : memref<512x128xbf16, #tpu.memory_space<vmem>>, vector<512x128xbf16>
    tpu.vector_store %arg4[%c0_6, %c0_7], %8 {strides = array<i32>} : memref<512x128xbf16, #tpu.memory_space<vmem>>, vector<512x128xbf16>,
    return
  }
  func.func @transform_0(%arg0: i32) -> (i32, i32) {
    %c0_i32 = arith.constant 0 : i32
    %c0_i32_0 = arith.constant 0 : i32
    return %arg0, %c0_i32 : i32, i32
  }
  func.func @transform_1(%arg0: i32) -> (i32, i32) {
    %c0_i32 = arith.constant 0 : i32
    %c0_i32_0 = arith.constant 0 : i32
    %c0_i32_1 = arith.constant 0 : i32
    return %c0_i32, %c0_i32_0 : i32, i32
  }
  func.func @transform_2(%arg0: i32) -> (i32, i32) {
    %c0_i32 = arith.constant 0 : i32
    %c0_i32_0 = arith.constant 0 : i32
    %c0_i32_1 = arith.constant 0 : i32
    return %c0_i32, %c0_i32_0 : i32, i32
  }
  func.func @transform_3(%arg0: i32) -> (i32, i32) {
    %c0_i32 = arith.constant 0 : i32
    %c0_i32_0 = arith.constant 0 : i32
    return %arg0, %c0_i32 : i32, i32
  }
}

module attributes {stable_mosaic.version = 11 : i64} {
  func.func @_max4_kernel(%arg0: i32, %arg1: memref<392x128xbf16, #tpu.memory_space<vmem>>, %arg2: memref<392x128xbf16, #tpu.memory_space<vmem>>, %arg3: memref<392x128xbf16, #tpu.memory_space<vmem>>, %arg4: memref<392x128xbf16, #tpu.memory_space<vmem>>, %arg5: memref<392x128xbf16, #tpu.memory_space<vmem>>) attributes {dimension_semantics = [#tpu.dimension_semantics<parallel>], iteration_bounds = array<i64: 1>, scalar_prefetch = 0 : i64, scratch_operands = 0 : i64, tpu.core_type = #tpu.core_type<tc>, window_params = [{transform_indices = @transform_0, window_bounds = array<i64: 392, 128>}, {transform_indices = @transform_1, window_bounds = array<i64: 392, 128>}, {transform_indices = @transform_2, window_bounds = array<i64: 392, 128>}, {transform_indices = @transform_3, window_bounds = array<i64: 392, 128>}, {transform_indices = @transform_4, window_bounds = array<i64: 392, 128>}]} {
    %c0 = arith.constant 0 : index
    %c0_0 = arith.constant 0 : index
    %0 = vector.load %arg1[%c0, %c0_0] : memref<392x128xbf16, #tpu.memory_space<vmem>>, vector<392x128xbf16>
    %c0_1 = arith.constant 0 : index
    %c0_2 = arith.constant 0 : index
    %1 = vector.load %arg2[%c0_1, %c0_2] : memref<392x128xbf16, #tpu.memory_space<vmem>>, vector<392x128xbf16>
    %2 = arith.maximumf %0, %1 : vector<392x128xbf16>
    %c0_3 = arith.constant 0 : index
    %c0_4 = arith.constant 0 : index
    %3 = vector.load %arg3[%c0_3, %c0_4] : memref<392x128xbf16, #tpu.memory_space<vmem>>, vector<392x128xbf16>
    %c0_5 = arith.constant 0 : index
    %c0_6 = arith.constant 0 : index
    %4 = vector.load %arg4[%c0_5, %c0_6] : memref<392x128xbf16, #tpu.memory_space<vmem>>, vector<392x128xbf16>
    %5 = arith.maximumf %3, %4 : vector<392x128xbf16>
    %6 = arith.maximumf %2, %5 : vector<392x128xbf16>
    %c0_7 = arith.constant 0 : index
    %c0_8 = arith.constant 0 : index
    %7 = vector.load %arg5[%c0_7, %c0_8] : memref<392x128xbf16, #tpu.memory_space<vmem>>, vector<392x128xbf16>
    tpu.vector_store %arg5[%c0_7, %c0_8], %6 {strides = array<i32>} : memref<392x128xbf16, #tpu.memory_space<vmem>>, vector<392x128xbf16>,
    return
  }
  func.func @transform_0(%arg0: i32) -> (i32, i32) {
    %c0_i32 = arith.constant 0 : i32
    %c0_i32_0 = arith.constant 0 : i32
    return %arg0, %c0_i32 : i32, i32
  }
  func.func @transform_1(%arg0: i32) -> (i32, i32) {
    %c0_i32 = arith.constant 0 : i32
    %c0_i32_0 = arith.constant 0 : i32
    return %arg0, %c0_i32 : i32, i32
  }
  func.func @transform_2(%arg0: i32) -> (i32, i32) {
    %c0_i32 = arith.constant 0 : i32
    %c0_i32_0 = arith.constant 0 : i32
    return %arg0, %c0_i32 : i32, i32
  }
  func.func @transform_3(%arg0: i32) -> (i32, i32) {
    %c0_i32 = arith.constant 0 : i32
    %c0_i32_0 = arith.constant 0 : i32
    return %arg0, %c0_i32 : i32, i32
  }
  func.func @transform_4(%arg0: i32) -> (i32, i32) {
    %c0_i32 = arith.constant 0 : i32
    %c0_i32_0 = arith.constant 0 : i32
    return %arg0, %c0_i32 : i32, i32
  }
}

module attributes {stable_mosaic.version = 11 : i64} {
  func.func @_matmul_bias_act_kernel(%arg0: i32, %arg1: memref<288x800xbf16, #tpu.memory_space<vmem>>, %arg2: memref<800x128xbf16, #tpu.memory_space<vmem>>, %arg3: memref<1x128xf32, #tpu.memory_space<vmem>>, %arg4: memref<288x128xbf16, #tpu.memory_space<vmem>>) attributes {dimension_semantics = [#tpu.dimension_semantics<parallel>], iteration_bounds = array<i64: 1>, scalar_prefetch = 0 : i64, scratch_operands = 0 : i64, tpu.core_type = #tpu.core_type<tc>, window_params = [{transform_indices = @transform_0, window_bounds = array<i64: 288, 800>}, {pipeline_mode = #tpu.pipeline_mode<synchronous>, transform_indices = @transform_1, window_bounds = array<i64: 800, 128>}, {pipeline_mode = #tpu.pipeline_mode<synchronous>, transform_indices = @transform_2, window_bounds = array<i64: 1, 128>}, {transform_indices = @transform_3, window_bounds = array<i64: 288, 128>}]} {
    %c0 = arith.constant 0 : index
    %c0_0 = arith.constant 0 : index
    %0 = vector.load %arg1[%c0, %c0_0] : memref<288x800xbf16, #tpu.memory_space<vmem>>, vector<288x800xbf16>
    %c0_1 = arith.constant 0 : index
    %c0_2 = arith.constant 0 : index
    %1 = vector.load %arg2[%c0_1, %c0_2] : memref<800x128xbf16, #tpu.memory_space<vmem>>, vector<800x128xbf16>
    %cst = arith.constant dense<0.000000e+00> : vector<288x128xf32>
    %2 = tpu.matmul %0, %1, %cst {dimension_numbers = #tpu.dot_dimension_numbers<[1], [0], [0], [1], [0, 0, 1, 1], [], []>} : vector<288x800xbf16>, vector<800x128xbf16>, vector<288x128xf32> -> vector<288x128xf32>
    %c0_3 = arith.constant 0 : index
    %c0_4 = arith.constant 0 : index
    %3 = vector.load %arg3[%c0_3, %c0_4] : memref<1x128xf32, #tpu.memory_space<vmem>>, vector<1x128xf32>
    %4 = vector.broadcast %3 : vector<1x128xf32> to vector<288x128xf32>
    %5 = arith.addf %2, %4 : vector<288x128xf32>
    %cst_5 = arith.constant 0.000000e+00 : f32
    %6 = vector.broadcast %cst_5 : f32 to vector<288x128xf32>
    %7 = arith.maximumf %5, %6 : vector<288x128xf32>
    %8 = arith.truncf %7 : vector<288x128xf32> to vector<288x128xbf16>
    %c0_6 = arith.constant 0 : index
    %c0_7 = arith.constant 0 : index
    %9 = vector.load %arg4[%c0_6, %c0_7] : memref<288x128xbf16, #tpu.memory_space<vmem>>, vector<288x128xbf16>
    tpu.vector_store %arg4[%c0_6, %c0_7], %8 {strides = array<i32>} : memref<288x128xbf16, #tpu.memory_space<vmem>>, vector<288x128xbf16>,
    return
  }
  func.func @transform_0(%arg0: i32) -> (i32, i32) {
    %c0_i32 = arith.constant 0 : i32
    %c0_i32_0 = arith.constant 0 : i32
    return %arg0, %c0_i32 : i32, i32
  }
  func.func @transform_1(%arg0: i32) -> (i32, i32) {
    %c0_i32 = arith.constant 0 : i32
    %c0_i32_0 = arith.constant 0 : i32
    %c0_i32_1 = arith.constant 0 : i32
    return %c0_i32, %c0_i32_0 : i32, i32
  }
  func.func @transform_2(%arg0: i32) -> (i32, i32) {
    %c0_i32 = arith.constant 0 : i32
    %c0_i32_0 = arith.constant 0 : i32
    %c0_i32_1 = arith.constant 0 : i32
    return %c0_i32, %c0_i32_0 : i32, i32
  }
  func.func @transform_3(%arg0: i32) -> (i32, i32) {
    %c0_i32 = arith.constant 0 : i32
    %c0_i32_0 = arith.constant 0 : i32
    return %arg0, %c0_i32 : i32, i32
  }
}

module attributes {stable_mosaic.version = 11 : i64} {
  func.func @_max4_kernel(%arg0: i32, %arg1: memref<98x128xbf16, #tpu.memory_space<vmem>>, %arg2: memref<98x128xbf16, #tpu.memory_space<vmem>>, %arg3: memref<98x128xbf16, #tpu.memory_space<vmem>>, %arg4: memref<98x128xbf16, #tpu.memory_space<vmem>>, %arg5: memref<98x128xbf16, #tpu.memory_space<vmem>>) attributes {dimension_semantics = [#tpu.dimension_semantics<parallel>], iteration_bounds = array<i64: 1>, scalar_prefetch = 0 : i64, scratch_operands = 0 : i64, tpu.core_type = #tpu.core_type<tc>, window_params = [{transform_indices = @transform_0, window_bounds = array<i64: 98, 128>}, {transform_indices = @transform_1, window_bounds = array<i64: 98, 128>}, {transform_indices = @transform_2, window_bounds = array<i64: 98, 128>}, {transform_indices = @transform_3, window_bounds = array<i64: 98, 128>}, {transform_indices = @transform_4, window_bounds = array<i64: 98, 128>}]} {
    %c0 = arith.constant 0 : index
    %c0_0 = arith.constant 0 : index
    %0 = vector.load %arg1[%c0, %c0_0] : memref<98x128xbf16, #tpu.memory_space<vmem>>, vector<98x128xbf16>
    %c0_1 = arith.constant 0 : index
    %c0_2 = arith.constant 0 : index
    %1 = vector.load %arg2[%c0_1, %c0_2] : memref<98x128xbf16, #tpu.memory_space<vmem>>, vector<98x128xbf16>
    %2 = arith.maximumf %0, %1 : vector<98x128xbf16>
    %c0_3 = arith.constant 0 : index
    %c0_4 = arith.constant 0 : index
    %3 = vector.load %arg3[%c0_3, %c0_4] : memref<98x128xbf16, #tpu.memory_space<vmem>>, vector<98x128xbf16>
    %c0_5 = arith.constant 0 : index
    %c0_6 = arith.constant 0 : index
    %4 = vector.load %arg4[%c0_5, %c0_6] : memref<98x128xbf16, #tpu.memory_space<vmem>>, vector<98x128xbf16>
    %5 = arith.maximumf %3, %4 : vector<98x128xbf16>
    %6 = arith.maximumf %2, %5 : vector<98x128xbf16>
    %c0_7 = arith.constant 0 : index
    %c0_8 = arith.constant 0 : index
    %7 = vector.load %arg5[%c0_7, %c0_8] : memref<98x128xbf16, #tpu.memory_space<vmem>>, vector<98x128xbf16>
    tpu.vector_store %arg5[%c0_7, %c0_8], %6 {strides = array<i32>} : memref<98x128xbf16, #tpu.memory_space<vmem>>, vector<98x128xbf16>,
    return
  }
  func.func @transform_0(%arg0: i32) -> (i32, i32) {
    %c0_i32 = arith.constant 0 : i32
    %c0_i32_0 = arith.constant 0 : i32
    return %arg0, %c0_i32 : i32, i32
  }
  func.func @transform_1(%arg0: i32) -> (i32, i32) {
    %c0_i32 = arith.constant 0 : i32
    %c0_i32_0 = arith.constant 0 : i32
    return %arg0, %c0_i32 : i32, i32
  }
  func.func @transform_2(%arg0: i32) -> (i32, i32) {
    %c0_i32 = arith.constant 0 : i32
    %c0_i32_0 = arith.constant 0 : i32
    return %arg0, %c0_i32 : i32, i32
  }
  func.func @transform_3(%arg0: i32) -> (i32, i32) {
    %c0_i32 = arith.constant 0 : i32
    %c0_i32_0 = arith.constant 0 : i32
    return %arg0, %c0_i32 : i32, i32
  }
  func.func @transform_4(%arg0: i32) -> (i32, i32) {
    %c0_i32 = arith.constant 0 : i32
    %c0_i32_0 = arith.constant 0 : i32
    return %arg0, %c0_i32 : i32, i32
  }
}

module attributes {stable_mosaic.version = 11 : i64} {
  func.func @_matmul_bias_act_kernel(%arg0: i32, %arg1: memref<2x3136xbf16, #tpu.memory_space<vmem>>, %arg2: memref<3136x512xbf16, #tpu.memory_space<vmem>>, %arg3: memref<1x512xf32, #tpu.memory_space<vmem>>, %arg4: memref<2x512xbf16, #tpu.memory_space<vmem>>) attributes {dimension_semantics = [#tpu.dimension_semantics<parallel>], iteration_bounds = array<i64: 1>, scalar_prefetch = 0 : i64, scratch_operands = 0 : i64, tpu.core_type = #tpu.core_type<tc>, window_params = [{transform_indices = @transform_0, window_bounds = array<i64: 2, 3136>}, {pipeline_mode = #tpu.pipeline_mode<synchronous>, transform_indices = @transform_1, window_bounds = array<i64: 3136, 512>}, {pipeline_mode = #tpu.pipeline_mode<synchronous>, transform_indices = @transform_2, window_bounds = array<i64: 1, 512>}, {transform_indices = @transform_3, window_bounds = array<i64: 2, 512>}]} {
    %c0 = arith.constant 0 : index
    %c0_0 = arith.constant 0 : index
    %0 = vector.load %arg1[%c0, %c0_0] : memref<2x3136xbf16, #tpu.memory_space<vmem>>, vector<2x3136xbf16>
    %c0_1 = arith.constant 0 : index
    %c0_2 = arith.constant 0 : index
    %1 = vector.load %arg2[%c0_1, %c0_2] : memref<3136x512xbf16, #tpu.memory_space<vmem>>, vector<3136x512xbf16>
    %cst = arith.constant dense<0.000000e+00> : vector<2x512xf32>
    %2 = tpu.matmul %0, %1, %cst {dimension_numbers = #tpu.dot_dimension_numbers<[1], [0], [0], [1], [0, 0, 1, 1], [], []>} : vector<2x3136xbf16>, vector<3136x512xbf16>, vector<2x512xf32> -> vector<2x512xf32>
    %c0_3 = arith.constant 0 : index
    %c0_4 = arith.constant 0 : index
    %3 = vector.load %arg3[%c0_3, %c0_4] : memref<1x512xf32, #tpu.memory_space<vmem>>, vector<1x512xf32>
    %4 = vector.broadcast %3 : vector<1x512xf32> to vector<2x512xf32>
    %5 = arith.addf %2, %4 : vector<2x512xf32>
    %cst_5 = arith.constant 0.000000e+00 : f32
    %6 = vector.broadcast %cst_5 : f32 to vector<2x512xf32>
    %7 = arith.maximumf %5, %6 : vector<2x512xf32>
    %8 = arith.truncf %7 : vector<2x512xf32> to vector<2x512xbf16>
    %c0_6 = arith.constant 0 : index
    %c0_7 = arith.constant 0 : index
    %9 = vector.load %arg4[%c0_6, %c0_7] : memref<2x512xbf16, #tpu.memory_space<vmem>>, vector<2x512xbf16>
    tpu.vector_store %arg4[%c0_6, %c0_7], %8 {strides = array<i32>} : memref<2x512xbf16, #tpu.memory_space<vmem>>, vector<2x512xbf16>,
    return
  }
  func.func @transform_0(%arg0: i32) -> (i32, i32) {
    %c0_i32 = arith.constant 0 : i32
    %c0_i32_0 = arith.constant 0 : i32
    return %arg0, %c0_i32 : i32, i32
  }
  func.func @transform_1(%arg0: i32) -> (i32, i32) {
    %c0_i32 = arith.constant 0 : i32
    %c0_i32_0 = arith.constant 0 : i32
    %c0_i32_1 = arith.constant 0 : i32
    return %c0_i32, %c0_i32_0 : i32, i32
  }
  func.func @transform_2(%arg0: i32) -> (i32, i32) {
    %c0_i32 = arith.constant 0 : i32
    %c0_i32_0 = arith.constant 0 : i32
    %c0_i32_1 = arith.constant 0 : i32
    return %c0_i32, %c0_i32_0 : i32, i32
  }
  func.func @transform_3(%arg0: i32) -> (i32, i32) {
    %c0_i32 = arith.constant 0 : i32
    %c0_i32_0 = arith.constant 0 : i32
    return %arg0, %c0_i32 : i32, i32
  }
}

module attributes {stable_mosaic.version = 11 : i64} {
  func.func @_matmul_bias_act_kernel(%arg0: i32, %arg1: memref<2x512xbf16, #tpu.memory_space<vmem>>, %arg2: memref<512x128xbf16, #tpu.memory_space<vmem>>, %arg3: memref<1x128xf32, #tpu.memory_space<vmem>>, %arg4: memref<2x128xf32, #tpu.memory_space<vmem>>) attributes {dimension_semantics = [#tpu.dimension_semantics<parallel>], iteration_bounds = array<i64: 1>, scalar_prefetch = 0 : i64, scratch_operands = 0 : i64, tpu.core_type = #tpu.core_type<tc>, window_params = [{transform_indices = @transform_0, window_bounds = array<i64: 2, 512>}, {pipeline_mode = #tpu.pipeline_mode<synchronous>, transform_indices = @transform_1, window_bounds = array<i64: 512, 128>}, {pipeline_mode = #tpu.pipeline_mode<synchronous>, transform_indices = @transform_2, window_bounds = array<i64: 1, 128>}, {transform_indices = @transform_3, window_bounds = array<i64: 2, 128>}]} {
    %c0 = arith.constant 0 : index
    %c0_0 = arith.constant 0 : index
    %0 = vector.load %arg1[%c0, %c0_0] : memref<2x512xbf16, #tpu.memory_space<vmem>>, vector<2x512xbf16>
    %c0_1 = arith.constant 0 : index
    %c0_2 = arith.constant 0 : index
    %1 = vector.load %arg2[%c0_1, %c0_2] : memref<512x128xbf16, #tpu.memory_space<vmem>>, vector<512x128xbf16>
    %cst = arith.constant dense<0.000000e+00> : vector<2x128xf32>
    %2 = tpu.matmul %0, %1, %cst {dimension_numbers = #tpu.dot_dimension_numbers<[1], [0], [0], [1], [0, 0, 1, 1], [], []>} : vector<2x512xbf16>, vector<512x128xbf16>, vector<2x128xf32> -> vector<2x128xf32>
    %c0_3 = arith.constant 0 : index
    %c0_4 = arith.constant 0 : index
    %3 = vector.load %arg3[%c0_3, %c0_4] : memref<1x128xf32, #tpu.memory_space<vmem>>, vector<1x128xf32>
    %4 = vector.broadcast %3 : vector<1x128xf32> to vector<2x128xf32>
    %5 = arith.addf %2, %4 : vector<2x128xf32>
    %c0_5 = arith.constant 0 : index
    %c0_6 = arith.constant 0 : index
    %6 = vector.load %arg4[%c0_5, %c0_6] : memref<2x128xf32, #tpu.memory_space<vmem>>, vector<2x128xf32>
    tpu.vector_store %arg4[%c0_5, %c0_6], %5 {strides = array<i32>} : memref<2x128xf32, #tpu.memory_space<vmem>>, vector<2x128xf32>,
    return
  }
  func.func @transform_0(%arg0: i32) -> (i32, i32) {
    %c0_i32 = arith.constant 0 : i32
    %c0_i32_0 = arith.constant 0 : i32
    return %arg0, %c0_i32 : i32, i32
  }
  func.func @transform_1(%arg0: i32) -> (i32, i32) {
    %c0_i32 = arith.constant 0 : i32
    %c0_i32_0 = arith.constant 0 : i32
    %c0_i32_1 = arith.constant 0 : i32
    return %c0_i32, %c0_i32_0 : i32, i32
  }
  func.func @transform_2(%arg0: i32) -> (i32, i32) {
    %c0_i32 = arith.constant 0 : i32
    %c0_i32_0 = arith.constant 0 : i32
    %c0_i32_1 = arith.constant 0 : i32
    return %c0_i32, %c0_i32_0 : i32, i32
  }
  func.func @transform_3(%arg0: i32) -> (i32, i32) {
    %c0_i32 = arith.constant 0 : i32
    %c0_i32_0 = arith.constant 0 : i32
    return %arg0, %c0_i32 : i32, i32
  }
}

</mosaic_0001>

<bundles_post_ra>
// kernel: net_mnist_forward.6
= control target key start
LH: loop header
LB: loop body
LE: loop exit
PB: predicated region body
PF: predicated region fallthrough
CT: control target
= control target key end

     0   :  { %s2425_s12 = smov 0   ;;  %s2427_s13 = smov 0   ;;  %s2837_s0 = inlined_call_operand.vmem [shape: bf16[1352,32], index: 0, kind: input, shape index: {}]   ;;  %s2838_s1 = inlined_call_operand.vmem [shape: bf16[32,128], index: 1, kind: input, shape index: {}]   ;;  %s2839_s2 = inlined_call_operand.vmem [shape: f32[1,128], index: 2, kind: input, shape index: {}]   ;;  %s2840_s3 = inlined_call_operand.vmem [shape: bf16[1352,128], index: 3, kind: output, shape index: {}]  }
   0x1   :  { %s2429_s14 = smov 0  }
   0x2 LB: > { %s2438_s15 = sadd.s32 4294967295, %s2371_s14   ;;  %s2440_s16 = sadd.s32 1, %s2371_s14   ;;  %s2371_s14 = sphi %s2429_s14, %s2847_s14   ;;  %s2367_s13 = sphi %s2427_s13, %s2846_s13   ;;  %s2363_s12 = sphi %s2425_s12, %s2845_s12  }
   0x3   : > { %s85_s17 = ssub.s32 %s2371_s14, %s2440_s16  ;;  %s88_s18 = sadd.s32 1, %s2367_s13 }
   0x4   : > { %p86_p0 = scmp.eq.s32.totalorder %s85_s17, 0  ;;  %p98_p1 = scmp.ne.s32.totalorder %s2367_s13, %s2363_s12 }
   0x5   : > { %p99_p2 = scmp.eq.s32.totalorder %s2438_s15, 2  ;;  %p1679_p3 = scmp.ge.s32.totalorder %s2371_s14, 1 }
   0x6   : > { %s2448_s19 = scalar_select %p86_p0, %s2367_s13, %s88_s18  }
   0x7   : > { %p2450_p4 = por %p99_p2, %p98_p1  ;;  %p146_p5 = scmp.lt.s32.totalorder %s2371_s14, 4 }
   0x9   : > { %p147_p6 = pnand %p1679_p3, %p146_p5 }
   0xa   : > { %v2283_v0 = vld [vmem:[%s2838_s1] sm:$0xff] (!%p147_p6)   ;;  %s2458_s23 = sshll.u32 (!%p147_p6), %s2438_s15, 6  ;;  %v2284_v1 = vld [vmem:[%s2838_s1 + $0x8] sm:$0xff] (!%p147_p6)   ;;  %vm440_vm0 = vcmask (!%p147_p6), 261120   ;;  %s170_s6 = sand.u32 (!%p147_p6), 1, %s2363_s12  }
   0xb   : > { %150 = sbr.rel (%p147_p6) target bundleno = 394 (0x18a), region = 32  ;;  %p178_p7 = scmp.lt.s32.totalorder (!%p147_p6), %s2458_s23, 168  ;;  %2123 = vmatprep.subr.bf16.mxu0 (!%p147_p6), %v2283_v0  ;;  %2191 = vmatprep.subr.bf16.mxu1 (!%p147_p6), %v2283_v0  ;;  %v2537_v34 = vld [vmem:[%s2839_s2] ss:$0 sm:$0xff] (!%p147_p6) }
   0xc   : > { %2124 = vmatpush3.bf16.msra.mxu0 (!%p147_p6), %v2283_v0  ;;  %2193 = vmatpush3.bf16.msra.mxu1 (!%p147_p6), %v2283_v0  ;;  %s1680_s7 = sshll.u32 (!%p147_p6), %s170_s6, 8 }
   0xd   : > { %2125 = vmatprep.subr.bf16.mxu0 (!%p147_p6), %v2284_v1  ;;  %2192 = vmatprep.subr.bf16.mxu1 (!%p147_p6), %v2284_v1  ;;  %s2548_s8 = scalar_lea.vmem (!%p147_p6), [#allocation2], %s1680_s7  }
  0x10   : > { %2126 = vmatpush3.bf16.msra.mxu0 (!%p147_p6), %v2284_v1  ;;  %2194 = vmatpush3.bf16.msra.mxu1 (!%p147_p6), %v2284_v1 }
  0x12   : > { %s179_s26 = scalar_select %p178_p7, %s2458_s23, 168 }
  0x13   : > { %s1218_s9 = ssub.s32 (%p2450_p4), 169, %s2458_s23  ;;  %s1895_s10 = sshll.u32 (%p2450_p4), %s2438_s15, 8 }
  0x14   : > { %s1682_s27 = sshll.u32 %s179_s26, 2  ;;  %p1219_p8 = scmp.lt.s32.totalorder (%p2450_p4), %s1218_s9, 64 }
  0x15   : > { %s2468_s30 = scalar_lea.vmem %s2837_s0, %s1682_s27  ;;  %s2645_s14 = scalar_lea.vmem (%p2450_p4), %s2840_s3, %s1895_s10  }
  0x16   : > { %v2285_v2 = vld [vmem:[%s2468_s30] sm:$0xff]   ;;  %v2287_v4 = vld [vmem:[%s2468_s30 + $0x8] sm:$0xff]   ;;  %v2289_v6 = vld [vmem:[%s2468_s30 + $0x10] sm:$0xff]  }
  0x17   : > { %v2286_v3 = vld [vmem:[%s2468_s30 + $0x80] sm:$0xff]   ;;  %2127 = vmatprep.mubr.msk.bf16.mxu0 %vm440_vm0, %v2285_v2  ;;  %v2288_v5 = vld [vmem:[%s2468_s30 + $0x88] sm:$0xff]   ;;  %v2290_v7 = vld [vmem:[%s2468_s30 + $0x90] sm:$0xff]  }
  0x18   : > { %2159 = vmatprep.mubr.msk.bf16.mxu1 %vm440_vm0, %v2286_v3  ;;  %2128 = vmatmul.mubr.msk.bf16.vlgmr.msra.gmra.mrb[0].mxu0 %vm440_vm0, %v2287_v4  ;;  %v2291_v8 = vld [vmem:[%s2468_s30 + $0x18] sm:$0xff]   ;;  %v2293_v10 = vld [vmem:[%s2468_s30 + $0x20] sm:$0xff]   ;;  %v2295_v12 = vld [vmem:[%s2468_s30 + $0x28] sm:$0xff]  }
  0x19   : > { %2160 = vmatmul.mubr.msk.bf16.vlgmr.msra.gmra.mrb[0].mxu1 %vm440_vm0, %v2288_v5  ;;  %2131 = vmatprep.mubr.msk.bf16.mxu0 %vm440_vm0, %v2289_v6  ;;  %v2292_v9 = vld [vmem:[%s2468_s30 + $0x98] sm:$0xff]   ;;  %v2294_v11 = vld [vmem:[%s2468_s30 + $0xa0] sm:$0xff]   ;;  %v2296_v13 = vld [vmem:[%s2468_s30 + $0xa8] sm:$0xff]  }
  0x1a   : > { %2163 = vmatprep.mubr.msk.bf16.mxu1 %vm440_vm0, %v2290_v7  ;;  %v2297_v14 = vld [vmem:[%s2468_s30 + $0x30] sm:$0xff]   ;;  %v2299_v16 = vld [vmem:[%s2468_s30 + $0x38] sm:$0xff]   ;;  %v2301_v18 = vld [vmem:[%s2468_s30 + $0x40] sm:$0xff]  }
  0x1b   : > { %v2298_v15 = vld [vmem:[%s2468_s30 + $0xb0] sm:$0xff]   ;;  %v2300_v17 = vld [vmem:[%s2468_s30 + $0xb8] sm:$0xff]   ;;  %v2302_v19 = vld [vmem:[%s2468_s30 + $0xc0] sm:$0xff]  }
  0x1c   : > { %v2303_v20 = vld [vmem:[%s2468_s30 + $0x48] sm:$0xff]   ;;  %v2305_v22 = vld [vmem:[%s2468_s30 + $0x50] sm:$0xff]   ;;  %v2307_v24 = vld [vmem:[%s2468_s30 + $0x58] sm:$0xff]  }
  0x1d   : > { %v2304_v21 = vld [vmem:[%s2468_s30 + $0xc8] sm:$0xff]   ;;  %v2306_v23 = vld [vmem:[%s2468_s30 + $0xd0] sm:$0xff]   ;;  %v2308_v25 = vld [vmem:[%s2468_s30 + $0xd8] sm:$0xff]  }
  0x1e   : > { %v2309_v26 = vld [vmem:[%s2468_s30 + $0x60] sm:$0xff]   ;;  %v2311_v28 = vld [vmem:[%s2468_s30 + $0x68] sm:$0xff]   ;;  %v2313_v30 = vld [vmem:[%s2468_s30 + $0x70] sm:$0xff]  }
  0x1f   : > { %v2310_v27 = vld [vmem:[%s2468_s30 + $0xe0] sm:$0xff]   ;;  %v2312_v29 = vld [vmem:[%s2468_s30 + $0xe8] sm:$0xff]   ;;  %v2314_v31 = vld [vmem:[%s2468_s30 + $0xf0] sm:$0xff]  }
  0x20   : > { %2132 = vmatmul.mubr.msk.bf16.gmra.mrb[4].mxu0 %vm440_vm0, %v2291_v8  ;;  %v2315_v32 = vld [vmem:[%s2468_s30 + $0x78] sm:$0xff]  }
  0x21   : > { %2164 = vmatmul.mubr.msk.bf16.gmra.mrb[4].mxu1 %vm440_vm0, %v2292_v9  ;;  %2135 = vmatprep.mubr.msk.bf16.mxu0 %vm440_vm0, %v2293_v10  ;;  %v2316_v33 = vld [vmem:[%s2468_s30 + $0xf8] sm:$0xff]  }
  0x22   : > { %2167 = vmatprep.mubr.msk.bf16.mxu1 %vm440_vm0, %v2294_v11 }
  0x28   : > { %2136 = vmatmul.mubr.msk.bf16.gmra.mrb[8].mxu0 %vm440_vm0, %v2295_v12 }
  0x29   : > { %2168 = vmatmul.mubr.msk.bf16.gmra.mrb[8].mxu1 %vm440_vm0, %v2296_v13  ;;  %2139 = vmatprep.mubr.msk.bf16.mxu0 %vm440_vm0, %v2297_v14 }
  0x2a   : > { %2171 = vmatprep.mubr.msk.bf16.mxu1 %vm440_vm0, %v2298_v15 }
  0x30   : > { %2140 = vmatmul.mubr.msk.bf16.gmra.mrb[12].mxu0 %vm440_vm0, %v2299_v16 }
  0x31   : > { %2172 = vmatmul.mubr.msk.bf16.gmra.mrb[12].mxu1 %vm440_vm0, %v2300_v17  ;;  %2143 = vmatprep.mubr.msk.bf16.mxu0 %vm440_vm0, %v2301_v18 }
  0x32   : > { %2175 = vmatprep.mubr.msk.bf16.mxu1 %vm440_vm0, %v2302_v19 }
  0x38   : > { %2144 = vmatmul.mubr.msk.bf16.gmra.mrb[16].mxu0 %vm440_vm0, %v2303_v20 }
  0x39   : > { %2176 = vmatmul.mubr.msk.bf16.gmra.mrb[16].mxu1 %vm440_vm0, %v2304_v21  ;;  %2147 = vmatprep.mubr.msk.bf16.mxu0 %vm440_vm0, %v2305_v22 }
  0x3a   : > { %2179 = vmatprep.mubr.msk.bf16.mxu1 %vm440_vm0, %v2306_v23 }
  0x40   : > { %2148 = vmatmul.mubr.msk.bf16.gmra.mrb[20].mxu0 %vm440_vm0, %v2307_v24 }
  0x41   : > { %2180 = vmatmul.mubr.msk.bf16.gmra.mrb[20].mxu1 %vm440_vm0, %v2308_v25  ;;  %2151 = vmatprep.mubr.msk.bf16.mxu0 %vm440_vm0, %v2309_v26 }
  0x42   : > { %2183 = vmatprep.mubr.msk.bf16.mxu1 %vm440_vm0, %v2310_v27 }
  0x48   : > { %2152 = vmatmul.mubr.msk.bf16.gmra.mrb[24].mxu0 %vm440_vm0, %v2311_v28 }
  0x49   : > { %2184 = vmatmul.mubr.msk.bf16.gmra.mrb[24].mxu1 %vm440_vm0, %v2312_v29  ;;  %2155 = vmatprep.mubr.msk.bf16.mxu0 %vm440_vm0, %v2313_v30 }
  0x4a   : > { %2187 = vmatprep.mubr.msk.bf16.mxu1 %vm440_vm0, %v2314_v31 }
  0x50   : > { %2156 = vmatmul.mubr.msk.bf16.gmra.mrb[28].mxu0 %vm440_vm0, %v2315_v32 }
  0x51   : > { %2188 = vmatmul.mubr.msk.bf16.gmra.mrb[28].mxu1 %vm440_vm0, %v2316_v33 }
  0xeb   : > { %v2129_v35 = vpop.f32.mrb[0].mxu0 }
  0xec   : > { %v580_v36 = vadd.f32 %v2129_v35, %v2537_v34  ;;  %v2161_v37 = vpop.f32.mrb[0].mxu1  ;;  %v571_v38 = vpop.f32.mrb[1].mxu0 }
  0xed   : > { %v708_v39 = vadd.f32 %v2161_v37, %v2537_v34  ;;  %v572_v40 = vadd.f32 %v2537_v34, %v571_v38  ;;  %v699_v41 = vpop.f32.mrb[1].mxu1  ;;  %v2130_v42 = vpop.f32.mrb[2].mxu0 }
  0xee   : > { %v700_v43 = vadd.f32 %v2537_v34, %v699_v41  ;;  %v583_v44 = vadd.f32 %v2130_v42, %v2537_v34  ;;  %v2162_v45 = vpop.f32.mrb[2].mxu1  ;;  %v574_v46 = vpop.f32.mrb[3].mxu0  ;;  %v828_v50 = vmax.f32 %v580_v36, 0.0 }
  0xef   : > { %v711_v47 = vadd.f32 %v2162_v45, %v2537_v34  ;;  %v575_v48 = vadd.f32 %v2537_v34, %v574_v46  ;;  %v702_v49 = vpop.f32.mrb[3].mxu1  ;;  %v860_v53 = vmax.f32 %v708_v39, 0.0  ;;  %v826_v54 = vmax.f32 %v572_v40, 0.0 }
  0xf0   : > { %v829_v51 = vmax.f32 %v583_v44, 0.0  ;;  %v703_v52 = vadd.f32 %v2537_v34, %v702_v49  ;;  %v858_v57 = vmax.f32 %v700_v43, 0.0 }
  0xf1   : > { %v861_v55 = vmax.f32 %v711_v47, 0.0  ;;  %v827_v56 = vmax.f32 %v575_v48, 0.0 }
  0xf2   : > { %v1906_v58 = vpack.c.bf16 %v829_v51, %v828_v50  ;;  %v859_v59 = vmax.f32 %v703_v52, 0.0 }
  0xf3   : > { %v1986_v60 = vpack.c.bf16 %v861_v55, %v860_v53  ;;  %v1901_v61 = vpack.c.bf16 %v827_v56, %v826_v54  ;;  %v2133_v62 = vpop.f32.mrb[4].mxu0 }
  0xf4   : > { %2058 = vst [vmem:[%s2548_s8 + $0x8] sm:$0xff] %v1906_v58   ;;  %v1981_v63 = vpack.c.bf16 %v859_v59, %v858_v57  ;;  %v596_v0 = vadd.f32 %v2133_v62, %v2537_v34  ;;  %v2165_v1 = vpop.f32.mrb[4].mxu1  ;;  %v587_v2 = vpop.f32.mrb[5].mxu0 }
  0xf5   : > { %2074 = vst [vmem:[%s2548_s8 + $0x88] sm:$0xff] %v1986_v60   ;;  %1902 = vst [vmem:[%s2548_s8] sm:$0xff] %v1901_v61   ;;  %v724_v3 = vadd.f32 %v2165_v1, %v2537_v34  ;;  %v588_v4 = vadd.f32 %v2537_v34, %v587_v2  ;;  %v715_v5 = vpop.f32.mrb[5].mxu1  ;;  %v2134_v6 = vpop.f32.mrb[6].mxu0 }
  0xf6   : > { %2073 = vst [vmem:[%s2548_s8 + $0x80] sm:$0xff] %v1981_v63   ;;  %v716_v7 = vadd.f32 %v2537_v34, %v715_v5  ;;  %v599_v8 = vadd.f32 %v2134_v6, %v2537_v34  ;;  %v2166_v9 = vpop.f32.mrb[6].mxu1  ;;  %v590_v10 = vpop.f32.mrb[7].mxu0  ;;  %v832_v14 = vmax.f32 %v596_v0, 0.0 }
  0xf7   : > { %v727_v11 = vadd.f32 %v2166_v9, %v2537_v34  ;;  %v591_v12 = vadd.f32 %v2537_v34, %v590_v10  ;;  %v718_v13 = vpop.f32.mrb[7].mxu1  ;;  %v864_v17 = vmax.f32 %v724_v3, 0.0  ;;  %v830_v18 = vmax.f32 %v588_v4, 0.0 }
  0xf8   : > { %v833_v15 = vmax.f32 %v599_v8, 0.0  ;;  %v719_v16 = vadd.f32 %v2537_v34, %v718_v13  ;;  %v862_v21 = vmax.f32 %v716_v7, 0.0 }
  0xf9   : > { %v865_v19 = vmax.f32 %v727_v11, 0.0  ;;  %v831_v20 = vmax.f32 %v591_v12, 0.0 }
  0xfa   : > { %v1916_v22 = vpack.c.bf16 %v833_v15, %v832_v14  ;;  %v863_v23 = vmax.f32 %v719_v16, 0.0 }
  0xfb   : > { %v1996_v24 = vpack.c.bf16 %v865_v19, %v864_v17  ;;  %v1911_v25 = vpack.c.bf16 %v831_v20, %v830_v18  ;;  %v2137_v26 = vpop.f32.mrb[8].mxu0 }
  0xfc   : > { %2060 = vst [vmem:[%s2548_s8 + $0x18] sm:$0xff] %v1916_v22   ;;  %v1991_v27 = vpack.c.bf16 %v863_v23, %v862_v21  ;;  %v612_v28 = vadd.f32 %v2137_v26, %v2537_v34  ;;  %v2169_v29 = vpop.f32.mrb[8].mxu1  ;;  %v603_v30 = vpop.f32.mrb[9].mxu0 }
  0xfd   : > { %2076 = vst [vmem:[%s2548_s8 + $0x98] sm:$0xff] %v1996_v24   ;;  %2059 = vst [vmem:[%s2548_s8 + $0x10] sm:$0xff] %v1911_v25   ;;  %v740_v31 = vadd.f32 %v2169_v29, %v2537_v34  ;;  %v604_v32 = vadd.f32 %v2537_v34, %v603_v30  ;;  %v731_v33 = vpop.f32.mrb[9].mxu1  ;;  %v2138_v35 = vpop.f32.mrb[10].mxu0 }
  0xfe   : > { %2075 = vst [vmem:[%s2548_s8 + $0x90] sm:$0xff] %v1991_v27   ;;  %v732_v36 = vadd.f32 %v2537_v34, %v731_v33  ;;  %v615_v37 = vadd.f32 %v2138_v35, %v2537_v34  ;;  %v2170_v38 = vpop.f32.mrb[10].mxu1  ;;  %v606_v39 = vpop.f32.mrb[11].mxu0  ;;  %v836_v43 = vmax.f32 %v612_v28, 0.0 }
  0xff   : > { %v743_v40 = vadd.f32 %v2170_v38, %v2537_v34  ;;  %v607_v41 = vadd.f32 %v2537_v34, %v606_v39  ;;  %v734_v42 = vpop.f32.mrb[11].mxu1  ;;  %v868_v46 = vmax.f32 %v740_v31, 0.0  ;;  %v834_v47 = vmax.f32 %v604_v32, 0.0 }
 0x100   : > { %v837_v44 = vmax.f32 %v615_v37, 0.0  ;;  %v735_v45 = vadd.f32 %v2537_v34, %v734_v42  ;;  %v866_v50 = vmax.f32 %v732_v36, 0.0 }
 0x101   : > { %v869_v48 = vmax.f32 %v743_v40, 0.0  ;;  %v835_v49 = vmax.f32 %v607_v41, 0.0 }
 0x102   : > { %v1926_v51 = vpack.c.bf16 %v837_v44, %v836_v43  ;;  %v867_v52 = vmax.f32 %v735_v45, 0.0 }
 0x103   : > { %v2006_v53 = vpack.c.bf16 %v869_v48, %v868_v46  ;;  %v1921_v54 = vpack.c.bf16 %v835_v49, %v834_v47  ;;  %v2141_v55 = vpop.f32.mrb[12].mxu0 }
 0x104   : > { %2062 = vst [vmem:[%s2548_s8 + $0x28] sm:$0xff] %v1926_v51   ;;  %v2001_v56 = vpack.c.bf16 %v867_v52, %v866_v50  ;;  %v628_v57 = vadd.f32 %v2141_v55, %v2537_v34  ;;  %v2173_v58 = vpop.f32.mrb[12].mxu1  ;;  %v619_v59 = vpop.f32.mrb[13].mxu0 }
 0x105   : > { %2078 = vst [vmem:[%s2548_s8 + $0xa8] sm:$0xff] %v2006_v53   ;;  %2061 = vst [vmem:[%s2548_s8 + $0x20] sm:$0xff] %v1921_v54   ;;  %v756_v60 = vadd.f32 %v2173_v58, %v2537_v34  ;;  %v620_v61 = vadd.f32 %v2537_v34, %v619_v59  ;;  %v747_v62 = vpop.f32.mrb[13].mxu1  ;;  %v2142_v63 = vpop.f32.mrb[14].mxu0 }
 0x106   : > { %2077 = vst [vmem:[%s2548_s8 + $0xa0] sm:$0xff] %v2001_v56   ;;  %v748_v0 = vadd.f32 %v2537_v34, %v747_v62  ;;  %v631_v1 = vadd.f32 %v2142_v63, %v2537_v34  ;;  %v2174_v2 = vpop.f32.mrb[14].mxu1  ;;  %v622_v3 = vpop.f32.mrb[15].mxu0  ;;  %v840_v7 = vmax.f32 %v628_v57, 0.0 }
 0x107   : > { %v759_v4 = vadd.f32 %v2174_v2, %v2537_v34  ;;  %v623_v5 = vadd.f32 %v2537_v34, %v622_v3  ;;  %v750_v6 = vpop.f32.mrb[15].mxu1  ;;  %v872_v10 = vmax.f32 %v756_v60, 0.0  ;;  %v838_v11 = vmax.f32 %v620_v61, 0.0 }
 0x108   : > { %v841_v8 = vmax.f32 %v631_v1, 0.0  ;;  %v751_v9 = vadd.f32 %v2537_v34, %v750_v6  ;;  %v870_v14 = vmax.f32 %v748_v0, 0.0 }
 0x109   : > { %v873_v12 = vmax.f32 %v759_v4, 0.0  ;;  %v839_v13 = vmax.f32 %v623_v5, 0.0 }
 0x10a   : > { %v1936_v15 = vpack.c.bf16 %v841_v8, %v840_v7  ;;  %v871_v16 = vmax.f32 %v751_v9, 0.0 }
 0x10b   : > { %v2016_v17 = vpack.c.bf16 %v873_v12, %v872_v10  ;;  %v1931_v18 = vpack.c.bf16 %v839_v13, %v838_v11  ;;  %v2145_v19 = vpop.f32.mrb[16].mxu0 }
 0x10c   : > { %2064 = vst [vmem:[%s2548_s8 + $0x38] sm:$0xff] %v1936_v15   ;;  %v2011_v20 = vpack.c.bf16 %v871_v16, %v870_v14  ;;  %v644_v21 = vadd.f32 %v2145_v19, %v2537_v34  ;;  %v2177_v22 = vpop.f32.mrb[16].mxu1  ;;  %v635_v23 = vpop.f32.mrb[17].mxu0 }
 0x10d   : > { %2080 = vst [vmem:[%s2548_s8 + $0xb8] sm:$0xff] %v2016_v17   ;;  %2063 = vst [vmem:[%s2548_s8 + $0x30] sm:$0xff] %v1931_v18   ;;  %v772_v24 = vadd.f32 %v2177_v22, %v2537_v34  ;;  %v636_v25 = vadd.f32 %v2537_v34, %v635_v23  ;;  %v763_v26 = vpop.f32.mrb[17].mxu1  ;;  %v2146_v27 = vpop.f32.mrb[18].mxu0 }
 0x10e   : > { %2079 = vst [vmem:[%s2548_s8 + $0xb0] sm:$0xff] %v2011_v20   ;;  %v764_v28 = vadd.f32 %v2537_v34, %v763_v26  ;;  %v647_v29 = vadd.f32 %v2146_v27, %v2537_v34  ;;  %v2178_v30 = vpop.f32.mrb[18].mxu1  ;;  %v638_v31 = vpop.f32.mrb[19].mxu0  ;;  %v844_v36 = vmax.f32 %v644_v21, 0.0 }
 0x10f   : > { %v775_v32 = vadd.f32 %v2178_v30, %v2537_v34  ;;  %v639_v33 = vadd.f32 %v2537_v34, %v638_v31  ;;  %v766_v35 = vpop.f32.mrb[19].mxu1  ;;  %v876_v39 = vmax.f32 %v772_v24, 0.0  ;;  %v842_v40 = vmax.f32 %v636_v25, 0.0 }
 0x110   : > { %v845_v37 = vmax.f32 %v647_v29, 0.0  ;;  %v767_v38 = vadd.f32 %v2537_v34, %v766_v35  ;;  %v874_v43 = vmax.f32 %v764_v28, 0.0 }
 0x111   : > { %v877_v41 = vmax.f32 %v775_v32, 0.0  ;;  %v843_v42 = vmax.f32 %v639_v33, 0.0 }
 0x112   : > { %v1946_v44 = vpack.c.bf16 %v845_v37, %v844_v36  ;;  %v875_v45 = vmax.f32 %v767_v38, 0.0 }
 0x113   : > { %v2026_v46 = vpack.c.bf16 %v877_v41, %v876_v39  ;;  %v1941_v47 = vpack.c.bf16 %v843_v42, %v842_v40  ;;  %v2149_v48 = vpop.f32.mrb[20].mxu0 }
 0x114   : > { %2066 = vst [vmem:[%s2548_s8 + $0x48] sm:$0xff] %v1946_v44   ;;  %v2021_v49 = vpack.c.bf16 %v875_v45, %v874_v43  ;;  %v660_v50 = vadd.f32 %v2149_v48, %v2537_v34  ;;  %v2181_v51 = vpop.f32.mrb[20].mxu1  ;;  %v651_v52 = vpop.f32.mrb[21].mxu0 }
 0x115   : > { %2082 = vst [vmem:[%s2548_s8 + $0xc8] sm:$0xff] %v2026_v46   ;;  %2065 = vst [vmem:[%s2548_s8 + $0x40] sm:$0xff] %v1941_v47   ;;  %v788_v53 = vadd.f32 %v2181_v51, %v2537_v34  ;;  %v652_v54 = vadd.f32 %v2537_v34, %v651_v52  ;;  %v779_v55 = vpop.f32.mrb[21].mxu1  ;;  %v2150_v56 = vpop.f32.mrb[22].mxu0 }
 0x116   : > { %2081 = vst [vmem:[%s2548_s8 + $0xc0] sm:$0xff] %v2021_v49   ;;  %v780_v57 = vadd.f32 %v2537_v34, %v779_v55  ;;  %v663_v58 = vadd.f32 %v2150_v56, %v2537_v34  ;;  %v2182_v59 = vpop.f32.mrb[22].mxu1  ;;  %v654_v60 = vpop.f32.mrb[23].mxu0  ;;  %v848_v0 = vmax.f32 %v660_v50, 0.0 }
 0x117   : > { %v791_v61 = vadd.f32 %v2182_v59, %v2537_v34  ;;  %v655_v62 = vadd.f32 %v2537_v34, %v654_v60  ;;  %v782_v63 = vpop.f32.mrb[23].mxu1  ;;  %v880_v3 = vmax.f32 %v788_v53, 0.0  ;;  %v846_v4 = vmax.f32 %v652_v54, 0.0 }
 0x118   : > { %v849_v1 = vmax.f32 %v663_v58, 0.0  ;;  %v783_v2 = vadd.f32 %v2537_v34, %v782_v63  ;;  %v878_v7 = vmax.f32 %v780_v57, 0.0 }
 0x119   : > { %v881_v5 = vmax.f32 %v791_v61, 0.0  ;;  %v847_v6 = vmax.f32 %v655_v62, 0.0 }
 0x11a   : > { %v1956_v8 = vpack.c.bf16 %v849_v1, %v848_v0  ;;  %v879_v9 = vmax.f32 %v783_v2, 0.0 }
 0x11b   : > { %v2036_v10 = vpack.c.bf16 %v881_v5, %v880_v3  ;;  %v1951_v11 = vpack.c.bf16 %v847_v6, %v846_v4  ;;  %v2153_v12 = vpop.f32.mrb[24].mxu0 }
 0x11c   : > { %2068 = vst [vmem:[%s2548_s8 + $0x58] sm:$0xff] %v1956_v8   ;;  %v2031_v13 = vpack.c.bf16 %v879_v9, %v878_v7  ;;  %v676_v14 = vadd.f32 %v2153_v12, %v2537_v34  ;;  %v2185_v15 = vpop.f32.mrb[24].mxu1  ;;  %v667_v16 = vpop.f32.mrb[25].mxu0 }
 0x11d   : > { %2084 = vst [vmem:[%s2548_s8 + $0xd8] sm:$0xff] %v2036_v10   ;;  %2067 = vst [vmem:[%s2548_s8 + $0x50] sm:$0xff] %v1951_v11   ;;  %v804_v17 = vadd.f32 %v2185_v15, %v2537_v34  ;;  %v668_v18 = vadd.f32 %v2537_v34, %v667_v16  ;;  %v795_v19 = vpop.f32.mrb[25].mxu1  ;;  %v2154_v20 = vpop.f32.mrb[26].mxu0 }
 0x11e   : > { %2083 = vst [vmem:[%s2548_s8 + $0xd0] sm:$0xff] %v2031_v13   ;;  %v796_v21 = vadd.f32 %v2537_v34, %v795_v19  ;;  %v679_v22 = vadd.f32 %v2154_v20, %v2537_v34  ;;  %v2186_v23 = vpop.f32.mrb[26].mxu1  ;;  %v670_v24 = vpop.f32.mrb[27].mxu0  ;;  %v852_v28 = vmax.f32 %v676_v14, 0.0 }
 0x11f   : > { %v807_v25 = vadd.f32 %v2186_v23, %v2537_v34  ;;  %v671_v26 = vadd.f32 %v2537_v34, %v670_v24  ;;  %v798_v27 = vpop.f32.mrb[27].mxu1  ;;  %v884_v31 = vmax.f32 %v804_v17, 0.0  ;;  %v850_v32 = vmax.f32 %v668_v18, 0.0 }
 0x120   : > { %v853_v29 = vmax.f32 %v679_v22, 0.0  ;;  %v799_v30 = vadd.f32 %v2537_v34, %v798_v27  ;;  %v882_v36 = vmax.f32 %v796_v21, 0.0 }
 0x121   : > { %v885_v33 = vmax.f32 %v807_v25, 0.0  ;;  %v851_v35 = vmax.f32 %v671_v26, 0.0 }
 0x122   : > { %v1966_v37 = vpack.c.bf16 %v853_v29, %v852_v28  ;;  %v883_v38 = vmax.f32 %v799_v30, 0.0 }
 0x123   : > { %v2046_v39 = vpack.c.bf16 %v885_v33, %v884_v31  ;;  %v1961_v40 = vpack.c.bf16 %v851_v35, %v850_v32  ;;  %v2157_v41 = vpop.f32.mrb[28].mxu0 }
 0x124   : > { %2070 = vst [vmem:[%s2548_s8 + $0x68] sm:$0xff] %v1966_v37   ;;  %v2041_v42 = vpack.c.bf16 %v883_v38, %v882_v36  ;;  %v692_v43 = vadd.f32 %v2157_v41, %v2537_v34  ;;  %v2189_v44 = vpop.f32.mrb[28].mxu1  ;;  %v683_v45 = vpop.f32.mrb[29].mxu0 }
 0x125   : > { %2086 = vst [vmem:[%s2548_s8 + $0xe8] sm:$0xff] %v2046_v39   ;;  %2069 = vst [vmem:[%s2548_s8 + $0x60] sm:$0xff] %v1961_v40   ;;  %v820_v46 = vadd.f32 %v2189_v44, %v2537_v34  ;;  %v684_v47 = vadd.f32 %v2537_v34, %v683_v45  ;;  %v811_v48 = vpop.f32.mrb[29].mxu1  ;;  %v2158_v49 = vpop.f32.mrb[30].mxu0 }
 0x126   : > { %2085 = vst [vmem:[%s2548_s8 + $0xe0] sm:$0xff] %v2041_v42   ;;  %v812_v50 = vadd.f32 %v2537_v34, %v811_v48  ;;  %v695_v51 = vadd.f32 %v2158_v49, %v2537_v34  ;;  %v2190_v52 = vpop.f32.mrb[30].mxu1  ;;  %v686_v53 = vpop.f32.mrb[31].mxu0  ;;  %v856_v57 = vmax.f32 %v692_v43, 0.0 }
 0x127   : > { %v823_v54 = vadd.f32 %v2190_v52, %v2537_v34  ;;  %v687_v55 = vadd.f32 %v2537_v34, %v686_v53  ;;  %v814_v56 = vpop.f32.mrb[31].mxu1  ;;  %v888_v60 = vmax.f32 %v820_v46, 0.0  ;;  %v854_v61 = vmax.f32 %v684_v47, 0.0 }
 0x128   : > { %v857_v58 = vmax.f32 %v695_v51, 0.0  ;;  %v815_v59 = vadd.f32 %v2537_v34, %v814_v56  ;;  %v886_v0 = vmax.f32 %v812_v50, 0.0  ;;  %1216 = sbr.rel (!%p2450_p4) target bundleno = 394 (0x18a), region = 36 }
 0x129   : > { %v889_v62 = vmax.f32 %v823_v54, 0.0  ;;  %v855_v63 = vmax.f32 %v687_v55, 0.0 }
 0x12a   : > { %v1976_v1 = vpack.c.bf16 %v857_v58, %v856_v57  ;;  %v887_v2 = vmax.f32 %v815_v59, 0.0 }
 0x12b   : > { %v2056_v3 = vpack.c.bf16 %v889_v62, %v888_v60  ;;  %v1971_v4 = vpack.c.bf16 %v855_v63, %v854_v61 }
 0x12c   : > { %2072 = vst [vmem:[%s2548_s8 + $0x78] sm:$0xff] %v1976_v1   ;;  %v2051_v5 = vpack.c.bf16 %v887_v2, %v886_v0 }
 0x12d   : > { %2088 = vst [vmem:[%s2548_s8 + $0xf8] sm:$0xff] %v2056_v3   ;;  %2071 = vst [vmem:[%s2548_s8 + $0x70] sm:$0xff] %v1971_v4  }
 0x12e   : > { %2087 = vst [vmem:[%s2548_s8 + $0xf0] sm:$0xff] %v2051_v5  }
 0x12f   : > { %s2849_s9 = smov (!%p1219_p8, %s1218_s9), 64 }
 0x130   : > { %s1816_s17 = sshll.u32 %s2849_s9, 6 }
 0x131   : > { %p1819_p9 = scmp.eq.s32.totalorder %s1816_s17, 0 }
 0x132   : > { %s2651_s18 = sshrl.u32 (!%p1819_p9), %s2849_s9, 6 }
 0x133   : > { %1227 = sbr.rel (%p1819_p9) target bundleno = 394 (0x18a), region = 40  ;;  %p1820_p10 = scmp.le.s32.totalorder (!%p1819_p9), %s2651_s18, 0 }
 0x13a   : > { %1632 = sbr.rel (%p1820_p10) target bundleno = 373 (0x175), region = 112  ;;  %s2842_s15 = smov (!%p1820_p10), %s2645_s14 }
 0x13b   : > { %s2843_s20 = smov (!%p1820_p10), %s2548_s8  ;;  %s2660_s21 = smov (!%p1820_p10), 0  }
 0x13c   : > { %s2662_s22 = smov (!%p1820_p10), 0  }
 0x141 LB: >> { %v1243_v34 = vld [vmem:[%s2379_s20] sm:$0xf]  ;;  %v1245_v6 = vld [vmem:[%s2379_s20 + $0x4] sm:$0xf]  ;;  %v1247_v7 = vld [vmem:[%s2379_s20 + $0x8] sm:$0xf]  ;;  %s2387_s22 = sphi %s2662_s22, %s1237_s22   ;;  %s2383_s21 = sphi %s2660_s21, %s2844_s21   ;;  %s2379_s20 = sphi %s2843_s20, %s1376_s20   ;;  %s2375_s15 = sphi %s2842_s15, %s1377_s15  }
 0x142   : >> { %1244 = vst [vmem:[%s2375_s15] sm:$0xf] %v1243_v34  ;;  %1246 = vst [vmem:[%s2375_s15 + $0x4] sm:$0xf] %v1245_v6  ;;  %v1249_v8 = vld [vmem:[%s2379_s20 + $0xc] sm:$0xf]  ;;  %s1371_s23 = sadd.s32 1, %s2383_s21 }
 0x143   : >> { %1248 = vst [vmem:[%s2375_s15 + $0x8] sm:$0xf] %v1247_v7  ;;  %v1251_v9 = vld [vmem:[%s2379_s20 + $0x10] sm:$0xf]  ;;  %v1253_v10 = vld [vmem:[%s2379_s20 + $0x14] sm:$0xf]  ;;  %p1372_p11 = scmp.ge.s32.totalorder %s1371_s23, %s2651_s18 }
 0x144   : >> { %1250 = vst [vmem:[%s2375_s15 + $0xc] sm:$0xf] %v1249_v8  ;;  %1252 = vst [vmem:[%s2375_s15 + $0x10] sm:$0xf] %v1251_v9  ;;  %v1255_v11 = vld [vmem:[%s2379_s20 + $0x18] sm:$0xf] }
 0x145   : >> { %1254 = vst [vmem:[%s2375_s15 + $0x14] sm:$0xf] %v1253_v10  ;;  %v1257_v12 = vld [vmem:[%s2379_s20 + $0x1c] sm:$0xf]  ;;  %v1259_v13 = vld [vmem:[%s2379_s20 + $0x20] sm:$0xf] }
 0x146   : >> { %1256 = vst [vmem:[%s2375_s15 + $0x18] sm:$0xf] %v1255_v11  ;;  %1258 = vst [vmem:[%s2375_s15 + $0x1c] sm:$0xf] %v1257_v12  ;;  %v1261_v14 = vld [vmem:[%s2379_s20 + $0x24] sm:$0xf] }
 0x147   : >> { %1260 = vst [vmem:[%s2375_s15 + $0x20] sm:$0xf] %v1259_v13  ;;  %v1263_v15 = vld [vmem:[%s2379_s20 + $0x28] sm:$0xf]  ;;  %v1265_v16 = vld [vmem:[%s2379_s20 + $0x2c] sm:$0xf] }
 0x148   : >> { %1262 = vst [vmem:[%s2375_s15 + $0x24] sm:$0xf] %v1261_v14  ;;  %1264 = vst [vmem:[%s2375_s15 + $0x28] sm:$0xf] %v1263_v15  ;;  %v1267_v17 = vld [vmem:[%s2379_s20 + $0x30] sm:$0xf] }
 0x149   : >> { %1266 = vst [vmem:[%s2375_s15 + $0x2c] sm:$0xf] %v1265_v16  ;;  %v1269_v18 = vld [vmem:[%s2379_s20 + $0x34] sm:$0xf]  ;;  %v1271_v19 = vld [vmem:[%s2379_s20 + $0x38] sm:$0xf] }
 0x14a   : >> { %1268 = vst [vmem:[%s2375_s15 + $0x30] sm:$0xf] %v1267_v17  ;;  %1270 = vst [vmem:[%s2375_s15 + $0x34] sm:$0xf] %v1269_v18  ;;  %v1273_v20 = vld [vmem:[%s2379_s20 + $0x3c] sm:$0xf] }
 0x14b   : >> { %1272 = vst [vmem:[%s2375_s15 + $0x38] sm:$0xf] %v1271_v19  ;;  %v1275_v21 = vld [vmem:[%s2379_s20 + $0x40] sm:$0xf]  ;;  %v1277_v22 = vld [vmem:[%s2379_s20 + $0x44] sm:$0xf] }
 0x14c   : >> { %1274 = vst [vmem:[%s2375_s15 + $0x3c] sm:$0xf] %v1273_v20  ;;  %1276 = vst [vmem:[%s2375_s15 + $0x40] sm:$0xf] %v1275_v21  ;;  %v1279_v23 = vld [vmem:[%s2379_s20 + $0x48] sm:$0xf] }
 0x14d   : >> { %1278 = vst [vmem:[%s2375_s15 + $0x44] sm:$0xf] %v1277_v22  ;;  %v1281_v24 = vld [vmem:[%s2379_s20 + $0x4c] sm:$0xf]  ;;  %v1283_v25 = vld [vmem:[%s2379_s20 + $0x50] sm:$0xf] }
 0x14e   : >> { %1280 = vst [vmem:[%s2375_s15 + $0x48] sm:$0xf] %v1279_v23  ;;  %1282 = vst [vmem:[%s2375_s15 + $0x4c] sm:$0xf] %v1281_v24  ;;  %v1285_v26 = vld [vmem:[%s2379_s20 + $0x54] sm:$0xf] }
 0x14f   : >> { %1284 = vst [vmem:[%s2375_s15 + $0x50] sm:$0xf] %v1283_v25  ;;  %v1287_v27 = vld [vmem:[%s2379_s20 + $0x58] sm:$0xf]  ;;  %v1289_v28 = vld [vmem:[%s2379_s20 + $0x5c] sm:$0xf] }
 0x150   : >> { %1286 = vst [vmem:[%s2375_s15 + $0x54] sm:$0xf] %v1285_v26  ;;  %1288 = vst [vmem:[%s2375_s15 + $0x58] sm:$0xf] %v1287_v27  ;;  %v1291_v29 = vld [vmem:[%s2379_s20 + $0x60] sm:$0xf] }
 0x151   : >> { %1290 = vst [vmem:[%s2375_s15 + $0x5c] sm:$0xf] %v1289_v28  ;;  %v1293_v30 = vld [vmem:[%s2379_s20 + $0x64] sm:$0xf]  ;;  %v1295_v31 = vld [vmem:[%s2379_s20 + $0x68] sm:$0xf] }
 0x152   : >> { %1292 = vst [vmem:[%s2375_s15 + $0x60] sm:$0xf] %v1291_v29  ;;  %1294 = vst [vmem:[%s2375_s15 + $0x64] sm:$0xf] %v1293_v30  ;;  %v1297_v32 = vld [vmem:[%s2379_s20 + $0x6c] sm:$0xf] }
 0x153   : >> { %1296 = vst [vmem:[%s2375_s15 + $0x68] sm:$0xf] %v1295_v31  ;;  %v1299_v33 = vld [vmem:[%s2379_s20 + $0x70] sm:$0xf]  ;;  %v1301_v35 = vld [vmem:[%s2379_s20 + $0x74] sm:$0xf] }
 0x154   : >> { %1298 = vst [vmem:[%s2375_s15 + $0x6c] sm:$0xf] %v1297_v32  ;;  %1300 = vst [vmem:[%s2375_s15 + $0x70] sm:$0xf] %v1299_v33  ;;  %v1303_v36 = vld [vmem:[%s2379_s20 + $0x78] sm:$0xf] }
 0x155   : >> { %1302 = vst [vmem:[%s2375_s15 + $0x74] sm:$0xf] %v1301_v35  ;;  %v1305_v37 = vld [vmem:[%s2379_s20 + $0x7c] sm:$0xf]  ;;  %v1307_v38 = vld [vmem:[%s2379_s20 + $0x80] sm:$0xf] }
 0x156   : >> { %1304 = vst [vmem:[%s2375_s15 + $0x78] sm:$0xf] %v1303_v36  ;;  %1306 = vst [vmem:[%s2375_s15 + $0x7c] sm:$0xf] %v1305_v37  ;;  %v1309_v39 = vld [vmem:[%s2379_s20 + $0x84] sm:$0xf] }
 0x157   : >> { %1308 = vst [vmem:[%s2375_s15 + $0x80] sm:$0xf] %v1307_v38  ;;  %v1311_v40 = vld [vmem:[%s2379_s20 + $0x88] sm:$0xf]  ;;  %v1313_v41 = vld [vmem:[%s2379_s20 + $0x8c] sm:$0xf] }
 0x158   : >> { %1310 = vst [vmem:[%s2375_s15 + $0x84] sm:$0xf] %v1309_v39  ;;  %1312 = vst [vmem:[%s2375_s15 + $0x88] sm:$0xf] %v1311_v40  ;;  %v1315_v42 = vld [vmem:[%s2379_s20 + $0x90] sm:$0xf] }
 0x159   : >> { %1314 = vst [vmem:[%s2375_s15 + $0x8c] sm:$0xf] %v1313_v41  ;;  %v1317_v43 = vld [vmem:[%s2379_s20 + $0x94] sm:$0xf]  ;;  %v1319_v44 = vld [vmem:[%s2379_s20 + $0x98] sm:$0xf] }
 0x15a   : >> { %1316 = vst [vmem:[%s2375_s15 + $0x90] sm:$0xf] %v1315_v42  ;;  %1318 = vst [vmem:[%s2375_s15 + $0x94] sm:$0xf] %v1317_v43  ;;  %v1321_v45 = vld [vmem:[%s2379_s20 + $0x9c] sm:$0xf] }
 0x15b   : >> { %1320 = vst [vmem:[%s2375_s15 + $0x98] sm:$0xf] %v1319_v44  ;;  %v1323_v46 = vld [vmem:[%s2379_s20 + $0xa0] sm:$0xf]  ;;  %v1325_v47 = vld [vmem:[%s2379_s20 + $0xa4] sm:$0xf] }
 0x15c   : >> { %1322 = vst [vmem:[%s2375_s15 + $0x9c] sm:$0xf] %v1321_v45  ;;  %1324 = vst [vmem:[%s2375_s15 + $0xa0] sm:$0xf] %v1323_v46  ;;  %v1327_v48 = vld [vmem:[%s2379_s20 + $0xa8] sm:$0xf] }
 0x15d   : >> { %1326 = vst [vmem:[%s2375_s15 + $0xa4] sm:$0xf] %v1325_v47  ;;  %v1329_v49 = vld [vmem:[%s2379_s20 + $0xac] sm:$0xf]  ;;  %v1331_v50 = vld [vmem:[%s2379_s20 + $0xb0] sm:$0xf] }
 0x15e   : >> { %1328 = vst [vmem:[%s2375_s15 + $0xa8] sm:$0xf] %v1327_v48  ;;  %1330 = vst [vmem:[%s2375_s15 + $0xac] sm:$0xf] %v1329_v49  ;;  %v1333_v51 = vld [vmem:[%s2379_s20 + $0xb4] sm:$0xf] }
 0x15f   : >> { %1332 = vst [vmem:[%s2375_s15 + $0xb0] sm:$0xf] %v1331_v50  ;;  %v1335_v52 = vld [vmem:[%s2379_s20 + $0xb8] sm:$0xf]  ;;  %v1337_v53 = vld [vmem:[%s2379_s20 + $0xbc] sm:$0xf] }
 0x160   : >> { %1334 = vst [vmem:[%s2375_s15 + $0xb4] sm:$0xf] %v1333_v51  ;;  %1336 = vst [vmem:[%s2375_s15 + $0xb8] sm:$0xf] %v1335_v52  ;;  %v1339_v54 = vld [vmem:[%s2379_s20 + $0xc0] sm:$0xf] }
 0x161   : >> { %1338 = vst [vmem:[%s2375_s15 + $0xbc] sm:$0xf] %v1337_v53  ;;  %v1341_v55 = vld [vmem:[%s2379_s20 + $0xc4] sm:$0xf]  ;;  %v1343_v56 = vld [vmem:[%s2379_s20 + $0xc8] sm:$0xf] }
 0x162   : >> { %1340 = vst [vmem:[%s2375_s15 + $0xc0] sm:$0xf] %v1339_v54  ;;  %1342 = vst [vmem:[%s2375_s15 + $0xc4] sm:$0xf] %v1341_v55  ;;  %v1345_v57 = vld [vmem:[%s2379_s20 + $0xcc] sm:$0xf] }
 0x163   : >> { %1344 = vst [vmem:[%s2375_s15 + $0xc8] sm:$0xf] %v1343_v56  ;;  %v1347_v58 = vld [vmem:[%s2379_s20 + $0xd0] sm:$0xf]  ;;  %v1349_v59 = vld [vmem:[%s2379_s20 + $0xd4] sm:$0xf] }
 0x164   : >> { %1346 = vst [vmem:[%s2375_s15 + $0xcc] sm:$0xf] %v1345_v57  ;;  %1348 = vst [vmem:[%s2375_s15 + $0xd0] sm:$0xf] %v1347_v58  ;;  %v1351_v60 = vld [vmem:[%s2379_s20 + $0xd8] sm:$0xf] }
 0x165   : >> { %1350 = vst [vmem:[%s2375_s15 + $0xd4] sm:$0xf] %v1349_v59  ;;  %v1353_v61 = vld [vmem:[%s2379_s20 + $0xdc] sm:$0xf]  ;;  %v1355_v62 = vld [vmem:[%s2379_s20 + $0xe0] sm:$0xf] }
 0x166   : >> { %1352 = vst [vmem:[%s2375_s15 + $0xd8] sm:$0xf] %v1351_v60  ;;  %1354 = vst [vmem:[%s2375_s15 + $0xdc] sm:$0xf] %v1353_v61  ;;  %v1357_v63 = vld [vmem:[%s2379_s20 + $0xe4] sm:$0xf] }
 0x167   : >> { %1356 = vst [vmem:[%s2375_s15 + $0xe0] sm:$0xf] %v1355_v62  ;;  %v1359_v0 = vld [vmem:[%s2379_s20 + $0xe8] sm:$0xf]  ;;  %v1361_v1 = vld [vmem:[%s2379_s20 + $0xec] sm:$0xf] }
 0x168   : >> { %1358 = vst [vmem:[%s2375_s15 + $0xe4] sm:$0xf] %v1357_v63  ;;  %1360 = vst [vmem:[%s2375_s15 + $0xe8] sm:$0xf] %v1359_v0  ;;  %v1363_v2 = vld [vmem:[%s2379_s20 + $0xf0] sm:$0xf] }
 0x169   : >> { %1362 = vst [vmem:[%s2375_s15 + $0xec] sm:$0xf] %v1361_v1  ;;  %v1365_v3 = vld [vmem:[%s2379_s20 + $0xf4] sm:$0xf]  ;;  %v1367_v4 = vld [vmem:[%s2379_s20 + $0xf8] sm:$0xf] }
 0x16a   : >> { %1364 = vst [vmem:[%s2375_s15 + $0xf0] sm:$0xf] %v1363_v2  ;;  %1366 = vst [vmem:[%s2375_s15 + $0xf4] sm:$0xf] %v1365_v3  ;;  %v1369_v5 = vld [vmem:[%s2379_s20 + $0xfc] sm:$0xf] }
 0x16b   : >> { %1368 = vst [vmem:[%s2375_s15 + $0xf8] sm:$0xf] %v1367_v4  ;;  %1370 = vst [vmem:[%s2375_s15 + $0xfc] sm:$0xf] %v1369_v5  ;;  %s2851_s23 = smov (%p1372_p11, %s1371_s23), 0  ;;  %s1237_s22 = sadd.s32 1, %s2387_s22  }
 0x16c   : >> { %s1821_s24 = sshll.u32 %s2851_s23, 8  ;;  %p1236_p12 = scmp.ge.s32.totalorder %s1237_s22, %s2651_s18 }
 0x16d   : >> { %s1376_s20 = scalar_lea.vmem %s2548_s8, %s1821_s24 [#allocation2]   ;;  %s1377_s15 = scalar_lea.vmem %s2645_s14, %s1821_s24  }
 0x16e   : >> { %s2844_s21 = smov %s2851_s23  ;;  %1239 = sbr.rel (!%p1236_p12) target bundleno = 321 (0x141), region = 118 }
 0x175 PF: > { %s2819_s25 = sand.u32 63, %s2849_s9   ;;  %s1896_s26 = sshll.u32 %s2651_s18, 8 }
 0x176   : > { %s1382_s27 = scalar_lea.vmem %s2548_s8, %s1896_s26 [#allocation2]   ;;  %s1384_s28 = scalar_lea.vmem %s2645_s14, %s1896_s26  }
 0x177   : > { %p1826_p13 = scmp.le.s32.totalorder %s2819_s25, 0 }
 0x178   : > { %s2389_s29 = smov (!%p1826_p13), %s1384_s28   ;;  %s2393_s30 = smov (!%p1826_p13), %s1382_s27  }
 0x179   : > { %1646 = sbr.rel (%p1826_p13) target bundleno = 394 (0x18a), region = 123  ;;  %s2397_s4 = smov (!%p1826_p13), 0  }
 0x17a   : > { %s2401_s5 = smov (!%p1826_p13), 0  }
 0x180 LB: >> { %v1394_v34 = vld [vmem:[%s2395_s30] sm:$0xf]  ;;  %s1396_s6 = sadd.s32 1, %s2399_s4  ;;  %s1388_s5 = sadd.s32 1, %s2403_s5   ;;  %s2403_s5 = sphi %s2401_s5, %s1388_s5   ;;  %s2399_s4 = sphi %s2397_s4, %s2398_s4   ;;  %s2395_s30 = sphi %s2393_s30, %s1401_s30   ;;  %s2391_s29 = sphi %s2389_s29, %s1402_s29  }
 0x181   : >> { %1395 = vst [vmem:[%s2391_s29] sm:$0xf] %v1394_v34  ;;  %p1397_p0 = scmp.ge.s32.totalorder %s1396_s6, %s2819_s25  ;;  %p1387_p1 = scmp.ge.s32.totalorder %s1388_s5, %s2819_s25 }
 0x183   : >> { %s2853_s6 = smov (%p1397_p0, %s1396_s6), 0  ;;  %1390 = sbr.rel (!%p1387_p1) target bundleno = 384 (0x180), region = 129 }
 0x184   : >> { %s1827_s7 = sshll.u32 %s2853_s6, 2  ;;  %s2398_s4 = smov %s2853_s6  }
 0x185   : >> { %s1401_s30 = scalar_lea.vmem %s1382_s27, %s1827_s7 [#allocation2]   ;;  %s1402_s29 = scalar_lea.vmem %s1384_s28, %s1827_s7  }
 0x18a PF: > { %p10_p2 = scmp.ge.s32.totalorder %s2440_s16, 5   ;;  %s2845_s12 = smov %s2367_s13 }
 0x18b   : > { %s2846_s13 = smov %s2448_s19  ;;  %s2847_s14 = smov %s2440_s16 }
 0x18c   :  { %12 = sbr.rel (!%p10_p2) target bundleno = 2 (0x2), region = 140 }

// kernel: net_mnist_forward.7
= control target key start
LH: loop header
LB: loop body
LE: loop exit
PB: predicated region body
PF: predicated region fallthrough
CT: control target
= control target key end

     0   :  { %s1268_s0 = inlined_call_operand.vmem [shape: bf16[392,128], index: 0, kind: input, shape index: {}]   ;;  %s1269_s1 = inlined_call_operand.vmem [shape: bf16[392,128], index: 1, kind: input, shape index: {}]   ;;  %s1270_s2 = inlined_call_operand.vmem [shape: bf16[392,128], index: 2, kind: input, shape index: {}]   ;;  %s1271_s3 = inlined_call_operand.vmem [shape: bf16[392,128], index: 3, kind: input, shape index: {}]   ;;  %s1272_s4 = inlined_call_operand.vmem [shape: bf16[392,128], index: 4, kind: output, shape index: {}]  }
   0x1   :  { %v17_v0 = vld [vmem:[%s1268_s0] sm:$0xf]  ;;  %v18_v1 = vld [vmem:[%s1268_s0 + $0x4] sm:$0xf]  ;;  %v19_v10 = vld [vmem:[%s1268_s0 + $0x8] sm:$0xf] }
   0x2   :  { %v66_v2 = vld [vmem:[%s1269_s1] sm:$0xf]  ;;  %v67_v3 = vld [vmem:[%s1269_s1 + $0x4] sm:$0xf]  ;;  %v20_v13 = vld [vmem:[%s1268_s0 + $0xc] sm:$0xf] }
   0x3   :  { %v115_v4 = vmax.bf16 %v66_v2, %v17_v0  ;;  %v164_v5 = vld [vmem:[%s1270_s2] sm:$0xf]  ;;  %v165_v6 = vld [vmem:[%s1270_s2 + $0x4] sm:$0xf]  ;;  %v116_v7 = vmax.bf16 %v67_v3, %v18_v1  ;;  %v68_v14 = vld [vmem:[%s1269_s1 + $0x8] sm:$0xf] }
   0x4   :  { %v213_v8 = vld [vmem:[%s1271_s3] sm:$0xf]  ;;  %v214_v9 = vld [vmem:[%s1271_s3 + $0x4] sm:$0xf]  ;;  %v69_v15 = vld [vmem:[%s1269_s1 + $0xc] sm:$0xf]  ;;  %v117_v16 = vmax.bf16 %v68_v14, %v19_v10 }
   0x5   :  { %v262_v11 = vmax.bf16 %v213_v8, %v164_v5  ;;  %v263_v12 = vmax.bf16 %v214_v9, %v165_v6  ;;  %v118_v17 = vmax.bf16 %v69_v15, %v20_v13  ;;  %v166_v18 = vld [vmem:[%s1270_s2 + $0x8] sm:$0xf]  ;;  %v167_v19 = vld [vmem:[%s1270_s2 + $0xc] sm:$0xf]  ;;  %v21_v25 = vld [vmem:[%s1268_s0 + $0x10] sm:$0xf] }
   0x6   :  { %v215_v20 = vld [vmem:[%s1271_s3 + $0x8] sm:$0xf]  ;;  %v216_v23 = vld [vmem:[%s1271_s3 + $0xc] sm:$0xf]  ;;  %v22_v26 = vld [vmem:[%s1268_s0 + $0x14] sm:$0xf] }
   0x7   :  { %v311_v21 = vmax.bf16 %v262_v11, %v115_v4  ;;  %v312_v22 = vmax.bf16 %v263_v12, %v116_v7  ;;  %v264_v24 = vmax.bf16 %v215_v20, %v166_v18  ;;  %v265_v27 = vmax.bf16 %v216_v23, %v167_v19  ;;  %v70_v28 = vld [vmem:[%s1269_s1 + $0x10] sm:$0xf]  ;;  %v71_v29 = vld [vmem:[%s1269_s1 + $0x14] sm:$0xf]  ;;  %v23_v41 = vld [vmem:[%s1268_s0 + $0x18] sm:$0xf] }
   0x8   :  { %v168_v30 = vld [vmem:[%s1270_s2 + $0x10] sm:$0xf]  ;;  %v119_v33 = vmax.bf16 %v70_v28, %v21_v25  ;;  %v120_v34 = vmax.bf16 %v71_v29, %v22_v26  ;;  %v169_v35 = vld [vmem:[%s1270_s2 + $0x14] sm:$0xf]  ;;  %v24_v42 = vld [vmem:[%s1268_s0 + $0x1c] sm:$0xf] }
   0x9   :  { %v533_v31 = vcombine.low %v311_v21, %v312_v22  ;;  %v313_v32 = vmax.bf16 %v264_v24, %v117_v16  ;;  %v217_v36 = vld [vmem:[%s1271_s3 + $0x10] sm:$0xf]  ;;  %v218_v37 = vld [vmem:[%s1271_s3 + $0x14] sm:$0xf]  ;;  %v314_v38 = vmax.bf16 %v265_v27, %v118_v17  ;;  %v72_v43 = vld [vmem:[%s1269_s1 + $0x18] sm:$0xf] }
   0xa   :  { %v266_v39 = vmax.bf16 %v217_v36, %v168_v30  ;;  %v267_v40 = vmax.bf16 %v218_v37, %v169_v35  ;;  %v73_v44 = vld [vmem:[%s1269_s1 + $0x1c] sm:$0xf]  ;;  %v121_v45 = vmax.bf16 %v72_v43, %v23_v41  ;;  %v170_v46 = vld [vmem:[%s1270_s2 + $0x18] sm:$0xf]  ;;  %v25_v54 = vld [vmem:[%s1268_s0 + $0x20] sm:$0xf] }
   0xb   :  { %417 = vst [vmem:[%s1272_s4] sm:$0xff] %v533_v31   ;;  %v171_v47 = vld [vmem:[%s1270_s2 + $0x1c] sm:$0xf]  ;;  %v534_v48 = vcombine.low %v313_v32, %v314_v38  ;;  %v122_v51 = vmax.bf16 %v73_v44, %v24_v42  ;;  %v219_v52 = vld [vmem:[%s1271_s3 + $0x18] sm:$0xf]  ;;  %v26_v57 = vld [vmem:[%s1268_s0 + $0x24] sm:$0xf] }
   0xc   :  { %v315_v49 = vmax.bf16 %v266_v39, %v119_v33  ;;  %v316_v50 = vmax.bf16 %v267_v40, %v120_v34  ;;  %v220_v53 = vld [vmem:[%s1271_s3 + $0x1c] sm:$0xf]  ;;  %v268_v55 = vmax.bf16 %v219_v52, %v170_v46  ;;  %v74_v58 = vld [vmem:[%s1269_s1 + $0x20] sm:$0xf]  ;;  %v75_v59 = vld [vmem:[%s1269_s1 + $0x24] sm:$0xf] }
   0xd   :  { %v269_v56 = vmax.bf16 %v220_v53, %v171_v47  ;;  %535 = vst [vmem:[%s1272_s4 + $0x8] sm:$0xff] %v534_v48   ;;  %v123_v61 = vmax.bf16 %v74_v58, %v25_v54  ;;  %v124_v62 = vmax.bf16 %v75_v59, %v26_v57  ;;  %v172_v63 = vld [vmem:[%s1270_s2 + $0x20] sm:$0xf]  ;;  %v173_v0 = vld [vmem:[%s1270_s2 + $0x24] sm:$0xf] }
   0xe   :  { %v536_v60 = vcombine.low %v315_v49, %v316_v50  ;;  %v221_v1 = vld [vmem:[%s1271_s3 + $0x20] sm:$0xf]  ;;  %v317_v2 = vmax.bf16 %v268_v55, %v121_v45  ;;  %v222_v4 = vld [vmem:[%s1271_s3 + $0x24] sm:$0xf]  ;;  %v27_v6 = vld [vmem:[%s1268_s0 + $0x28] sm:$0xf] }
   0xf   :  { %v318_v3 = vmax.bf16 %v269_v56, %v122_v51  ;;  %v270_v5 = vmax.bf16 %v221_v1, %v172_v63  ;;  %v28_v7 = vld [vmem:[%s1268_s0 + $0x2c] sm:$0xf]  ;;  %v271_v8 = vmax.bf16 %v222_v4, %v173_v0  ;;  %v76_v9 = vld [vmem:[%s1269_s1 + $0x28] sm:$0xf]  ;;  %v29_v22 = vld [vmem:[%s1268_s0 + $0x30] sm:$0xf] }
  0x10   :  { %537 = vst [vmem:[%s1272_s4 + $0x10] sm:$0xff] %v536_v60   ;;  %v77_v10 = vld [vmem:[%s1269_s1 + $0x2c] sm:$0xf]  ;;  %v174_v11 = vld [vmem:[%s1270_s2 + $0x28] sm:$0xf]  ;;  %v125_v14 = vmax.bf16 %v76_v9, %v27_v6 }
  0x11   :  { %v538_v12 = vcombine.low %v317_v2, %v318_v3  ;;  %v319_v13 = vmax.bf16 %v270_v5, %v123_v61  ;;  %v126_v15 = vmax.bf16 %v77_v10, %v28_v7  ;;  %v175_v16 = vld [vmem:[%s1270_s2 + $0x2c] sm:$0xf]  ;;  %v223_v17 = vld [vmem:[%s1271_s3 + $0x28] sm:$0xf]  ;;  %v320_v19 = vmax.bf16 %v271_v8, %v124_v62  ;;  %v30_v23 = vld [vmem:[%s1268_s0 + $0x34] sm:$0xf] }
  0x12   :  { %v224_v18 = vld [vmem:[%s1271_s3 + $0x2c] sm:$0xf]  ;;  %v272_v20 = vmax.bf16 %v223_v17, %v174_v11  ;;  %v78_v24 = vld [vmem:[%s1269_s1 + $0x30] sm:$0xf]  ;;  %v79_v25 = vld [vmem:[%s1269_s1 + $0x34] sm:$0xf] }
  0x13   :  { %v273_v21 = vmax.bf16 %v224_v18, %v175_v16  ;;  %539 = vst [vmem:[%s1272_s4 + $0x18] sm:$0xff] %v538_v12   ;;  %v127_v26 = vmax.bf16 %v78_v24, %v29_v22  ;;  %v176_v27 = vld [vmem:[%s1270_s2 + $0x30] sm:$0xf]  ;;  %v177_v28 = vld [vmem:[%s1270_s2 + $0x34] sm:$0xf]  ;;  %v540_v29 = vcombine.low %v319_v13, %v320_v19  ;;  %v128_v32 = vmax.bf16 %v79_v25, %v30_v23 }
  0x14   :  { %v321_v30 = vmax.bf16 %v272_v20, %v125_v14  ;;  %v225_v33 = vld [vmem:[%s1271_s3 + $0x30] sm:$0xf]  ;;  %v226_v34 = vld [vmem:[%s1271_s3 + $0x34] sm:$0xf]  ;;  %v31_v35 = vld [vmem:[%s1268_s0 + $0x38] sm:$0xf] }
  0x15   :  { %v322_v31 = vmax.bf16 %v273_v21, %v126_v15  ;;  %v274_v36 = vmax.bf16 %v225_v33, %v176_v27  ;;  %v275_v37 = vmax.bf16 %v226_v34, %v177_v28  ;;  %v32_v38 = vld [vmem:[%s1268_s0 + $0x3c] sm:$0xf]  ;;  %v80_v39 = vld [vmem:[%s1269_s1 + $0x38] sm:$0xf]  ;;  %541 = vst [vmem:[%s1272_s4 + $0x20] sm:$0xff] %v540_v29  }
  0x16   :  { %v81_v40 = vld [vmem:[%s1269_s1 + $0x3c] sm:$0xf]  ;;  %v129_v42 = vmax.bf16 %v80_v39, %v31_v35  ;;  %v178_v44 = vld [vmem:[%s1270_s2 + $0x38] sm:$0xf]  ;;  %v33_v51 = vld [vmem:[%s1268_s0 + $0x40] sm:$0xf] }
  0x17   :  { %v542_v41 = vcombine.low %v321_v30, %v322_v31  ;;  %v130_v43 = vmax.bf16 %v81_v40, %v32_v38  ;;  %v179_v45 = vld [vmem:[%s1270_s2 + $0x3c] sm:$0xf]  ;;  %v227_v46 = vld [vmem:[%s1271_s3 + $0x38] sm:$0xf]  ;;  %v323_v47 = vmax.bf16 %v274_v36, %v127_v26  ;;  %v324_v48 = vmax.bf16 %v275_v37, %v128_v32  ;;  %v34_v52 = vld [vmem:[%s1268_s0 + $0x44] sm:$0xf] }
  0x18   :  { %v228_v49 = vld [vmem:[%s1271_s3 + $0x3c] sm:$0xf]  ;;  %v276_v50 = vmax.bf16 %v227_v46, %v178_v44  ;;  %v82_v54 = vld [vmem:[%s1269_s1 + $0x40] sm:$0xf]  ;;  %v83_v55 = vld [vmem:[%s1269_s1 + $0x44] sm:$0xf] }
  0x19   :  { %543 = vst [vmem:[%s1272_s4 + $0x28] sm:$0xff] %v542_v41   ;;  %v277_v53 = vmax.bf16 %v228_v49, %v179_v45  ;;  %v180_v56 = vld [vmem:[%s1270_s2 + $0x40] sm:$0xf]  ;;  %v544_v57 = vcombine.low %v323_v47, %v324_v48  ;;  %v131_v59 = vmax.bf16 %v82_v54, %v33_v51  ;;  %v132_v60 = vmax.bf16 %v83_v55, %v34_v52  ;;  %v181_v61 = vld [vmem:[%s1270_s2 + $0x44] sm:$0xf] }
  0x1a   :  { %v325_v58 = vmax.bf16 %v276_v50, %v129_v42  ;;  %v229_v62 = vld [vmem:[%s1271_s3 + $0x40] sm:$0xf]  ;;  %v230_v63 = vld [vmem:[%s1271_s3 + $0x44] sm:$0xf]  ;;  %v35_v3 = vld [vmem:[%s1268_s0 + $0x48] sm:$0xf] }
  0x1b   :  { %v326_v0 = vmax.bf16 %v277_v53, %v130_v43  ;;  %v278_v1 = vmax.bf16 %v229_v62, %v180_v56  ;;  %v279_v2 = vmax.bf16 %v230_v63, %v181_v61  ;;  %v36_v4 = vld [vmem:[%s1268_s0 + $0x4c] sm:$0xf]  ;;  %v84_v5 = vld [vmem:[%s1269_s1 + $0x48] sm:$0xf]  ;;  %545 = vst [vmem:[%s1272_s4 + $0x30] sm:$0xff] %v544_v57  }
  0x1c   :  { %v85_v6 = vld [vmem:[%s1269_s1 + $0x4c] sm:$0xf]  ;;  %v133_v7 = vmax.bf16 %v84_v5, %v35_v3  ;;  %v182_v8 = vld [vmem:[%s1270_s2 + $0x48] sm:$0xf]  ;;  %v37_v16 = vld [vmem:[%s1268_s0 + $0x50] sm:$0xf] }
  0x1d   :  { %v183_v9 = vld [vmem:[%s1270_s2 + $0x4c] sm:$0xf]  ;;  %v546_v10 = vcombine.low %v325_v58, %v326_v0  ;;  %v327_v11 = vmax.bf16 %v278_v1, %v131_v59  ;;  %v328_v12 = vmax.bf16 %v279_v2, %v132_v60  ;;  %v134_v13 = vmax.bf16 %v85_v6, %v36_v4  ;;  %v231_v14 = vld [vmem:[%s1271_s3 + $0x48] sm:$0xf]  ;;  %v38_v19 = vld [vmem:[%s1268_s0 + $0x54] sm:$0xf] }
  0x1e   :  { %v232_v15 = vld [vmem:[%s1271_s3 + $0x4c] sm:$0xf]  ;;  %v280_v17 = vmax.bf16 %v231_v14, %v182_v8  ;;  %v86_v20 = vld [vmem:[%s1269_s1 + $0x50] sm:$0xf]  ;;  %v87_v21 = vld [vmem:[%s1269_s1 + $0x54] sm:$0xf] }
  0x1f   :  { %v281_v18 = vmax.bf16 %v232_v15, %v183_v9  ;;  %547 = vst [vmem:[%s1272_s4 + $0x38] sm:$0xff] %v546_v10   ;;  %v548_v22 = vcombine.low %v327_v11, %v328_v12  ;;  %v135_v23 = vmax.bf16 %v86_v20, %v37_v16  ;;  %v136_v24 = vmax.bf16 %v87_v21, %v38_v19  ;;  %v184_v25 = vld [vmem:[%s1270_s2 + $0x50] sm:$0xf]  ;;  %v185_v26 = vld [vmem:[%s1270_s2 + $0x54] sm:$0xf] }
  0x20   :  { %v233_v27 = vld [vmem:[%s1271_s3 + $0x50] sm:$0xf]  ;;  %v329_v28 = vmax.bf16 %v280_v17, %v133_v7  ;;  %v234_v30 = vld [vmem:[%s1271_s3 + $0x54] sm:$0xf]  ;;  %v39_v32 = vld [vmem:[%s1268_s0 + $0x58] sm:$0xf] }
  0x21   :  { %v330_v29 = vmax.bf16 %v281_v18, %v134_v13  ;;  %v282_v31 = vmax.bf16 %v233_v27, %v184_v25  ;;  %v40_v33 = vld [vmem:[%s1268_s0 + $0x5c] sm:$0xf]  ;;  %549 = vst [vmem:[%s1272_s4 + $0x40] sm:$0xff] %v548_v22   ;;  %v283_v34 = vmax.bf16 %v234_v30, %v185_v26  ;;  %v88_v35 = vld [vmem:[%s1269_s1 + $0x58] sm:$0xf] }
  0x22   :  { %v89_v36 = vld [vmem:[%s1269_s1 + $0x5c] sm:$0xf]  ;;  %v186_v37 = vld [vmem:[%s1270_s2 + $0x58] sm:$0xf]  ;;  %v137_v40 = vmax.bf16 %v88_v35, %v39_v32  ;;  %v41_v48 = vld [vmem:[%s1268_s0 + $0x60] sm:$0xf] }
  0x23   :  { %v550_v38 = vcombine.low %v329_v28, %v330_v29  ;;  %v331_v39 = vmax.bf16 %v282_v31, %v135_v23  ;;  %v138_v41 = vmax.bf16 %v89_v36, %v40_v33  ;;  %v187_v42 = vld [vmem:[%s1270_s2 + $0x5c] sm:$0xf]  ;;  %v235_v43 = vld [vmem:[%s1271_s3 + $0x58] sm:$0xf]  ;;  %v332_v45 = vmax.bf16 %v283_v34, %v136_v24  ;;  %v42_v49 = vld [vmem:[%s1268_s0 + $0x64] sm:$0xf] }
  0x24   :  { %v236_v44 = vld [vmem:[%s1271_s3 + $0x5c] sm:$0xf]  ;;  %v284_v46 = vmax.bf16 %v235_v43, %v186_v37  ;;  %v90_v50 = vld [vmem:[%s1269_s1 + $0x60] sm:$0xf]  ;;  %v91_v51 = vld [vmem:[%s1269_s1 + $0x64] sm:$0xf] }
  0x25   :  { %v285_v47 = vmax.bf16 %v236_v44, %v187_v42  ;;  %551 = vst [vmem:[%s1272_s4 + $0x48] sm:$0xff] %v550_v38   ;;  %v139_v52 = vmax.bf16 %v90_v50, %v41_v48  ;;  %v188_v53 = vld [vmem:[%s1270_s2 + $0x60] sm:$0xf]  ;;  %v189_v54 = vld [vmem:[%s1270_s2 + $0x64] sm:$0xf]  ;;  %v552_v55 = vcombine.low %v331_v39, %v332_v45  ;;  %v140_v58 = vmax.bf16 %v91_v51, %v42_v49 }
  0x26   :  { %v333_v56 = vmax.bf16 %v284_v46, %v137_v40  ;;  %v237_v59 = vld [vmem:[%s1271_s3 + $0x60] sm:$0xf]  ;;  %v238_v60 = vld [vmem:[%s1271_s3 + $0x64] sm:$0xf]  ;;  %v43_v61 = vld [vmem:[%s1268_s0 + $0x68] sm:$0xf] }
  0x27   :  { %v334_v57 = vmax.bf16 %v285_v47, %v138_v41  ;;  %v286_v62 = vmax.bf16 %v237_v59, %v188_v53  ;;  %v287_v63 = vmax.bf16 %v238_v60, %v189_v54  ;;  %v44_v0 = vld [vmem:[%s1268_s0 + $0x6c] sm:$0xf]  ;;  %v92_v1 = vld [vmem:[%s1269_s1 + $0x68] sm:$0xf]  ;;  %553 = vst [vmem:[%s1272_s4 + $0x50] sm:$0xff] %v552_v55  }
  0x28   :  { %v93_v2 = vld [vmem:[%s1269_s1 + $0x6c] sm:$0xf]  ;;  %v141_v4 = vmax.bf16 %v92_v1, %v43_v61  ;;  %v190_v6 = vld [vmem:[%s1270_s2 + $0x68] sm:$0xf]  ;;  %v45_v13 = vld [vmem:[%s1268_s0 + $0x70] sm:$0xf] }
  0x29   :  { %v554_v3 = vcombine.low %v333_v56, %v334_v57  ;;  %v142_v5 = vmax.bf16 %v93_v2, %v44_v0  ;;  %v191_v7 = vld [vmem:[%s1270_s2 + $0x6c] sm:$0xf]  ;;  %v239_v8 = vld [vmem:[%s1271_s3 + $0x68] sm:$0xf]  ;;  %v335_v9 = vmax.bf16 %v286_v62, %v139_v52  ;;  %v336_v10 = vmax.bf16 %v287_v63, %v140_v58  ;;  %v46_v14 = vld [vmem:[%s1268_s0 + $0x74] sm:$0xf] }
  0x2a   :  { %v240_v11 = vld [vmem:[%s1271_s3 + $0x6c] sm:$0xf]  ;;  %v288_v12 = vmax.bf16 %v239_v8, %v190_v6  ;;  %v94_v16 = vld [vmem:[%s1269_s1 + $0x70] sm:$0xf]  ;;  %v95_v17 = vld [vmem:[%s1269_s1 + $0x74] sm:$0xf] }
  0x2b   :  { %555 = vst [vmem:[%s1272_s4 + $0x58] sm:$0xff] %v554_v3   ;;  %v289_v15 = vmax.bf16 %v240_v11, %v191_v7  ;;  %v192_v18 = vld [vmem:[%s1270_s2 + $0x70] sm:$0xf]  ;;  %v556_v19 = vcombine.low %v335_v9, %v336_v10  ;;  %v143_v21 = vmax.bf16 %v94_v16, %v45_v13  ;;  %v144_v22 = vmax.bf16 %v95_v17, %v46_v14  ;;  %v193_v23 = vld [vmem:[%s1270_s2 + $0x74] sm:$0xf] }
  0x2c   :  { %v337_v20 = vmax.bf16 %v288_v12, %v141_v4  ;;  %v241_v24 = vld [vmem:[%s1271_s3 + $0x70] sm:$0xf]  ;;  %v242_v25 = vld [vmem:[%s1271_s3 + $0x74] sm:$0xf]  ;;  %v47_v29 = vld [vmem:[%s1268_s0 + $0x78] sm:$0xf] }
  0x2d   :  { %v338_v26 = vmax.bf16 %v289_v15, %v142_v5  ;;  %v290_v27 = vmax.bf16 %v241_v24, %v192_v18  ;;  %v291_v28 = vmax.bf16 %v242_v25, %v193_v23  ;;  %v48_v30 = vld [vmem:[%s1268_s0 + $0x7c] sm:$0xf]  ;;  %v96_v31 = vld [vmem:[%s1269_s1 + $0x78] sm:$0xf]  ;;  %557 = vst [vmem:[%s1272_s4 + $0x60] sm:$0xff] %v556_v19  }
  0x2e   :  { %v97_v32 = vld [vmem:[%s1269_s1 + $0x7c] sm:$0xf]  ;;  %v145_v33 = vmax.bf16 %v96_v31, %v47_v29  ;;  %v194_v34 = vld [vmem:[%s1270_s2 + $0x78] sm:$0xf]  ;;  %v49_v42 = vld [vmem:[%s1268_s0 + $0x80] sm:$0xf] }
  0x2f   :  { %v195_v35 = vld [vmem:[%s1270_s2 + $0x7c] sm:$0xf]  ;;  %v558_v36 = vcombine.low %v337_v20, %v338_v26  ;;  %v339_v37 = vmax.bf16 %v290_v27, %v143_v21  ;;  %v340_v38 = vmax.bf16 %v291_v28, %v144_v22  ;;  %v146_v39 = vmax.bf16 %v97_v32, %v48_v30  ;;  %v243_v40 = vld [vmem:[%s1271_s3 + $0x78] sm:$0xf]  ;;  %v50_v45 = vld [vmem:[%s1268_s0 + $0x84] sm:$0xf] }
  0x30   :  { %v244_v41 = vld [vmem:[%s1271_s3 + $0x7c] sm:$0xf]  ;;  %v292_v43 = vmax.bf16 %v243_v40, %v194_v34  ;;  %v98_v46 = vld [vmem:[%s1269_s1 + $0x80] sm:$0xf]  ;;  %v99_v47 = vld [vmem:[%s1269_s1 + $0x84] sm:$0xf] }
  0x31   :  { %v293_v44 = vmax.bf16 %v244_v41, %v195_v35  ;;  %559 = vst [vmem:[%s1272_s4 + $0x68] sm:$0xff] %v558_v36   ;;  %v560_v48 = vcombine.low %v339_v37, %v340_v38  ;;  %v147_v49 = vmax.bf16 %v98_v46, %v49_v42  ;;  %v148_v50 = vmax.bf16 %v99_v47, %v50_v45  ;;  %v196_v51 = vld [vmem:[%s1270_s2 + $0x80] sm:$0xf]  ;;  %v197_v52 = vld [vmem:[%s1270_s2 + $0x84] sm:$0xf] }
  0x32   :  { %v245_v53 = vld [vmem:[%s1271_s3 + $0x80] sm:$0xf]  ;;  %v341_v54 = vmax.bf16 %v292_v43, %v145_v33  ;;  %v246_v56 = vld [vmem:[%s1271_s3 + $0x84] sm:$0xf]  ;;  %v51_v58 = vld [vmem:[%s1268_s0 + $0x88] sm:$0xf] }
  0x33   :  { %v342_v55 = vmax.bf16 %v293_v44, %v146_v39  ;;  %v294_v57 = vmax.bf16 %v245_v53, %v196_v51  ;;  %v52_v59 = vld [vmem:[%s1268_s0 + $0x8c] sm:$0xf]  ;;  %561 = vst [vmem:[%s1272_s4 + $0x70] sm:$0xff] %v560_v48   ;;  %v295_v60 = vmax.bf16 %v246_v56, %v197_v52  ;;  %v100_v61 = vld [vmem:[%s1269_s1 + $0x88] sm:$0xf] }
  0x34   :  { %v101_v62 = vld [vmem:[%s1269_s1 + $0x8c] sm:$0xf]  ;;  %v198_v63 = vld [vmem:[%s1270_s2 + $0x88] sm:$0xf]  ;;  %v149_v2 = vmax.bf16 %v100_v61, %v51_v58  ;;  %v53_v10 = vld [vmem:[%s1268_s0 + $0x90] sm:$0xf] }
  0x35   :  { %v562_v0 = vcombine.low %v341_v54, %v342_v55  ;;  %v343_v1 = vmax.bf16 %v294_v57, %v147_v49  ;;  %v150_v3 = vmax.bf16 %v101_v62, %v52_v59  ;;  %v199_v4 = vld [vmem:[%s1270_s2 + $0x8c] sm:$0xf]  ;;  %v247_v5 = vld [vmem:[%s1271_s3 + $0x88] sm:$0xf]  ;;  %v344_v7 = vmax.bf16 %v295_v60, %v148_v50  ;;  %v54_v11 = vld [vmem:[%s1268_s0 + $0x94] sm:$0xf] }
  0x36   :  { %v248_v6 = vld [vmem:[%s1271_s3 + $0x8c] sm:$0xf]  ;;  %v296_v8 = vmax.bf16 %v247_v5, %v198_v63  ;;  %v102_v12 = vld [vmem:[%s1269_s1 + $0x90] sm:$0xf]  ;;  %v103_v13 = vld [vmem:[%s1269_s1 + $0x94] sm:$0xf] }
  0x37   :  { %v297_v9 = vmax.bf16 %v248_v6, %v199_v4  ;;  %563 = vst [vmem:[%s1272_s4 + $0x78] sm:$0xff] %v562_v0   ;;  %v151_v14 = vmax.bf16 %v102_v12, %v53_v10  ;;  %v200_v15 = vld [vmem:[%s1270_s2 + $0x90] sm:$0xf]  ;;  %v201_v16 = vld [vmem:[%s1270_s2 + $0x94] sm:$0xf]  ;;  %v564_v17 = vcombine.low %v343_v1, %v344_v7  ;;  %v152_v20 = vmax.bf16 %v103_v13, %v54_v11 }
  0x38   :  { %v345_v18 = vmax.bf16 %v296_v8, %v149_v2  ;;  %v249_v21 = vld [vmem:[%s1271_s3 + $0x90] sm:$0xf]  ;;  %v250_v22 = vld [vmem:[%s1271_s3 + $0x94] sm:$0xf]  ;;  %v55_v23 = vld [vmem:[%s1268_s0 + $0x98] sm:$0xf] }
  0x39   :  { %v346_v19 = vmax.bf16 %v297_v9, %v150_v3  ;;  %v298_v24 = vmax.bf16 %v249_v21, %v200_v15  ;;  %v299_v25 = vmax.bf16 %v250_v22, %v201_v16  ;;  %v56_v26 = vld [vmem:[%s1268_s0 + $0x9c] sm:$0xf]  ;;  %v104_v27 = vld [vmem:[%s1269_s1 + $0x98] sm:$0xf]  ;;  %565 = vst [vmem:[%s1272_s4 + $0x80] sm:$0xff] %v564_v17  }
  0x3a   :  { %v105_v28 = vld [vmem:[%s1269_s1 + $0x9c] sm:$0xf]  ;;  %v153_v30 = vmax.bf16 %v104_v27, %v55_v23  ;;  %v202_v32 = vld [vmem:[%s1270_s2 + $0x98] sm:$0xf]  ;;  %v57_v39 = vld [vmem:[%s1268_s0 + $0xa0] sm:$0xf] }
  0x3b   :  { %v566_v29 = vcombine.low %v345_v18, %v346_v19  ;;  %v154_v31 = vmax.bf16 %v105_v28, %v56_v26  ;;  %v203_v33 = vld [vmem:[%s1270_s2 + $0x9c] sm:$0xf]  ;;  %v251_v34 = vld [vmem:[%s1271_s3 + $0x98] sm:$0xf]  ;;  %v347_v35 = vmax.bf16 %v298_v24, %v151_v14  ;;  %v348_v36 = vmax.bf16 %v299_v25, %v152_v20  ;;  %v58_v40 = vld [vmem:[%s1268_s0 + $0xa4] sm:$0xf] }
  0x3c   :  { %v252_v37 = vld [vmem:[%s1271_s3 + $0x9c] sm:$0xf]  ;;  %v300_v38 = vmax.bf16 %v251_v34, %v202_v32  ;;  %v106_v42 = vld [vmem:[%s1269_s1 + $0xa0] sm:$0xf]  ;;  %v107_v43 = vld [vmem:[%s1269_s1 + $0xa4] sm:$0xf] }
  0x3d   :  { %567 = vst [vmem:[%s1272_s4 + $0x88] sm:$0xff] %v566_v29   ;;  %v301_v41 = vmax.bf16 %v252_v37, %v203_v33  ;;  %v204_v44 = vld [vmem:[%s1270_s2 + $0xa0] sm:$0xf]  ;;  %v568_v45 = vcombine.low %v347_v35, %v348_v36  ;;  %v155_v47 = vmax.bf16 %v106_v42, %v57_v39  ;;  %v156_v48 = vmax.bf16 %v107_v43, %v58_v40  ;;  %v205_v49 = vld [vmem:[%s1270_s2 + $0xa4] sm:$0xf] }
  0x3e   :  { %v349_v46 = vmax.bf16 %v300_v38, %v153_v30  ;;  %v253_v50 = vld [vmem:[%s1271_s3 + $0xa0] sm:$0xf]  ;;  %v254_v51 = vld [vmem:[%s1271_s3 + $0xa4] sm:$0xf]  ;;  %v59_v55 = vld [vmem:[%s1268_s0 + $0xa8] sm:$0xf] }
  0x3f   :  { %v350_v52 = vmax.bf16 %v301_v41, %v154_v31  ;;  %v302_v53 = vmax.bf16 %v253_v50, %v204_v44  ;;  %v303_v54 = vmax.bf16 %v254_v51, %v205_v49  ;;  %v60_v56 = vld [vmem:[%s1268_s0 + $0xac] sm:$0xf]  ;;  %v108_v57 = vld [vmem:[%s1269_s1 + $0xa8] sm:$0xf]  ;;  %569 = vst [vmem:[%s1272_s4 + $0x90] sm:$0xff] %v568_v45  }
  0x40   :  { %v109_v58 = vld [vmem:[%s1269_s1 + $0xac] sm:$0xf]  ;;  %v157_v59 = vmax.bf16 %v108_v57, %v59_v55  ;;  %v206_v60 = vld [vmem:[%s1270_s2 + $0xa8] sm:$0xf]  ;;  %v61_v4 = vld [vmem:[%s1268_s0 + $0xb0] sm:$0xf] }
  0x41   :  { %v207_v61 = vld [vmem:[%s1270_s2 + $0xac] sm:$0xf]  ;;  %v570_v62 = vcombine.low %v349_v46, %v350_v52  ;;  %v351_v63 = vmax.bf16 %v302_v53, %v155_v47  ;;  %v352_v0 = vmax.bf16 %v303_v54, %v156_v48  ;;  %v158_v1 = vmax.bf16 %v109_v58, %v60_v56  ;;  %v255_v2 = vld [vmem:[%s1271_s3 + $0xa8] sm:$0xf]  ;;  %v62_v7 = vld [vmem:[%s1268_s0 + $0xb4] sm:$0xf] }
  0x42   :  { %v256_v3 = vld [vmem:[%s1271_s3 + $0xac] sm:$0xf]  ;;  %v304_v5 = vmax.bf16 %v255_v2, %v206_v60  ;;  %v110_v8 = vld [vmem:[%s1269_s1 + $0xb0] sm:$0xf]  ;;  %v111_v9 = vld [vmem:[%s1269_s1 + $0xb4] sm:$0xf] }
  0x43   :  { %v305_v6 = vmax.bf16 %v256_v3, %v207_v61  ;;  %571 = vst [vmem:[%s1272_s4 + $0x98] sm:$0xff] %v570_v62   ;;  %v572_v10 = vcombine.low %v351_v63, %v352_v0  ;;  %v159_v11 = vmax.bf16 %v110_v8, %v61_v4  ;;  %v160_v12 = vmax.bf16 %v111_v9, %v62_v7  ;;  %v208_v13 = vld [vmem:[%s1270_s2 + $0xb0] sm:$0xf]  ;;  %v209_v14 = vld [vmem:[%s1270_s2 + $0xb4] sm:$0xf] }
  0x44   :  { %v257_v15 = vld [vmem:[%s1271_s3 + $0xb0] sm:$0xf]  ;;  %v353_v16 = vmax.bf16 %v304_v5, %v157_v59  ;;  %v258_v18 = vld [vmem:[%s1271_s3 + $0xb4] sm:$0xf]  ;;  %v63_v20 = vld [vmem:[%s1268_s0 + $0xb8] sm:$0xf] }
  0x45   :  { %v354_v17 = vmax.bf16 %v305_v6, %v158_v1  ;;  %v306_v19 = vmax.bf16 %v257_v15, %v208_v13  ;;  %v64_v21 = vld [vmem:[%s1268_s0 + $0xbc] sm:$0xf]  ;;  %573 = vst [vmem:[%s1272_s4 + $0xa0] sm:$0xff] %v572_v10   ;;  %v307_v22 = vmax.bf16 %v258_v18, %v209_v14  ;;  %v112_v23 = vld [vmem:[%s1269_s1 + $0xb8] sm:$0xf] }
  0x46   :  { %v113_v24 = vld [vmem:[%s1269_s1 + $0xbc] sm:$0xf]  ;;  %v210_v25 = vld [vmem:[%s1270_s2 + $0xb8] sm:$0xf]  ;;  %v161_v28 = vmax.bf16 %v112_v23, %v63_v20  ;;  %v65_v36 = vld [vmem:[%s1268_s0 + $0xc0] sm:$0xf] }
  0x47   :  { %v574_v26 = vcombine.low %v353_v16, %v354_v17  ;;  %v355_v27 = vmax.bf16 %v306_v19, %v159_v11  ;;  %v162_v29 = vmax.bf16 %v113_v24, %v64_v21  ;;  %v211_v30 = vld [vmem:[%s1270_s2 + $0xbc] sm:$0xf]  ;;  %v259_v31 = vld [vmem:[%s1271_s3 + $0xb8] sm:$0xf]  ;;  %v356_v33 = vmax.bf16 %v307_v22, %v160_v12  ;;  %v114_v37 = vld [vmem:[%s1269_s1 + $0xc0] sm:$0xf] }
  0x48   :  { %v260_v32 = vld [vmem:[%s1271_s3 + $0xbc] sm:$0xf]  ;;  %v308_v34 = vmax.bf16 %v259_v31, %v210_v25  ;;  %v212_v38 = vld [vmem:[%s1270_s2 + $0xc0] sm:$0xf]  ;;  %v163_v39 = vmax.bf16 %v114_v37, %v65_v36 }
  0x49   :  { %v309_v35 = vmax.bf16 %v260_v32, %v211_v30  ;;  %575 = vst [vmem:[%s1272_s4 + $0xa8] sm:$0xff] %v574_v26   ;;  %v261_v40 = vld [vmem:[%s1271_s3 + $0xc0] sm:$0xf]  ;;  %v576_v41 = vcombine.low %v355_v27, %v356_v33 }
  0x4a   :  { %v357_v42 = vmax.bf16 %v308_v34, %v161_v28  ;;  %v310_v44 = vmax.bf16 %v261_v40, %v212_v38 }
  0x4b   :  { %v358_v43 = vmax.bf16 %v309_v35, %v162_v29  ;;  %577 = vst [vmem:[%s1272_s4 + $0xb0] sm:$0xff] %v576_v41  }
  0x4c   :  { %v359_v46 = vmax.bf16 %v310_v44, %v163_v39 }
  0x4d   :  { %v578_v45 = vcombine.low %v357_v42, %v358_v43 }
  0x4e   :  { %408 = vst [vmem:[%s1272_s4 + $0xc0] sm:$0xf] %v359_v46 }
  0x4f   :  { %579 = vst [vmem:[%s1272_s4 + $0xb8] sm:$0xff] %v578_v45  }

// kernel: net_mnist_forward.9
= control target key start
LH: loop header
LB: loop body
LE: loop exit
PB: predicated region body
PF: predicated region fallthrough
CT: control target
= control target key end

     0   :  { %s368_s0 = inlined_call_operand.vmem [shape: bf16[98,128], index: 0, kind: input, shape index: {}]   ;;  %s369_s1 = inlined_call_operand.vmem [shape: bf16[98,128], index: 1, kind: input, shape index: {}]   ;;  %s370_s2 = inlined_call_operand.vmem [shape: bf16[98,128], index: 2, kind: input, shape index: {}]   ;;  %s371_s3 = inlined_call_operand.vmem [shape: bf16[98,128], index: 3, kind: input, shape index: {}]   ;;  %s372_s4 = inlined_call_operand.vmem [shape: bf16[98,128], index: 4, kind: output, shape index: {}]  }
   0x1   :  { %v17_v0 = vld [vmem:[%s368_s0] sm:$0xf]  ;;  %v18_v1 = vld [vmem:[%s368_s0 + $0x4] sm:$0xf]  ;;  %v19_v10 = vld [vmem:[%s368_s0 + $0x8] sm:$0xf] }
   0x2   :  { %v30_v2 = vld [vmem:[%s369_s1] sm:$0xf]  ;;  %v31_v3 = vld [vmem:[%s369_s1 + $0x4] sm:$0xf]  ;;  %v20_v13 = vld [vmem:[%s368_s0 + $0xc] sm:$0xf] }
   0x3   :  { %v43_v4 = vmax.bf16 %v30_v2, %v17_v0  ;;  %v56_v5 = vld [vmem:[%s370_s2] sm:$0xf]  ;;  %v57_v6 = vld [vmem:[%s370_s2 + $0x4] sm:$0xf]  ;;  %v44_v7 = vmax.bf16 %v31_v3, %v18_v1  ;;  %v32_v14 = vld [vmem:[%s369_s1 + $0x8] sm:$0xf] }
   0x4   :  { %v69_v8 = vld [vmem:[%s371_s3] sm:$0xf]  ;;  %v70_v9 = vld [vmem:[%s371_s3 + $0x4] sm:$0xf]  ;;  %v33_v15 = vld [vmem:[%s369_s1 + $0xc] sm:$0xf]  ;;  %v45_v16 = vmax.bf16 %v32_v14, %v19_v10 }
   0x5   :  { %v82_v11 = vmax.bf16 %v69_v8, %v56_v5  ;;  %v83_v12 = vmax.bf16 %v70_v9, %v57_v6  ;;  %v46_v17 = vmax.bf16 %v33_v15, %v20_v13  ;;  %v58_v18 = vld [vmem:[%s370_s2 + $0x8] sm:$0xf]  ;;  %v59_v19 = vld [vmem:[%s370_s2 + $0xc] sm:$0xf]  ;;  %v21_v25 = vld [vmem:[%s368_s0 + $0x10] sm:$0xf] }
   0x6   :  { %v71_v20 = vld [vmem:[%s371_s3 + $0x8] sm:$0xf]  ;;  %v72_v23 = vld [vmem:[%s371_s3 + $0xc] sm:$0xf]  ;;  %v22_v26 = vld [vmem:[%s368_s0 + $0x14] sm:$0xf] }
   0x7   :  { %v95_v21 = vmax.bf16 %v82_v11, %v43_v4  ;;  %v96_v22 = vmax.bf16 %v83_v12, %v44_v7  ;;  %v84_v24 = vmax.bf16 %v71_v20, %v58_v18  ;;  %v85_v27 = vmax.bf16 %v72_v23, %v59_v19  ;;  %v34_v28 = vld [vmem:[%s369_s1 + $0x10] sm:$0xf]  ;;  %v35_v29 = vld [vmem:[%s369_s1 + $0x14] sm:$0xf]  ;;  %v23_v41 = vld [vmem:[%s368_s0 + $0x18] sm:$0xf] }
   0x8   :  { %v60_v30 = vld [vmem:[%s370_s2 + $0x10] sm:$0xf]  ;;  %v47_v33 = vmax.bf16 %v34_v28, %v21_v25  ;;  %v48_v34 = vmax.bf16 %v35_v29, %v22_v26  ;;  %v61_v35 = vld [vmem:[%s370_s2 + $0x14] sm:$0xf]  ;;  %v24_v42 = vld [vmem:[%s368_s0 + $0x1c] sm:$0xf] }
   0x9   :  { %v155_v31 = vcombine.low %v95_v21, %v96_v22  ;;  %v97_v32 = vmax.bf16 %v84_v24, %v45_v16  ;;  %v73_v36 = vld [vmem:[%s371_s3 + $0x10] sm:$0xf]  ;;  %v74_v37 = vld [vmem:[%s371_s3 + $0x14] sm:$0xf]  ;;  %v98_v38 = vmax.bf16 %v85_v27, %v46_v17  ;;  %v36_v43 = vld [vmem:[%s369_s1 + $0x18] sm:$0xf] }
   0xa   :  { %v86_v39 = vmax.bf16 %v73_v36, %v60_v30  ;;  %v87_v40 = vmax.bf16 %v74_v37, %v61_v35  ;;  %v37_v44 = vld [vmem:[%s369_s1 + $0x1c] sm:$0xf]  ;;  %v49_v45 = vmax.bf16 %v36_v43, %v23_v41  ;;  %v62_v46 = vld [vmem:[%s370_s2 + $0x18] sm:$0xf]  ;;  %v25_v54 = vld [vmem:[%s368_s0 + $0x20] sm:$0xf] }
   0xb   :  { %129 = vst [vmem:[%s372_s4] sm:$0xff] %v155_v31   ;;  %v63_v47 = vld [vmem:[%s370_s2 + $0x1c] sm:$0xf]  ;;  %v156_v48 = vcombine.low %v97_v32, %v98_v38  ;;  %v50_v51 = vmax.bf16 %v37_v44, %v24_v42  ;;  %v75_v52 = vld [vmem:[%s371_s3 + $0x18] sm:$0xf]  ;;  %v26_v57 = vld [vmem:[%s368_s0 + $0x24] sm:$0xf] }
   0xc   :  { %v99_v49 = vmax.bf16 %v86_v39, %v47_v33  ;;  %v100_v50 = vmax.bf16 %v87_v40, %v48_v34  ;;  %v76_v53 = vld [vmem:[%s371_s3 + $0x1c] sm:$0xf]  ;;  %v88_v55 = vmax.bf16 %v75_v52, %v62_v46  ;;  %v38_v58 = vld [vmem:[%s369_s1 + $0x20] sm:$0xf]  ;;  %v39_v59 = vld [vmem:[%s369_s1 + $0x24] sm:$0xf] }
   0xd   :  { %v89_v56 = vmax.bf16 %v76_v53, %v63_v47  ;;  %157 = vst [vmem:[%s372_s4 + $0x8] sm:$0xff] %v156_v48   ;;  %v51_v61 = vmax.bf16 %v38_v58, %v25_v54  ;;  %v52_v62 = vmax.bf16 %v39_v59, %v26_v57  ;;  %v64_v63 = vld [vmem:[%s370_s2 + $0x20] sm:$0xf]  ;;  %v65_v0 = vld [vmem:[%s370_s2 + $0x24] sm:$0xf] }
   0xe   :  { %v158_v60 = vcombine.low %v99_v49, %v100_v50  ;;  %v77_v1 = vld [vmem:[%s371_s3 + $0x20] sm:$0xf]  ;;  %v101_v2 = vmax.bf16 %v88_v55, %v49_v45  ;;  %v78_v4 = vld [vmem:[%s371_s3 + $0x24] sm:$0xf]  ;;  %v27_v6 = vld [vmem:[%s368_s0 + $0x28] sm:$0xf] }
   0xf   :  { %v102_v3 = vmax.bf16 %v89_v56, %v50_v51  ;;  %v90_v5 = vmax.bf16 %v77_v1, %v64_v63  ;;  %v28_v7 = vld [vmem:[%s368_s0 + $0x2c] sm:$0xf]  ;;  %v91_v8 = vmax.bf16 %v78_v4, %v65_v0  ;;  %v40_v9 = vld [vmem:[%s369_s1 + $0x28] sm:$0xf]  ;;  %v29_v22 = vld [vmem:[%s368_s0 + $0x30] sm:$0x1] }
  0x10   :  { %159 = vst [vmem:[%s372_s4 + $0x10] sm:$0xff] %v158_v60   ;;  %v41_v10 = vld [vmem:[%s369_s1 + $0x2c] sm:$0xf]  ;;  %v66_v11 = vld [vmem:[%s370_s2 + $0x28] sm:$0xf]  ;;  %v53_v14 = vmax.bf16 %v40_v9, %v27_v6 }
  0x11   :  { %v160_v12 = vcombine.low %v101_v2, %v102_v3  ;;  %v103_v13 = vmax.bf16 %v90_v5, %v51_v61  ;;  %v54_v15 = vmax.bf16 %v41_v10, %v28_v7  ;;  %v67_v16 = vld [vmem:[%s370_s2 + $0x2c] sm:$0xf]  ;;  %v79_v17 = vld [vmem:[%s371_s3 + $0x28] sm:$0xf]  ;;  %v104_v19 = vmax.bf16 %v91_v8, %v52_v62  ;;  %v42_v23 = vld [vmem:[%s369_s1 + $0x30] sm:$0x1] }
  0x12   :  { %v80_v18 = vld [vmem:[%s371_s3 + $0x2c] sm:$0xf]  ;;  %v92_v20 = vmax.bf16 %v79_v17, %v66_v11  ;;  %v68_v24 = vld [vmem:[%s370_s2 + $0x30] sm:$0x1]  ;;  %v55_v25 = vmax.bf16 %v42_v23, %v29_v22 }
  0x13   :  { %v93_v21 = vmax.bf16 %v80_v18, %v67_v16  ;;  %161 = vst [vmem:[%s372_s4 + $0x18] sm:$0xff] %v160_v12   ;;  %v81_v26 = vld [vmem:[%s371_s3 + $0x30] sm:$0x1]  ;;  %v162_v27 = vcombine.low %v103_v13, %v104_v19 }
  0x14   :  { %v105_v28 = vmax.bf16 %v92_v20, %v53_v14  ;;  %v94_v30 = vmax.bf16 %v81_v26, %v68_v24 }
  0x15   :  { %v106_v29 = vmax.bf16 %v93_v21, %v54_v15  ;;  %163 = vst [vmem:[%s372_s4 + $0x20] sm:$0xff] %v162_v27  }
  0x16   :  { %v107_v32 = vmax.bf16 %v94_v30, %v55_v25 }
  0x17   :  { %v164_v31 = vcombine.low %v105_v28, %v106_v29 }
  0x18   :  { %120 = vst [vmem:[%s372_s4 + $0x30] sm:$0x1] %v107_v32 }
  0x19   :  { %165 = vst [vmem:[%s372_s4 + $0x28] sm:$0xff] %v164_v31  }

// kernel: net_mnist_forward.8
= control target key start
LH: loop header
LB: loop body
LE: loop exit
PB: predicated region body
PF: predicated region fallthrough
CT: control target
= control target key end

     0   :  { %v3020_v0 = vmov 0   ;;  %vm1196_vm0 = vcmask 261120   ;;  %s3988_s1 = inlined_call_operand.vmem [shape: bf16[800,128], index: 1, kind: input, shape index: {}]   ;;  %s3989_s0 = inlined_call_operand.vmem [shape: bf16[288,800], index: 0, kind: input, shape index: {}]   ;;  %s3990_s2 = inlined_call_operand.vmem [shape: f32[1,128], index: 2, kind: input, shape index: {}]   ;;  %s3991_s3 = inlined_call_operand.vmem [shape: bf16[288,128], index: 3, kind: output, shape index: {}]  }
   0x1   :  { %1251 = vmatprep.subr.bf16.mxu1 %v3020_v0  ;;  %1428 = vmatprep.subr.bf16.mxu0 %v3020_v0  ;;  %v2790_v1 = vld [vmem:[%s3988_s1] sm:$0xff]   ;;  %v2792_v3 = vld [vmem:[%s3988_s1 + $0x8] sm:$0xff]   ;;  %v2794_v5 = vld [vmem:[%s3988_s1 + $0x10] sm:$0xff]  }
   0x2   :  { %v3049_v2 = vld [vmem:[%s3988_s1 + $0x80] sm:$0xff]   ;;  %1252 = vmatpush1.bf16.msra.mxu1 %v2790_v1  ;;  %v3059_v4 = vld [vmem:[%s3988_s1 + $0x88] sm:$0xff]   ;;  %v3070_v6 = vld [vmem:[%s3988_s1 + $0x90] sm:$0xff]  }
   0x3   :  { %1429 = vmatpush1.bf16.msra.mxu0 %v3049_v2  ;;  %1253 = vmatprep.subr.bf16.mxu1 %v3020_v0  ;;  %v2796_v7 = vld [vmem:[%s3988_s1 + $0x18] sm:$0xff]   ;;  %v2798_v9 = vld [vmem:[%s3988_s1 + $0x20] sm:$0xff]   ;;  %v2800_v11 = vld [vmem:[%s3988_s1 + $0x28] sm:$0xff]  }
   0x4   :  { %1430 = vmatprep.subr.bf16.mxu0 %v3020_v0  ;;  %v3081_v8 = vld [vmem:[%s3988_s1 + $0x98] sm:$0xff]   ;;  %v3092_v10 = vld [vmem:[%s3988_s1 + $0xa0] sm:$0xff]   ;;  %v3103_v12 = vld [vmem:[%s3988_s1 + $0xa8] sm:$0xff]  }
   0x5   :  { %v2802_v13 = vld [vmem:[%s3988_s1 + $0x30] sm:$0xff]   ;;  %v2804_v15 = vld [vmem:[%s3988_s1 + $0x38] sm:$0xff]   ;;  %v2806_v17 = vld [vmem:[%s3988_s1 + $0x40] sm:$0xff]  }
   0x6   :  { %1254 = vmatpush1.bf16.msra.mxu1 %v2792_v3  ;;  %v3114_v14 = vld [vmem:[%s3988_s1 + $0xb0] sm:$0xff]   ;;  %v3125_v16 = vld [vmem:[%s3988_s1 + $0xb8] sm:$0xff]   ;;  %v3136_v18 = vld [vmem:[%s3988_s1 + $0xc0] sm:$0xff]  }
   0x7   :  { %1431 = vmatpush1.bf16.msra.mxu0 %v3059_v4  ;;  %1255 = vmatprep.subr.bf16.mxu1 %v3020_v0  ;;  %v2824_v19 = vld [vmem:[%s3989_s0 + $0x4] ss:$28 sps:$4 sm:$0xff]   ;;  %v2808_v20 = vld [vmem:[%s3988_s1 + $0x48] sm:$0xff]   ;;  %v2810_v23 = vld [vmem:[%s3988_s1 + $0x50] sm:$0xff]  }
   0x8   :  { %1432 = vmatprep.subr.bf16.mxu0 %v3020_v0  ;;  %v2827_v21 = vld [vmem:[%s3989_s0 + $0xc] ss:$28 sps:$4 sm:$0xff]   ;;  %1283 = vmatprep.mubr.bf16.mxu1 %v2824_v19  ;;  %v3164_v24 = vld [vmem:[%s3988_s1 + $0xd0] sm:$0xff]   ;;  %v2812_v25 = vld [vmem:[%s3988_s1 + $0x58] sm:$0xff]  }
   0x9   :  { %v3153_v22 = vld [vmem:[%s3988_s1 + $0xc8] sm:$0xff]   ;;  %1460 = vmatprep.mubr.bf16.mxu0 %v2827_v21  ;;  %v3175_v26 = vld [vmem:[%s3988_s1 + $0xd8] sm:$0xff]   ;;  %v2814_v27 = vld [vmem:[%s3988_s1 + $0x60] sm:$0xff]  }
   0xa   :  { %1256 = vmatpush1.bf16.msra.mxu1 %v2794_v5  ;;  %v3186_v28 = vld [vmem:[%s3988_s1 + $0xe0] sm:$0xff]   ;;  %v2816_v29 = vld [vmem:[%s3988_s1 + $0x68] sm:$0xff]   ;;  %v2818_v31 = vld [vmem:[%s3988_s1 + $0x70] sm:$0xff]  }
   0xb   :  { %1433 = vmatpush1.bf16.msra.mxu0 %v3070_v6  ;;  %1257 = vmatprep.subr.bf16.mxu1 %v3020_v0  ;;  %v3197_v30 = vld [vmem:[%s3988_s1 + $0xe8] sm:$0xff]   ;;  %v3208_v32 = vld [vmem:[%s3988_s1 + $0xf0] sm:$0xff]   ;;  %v2820_v33 = vld [vmem:[%s3988_s1 + $0x78] sm:$0xff]  }
   0xc   :  { %1434 = vmatprep.subr.bf16.mxu0 %v3020_v0  ;;  %v3219_v34 = vld [vmem:[%s3988_s1 + $0xf8] sm:$0xff]   ;;  %v2825_v36 = vld [vmem:[%s3989_s0 + $0x8] ss:$28 sps:$4 sm:$0xff]   ;;  %v2836_v43 = vld [vmem:[%s3989_s0 + $0x74] ss:$28 sps:$4 sm:$0xff]  }
   0xd   :  { %v2822_v35 = vld [vmem:[%s3989_s0] ss:$28 sps:$4 sm:$0xff]   ;;  %v2835_v40 = vld [vmem:[%s3988_s1 + $0x108] sm:$0xff]   ;;  %v2833_v41 = vld [vmem:[%s3989_s0 + $0x38] ss:$28 sps:$4 sm:$0xff]  }
   0xe   :  { %1258 = vmatpush1.bf16.msra.mxu1 %v2796_v7  ;;  %v2828_v37 = vld [vmem:[%s3988_s1 + $0x100] sm:$0xff]   ;;  %v2829_v38 = vld [vmem:[%s3989_s0 + $0x3c] ss:$28 sps:$4 sm:$0xff]   ;;  %v2840_v45 = vld [vmem:[%s3988_s1 + $0x110] sm:$0xff]  }
   0xf   :  { %1435 = vmatpush1.bf16.msra.mxu0 %v3081_v8  ;;  %1259 = vmatprep.subr.bf16.mxu1 %v3020_v0  ;;  %v2831_v39 = vld [vmem:[%s3989_s0 + $0x44] ss:$28 sps:$4 sm:$0xff]   ;;  %v2838_v44 = vld [vmem:[%s3989_s0 + $0x7c] ss:$28 sps:$4 sm:$0xff]   ;;  %v2841_v47 = vld [vmem:[%s3989_s0 + $0x70] ss:$28 sps:$4 sm:$0xff]  }
  0x10   :  { %1436 = vmatprep.subr.bf16.mxu0 %v3020_v0  ;;  %v2834_v42 = vld [vmem:[%s3989_s0 + $0x40] ss:$28 sps:$4 sm:$0xff]   ;;  %v2842_v48 = vld [vmem:[%s3989_s0 + $0x78] ss:$28 sps:$4 sm:$0xff]   ;;  %v2844_v49 = vld [vmem:[%s3989_s0 + $0xac] ss:$28 sps:$4 sm:$0xff]  }
  0x11   :  { %v2843_v46 = vld [vmem:[%s3988_s1 + $0x118] sm:$0xff]   ;;  %v2846_v50 = vld [vmem:[%s3989_s0 + $0xb4] ss:$28 sps:$4 sm:$0xff]   ;;  %v2850_v51 = vld [vmem:[%s3988_s1 + $0x120] sm:$0xff]  }
  0x12   :  { %1260 = vmatpush1.bf16.msra.mxu1 %v2798_v9  ;;  %v2857_v52 = vld [vmem:[%s3988_s1 + $0x128] sm:$0xff]   ;;  %v2851_v55 = vld [vmem:[%s3989_s0 + $0xe4] ss:$28 sps:$4 sm:$0xff]   ;;  %v2864_v57 = vld [vmem:[%s3988_s1 + $0x130] sm:$0xff]  }
  0x13   :  { %1437 = vmatpush1.bf16.msra.mxu0 %v3092_v10  ;;  %1261 = vmatprep.subr.bf16.mxu1 %v3020_v0  ;;  %v2848_v53 = vld [vmem:[%s3989_s0 + $0xa8] ss:$28 sps:$4 sm:$0xff]   ;;  %v2849_v54 = vld [vmem:[%s3989_s0 + $0xb0] ss:$28 sps:$4 sm:$0xff]   ;;  %v2871_v58 = vld [vmem:[%s3988_s1 + $0x138] sm:$0xff]  }
  0x14   :  { %1438 = vmatprep.subr.bf16.mxu0 %v3020_v0  ;;  %v2853_v56 = vld [vmem:[%s3989_s0 + $0xec] ss:$28 sps:$4 sm:$0xff]   ;;  %v2855_v59 = vld [vmem:[%s3989_s0 + $0xe0] ss:$28 sps:$4 sm:$0xff]   ;;  %v2870_v9 = vld [vmem:[%s3989_s0 + $0x158] ss:$28 sps:$4 sm:$0xff]  }
  0x15   :  { %v2856_v60 = vld [vmem:[%s3989_s0 + $0xe8] ss:$28 sps:$4 sm:$0xff]   ;;  %v2858_v61 = vld [vmem:[%s3989_s0 + $0x11c] ss:$28 sps:$4 sm:$0xff]   ;;  %v2869_v7 = vld [vmem:[%s3989_s0 + $0x150] ss:$28 sps:$4 sm:$0xff]  }
  0x16   :  { %1262 = vmatpush1.bf16.msra.mxu1 %v2800_v11  ;;  %v2860_v62 = vld [vmem:[%s3989_s0 + $0x124] ss:$28 sps:$4 sm:$0xff]   ;;  %v2885_v1 = vld [vmem:[%s3988_s1 + $0x148] sm:$0xff]   ;;  %v2867_v5 = vld [vmem:[%s3989_s0 + $0x15c] ss:$28 sps:$4 sm:$0xff]  }
  0x17   :  { %1439 = vmatpush1.bf16.msra.mxu0 %v3103_v12  ;;  %1263 = vmatprep.subr.bf16.mxu1 %v3020_v0  ;;  %v2878_v63 = vld [vmem:[%s3988_s1 + $0x140] sm:$0xff]   ;;  %v2874_v11 = vld [vmem:[%s3989_s0 + $0x194] ss:$28 sps:$4 sm:$0xff]  }
  0x18   :  { %1440 = vmatprep.subr.bf16.mxu0 %v3020_v0  ;;  %v2863_v3 = vld [vmem:[%s3989_s0 + $0x120] ss:$28 sps:$4 sm:$0xff]  }
  0x19   :  { %v2883_v19 = vld [vmem:[%s3989_s0 + $0x1c0] ss:$28 sps:$4 sm:$0xff]  }
  0x1a   :  { %1264 = vmatpush1.bf16.msra.mxu1 %v2802_v13  ;;  %v2876_v13 = vld [vmem:[%s3989_s0 + $0x188] ss:$28 sps:$4 sm:$0xff]  }
  0x1b   :  { %1441 = vmatpush1.bf16.msra.mxu0 %v3114_v14  ;;  %1265 = vmatprep.subr.bf16.mxu1 %v3020_v0  ;;  %v3417_v21 = vld [vmem:[%s3988_s1 + $0x180] sm:$0xff]  }
  0x1c   :  { %1442 = vmatprep.subr.bf16.mxu0 %v3020_v0 }
  0x1e   :  { %1266 = vmatpush1.bf16.msra.mxu1 %v2804_v15  ;;  %v2877_v15 = vld [vmem:[%s3989_s0 + $0x190] ss:$28 sps:$4 sm:$0xff]  }
  0x1f   :  { %1443 = vmatpush1.bf16.msra.mxu0 %v3125_v16  ;;  %1267 = vmatprep.subr.bf16.mxu1 %v3020_v0 }
  0x20   :  { %1444 = vmatprep.subr.bf16.mxu0 %v3020_v0 }
  0x22   :  { %1268 = vmatpush1.bf16.msra.mxu1 %v2806_v17  ;;  %v2881_v17 = vld [vmem:[%s3989_s0 + $0x1cc] ss:$28 sps:$4 sm:$0xff]  }
  0x23   :  { %1445 = vmatpush1.bf16.msra.mxu0 %v3136_v18  ;;  %1269 = vmatprep.subr.bf16.mxu1 %v3020_v0 }
  0x24   :  { %1446 = vmatprep.subr.bf16.mxu0 %v3020_v0 }
  0x26   :  { %1270 = vmatpush1.bf16.msra.mxu1 %v2808_v20  ;;  %v2921_v20 = vld [vmem:[%s3988_s1 + $0x178] sm:$0xff]  }
  0x27   :  { %1447 = vmatpush1.bf16.msra.mxu0 %v3153_v22  ;;  %1271 = vmatprep.subr.bf16.mxu1 %v3020_v0 }
  0x28   :  { %1448 = vmatprep.subr.bf16.mxu0 %v3020_v0 }
  0x2a   :  { %1272 = vmatpush1.bf16.msra.mxu1 %v2810_v23  ;;  %v2886_v23 = vld [vmem:[%s3989_s0 + $0x1fc] ss:$28 sps:$4 sm:$0xff]  }
  0x2b   :  { %1449 = vmatpush1.bf16.msra.mxu0 %v3164_v24  ;;  %1273 = vmatprep.subr.bf16.mxu1 %v3020_v0 }
  0x2c   :  { %1450 = vmatprep.subr.bf16.mxu0 %v3020_v0 }
  0x2e   :  { %1274 = vmatpush1.bf16.msra.mxu1 %v2812_v25  ;;  %v2891_v25 = vld [vmem:[%s3989_s0 + $0x1f8] ss:$28 sps:$4 sm:$0xff]  }
  0x2f   :  { %1451 = vmatpush1.bf16.msra.mxu0 %v3175_v26  ;;  %1275 = vmatprep.subr.bf16.mxu1 %v3020_v0 }
  0x30   :  { %1452 = vmatprep.subr.bf16.mxu0 %v3020_v0 }
  0x32   :  { %1276 = vmatpush1.bf16.msra.mxu1 %v2814_v27  ;;  %v2896_v27 = vld [vmem:[%s3989_s0 + $0x23c] ss:$28 sps:$4 sm:$0xff]  }
  0x33   :  { %1453 = vmatpush1.bf16.msra.mxu0 %v3186_v28  ;;  %1277 = vmatprep.subr.bf16.mxu1 %v3020_v0 }
  0x34   :  { %1454 = vmatprep.subr.bf16.mxu0 %v3020_v0 }
  0x36   :  { %1278 = vmatpush1.bf16.msra.mxu1 %v2816_v29  ;;  %v2899_v29 = vld [vmem:[%s3989_s0 + $0x238] ss:$28 sps:$4 sm:$0xff]  }
  0x37   :  { %1455 = vmatpush1.bf16.msra.mxu0 %v3197_v30  ;;  %1279 = vmatprep.subr.bf16.mxu1 %v3020_v0 }
  0x38   :  { %1456 = vmatprep.subr.bf16.mxu0 %v3020_v0 }
  0x3a   :  { %1280 = vmatpush1.bf16.msra.mxu1 %v2818_v31  ;;  %v2903_v31 = vld [vmem:[%s3989_s0 + $0x274] ss:$28 sps:$4 sm:$0xff]  }
  0x3b   :  { %1457 = vmatpush1.bf16.msra.mxu0 %v3208_v32  ;;  %1281 = vmatprep.subr.bf16.mxu1 %v3020_v0 }
  0x3c   :  { %1458 = vmatprep.subr.bf16.mxu0 %v3020_v0 }
  0x3e   :  { %1282 = vmatpush1.bf16.msra.mxu1 %v2820_v33  ;;  %v2906_v33 = vld [vmem:[%s3989_s0 + $0x270] ss:$28 sps:$4 sm:$0xff]  }
  0x3f   :  { %1459 = vmatpush1.bf16.msra.mxu0 %v3219_v34  ;;  %2613 = vmatprep.subr.bf16.mxu1 %v3020_v0 }
  0x40   :  { %1605 = vmatprep.subr.bf16.mxu0 %v3020_v0 }
  0x41   :  { %1284 = vmatmul.mubr.bf16.vlgmr.msra.gmra.mrb[0].mxu1 %v2822_v35  ;;  %v2910_v35 = vld [vmem:[%s3989_s0 + $0x2ac] ss:$28 sps:$4 sm:$0xff]  }
  0x42   :  { %1461 = vmatmul.mubr.bf16.vlgmr.msra.gmra.mrb[0].mxu0 %v2825_v36  ;;  %1291 = vmatprep.mubr.bf16.mxu1 %v2829_v38  ;;  %v2912_v36 = vld [vmem:[%s3989_s0 + $0x2a0] ss:$28 sps:$4 sm:$0xff]  }
  0x43   :  { %1606 = vmatpush1.bf16.msra.mxu0 %v2828_v37  ;;  %1468 = vmatprep.mubr.bf16.mxu0 %v2831_v39  ;;  %v2913_v37 = vld [vmem:[%s3989_s0 + $0x2a8] ss:$28 sps:$4 sm:$0xff]   ;;  %v2915_v38 = vld [vmem:[%s3989_s0 + $0x2dc] ss:$28 sps:$4 sm:$0xff]  }
  0x44   :  { %1607 = vmatprep.subr.bf16.mxu0 %v3020_v0  ;;  %2629 = vmatpush1.bf16.msra.mxu1 %v3049_v2  ;;  %v2862_v2 = vld [vmem:[%s3989_s0 + $0x118] ss:$28 sps:$4 sm:$0xff]   ;;  %v2917_v39 = vld [vmem:[%s3989_s0 + $0x2e4] ss:$28 sps:$4 sm:$0xff]  }
  0x45   :  { %2614 = vmatprep.subr.bf16.mxu1 %v3020_v0 }
  0x47   :  { %1608 = vmatpush1.bf16.msra.mxu0 %v2835_v40  ;;  %v2919_v40 = vld [vmem:[%s3989_s0 + $0x2d8] ss:$28 sps:$4 sm:$0xff]  }
  0x48   :  { %1609 = vmatprep.subr.bf16.mxu0 %v3020_v0  ;;  %2630 = vmatpush1.bf16.msra.mxu1 %v3059_v4  ;;  %v2865_v4 = vld [vmem:[%s3989_s0 + $0x154] ss:$28 sps:$4 sm:$0xff]  }
  0x49   :  { %1292 = vmatmul.mubr.bf16.gmra.mrb[4].mxu1 %v2833_v41  ;;  %2615 = vmatprep.subr.bf16.mxu1 %v3020_v0  ;;  %v2920_v41 = vld [vmem:[%s3989_s0 + $0x2e0] ss:$28 sps:$4 sm:$0xff]  }
  0x4a   :  { %1469 = vmatmul.mubr.bf16.gmra.mrb[4].mxu0 %v2834_v42  ;;  %1299 = vmatprep.mubr.bf16.mxu1 %v2836_v43  ;;  %v2922_v42 = vld [vmem:[%s3989_s0 + $0x314] ss:$28 sps:$4 sm:$0xff]  }
  0x4b   :  { %1476 = vmatprep.mubr.bf16.mxu0 %v2838_v44  ;;  %1610 = vmatpush1.bf16.msra.mxu0 %v2840_v45  ;;  %v2926_v43 = vld [vmem:[%s3989_s0 + $0x14] ss:$28 sps:$4 sm:$0xff]  }
  0x4c   :  { %1611 = vmatprep.subr.bf16.mxu0 %v3020_v0  ;;  %2631 = vmatpush1.bf16.msra.mxu1 %v3070_v6  ;;  %v2890_v6 = vld [vmem:[%s3988_s1 + $0x150] sm:$0xff]  }
  0x4d   :  { %2616 = vmatprep.subr.bf16.mxu1 %v3020_v0  ;;  %v2927_v44 = vld [vmem:[%s3989_s0 + $0x310] ss:$28 sps:$4 sm:$0xff]  }
  0x4e   :  { %v2924_v45 = vld [vmem:[%s3989_s0 + $0x10] ss:$28 sps:$4 sm:$0xff]  }
  0x4f   :  { %1612 = vmatpush1.bf16.msra.mxu0 %v2843_v46  ;;  %v2928_v46 = vld [vmem:[%s3989_s0 + $0x34c] ss:$28 sps:$4 sm:$0xff]  }
  0x50   :  { %1613 = vmatprep.subr.bf16.mxu0 %v3020_v0  ;;  %2632 = vmatpush1.bf16.msra.mxu1 %v3081_v8  ;;  %v2893_v8 = vld [vmem:[%s3988_s1 + $0x158] sm:$0xff]  }
  0x51   :  { %1300 = vmatmul.mubr.bf16.gmra.mrb[8].mxu1 %v2841_v47  ;;  %2617 = vmatprep.subr.bf16.mxu1 %v3020_v0  ;;  %v2930_v47 = vld [vmem:[%s3989_s0 + $0x4c] ss:$28 sps:$4 sm:$0xff]  }
  0x52   :  { %1477 = vmatmul.mubr.bf16.gmra.mrb[8].mxu0 %v2842_v48  ;;  %1307 = vmatprep.mubr.bf16.mxu1 %v2844_v49  ;;  %v2932_v48 = vld [vmem:[%s3989_s0 + $0x348] ss:$28 sps:$4 sm:$0xff]  }
  0x53   :  { %1484 = vmatprep.mubr.bf16.mxu0 %v2846_v50  ;;  %1614 = vmatpush1.bf16.msra.mxu0 %v2850_v51  ;;  %v2933_v49 = vld [vmem:[%s3989_s0 + $0x48] ss:$28 sps:$4 sm:$0xff]  }
  0x54   :  { %1615 = vmatprep.subr.bf16.mxu0 %v3020_v0  ;;  %2633 = vmatpush1.bf16.msra.mxu1 %v3092_v10  ;;  %v2872_v10 = vld [vmem:[%s3989_s0 + $0x18c] ss:$28 sps:$4 sm:$0xff]   ;;  %v2934_v50 = vld [vmem:[%s3989_s0 + $0x384] ss:$28 sps:$4 sm:$0xff]  }
  0x55   :  { %2618 = vmatprep.subr.bf16.mxu1 %v3020_v0  ;;  %v2936_v51 = vld [vmem:[%s3989_s0 + $0x84] ss:$28 sps:$4 sm:$0xff]  }
  0x57   :  { %1616 = vmatpush1.bf16.msra.mxu0 %v2857_v52  ;;  %v2938_v52 = vld [vmem:[%s3989_s0 + $0x380] ss:$28 sps:$4 sm:$0xff]  }
  0x58   :  { %1617 = vmatprep.subr.bf16.mxu0 %v3020_v0  ;;  %2634 = vmatpush1.bf16.msra.mxu1 %v3103_v12  ;;  %v2900_v12 = vld [vmem:[%s3988_s1 + $0x160] sm:$0xff]  }
  0x59   :  { %1308 = vmatmul.mubr.bf16.gmra.mrb[12].mxu1 %v2848_v53  ;;  %2619 = vmatprep.subr.bf16.mxu1 %v3020_v0  ;;  %v2939_v53 = vld [vmem:[%s3989_s0 + $0x80] ss:$28 sps:$4 sm:$0xff]  }
  0x5a   :  { %1485 = vmatmul.mubr.bf16.gmra.mrb[12].mxu0 %v2849_v54  ;;  %1315 = vmatprep.mubr.bf16.mxu1 %v2851_v55  ;;  %v2940_v54 = vld [vmem:[%s3989_s0 + $0x3bc] ss:$28 sps:$4 sm:$0xff]  }
  0x5b   :  { %1492 = vmatprep.mubr.bf16.mxu0 %v2853_v56  ;;  %1618 = vmatpush1.bf16.msra.mxu0 %v2864_v57  ;;  %v2942_v55 = vld [vmem:[%s3989_s0 + $0xbc] ss:$28 sps:$4 sm:$0xff]  }
  0x5c   :  { %1619 = vmatprep.subr.bf16.mxu0 %v3020_v0  ;;  %2635 = vmatpush1.bf16.msra.mxu1 %v3114_v14  ;;  %v2907_v14 = vld [vmem:[%s3988_s1 + $0x168] sm:$0xff]   ;;  %v2944_v56 = vld [vmem:[%s3989_s0 + $0x3b8] ss:$28 sps:$4 sm:$0xff]  }
  0x5d   :  { %2620 = vmatprep.subr.bf16.mxu1 %v3020_v0  ;;  %v2945_v57 = vld [vmem:[%s3989_s0 + $0xb8] ss:$28 sps:$4 sm:$0xff]  }
  0x5f   :  { %1620 = vmatpush1.bf16.msra.mxu0 %v2871_v58  ;;  %v2948_v58 = vld [vmem:[%s3989_s0 + $0x31c] ss:$28 sps:$4 sm:$0xff]  }
  0x60   :  { %1621 = vmatprep.subr.bf16.mxu0 %v3020_v0  ;;  %2636 = vmatpush1.bf16.msra.mxu1 %v3125_v16  ;;  %v2879_v16 = vld [vmem:[%s3989_s0 + $0x1c4] ss:$28 sps:$4 sm:$0xff]  }
  0x61   :  { %1316 = vmatmul.mubr.bf16.gmra.mrb[16].mxu1 %v2855_v59  ;;  %2621 = vmatprep.subr.bf16.mxu1 %v3020_v0  ;;  %v2949_v59 = vld [vmem:[%s3989_s0 + $0xf4] ss:$28 sps:$4 sm:$0xff]  }
  0x62   :  { %1493 = vmatmul.mubr.bf16.gmra.mrb[16].mxu0 %v2856_v60  ;;  %1323 = vmatprep.mubr.bf16.mxu1 %v2858_v61  ;;  %v2946_v60 = vld [vmem:[%s3989_s0 + $0x318] ss:$28 sps:$4 sm:$0xff]   ;;  %v2951_v61 = vld [vmem:[%s3989_s0 + $0xf0] ss:$28 sps:$4 sm:$0xff]  }
  0x63   :  { %1500 = vmatprep.mubr.bf16.mxu0 %v2860_v62  ;;  %1622 = vmatpush1.bf16.msra.mxu0 %v2878_v63  ;;  %v2952_v62 = vld [vmem:[%s3989_s0 + $0x354] ss:$28 sps:$4 sm:$0xff]   ;;  %v2954_v63 = vld [vmem:[%s3989_s0 + $0x12c] ss:$28 sps:$4 sm:$0xff]  }
  0x64   :  { %1623 = vmatprep.subr.bf16.mxu0 %v3020_v0  ;;  %2637 = vmatpush1.bf16.msra.mxu1 %v3136_v18  ;;  %v2914_v18 = vld [vmem:[%s3988_s1 + $0x170] sm:$0xff]  }
  0x65   :  { %2622 = vmatprep.subr.bf16.mxu1 %v3020_v0 }
  0x67   :  { %1624 = vmatpush1.bf16.msra.mxu0 %v2885_v1  ;;  %v2971_v1 = vld [vmem:[%s3988_s1 + $0x188] sm:$0xff]  }
  0x68   :  { %1625 = vmatprep.subr.bf16.mxu0 %v3020_v0  ;;  %2638 = vmatpush1.bf16.msra.mxu1 %v3153_v22  ;;  %v2884_v22 = vld [vmem:[%s3989_s0 + $0x1c8] ss:$28 sps:$4 sm:$0xff]  }
  0x69   :  { %1324 = vmatmul.mubr.bf16.gmra.mrb[20].mxu1 %v2862_v2  ;;  %2623 = vmatprep.subr.bf16.mxu1 %v3020_v0  ;;  %v2956_v2 = vld [vmem:[%s3989_s0 + $0x350] ss:$28 sps:$4 sm:$0xff]  }
  0x6a   :  { %1501 = vmatmul.mubr.bf16.gmra.mrb[20].mxu0 %v2863_v3  ;;  %1331 = vmatprep.mubr.bf16.mxu1 %v2865_v4  ;;  %v2957_v3 = vld [vmem:[%s3989_s0 + $0x128] ss:$28 sps:$4 sm:$0xff]  }
  0x6b   :  { %1508 = vmatprep.mubr.bf16.mxu0 %v2867_v5  ;;  %1626 = vmatpush1.bf16.msra.mxu0 %v2890_v6  ;;  %v2959_v4 = vld [vmem:[%s3989_s0 + $0x38c] ss:$28 sps:$4 sm:$0xff]   ;;  %v2961_v5 = vld [vmem:[%s3989_s0 + $0x164] ss:$28 sps:$4 sm:$0xff]  }
  0x6c   :  { %1627 = vmatprep.subr.bf16.mxu0 %v3020_v0  ;;  %2639 = vmatpush1.bf16.msra.mxu1 %v3164_v24  ;;  %v2888_v24 = vld [vmem:[%s3989_s0 + $0x204] ss:$28 sps:$4 sm:$0xff]  }
  0x6d   :  { %2624 = vmatprep.subr.bf16.mxu1 %v3020_v0  ;;  %v2963_v6 = vld [vmem:[%s3989_s0 + $0x388] ss:$28 sps:$4 sm:$0xff]  }
  0x6f   :  { %1628 = vmatpush1.bf16.msra.mxu0 %v2893_v8  ;;  %v2965_v8 = vld [vmem:[%s3989_s0 + $0x3c4] ss:$28 sps:$4 sm:$0xff]  }
  0x70   :  { %1629 = vmatprep.subr.bf16.mxu0 %v3020_v0  ;;  %2640 = vmatpush1.bf16.msra.mxu1 %v3175_v26  ;;  %v2892_v26 = vld [vmem:[%s3989_s0 + $0x200] ss:$28 sps:$4 sm:$0xff]  }
  0x71   :  { %1332 = vmatmul.mubr.bf16.gmra.mrb[24].mxu1 %v2869_v7  ;;  %2625 = vmatprep.subr.bf16.mxu1 %v3020_v0  ;;  %v2964_v7 = vld [vmem:[%s3989_s0 + $0x160] ss:$28 sps:$4 sm:$0xff]  }
  0x72   :  { %1509 = vmatmul.mubr.bf16.gmra.mrb[24].mxu0 %v2870_v9  ;;  %1339 = vmatprep.mubr.bf16.mxu1 %v2872_v10  ;;  %v2967_v9 = vld [vmem:[%s3989_s0 + $0x19c] ss:$28 sps:$4 sm:$0xff]  }
  0x73   :  { %1516 = vmatprep.mubr.bf16.mxu0 %v2874_v11  ;;  %1630 = vmatpush1.bf16.msra.mxu0 %v2900_v12  ;;  %v2969_v10 = vld [vmem:[%s3989_s0 + $0x3c0] ss:$28 sps:$4 sm:$0xff]   ;;  %v2970_v11 = vld [vmem:[%s3989_s0 + $0x198] ss:$28 sps:$4 sm:$0xff]  }
  0x74   :  { %1631 = vmatprep.subr.bf16.mxu0 %v3020_v0  ;;  %2641 = vmatpush1.bf16.msra.mxu1 %v3186_v28  ;;  %v2898_v28 = vld [vmem:[%s3989_s0 + $0x230] ss:$28 sps:$4 sm:$0xff]   ;;  %v2974_v12 = vld [vmem:[%s3989_s0 + $0x18] ss:$28 sps:$4 sm:$0xff]  }
  0x75   :  { %2626 = vmatprep.subr.bf16.mxu1 %v3020_v0 }
  0x77   :  { %1632 = vmatpush1.bf16.msra.mxu0 %v2907_v14  ;;  %v2976_v14 = vld [vmem:[%s3989_s0 + $0x50] ss:$28 sps:$4 sm:$0xff]  }
  0x78   :  { %1633 = vmatprep.subr.bf16.mxu0 %v3020_v0  ;;  %2642 = vmatpush1.bf16.msra.mxu1 %v3197_v30  ;;  %v2901_v30 = vld [vmem:[%s3989_s0 + $0x26c] ss:$28 sps:$4 sm:$0xff]  }
  0x79   :  { %1340 = vmatmul.mubr.bf16.gmra.mrb[28].mxu1 %v2876_v13  ;;  %2627 = vmatprep.subr.bf16.mxu1 %v3020_v0  ;;  %v2972_v13 = vld [vmem:[%s3989_s0 + $0x1d4] ss:$28 sps:$4 sm:$0xff]  }
  0x7a   :  { %1517 = vmatmul.mubr.bf16.gmra.mrb[28].mxu0 %v2877_v15  ;;  %1347 = vmatprep.mubr.bf16.mxu1 %v2879_v16  ;;  %v2975_v15 = vld [vmem:[%s3989_s0 + $0x1d0] ss:$28 sps:$4 sm:$0xff]   ;;  %v2979_v16 = vld [vmem:[%s3989_s0 + $0x88] ss:$28 sps:$4 sm:$0xff]  }
  0x7b   :  { %1524 = vmatprep.mubr.bf16.mxu0 %v2881_v17  ;;  %1634 = vmatpush1.bf16.msra.mxu0 %v2914_v18  ;;  %v2977_v17 = vld [vmem:[%s3989_s0 + $0x20c] ss:$28 sps:$4 sm:$0xff]   ;;  %v2981_v18 = vld [vmem:[%s3989_s0 + $0xc0] ss:$28 sps:$4 sm:$0xff]  }
  0x7c   :  { %1635 = vmatprep.subr.bf16.mxu0 %v3020_v0  ;;  %2643 = vmatpush1.bf16.msra.mxu1 %v3208_v32  ;;  %v2905_v32 = vld [vmem:[%s3989_s0 + $0x268] ss:$28 sps:$4 sm:$0xff]  }
  0x7d   :  { %2628 = vmatprep.subr.bf16.mxu1 %v3020_v0  ;;  %v2894_v0 = vld [vmem:[%s3989_s0 + $0x234] ss:$28 sps:$4 sm:$0xff]  }
  0x7f   :  { %1636 = vmatpush1.bf16.msra.mxu0 %v2921_v20  ;;  %v2984_v20 = vld [vmem:[%s3989_s0 + $0xf8] ss:$28 sps:$4 sm:$0xff]  }
  0x80   :  { %2644 = vmatpush1.bf16.msra.mxu1 %v3219_v34  ;;  %v2908_v34 = vld [vmem:[%s3989_s0 + $0x2a4] ss:$28 sps:$4 sm:$0xff]  }
  0x81   :  { %1348 = vmatmul.mubr.bf16.gmra.mrb[32].mxu1 %v2883_v19  ;;  %2573 = vmatprep.subr.bf16.mxu1 %v3417_v21  ;;  %v2980_v19 = vld [vmem:[%s3989_s0 + $0x208] ss:$28 sps:$4 sm:$0xff]  }
  0x82   :  { %1525 = vmatmul.mubr.bf16.gmra.mrb[32].mxu0 %v2884_v22  ;;  %1355 = vmatprep.mubr.bf16.mxu1 %v2886_v23  ;;  %v2986_v22 = vld [vmem:[%s3989_s0 + $0x130] ss:$28 sps:$4 sm:$0xff]   ;;  %v2985_v23 = vld [vmem:[%s3989_s0 + $0x240] ss:$28 sps:$4 sm:$0xff]  }
  0x83   :  { %1532 = vmatprep.mubr.bf16.mxu0 %v2888_v24  ;;  %v2989_v24 = vld [vmem:[%s3989_s0 + $0x168] ss:$28 sps:$4 sm:$0xff]  }
  0x89   :  { %1356 = vmatmul.mubr.bf16.gmra.mrb[36].mxu1 %v2891_v25  ;;  %v2987_v25 = vld [vmem:[%s3989_s0 + $0x27c] ss:$28 sps:$4 sm:$0xff]  }
  0x8a   :  { %1533 = vmatmul.mubr.bf16.gmra.mrb[36].mxu0 %v2892_v26  ;;  %1363 = vmatprep.mubr.bf16.mxu1 %v2894_v0  ;;  %v2991_v26 = vld [vmem:[%s3989_s0 + $0x1a0] ss:$28 sps:$4 sm:$0xff]   ;;  %v2990_v0 = vld [vmem:[%s3989_s0 + $0x278] ss:$28 sps:$4 sm:$0xff]  }
  0x8b   :  { %1540 = vmatprep.mubr.bf16.mxu0 %v2896_v27  ;;  %v2994_v27 = vld [vmem:[%s3989_s0 + $0x1d8] ss:$28 sps:$4 sm:$0xff]  }
  0x91   :  { %1364 = vmatmul.mubr.bf16.gmra.mrb[40].mxu1 %v2898_v28  ;;  %v2992_v28 = vld [vmem:[%s3989_s0 + $0x2b4] ss:$28 sps:$4 sm:$0xff]  }
  0x92   :  { %1541 = vmatmul.mubr.bf16.gmra.mrb[40].mxu0 %v2899_v29  ;;  %1371 = vmatprep.mubr.bf16.mxu1 %v2901_v30  ;;  %v2996_v29 = vld [vmem:[%s3989_s0 + $0x210] ss:$28 sps:$4 sm:$0xff]  }
  0x93   :  { %1548 = vmatprep.mubr.bf16.mxu0 %v2903_v31  ;;  %v2995_v30 = vld [vmem:[%s3989_s0 + $0x2b0] ss:$28 sps:$4 sm:$0xff]   ;;  %v2999_v31 = vld [vmem:[%s3989_s0 + $0x248] ss:$28 sps:$4 sm:$0xff]  }
  0x99   :  { %1372 = vmatmul.mubr.bf16.gmra.mrb[44].mxu1 %v2905_v32  ;;  %v2997_v32 = vld [vmem:[%s3989_s0 + $0x2ec] ss:$28 sps:$4 sm:$0xff]  }
  0x9a   :  { %1549 = vmatmul.mubr.bf16.gmra.mrb[44].mxu0 %v2906_v33  ;;  %1379 = vmatprep.mubr.bf16.mxu1 %v2908_v34  ;;  %v3001_v34 = vld [vmem:[%s3989_s0 + $0x280] ss:$28 sps:$4 sm:$0xff]  }
  0x9b   :  { %1556 = vmatprep.mubr.bf16.mxu0 %v2910_v35 }
  0xa1   :  { %1380 = vmatmul.mubr.bf16.gmra.mrb[48].mxu1 %v2912_v36  ;;  %v3000_v36 = vld [vmem:[%s3989_s0 + $0x2e8] ss:$28 sps:$4 sm:$0xff]  }
  0xa2   :  { %1557 = vmatmul.mubr.bf16.gmra.mrb[48].mxu0 %v2913_v37  ;;  %1387 = vmatprep.mubr.bf16.mxu1 %v2915_v38  ;;  %v3004_v38 = vld [vmem:[%s3989_s0 + $0x2b8] ss:$28 sps:$4 sm:$0xff]  }
  0xa3   :  { %1564 = vmatprep.mubr.bf16.mxu0 %v2917_v39 }
  0xa9   :  { %1388 = vmatmul.mubr.bf16.gmra.mrb[52].mxu1 %v2919_v40  ;;  %v3002_v40 = vld [vmem:[%s3989_s0 + $0x324] ss:$28 sps:$4 sm:$0xff]  }
  0xaa   :  { %1565 = vmatmul.mubr.bf16.gmra.mrb[52].mxu0 %v2920_v41  ;;  %1395 = vmatprep.mubr.bf16.mxu1 %v2922_v42  ;;  %v3006_v42 = vld [vmem:[%s3989_s0 + $0x2f0] ss:$28 sps:$4 sm:$0xff]  }
  0xab   :  { %1637 = vmatprep.mubr.bf16.mxu0 %v2926_v43 }
  0xb1   :  { %1396 = vmatmul.mubr.bf16.gmra.mrb[56].mxu1 %v2927_v44  ;;  %v3005_v44 = vld [vmem:[%s3989_s0 + $0x320] ss:$28 sps:$4 sm:$0xff]  }
  0xb2   :  { %1638 = vmatmul.mubr.bf16.vlgmr.msra.gmra.mrb[0].mxu0 %v2924_v45  ;;  %1403 = vmatprep.mubr.bf16.mxu1 %v2928_v46  ;;  %v3009_v46 = vld [vmem:[%s3989_s0 + $0x328] ss:$28 sps:$4 sm:$0xff]  }
  0xb3   :  { %1645 = vmatprep.mubr.bf16.mxu0 %v2930_v47 }
  0xb9   :  { %1404 = vmatmul.mubr.bf16.gmra.mrb[60].mxu1 %v2932_v48  ;;  %v3007_v48 = vld [vmem:[%s3989_s0 + $0x35c] ss:$28 sps:$4 sm:$0xff]  }
  0xba   :  { %1646 = vmatmul.mubr.bf16.gmra.mrb[4].mxu0 %v2933_v49  ;;  %1411 = vmatprep.mubr.bf16.mxu1 %v2934_v50  ;;  %v3011_v50 = vld [vmem:[%s3989_s0 + $0x360] ss:$28 sps:$4 sm:$0xff]  }
  0xbb   :  { %1653 = vmatprep.mubr.bf16.mxu0 %v2936_v51 }
  0xc1   :  { %1412 = vmatmul.mubr.bf16.gmra.mrb[64].mxu1 %v2938_v52  ;;  %v3010_v52 = vld [vmem:[%s3989_s0 + $0x358] ss:$28 sps:$4 sm:$0xff]  }
  0xc2   :  { %1654 = vmatmul.mubr.bf16.gmra.mrb[8].mxu0 %v2939_v53  ;;  %1419 = vmatprep.mubr.bf16.mxu1 %v2940_v54  ;;  %v3015_v54 = vld [vmem:[%s3989_s0 + $0x398] ss:$28 sps:$4 sm:$0xff]  }
  0xc3   :  { %1661 = vmatprep.mubr.bf16.mxu0 %v2942_v55 }
  0xc9   :  { %1420 = vmatmul.mubr.bf16.gmra.mrb[68].mxu1 %v2944_v56  ;;  %v3012_v56 = vld [vmem:[%s3989_s0 + $0x394] ss:$28 sps:$4 sm:$0xff]  }
  0xca   :  { %1662 = vmatmul.mubr.bf16.gmra.mrb[12].mxu0 %v2945_v57  ;;  %1572 = vmatprep.mubr.bf16.mxu1 %v2948_v58  ;;  %v3016_v58 = vld [vmem:[%s3989_s0 + $0x3d0] ss:$28 sps:$4 sm:$0xff]  }
  0xcb   :  { %1669 = vmatprep.mubr.bf16.mxu0 %v2949_v59 }
  0xd1   :  { %1573 = vmatmul.mubr.bf16.vlgmr.msra.gmra.mrb[56].mxu1 %v2946_v60  ;;  %v3014_v60 = vld [vmem:[%s3989_s0 + $0x390] ss:$28 sps:$4 sm:$0xff]  }
  0xd2   :  { %1670 = vmatmul.mubr.bf16.gmra.mrb[16].mxu0 %v2951_v61  ;;  %1580 = vmatprep.mubr.bf16.mxu1 %v2952_v62 }
  0xd3   :  { %1677 = vmatprep.mubr.bf16.mxu0 %v2954_v63  ;;  %2574 = vmatpush3.bf16.msra.mxu1 %v3417_v21  ;;  %v2982_v21 = vld [vmem:[%s3989_s0 + $0x244] ss:$28 sps:$4 sm:$0xff]   ;;  %v3017_v63 = vld [vmem:[%s3989_s0 + $0x3cc] ss:$28 sps:$4 sm:$0xff]  }
  0xd4   :  { %2575 = vmatprep.subr.bf16.mxu1 %v2971_v1 }
  0xd7   :  { %2576 = vmatpush3.bf16.msra.mxu1 %v2971_v1 }
  0xd9   :  { %1581 = vmatmul.mubr.bf16.gmra.mrb[60].mxu1 %v2956_v2 }
  0xda   :  { %1678 = vmatmul.mubr.bf16.gmra.mrb[20].mxu0 %v2957_v3  ;;  %1588 = vmatprep.mubr.bf16.mxu1 %v2959_v4  ;;  %v3019_v3 = vld [vmem:[%s3989_s0 + $0x3c8] ss:$28 sps:$4 sm:$0xff]  }
  0xdb   :  { %1685 = vmatprep.mubr.bf16.mxu0 %v2961_v5 }
  0xe1   :  { %1589 = vmatmul.mubr.bf16.gmra.mrb[64].mxu1 %v2963_v6 }
  0xe2   :  { %1686 = vmatmul.mubr.bf16.gmra.mrb[24].mxu0 %v2964_v7  ;;  %1596 = vmatprep.mubr.bf16.mxu1 %v2965_v8 }
  0xe3   :  { %1693 = vmatprep.mubr.bf16.mxu0 %v2967_v9 }
  0xe9   :  { %1597 = vmatmul.mubr.bf16.gmra.mrb[68].mxu1 %v2969_v10 }
  0xea   :  { %1694 = vmatmul.mubr.bf16.gmra.mrb[28].mxu0 %v2970_v11  ;;  %2577 = vmatprep.mubr.msk.bf16.mxu1 %vm1196_vm0, %v2974_v12 }
  0xeb   :  { %1701 = vmatprep.mubr.bf16.mxu0 %v2972_v13 }
  0xf1   :  { %2578 = vmatmul.mubr.msk.bf16.vlgmr.msra.gmra.mrb[72].mxu1 %vm1196_vm0, %v2976_v14 }
  0xf2   :  { %1702 = vmatmul.mubr.bf16.gmra.mrb[32].mxu0 %v2975_v15  ;;  %2581 = vmatprep.mubr.msk.bf16.mxu1 %vm1196_vm0, %v2979_v16 }
  0xf3   :  { %1709 = vmatprep.mubr.bf16.mxu0 %v2977_v17 }
  0xf9   :  { %2582 = vmatmul.mubr.msk.bf16.gmra.mrb[76].mxu1 %vm1196_vm0, %v2981_v18 }
  0xfa   :  { %1710 = vmatmul.mubr.bf16.gmra.mrb[36].mxu0 %v2980_v19  ;;  %2585 = vmatprep.mubr.msk.bf16.mxu1 %vm1196_vm0, %v2984_v20 }
  0xfb   :  { %1717 = vmatprep.mubr.bf16.mxu0 %v2982_v21 }
 0x101   :  { %2586 = vmatmul.mubr.msk.bf16.gmra.mrb[80].mxu1 %vm1196_vm0, %v2986_v22 }
 0x102   :  { %1718 = vmatmul.mubr.bf16.gmra.mrb[40].mxu0 %v2985_v23  ;;  %2589 = vmatprep.mubr.msk.bf16.mxu1 %vm1196_vm0, %v2989_v24 }
 0x103   :  { %1725 = vmatprep.mubr.bf16.mxu0 %v2987_v25 }
 0x109   :  { %2590 = vmatmul.mubr.msk.bf16.gmra.mrb[84].mxu1 %vm1196_vm0, %v2991_v26 }
 0x10a   :  { %1726 = vmatmul.mubr.bf16.gmra.mrb[44].mxu0 %v2990_v0  ;;  %2593 = vmatprep.mubr.msk.bf16.mxu1 %vm1196_vm0, %v2994_v27 }
 0x10b   :  { %1733 = vmatprep.mubr.bf16.mxu0 %v2992_v28 }
 0x111   :  { %2594 = vmatmul.mubr.msk.bf16.gmra.mrb[88].mxu1 %vm1196_vm0, %v2996_v29 }
 0x112   :  { %1734 = vmatmul.mubr.bf16.gmra.mrb[48].mxu0 %v2995_v30  ;;  %2597 = vmatprep.mubr.msk.bf16.mxu1 %vm1196_vm0, %v2999_v31 }
 0x113   :  { %1741 = vmatprep.mubr.bf16.mxu0 %v2997_v32 }
 0x114   :  { %v3664_v33 = vpop.f32.mrb[0].mxu1 }
 0x115   :  { %v1287_v35 = vpop.f32.mrb[1].mxu1 }
 0x116   :  { %v3672_v37 = vpop.f32.mrb[2].mxu1 }
 0x117   :  { %v1290_v39 = vpop.f32.mrb[3].mxu1 }
 0x119   :  { %2598 = vmatmul.mubr.msk.bf16.gmra.mrb[92].mxu1 %vm1196_vm0, %v3001_v34 }
 0x11a   :  { %1742 = vmatmul.mubr.bf16.gmra.mrb[52].mxu0 %v3000_v36  ;;  %2601 = vmatprep.mubr.msk.bf16.mxu1 %vm1196_vm0, %v3004_v38 }
 0x11b   :  { %1749 = vmatprep.mubr.bf16.mxu0 %v3002_v40 }
 0x11c   :  { %v3682_v41 = vpop.f32.mrb[4].mxu1 }
 0x11d   :  { %v1295_v43 = vpop.f32.mrb[5].mxu1 }
 0x11e   :  { %v3690_v45 = vpop.f32.mrb[6].mxu1 }
 0x11f   :  { %v1298_v47 = vpop.f32.mrb[7].mxu1 }
 0x121   :  { %2602 = vmatmul.mubr.msk.bf16.gmra.mrb[96].mxu1 %vm1196_vm0, %v3006_v42 }
 0x122   :  { %1750 = vmatmul.mubr.bf16.gmra.mrb[56].mxu0 %v3005_v44  ;;  %2605 = vmatprep.mubr.msk.bf16.mxu1 %vm1196_vm0, %v3009_v46  ;;  %v3778_v44 = vld [vmem:[%s3990_s2] ss:$0 sm:$0xff] }
 0x123   :  { %1757 = vmatprep.mubr.bf16.mxu0 %v3007_v48  ;;  %v1286_v46 = vadd.f32 %v3778_v44, %v3664_v33  ;;  %v1289_v48 = vadd.f32 %v3778_v44, %v3672_v37 }
 0x124   :  { %v3700_v49 = vpop.f32.mrb[8].mxu1 }
 0x125   :  { %v1303_v51 = vpop.f32.mrb[9].mxu1 }
 0x126   :  { %v3708_v53 = vpop.f32.mrb[10].mxu1 }
 0x127   :  { %v1306_v55 = vpop.f32.mrb[11].mxu1 }
 0x129   :  { %2606 = vmatmul.mubr.msk.bf16.gmra.mrb[100].mxu1 %vm1196_vm0, %v3011_v50 }
 0x12a   :  { %1758 = vmatmul.mubr.bf16.gmra.mrb[60].mxu0 %v3010_v52  ;;  %2609 = vmatprep.mubr.msk.bf16.mxu1 %vm1196_vm0, %v3015_v54 }
 0x12b   :  { %1765 = vmatprep.mubr.bf16.mxu0 %v3012_v56  ;;  %v1294_v56 = vadd.f32 %v3778_v44, %v3682_v41 }
 0x12c   :  { %v3718_v57 = vpop.f32.mrb[12].mxu1 }
 0x12d   :  { %v1311_v59 = vpop.f32.mrb[13].mxu1 }
 0x12e   :  { %v3726_v61 = vpop.f32.mrb[14].mxu1  ;;  %v1297_v59 = vadd.f32 %v3778_v44, %v3690_v45 }
 0x12f   :  { %v1314_v62 = vpop.f32.mrb[15].mxu1 }
 0x131   :  { %2610 = vmatmul.mubr.msk.bf16.gmra.mrb[104].mxu1 %vm1196_vm0, %v3016_v58 }
 0x132   :  { %1766 = vmatmul.mubr.bf16.gmra.mrb[64].mxu0 %v3014_v60 }
 0x133   :  { %1773 = vmatprep.mubr.bf16.mxu0 %v3017_v63 }
 0x134   :  { %v3732_v1 = vpop.f32.mrb[16].mxu1 }
 0x135   :  { %v1319_v2 = vpop.f32.mrb[17].mxu1 }
 0x136   :  { %v3737_v4 = vpop.f32.mrb[18].mxu1  ;;  %v1302_v2 = vadd.f32 %v3778_v44, %v3700_v49 }
 0x137   :  { %v1322_v5 = vpop.f32.mrb[19].mxu1 }
 0x138   :  { %v1305_v5 = vadd.f32 %v3778_v44, %v3708_v53 }
 0x13a   :  { %1774 = vmatmul.mubr.bf16.gmra.mrb[68].mxu0 %v3019_v3 }
 0x13c   :  { %v3739_v6 = vpop.f32.mrb[20].mxu1 }
 0x13d   :  { %v1327_v7 = vpop.f32.mrb[21].mxu1 }
 0x13e   :  { %v3741_v8 = vpop.f32.mrb[22].mxu1 }
 0x13f   :  { %v1330_v9 = vpop.f32.mrb[23].mxu1 }
 0x144   :  { %v3743_v10 = vpop.f32.mrb[24].mxu1 }
 0x145   :  { %v1335_v11 = vpop.f32.mrb[25].mxu1 }
 0x146   :  { %v3745_v12 = vpop.f32.mrb[26].mxu1 }
 0x147   :  { %v1338_v13 = vpop.f32.mrb[27].mxu1 }
 0x148   :  { %v1310_v13 = vadd.f32 %v3778_v44, %v3718_v57  ;;  %v1321_v57 = vadd.f32 %v3778_v44, %v3737_v4  ;;  %v1329_v4 = vadd.f32 %v3778_v44, %v3741_v8  ;;  %v1337_v8 = vadd.f32 %v3778_v44, %v3745_v12 }
 0x14c   :  { %v3747_v14 = vpop.f32.mrb[28].mxu1 }
 0x14d   :  { %v1343_v15 = vpop.f32.mrb[29].mxu1 }
 0x14e   :  { %v3749_v16 = vpop.f32.mrb[30].mxu1 }
 0x14f   :  { %v1346_v17 = vpop.f32.mrb[31].mxu1  ;;  %v1345_v12 = vadd.f32 %v3778_v44, %v3749_v16 }
 0x150   :  { %v1313_v17 = vadd.f32 %v3778_v44, %v3726_v61 }
 0x154   :  { %v3751_v18 = vpop.f32.mrb[32].mxu1 }
 0x155   :  { %v1351_v19 = vpop.f32.mrb[33].mxu1 }
 0x156   :  { %v3753_v20 = vpop.f32.mrb[34].mxu1 }
 0x157   :  { %v1354_v21 = vpop.f32.mrb[35].mxu1  ;;  %v1353_v16 = vadd.f32 %v3778_v44, %v3753_v20 }
 0x15c   :  { %v3755_v22 = vpop.f32.mrb[36].mxu1 }
 0x15d   :  { %v1359_v23 = vpop.f32.mrb[37].mxu1 }
 0x15e   :  { %v3757_v24 = vpop.f32.mrb[38].mxu1 }
 0x15f   :  { %v1362_v25 = vpop.f32.mrb[39].mxu1 }
 0x160   :  { %v1318_v25 = vadd.f32 %v3778_v44, %v3732_v1  ;;  %v1326_v1 = vadd.f32 %v3778_v44, %v3739_v6  ;;  %v1334_v6 = vadd.f32 %v3778_v44, %v3743_v10  ;;  %v1342_v10 = vadd.f32 %v3778_v44, %v3747_v14 }
 0x161   :  { %v1350_v14 = vadd.f32 %v3778_v44, %v3751_v18 }
 0x164   :  { %v3759_v26 = vpop.f32.mrb[40].mxu1 }
 0x165   :  { %v1367_v0 = vpop.f32.mrb[41].mxu1 }
 0x166   :  { %v3761_v27 = vpop.f32.mrb[42].mxu1 }
 0x167   :  { %v1370_v28 = vpop.f32.mrb[43].mxu1 }
 0x16c   :  { %v3763_v29 = vpop.f32.mrb[44].mxu1 }
 0x16d   :  { %v1375_v30 = vpop.f32.mrb[45].mxu1 }
 0x16e   :  { %v3765_v31 = vpop.f32.mrb[46].mxu1 }
 0x16f   :  { %v1378_v32 = vpop.f32.mrb[47].mxu1 }
 0x174   :  { %v3767_v34 = vpop.f32.mrb[48].mxu1 }
 0x175   :  { %v1383_v35 = vpop.f32.mrb[49].mxu1 }
 0x176   :  { %v3769_v36 = vpop.f32.mrb[50].mxu1 }
 0x177   :  { %v1386_v38 = vpop.f32.mrb[51].mxu1 }
 0x17c   :  { %v3771_v39 = vpop.f32.mrb[52].mxu1 }
 0x17d   :  { %v1391_v40 = vpop.f32.mrb[53].mxu1 }
 0x17e   :  { %v3773_v42 = vpop.f32.mrb[54].mxu1 }
 0x17f   :  { %v1394_v43 = vpop.f32.mrb[55].mxu1 }
 0x185   :  { %v1639_v47 = vpop.f32.mrb[0].mxu0 }
 0x186   :  { %v3784_v50 = vadd.f32 %v1639_v47, %v1286_v46  ;;  %v1641_v51 = vpop.f32.mrb[1].mxu0 }
 0x187   :  { %v1642_v52 = vpop.f32.mrb[2].mxu0 }
 0x188   :  { %v3786_v54 = vadd.f32 %v1642_v52, %v1289_v48  ;;  %v1644_v55 = vpop.f32.mrb[3].mxu0 }
 0x18d   :  { %v1647_v58 = vpop.f32.mrb[4].mxu0 }
 0x18e   :  { %v3792_v60 = vadd.f32 %v1647_v58, %v1294_v56  ;;  %v1649_v33 = vpop.f32.mrb[5].mxu0 }
 0x18f   :  { %v1650_v62 = vpop.f32.mrb[6].mxu0 }
 0x190   :  { %v3794_v63 = vadd.f32 %v1650_v62, %v1297_v59  ;;  %v1652_v37 = vpop.f32.mrb[7].mxu0 }
 0x195   :  { %v1655_v3 = vpop.f32.mrb[8].mxu0 }
 0x196   :  { %v3800_v7 = vadd.f32 %v1655_v3, %v1302_v2  ;;  %v1657_v41 = vpop.f32.mrb[9].mxu0 }
 0x197   :  { %v1658_v9 = vpop.f32.mrb[10].mxu0 }
 0x198   :  { %v3802_v11 = vadd.f32 %v1658_v9, %v1305_v5  ;;  %v1660_v45 = vpop.f32.mrb[11].mxu0 }
 0x19d   :  { %v1663_v15 = vpop.f32.mrb[12].mxu0 }
 0x19e   :  { %v3808_v19 = vadd.f32 %v1663_v15, %v1310_v13  ;;  %v1665_v49 = vpop.f32.mrb[13].mxu0 }
 0x19f   :  { %v1666_v21 = vpop.f32.mrb[14].mxu0 }
 0x1a0   :  { %v3810_v23 = vadd.f32 %v1666_v21, %v1313_v17  ;;  %v1668_v53 = vpop.f32.mrb[15].mxu0 }
 0x1a4   :  { %v3814_v0 = vpop.f32.mrb[56].mxu1 }
 0x1a5   :  { %v1671_v28 = vpop.f32.mrb[16].mxu0  ;;  %v1576_v30 = vpop.f32.mrb[57].mxu1 }
 0x1a6   :  { %v3818_v32 = vadd.f32 %v1671_v28, %v1318_v25  ;;  %v1673_v61 = vpop.f32.mrb[17].mxu0  ;;  %v3820_v35 = vpop.f32.mrb[58].mxu1 }
 0x1a7   :  { %v1674_v38 = vpop.f32.mrb[18].mxu0  ;;  %v1579_v40 = vpop.f32.mrb[59].mxu1 }
 0x1a8   :  { %v3822_v43 = vadd.f32 %v1674_v38, %v1321_v57  ;;  %v1676_v46 = vpop.f32.mrb[19].mxu0 }
 0x1ac   :  { %v3826_v47 = vpop.f32.mrb[60].mxu1 }
 0x1ad   :  { %v1679_v48 = vpop.f32.mrb[20].mxu0  ;;  %v1584_v51 = vpop.f32.mrb[61].mxu1 }
 0x1ae   :  { %v3830_v52 = vadd.f32 %v1679_v48, %v1326_v1  ;;  %v1681_v55 = vpop.f32.mrb[21].mxu0  ;;  %v3832_v56 = vpop.f32.mrb[62].mxu1 }
 0x1af   :  { %v1682_v58 = vpop.f32.mrb[22].mxu0  ;;  %v1587_v59 = vpop.f32.mrb[63].mxu1 }
 0x1b0   :  { %v3834_v33 = vadd.f32 %v1682_v58, %v1329_v4  ;;  %v1684_v62 = vpop.f32.mrb[23].mxu0 }
 0x1b4   :  { %v3838_v37 = vpop.f32.mrb[64].mxu1 }
 0x1b5   :  { %v1687_v2 = vpop.f32.mrb[24].mxu0  ;;  %v1592_v3 = vpop.f32.mrb[65].mxu1 }
 0x1b6   :  { %v3842_v5 = vadd.f32 %v1687_v2, %v1334_v6  ;;  %v1689_v41 = vpop.f32.mrb[25].mxu0  ;;  %v3844_v9 = vpop.f32.mrb[66].mxu1 }
 0x1b7   :  { %v1690_v45 = vpop.f32.mrb[26].mxu0  ;;  %v1595_v13 = vpop.f32.mrb[67].mxu1 }
 0x1b8   :  { %v3846_v15 = vadd.f32 %v1690_v45, %v1337_v8  ;;  %v1692_v17 = vpop.f32.mrb[27].mxu0 }
 0x1b9   :  { %v1358_v17 = vadd.f32 %v3778_v44, %v3755_v22 }
 0x1bc   :  { %v3850_v49 = vpop.f32.mrb[68].mxu1 }
 0x1bd   :  { %v1695_v21 = vpop.f32.mrb[28].mxu0  ;;  %v1600_v53 = vpop.f32.mrb[69].mxu1 }
 0x1be   :  { %v3854_v25 = vadd.f32 %v1695_v21, %v1342_v10  ;;  %v1697_v28 = vpop.f32.mrb[29].mxu0  ;;  %v3856_v30 = vpop.f32.mrb[70].mxu1 }
 0x1bf   :  { %v1698_v57 = vpop.f32.mrb[30].mxu0  ;;  %v1603_v61 = vpop.f32.mrb[71].mxu1 }
 0x1c0   :  { %v3858_v38 = vadd.f32 %v1698_v57, %v1345_v12  ;;  %v1700_v40 = vpop.f32.mrb[31].mxu0 }
 0x1c4   :  { %v2579_v46 = vpop.f32.mrb[72].mxu1 }
 0x1c5   :  { %v1703_v1 = vpop.f32.mrb[32].mxu0  ;;  %v1825_v48 = vadd.f32 %v3792_v60, %v2579_v46  ;;  %v1816_v51 = vpop.f32.mrb[73].mxu1 }
 0x1c6   :  { %v3865_v4 = vadd.f32 %v1703_v1, %v1350_v14  ;;  %v1705_v55 = vpop.f32.mrb[33].mxu0  ;;  %v1817_v58 = vadd.f32 %v3784_v50, %v1816_v51  ;;  %v2580_v59 = vpop.f32.mrb[74].mxu1 }
 0x1c7   :  { %v1706_v62 = vpop.f32.mrb[34].mxu0  ;;  %v1828_v6 = vadd.f32 %v3794_v63, %v2580_v59  ;;  %v1819_v2 = vpop.f32.mrb[75].mxu1  ;;  %v1961_v60 = vmax.f32 %v1825_v48, 0.0 }
 0x1c8   :  { %v3869_v3 = vadd.f32 %v1706_v62, %v1353_v16  ;;  %v1708_v18 = vpop.f32.mrb[35].mxu0  ;;  %v1820_v8 = vadd.f32 %v3786_v54, %v1819_v2  ;;  %v1959_v45 = vmax.f32 %v1817_v58, 0.0  ;;  %v1361_v54 = vadd.f32 %v3778_v44, %v3757_v24 }
 0x1c9   :  { %v1962_v41 = vmax.f32 %v1828_v6, 0.0  ;;  %v1366_v58 = vadd.f32 %v3778_v44, %v3759_v26 }
 0x1ca   :  { %v1960_v13 = vmax.f32 %v1820_v8, 0.0 }
 0x1cb   :  { %v2454_v20 = vpack.c.bf16 %v1962_v41, %v1961_v60 }
 0x1cc   :  { %v2449_v10 = vpack.c.bf16 %v1960_v13, %v1959_v45  ;;  %v2583_v50 = vpop.f32.mrb[76].mxu1 }
 0x1cd   :  { %2536 = vst [vmem:[%s3991_s3 + $0x8] sm:$0xff] %v2454_v20   ;;  %v1711_v63 = vpop.f32.mrb[36].mxu0  ;;  %v1841_v21 = vadd.f32 %v3808_v19, %v2583_v50  ;;  %v1832_v53 = vpop.f32.mrb[77].mxu1 }
 0x1ce   :  { %2450 = vst [vmem:[%s3991_s3] sm:$0xff] %v2449_v10   ;;  %v3883_v12 = vadd.f32 %v1711_v63, %v1358_v17  ;;  %v1713_v22 = vpop.f32.mrb[37].mxu0  ;;  %v1833_v28 = vadd.f32 %v3800_v7, %v1832_v53  ;;  %v2584_v57 = vpop.f32.mrb[78].mxu1 }
 0x1cf   :  { %v1714_v61 = vpop.f32.mrb[38].mxu0  ;;  %v1844_v40 = vadd.f32 %v3810_v23, %v2584_v57  ;;  %v1835_v14 = vpop.f32.mrb[79].mxu1  ;;  %v1965_v24 = vmax.f32 %v1841_v21, 0.0  ;;  %v1374_v21 = vadd.f32 %v3778_v44, %v3763_v29 }
 0x1d0   :  { %v3887_v46 = vadd.f32 %v1714_v61, %v1361_v54  ;;  %v1716_v19 = vpop.f32.mrb[39].mxu0  ;;  %v1836_v1 = vadd.f32 %v3802_v11, %v1835_v14  ;;  %v1963_v51 = vmax.f32 %v1833_v28, 0.0  ;;  %v1369_v11 = vadd.f32 %v3778_v44, %v3761_v27 }
 0x1d1   :  { %v1966_v48 = vmax.f32 %v1844_v40, 0.0 }
 0x1d2   :  { %v1964_v16 = vmax.f32 %v1836_v1, 0.0 }
 0x1d3   :  { %v2464_v55 = vpack.c.bf16 %v1966_v48, %v1965_v24 }
 0x1d4   :  { %v2459_v59 = vpack.c.bf16 %v1964_v16, %v1963_v51  ;;  %v2587_v7 = vpop.f32.mrb[80].mxu1 }
 0x1d5   :  { %2538 = vst [vmem:[%s3991_s3 + $0x18] sm:$0xff] %v2464_v55   ;;  %v1719_v23 = vpop.f32.mrb[40].mxu0  ;;  %v1857_v62 = vadd.f32 %v3830_v52, %v2587_v7  ;;  %v1848_v6 = vpop.f32.mrb[81].mxu1 }
 0x1d6   :  { %2537 = vst [vmem:[%s3991_s3 + $0x10] sm:$0xff] %v2459_v59   ;;  %v3901_v2 = vadd.f32 %v1719_v23, %v1366_v58  ;;  %v1721_v26 = vpop.f32.mrb[41].mxu0  ;;  %v1849_v18 = vadd.f32 %v3818_v32, %v1848_v6  ;;  %v2588_v8 = vpop.f32.mrb[82].mxu1  ;;  %v1382_v58 = vadd.f32 %v3778_v44, %v3767_v34 }
 0x1d7   :  { %v1722_v60 = vpop.f32.mrb[42].mxu0  ;;  %v1860_v41 = vadd.f32 %v3834_v33, %v2588_v8  ;;  %v1851_v45 = vpop.f32.mrb[83].mxu1  ;;  %v1969_v27 = vmax.f32 %v1857_v62, 0.0 }
 0x1d8   :  { %v3905_v13 = vadd.f32 %v1722_v60, %v1369_v11  ;;  %v1724_v52 = vpop.f32.mrb[43].mxu0  ;;  %v1852_v20 = vadd.f32 %v3822_v43, %v1851_v45  ;;  %v1967_v10 = vmax.f32 %v1849_v18, 0.0  ;;  %v1377_v43 = vadd.f32 %v3778_v44, %v3765_v31 }
 0x1d9   :  { %v1970_v17 = vmax.f32 %v1860_v41, 0.0 }
 0x1da   :  { %v1968_v50 = vmax.f32 %v1852_v20, 0.0 }
 0x1db   :  { %v2474_v63 = vpack.c.bf16 %v1970_v17, %v1969_v27  ;;  %v1390_v17 = vadd.f32 %v3778_v44, %v3771_v39 }
 0x1dc   :  { %v2469_v53 = vpack.c.bf16 %v1968_v50, %v1967_v10  ;;  %v2591_v32 = vpop.f32.mrb[84].mxu1 }
 0x1dd   :  { %2540 = vst [vmem:[%s3991_s3 + $0x28] sm:$0xff] %v2474_v63   ;;  %v1727_v33 = vpop.f32.mrb[44].mxu0  ;;  %v1873_v54 = vadd.f32 %v3854_v25, %v2591_v32  ;;  %v1864_v22 = vpop.f32.mrb[85].mxu1 }
 0x1de   :  { %2539 = vst [vmem:[%s3991_s3 + $0x20] sm:$0xff] %v2469_v53   ;;  %v2690_v28 = vadd.f32 %v1727_v33, %v1374_v21  ;;  %v1729_v57 = vpop.f32.mrb[45].mxu0  ;;  %v1865_v29 = vadd.f32 %v3842_v5, %v1864_v22  ;;  %v2592_v61 = vpop.f32.mrb[86].mxu1 }
 0x1df   :  { %v1730_v40 = vpop.f32.mrb[46].mxu0  ;;  %v1876_v14 = vadd.f32 %v3858_v38, %v2592_v61  ;;  %v1867_v19 = vpop.f32.mrb[87].mxu1  ;;  %v1973_v48 = vmax.f32 %v1873_v54, 0.0 }
 0x1e0   :  { %v2692_v1 = vadd.f32 %v1730_v40, %v1377_v43  ;;  %v1732_v24 = vpop.f32.mrb[47].mxu0  ;;  %v1868_v25 = vadd.f32 %v3846_v15, %v1867_v19  ;;  %v1971_v31 = vmax.f32 %v1865_v29, 0.0  ;;  %v1385_v15 = vadd.f32 %v3778_v44, %v3769_v36 }
 0x1e1   :  { %v1974_v51 = vmax.f32 %v1876_v14, 0.0  ;;  %v2701_v19 = vadd.f32 %v3778_v44, %v3814_v0 }
 0x1e2   :  { %v1972_v16 = vmax.f32 %v1868_v25, 0.0 }
 0x1e3   :  { %v2484_v55 = vpack.c.bf16 %v1974_v51, %v1973_v48 }
 0x1e4   :  { %v2479_v59 = vpack.c.bf16 %v1972_v16, %v1971_v31  ;;  %v2595_v7 = vpop.f32.mrb[88].mxu1 }
 0x1e5   :  { %2542 = vst [vmem:[%s3991_s3 + $0x38] sm:$0xff] %v2484_v55   ;;  %v1735_v5 = vpop.f32.mrb[48].mxu0  ;;  %v1889_v38 = vadd.f32 %v3883_v12, %v2595_v7  ;;  %v1880_v23 = vpop.f32.mrb[89].mxu1 }
 0x1e6   :  { %2541 = vst [vmem:[%s3991_s3 + $0x30] sm:$0xff] %v2479_v59   ;;  %v2694_v62 = vadd.f32 %v1735_v5, %v1382_v58  ;;  %v1737_v6 = vpop.f32.mrb[49].mxu0  ;;  %v1881_v34 = vadd.f32 %v3865_v4, %v1880_v23  ;;  %v2596_v11 = vpop.f32.mrb[90].mxu1 }
 0x1e7   :  { %v1738_v26 = vpop.f32.mrb[50].mxu0  ;;  %v1892_v18 = vadd.f32 %v3887_v46, %v2596_v11  ;;  %v1883_v8 = vpop.f32.mrb[91].mxu1  ;;  %v1977_v45 = vmax.f32 %v1889_v38, 0.0 }
 0x1e8   :  { %v2696_v60 = vadd.f32 %v1738_v26, %v1385_v15  ;;  %v1740_v41 = vpop.f32.mrb[51].mxu0  ;;  %v1884_v12 = vadd.f32 %v3869_v3, %v1883_v8  ;;  %v1975_v36 = vmax.f32 %v1881_v34, 0.0  ;;  %v1393_v3 = vadd.f32 %v3778_v44, %v3773_v42 }
 0x1e9   :  { %v1978_v52 = vmax.f32 %v1892_v18, 0.0  ;;  %v2707_v41 = vadd.f32 %v3778_v44, %v3832_v56  ;;  %v2709_v56 = vadd.f32 %v3778_v44, %v3838_v37 }
 0x1ea   :  { %v1976_v20 = vmax.f32 %v1884_v12, 0.0 }
 0x1eb   :  { %v2494_v27 = vpack.c.bf16 %v1978_v52, %v1977_v45 }
 0x1ec   :  { %v2489_v10 = vpack.c.bf16 %v1976_v20, %v1975_v36  ;;  %v2599_v50 = vpop.f32.mrb[92].mxu1 }
 0x1ed   :  { %2544 = vst [vmem:[%s3991_s3 + $0x48] sm:$0xff] %v2494_v27   ;;  %v1743_v4 = vpop.f32.mrb[52].mxu0  ;;  %v1905_v46 = vadd.f32 %v2690_v28, %v2599_v50  ;;  %v1896_v63 = vpop.f32.mrb[93].mxu1 }
 0x1ee   :  { %2543 = vst [vmem:[%s3991_s3 + $0x40] sm:$0xff] %v2489_v10   ;;  %v2698_v21 = vadd.f32 %v1743_v4, %v1390_v17  ;;  %v1745_v53 = vpop.f32.mrb[53].mxu0  ;;  %v1897_v39 = vadd.f32 %v3901_v2, %v1896_v63  ;;  %v2600_v32 = vpop.f32.mrb[94].mxu1 }
 0x1ef   :  { %v1746_v33 = vpop.f32.mrb[54].mxu0  ;;  %v1908_v54 = vadd.f32 %v2692_v1, %v2600_v32  ;;  %v1899_v22 = vpop.f32.mrb[95].mxu1  ;;  %v1981_v29 = vmax.f32 %v1905_v46, 0.0 }
 0x1f0   :  { %v2700_v43 = vadd.f32 %v1746_v33, %v1393_v3  ;;  %v1748_v57 = vpop.f32.mrb[55].mxu0  ;;  %v1900_v28 = vadd.f32 %v3905_v13, %v1899_v22  ;;  %v1979_v40 = vmax.f32 %v1897_v39, 0.0  ;;  %v2703_v13 = vadd.f32 %v3778_v44, %v3820_v35 }
 0x1f1   :  { %v1982_v61 = vmax.f32 %v1908_v54, 0.0  ;;  %v2705_v35 = vadd.f32 %v3778_v44, %v3826_v47  ;;  %v2711_v33 = vadd.f32 %v3778_v44, %v3844_v9  ;;  %v2713_v9 = vadd.f32 %v3778_v44, %v3850_v49 }
 0x1f2   :  { %v1980_v42 = vmax.f32 %v1900_v28, 0.0 }
 0x1f3   :  { %v2504_v14 = vpack.c.bf16 %v1982_v61, %v1981_v29 }
 0x1f4   :  { %v2499_v24 = vpack.c.bf16 %v1980_v42, %v1979_v40  ;;  %v2603_v25 = vpop.f32.mrb[96].mxu1 }
 0x1f5   :  { %2546 = vst [vmem:[%s3991_s3 + $0x58] sm:$0xff] %v2504_v14   ;;  %v1751_v2 = vpop.f32.mrb[56].mxu0  ;;  %v1921_v1 = vadd.f32 %v2698_v21, %v2603_v25  ;;  %v1912_v48 = vpop.f32.mrb[97].mxu1  ;;  %v2715_v25 = vadd.f32 %v3778_v44, %v3856_v30 }
 0x1f6   :  { %2545 = vst [vmem:[%s3991_s3 + $0x50] sm:$0xff] %v2499_v24   ;;  %v2702_v51 = vadd.f32 %v2701_v19, %v1751_v2  ;;  %v1753_v31 = vpop.f32.mrb[57].mxu0  ;;  %v1913_v16 = vadd.f32 %v2694_v62, %v1912_v48  ;;  %v2604_v0 = vpop.f32.mrb[98].mxu1 }
 0x1f7   :  { %v1754_v55 = vpop.f32.mrb[58].mxu0  ;;  %v1924_v58 = vadd.f32 %v2700_v43, %v2604_v0  ;;  %v1915_v59 = vpop.f32.mrb[99].mxu1  ;;  %v1985_v23 = vmax.f32 %v1921_v1, 0.0 }
 0x1f8   :  { %v2704_v7 = vadd.f32 %v2703_v13, %v1754_v55  ;;  %v1756_v5 = vpop.f32.mrb[59].mxu0  ;;  %v1916_v38 = vadd.f32 %v2696_v60, %v1915_v59  ;;  %v1983_v6 = vmax.f32 %v1913_v16, 0.0 }
 0x1f9   :  { %v1986_v15 = vmax.f32 %v1924_v58, 0.0 }
 0x1fa   :  { %v1984_v34 = vmax.f32 %v1916_v38, 0.0 }
 0x1fb   :  { %v2514_v11 = vpack.c.bf16 %v1986_v15, %v1985_v23 }
 0x1fc   :  { %v2509_v26 = vpack.c.bf16 %v1984_v34, %v1983_v6  ;;  %v2607_v18 = vpop.f32.mrb[100].mxu1 }
 0x1fd   :  { %2548 = vst [vmem:[%s3991_s3 + $0x68] sm:$0xff] %v2514_v11   ;;  %v1759_v62 = vpop.f32.mrb[60].mxu0  ;;  %v1928_v8 = vpop.f32.mrb[101].mxu1 }
 0x1fe   :  { %2547 = vst [vmem:[%s3991_s3 + $0x60] sm:$0xff] %v2509_v26   ;;  %v2706_v60 = vadd.f32 %v2705_v35, %v1759_v62  ;;  %v1761_v12 = vpop.f32.mrb[61].mxu0  ;;  %v1929_v45 = vadd.f32 %v2702_v51, %v1928_v8  ;;  %v2608_v52 = vpop.f32.mrb[102].mxu1 }
 0x1ff   :  { %v1762_v47 = vpop.f32.mrb[62].mxu0  ;;  %v1931_v36 = vpop.f32.mrb[103].mxu1 }
 0x200   :  { %v1937_v20 = vadd.f32 %v2706_v60, %v2607_v18  ;;  %v2708_v27 = vadd.f32 %v2707_v41, %v1762_v47  ;;  %v1764_v17 = vpop.f32.mrb[63].mxu0  ;;  %v1932_v10 = vadd.f32 %v2704_v7, %v1931_v36  ;;  %v1987_v50 = vmax.f32 %v1929_v45, 0.0 }
 0x202   :  { %v1940_v4 = vadd.f32 %v2708_v27, %v2608_v52  ;;  %v1988_v46 = vmax.f32 %v1932_v10, 0.0  ;;  %v1989_v63 = vmax.f32 %v1937_v20, 0.0 }
 0x204   :  { %v1990_v3 = vmax.f32 %v1940_v4, 0.0  ;;  %v2519_v21 = vpack.c.bf16 %v1988_v46, %v1987_v50  ;;  %v2611_v53 = vpop.f32.mrb[104].mxu1 }
 0x205   :  { %v1767_v39 = vpop.f32.mrb[64].mxu0  ;;  %v1944_v32 = vpop.f32.mrb[105].mxu1 }
 0x206   :  { %v2524_v54 = vpack.c.bf16 %v1990_v3, %v1989_v63  ;;  %2549 = vst [vmem:[%s3991_s3 + $0x70] sm:$0xff] %v2519_v21   ;;  %v2710_v22 = vadd.f32 %v2709_v56, %v1767_v39  ;;  %v1769_v43 = vpop.f32.mrb[65].mxu0  ;;  %v2612_v57 = vpop.f32.mrb[106].mxu1 }
 0x207   :  { %v1770_v28 = vpop.f32.mrb[66].mxu0  ;;  %v1947_v29 = vpop.f32.mrb[107].mxu1 }
 0x208   :  { %2550 = vst [vmem:[%s3991_s3 + $0x78] sm:$0xff] %v2524_v54   ;;  %v2712_v37 = vadd.f32 %v2711_v33, %v1770_v28  ;;  %v1945_v61 = vadd.f32 %v2710_v22, %v1944_v32  ;;  %v1772_v40 = vpop.f32.mrb[67].mxu0 }
 0x20a   :  { %v1948_v42 = vadd.f32 %v2712_v37, %v1947_v29  ;;  %v1991_v14 = vmax.f32 %v1945_v61, 0.0 }
 0x20c   :  { %v1992_v19 = vmax.f32 %v1948_v42, 0.0 }
 0x20d   :  { %v1775_v24 = vpop.f32.mrb[68].mxu0 }
 0x20e   :  { %v2529_v2 = vpack.c.bf16 %v1992_v19, %v1991_v14  ;;  %v2714_v1 = vadd.f32 %v2713_v9, %v1775_v24  ;;  %v1777_v48 = vpop.f32.mrb[69].mxu0 }
 0x20f   :  { %v1778_v13 = vpop.f32.mrb[70].mxu0 }
 0x210   :  { %2551 = vst [vmem:[%s3991_s3 + $0x80] sm:$0xff] %v2529_v2   ;;  %v1953_v51 = vadd.f32 %v2714_v1, %v2611_v53  ;;  %v2716_v31 = vadd.f32 %v2715_v25, %v1778_v13  ;;  %v1780_v16 = vpop.f32.mrb[71].mxu0 }
 0x212   :  { %v1956_v0 = vadd.f32 %v2716_v31, %v2612_v57  ;;  %v1993_v55 = vmax.f32 %v1953_v51, 0.0 }
 0x214   :  { %v1994_v49 = vmax.f32 %v1956_v0, 0.0 }
 0x216   :  { %v2534_v58 = vpack.c.bf16 %v1994_v49, %v1993_v55 }
 0x218   :  { %2552 = vst [vmem:[%s3991_s3 + $0x88] sm:$0xff] %v2534_v58  }

// kernel: net_mnist_forward.11
= control target key start
LH: loop header
LB: loop body
LE: loop exit
PB: predicated region body
PF: predicated region fallthrough
CT: control target
= control target key end

     0   :  { %v100_v30 = vlaneseq  ;;  %v540_v34 = vmov 1966171168   ;;  %s676_s0 = inlined_call_operand.vmem [shape: bf16[2,512], index: 0, kind: input, shape index: {}]   ;;  %s677_s1 = inlined_call_operand.vmem [shape: bf16[512,128], index: 1, kind: input, shape index: {}]   ;;  %s678_s2 = inlined_call_operand.vmem [shape: f32[1,128], index: 2, kind: input, shape index: {}]   ;;  %s679_s3 = inlined_call_operand.hbm [shape: f32[2,128], index: 3, kind: output, shape index: {}]  }
   0x1   :  { %v484_v0 = vld [vmem:[%s677_s1 + $0x40] sm:$0xff]   ;;  %v488_v4 = vld [vmem:[%s677_s1 + $0x48] sm:$0xff]   ;;  %v492_v8 = vld [vmem:[%s677_s1 + $0x50] sm:$0xff]   ;;  %v98_v35 = vunpack.c.l.s4 %v540_v34 }
   0x2   :  { %v485_v1 = vld [vmem:[%s677_s1 + $0xc0] sm:$0xff]   ;;  %438 = vmatprep.subr.bf16.mxu0 %v484_v0  ;;  %v489_v5 = vld [vmem:[%s677_s1 + $0xc8] sm:$0xff]   ;;  %v493_v9 = vld [vmem:[%s677_s1 + $0xd0] sm:$0xff]   ;;  %v101_v36 = vshrl.u32 %v100_v30, 7 }
   0x3   :  { %v486_v2 = vld [vmem:[%s677_s1] sm:$0xff]   ;;  %460 = vmatprep.subr.bf16.mxu1 %v485_v1  ;;  %v490_v6 = vld [vmem:[%s677_s1 + $0x8] sm:$0xff]   ;;  %v494_v10 = vld [vmem:[%s677_s1 + $0x10] sm:$0xff]  }
   0x4   :  { %v487_v3 = vld [vmem:[%s677_s1 + $0x80] sm:$0xff]   ;;  %439 = vmatpush3.bf16.msra.mxu0 %v486_v2  ;;  %v491_v7 = vld [vmem:[%s677_s1 + $0x88] sm:$0xff]   ;;  %v495_v11 = vld [vmem:[%s677_s1 + $0x90] sm:$0xff]  }
   0x5   :  { %461 = vmatpush3.bf16.msra.mxu1 %v487_v3  ;;  %440 = vmatprep.subr.bf16.mxu0 %v488_v4  ;;  %v496_v12 = vld [vmem:[%s677_s1 + $0x58] sm:$0xff]   ;;  %v500_v16 = vld [vmem:[%s677_s1 + $0x60] sm:$0xff]   ;;  %v504_v20 = vld [vmem:[%s677_s1 + $0x68] sm:$0xff]  }
   0x6   :  { %462 = vmatprep.subr.bf16.mxu1 %v489_v5  ;;  %v497_v13 = vld [vmem:[%s677_s1 + $0xd8] sm:$0xff]   ;;  %v501_v17 = vld [vmem:[%s677_s1 + $0xe0] sm:$0xff]   ;;  %v505_v21 = vld [vmem:[%s677_s1 + $0xe8] sm:$0xff]  }
   0x7   :  { %v498_v14 = vld [vmem:[%s677_s1 + $0x18] sm:$0xff]   ;;  %v502_v18 = vld [vmem:[%s677_s1 + $0x20] sm:$0xff]   ;;  %v506_v22 = vld [vmem:[%s677_s1 + $0x28] sm:$0xff]  }
   0x8   :  { %441 = vmatpush3.bf16.msra.mxu0 %v490_v6  ;;  %v499_v15 = vld [vmem:[%s677_s1 + $0x98] sm:$0xff]   ;;  %v503_v19 = vld [vmem:[%s677_s1 + $0xa0] sm:$0xff]   ;;  %v507_v23 = vld [vmem:[%s677_s1 + $0xa8] sm:$0xff]  }
   0x9   :  { %463 = vmatpush3.bf16.msra.mxu1 %v491_v7  ;;  %442 = vmatprep.subr.bf16.mxu0 %v492_v8  ;;  %v508_v24 = vld [vmem:[%s677_s1 + $0x70] sm:$0xff]   ;;  %v512_v28 = vld [vmem:[%s677_s1 + $0x78] sm:$0xff]   ;;  %v405_v33 = vld.sshfl [vmem:[%s676_s0] sm:$0x33 pattern:$0x75316420] }
   0xa   :  { %464 = vmatprep.subr.bf16.mxu1 %v493_v9  ;;  %v509_v25 = vld [vmem:[%s677_s1 + $0xf0] sm:$0xff]   ;;  %v513_v29 = vld [vmem:[%s677_s1 + $0xf8] sm:$0xff]  }
   0xb   :  { %v510_v26 = vld [vmem:[%s677_s1 + $0x30] sm:$0xff]   ;;  %v514_v31 = vld [vmem:[%s677_s1 + $0x38] sm:$0xff]  }
   0xc   :  { %443 = vmatpush3.bf16.msra.mxu0 %v494_v10  ;;  %v511_v27 = vld [vmem:[%s677_s1 + $0xb0] sm:$0xff]   ;;  %v515_v32 = vld [vmem:[%s677_s1 + $0xb8] sm:$0xff]  }
   0xd   :  { %465 = vmatpush3.bf16.msra.mxu1 %v495_v11  ;;  %444 = vmatprep.subr.bf16.mxu0 %v496_v12 }
   0xe   :  { %466 = vmatprep.subr.bf16.mxu1 %v497_v13 }
  0x10   :  { %445 = vmatpush3.bf16.msra.mxu0 %v498_v14 }
  0x11   :  { %467 = vmatpush3.bf16.msra.mxu1 %v499_v15  ;;  %446 = vmatprep.subr.bf16.mxu0 %v500_v16 }
  0x12   :  { %468 = vmatprep.subr.bf16.mxu1 %v501_v17 }
  0x14   :  { %447 = vmatpush3.bf16.msra.mxu0 %v502_v18 }
  0x15   :  { %469 = vmatpush3.bf16.msra.mxu1 %v503_v19  ;;  %448 = vmatprep.subr.bf16.mxu0 %v504_v20 }
  0x16   :  { %470 = vmatprep.subr.bf16.mxu1 %v505_v21 }
  0x18   :  { %449 = vmatpush3.bf16.msra.mxu0 %v506_v22 }
  0x19   :  { %471 = vmatpush3.bf16.msra.mxu1 %v507_v23  ;;  %450 = vmatprep.subr.bf16.mxu0 %v508_v24 }
  0x1a   :  { %472 = vmatprep.subr.bf16.mxu1 %v509_v25 }
  0x1c   :  { %451 = vmatpush3.bf16.msra.mxu0 %v510_v26 }
  0x1d   :  { %473 = vmatpush3.bf16.msra.mxu1 %v511_v27  ;;  %452 = vmatprep.subr.bf16.mxu0 %v512_v28 }
  0x1e   :  { %474 = vmatprep.subr.bf16.mxu1 %v513_v29 }
  0x20   :  { %453 = vmatpush3.bf16.msra.mxu0 %v514_v31 }
  0x21   :  { %475 = vmatpush3.bf16.msra.mxu1 %v515_v32 }
  0x22   :  { %8 = vsyncpa [#allocation3], 0  ;;  %v96_v37 = vcombine.high %v405_v33, %v405_v33  ;;  %v99_v38 = vunpack.c.0.s8 %v98_v35  ;;  %v404_v45 = vld [vmem:[%s678_s2] ss:$0 sm:$0xff]  ;;  %s541_s0 = smov [#allocation2]  }
  0x23   :  { %s396_s25 = sshll.u32 %s541_s0, 4  ;;  %s397_s25 = int_to_ptr.vmem [resolvable:$true] %s396_s25 }
  0x24   :  { %v102_v39 = vsub.s32 %v99_v38, %v101_v36  ;;  %s516_s26 = scalar_lea.vmem %s397_s25, 32  ;;  %p521_p1 = scmp.lt.s32.totalorder %s397_s25, %s397_s25 }
  0x25   :  { %p517_p0 = scmp.ne.s32.totalorder %s397_s25, %s516_s26  ;;  %p522_p2 = scmp.lt.s32.totalorder %s516_s26, %s516_s26 }
  0x26   :  { %v110_v40 = vrot.slane %v96_v37, %v102_v39  ;;  %v103_v41 = vrot.slane %v405_v33, %v102_v39 }
  0x27   :  { %p523_p3 = por %p522_p2, %p521_p1 }
  0x28   :  { %341 = vmatprep.mubr.bf16.mxu0 %v110_v40  ;;  %v112_v42 = vcombine.high %v110_v40, %v110_v40  ;;  %v111_v43 = vcombine.high %v103_v41, %v103_v41 }
  0x29   :  { %342 = vmatmul.mubr.bf16.vlgmr.msra.gmra.mrb[0].mxu0 %v103_v41  ;;  %p524_p4 = pnand %p523_p3, %p517_p0 }
  0x2a   :  { %381 = vmatprep.mubr.bf16.mxu1 %v112_v42 }
  0x2b   :  { %382 = vmatmul.mubr.bf16.vlgmr.msra.gmra.mrb[0].mxu1 %v111_v43 }
  0xfc   :  { %v454_v44 = vpop.f32.mrb[0].mxu0 }
  0xfd   :  { %v455_v46 = vpop.f32.mrb[1].mxu0 }
  0xfe   :  { %v476_v47 = vpop.f32.mrb[0].mxu1  ;;  %v456_v48 = vadd.f32 %v455_v46, %v454_v44  ;;  %v457_v49 = vpop.f32.mrb[2].mxu0 }
  0xff   :  { %v477_v50 = vpop.f32.mrb[1].mxu1  ;;  %v458_v51 = vpop.f32.mrb[3].mxu0 }
 0x100   :  { %v344_v52 = vadd.f32 %v456_v48, %v404_v45  ;;  %v478_v53 = vadd.f32 %v477_v50, %v476_v47  ;;  %v479_v54 = vpop.f32.mrb[2].mxu1 }
 0x101   :  { %v480_v55 = vpop.f32.mrb[3].mxu1 }
 0x102   :  { %v384_v56 = vadd.f32 %v478_v53, %v344_v52 }
 0x104   :  { %389 = vst [vmem:[#allocation2] sm:$0x3] %v384_v56 }
 0x105   :  { %527 = shalt.err (!%p524_p4)
}
 0x106   :  { %s528_s28 = scalar_lea.hbm %s679_s3, 32 }
 0x107   :  { %p529_p5 = scmp.ne.s32.totalorder %s679_s3, %s528_s28  ;;  %p532_p6 = scmp.lt.u32.totalorder %s528_s28, %s679_s3 }
 0x109   :  { %p534_p7 = pnand %p532_p6, %p529_p5 }
 0x10b   :  { %537 = shalt.err (!%p534_p7)
}
 0x10c   :  { %399 = dma.vmem_to_hbm [thread:$0]  %s397_s25, 32, %s679_s3, [#allocation3]  }
 0x10d   :  { %538 = dma.done.wait [#allocation3], 32  }
 0x10e   :  { %539 = vsyncadd [#allocation3], 4294967264 }
 0x10f   :  { %403 = vsyncpa [#allocation3], 1 }

// kernel: net_mnist_forward.10
= control target key start
LH: loop header
LB: loop body
LE: loop exit
PB: predicated region body
PF: predicated region fallthrough
CT: control target
= control target key end

     0   :  { %v805_v36 = vlaneseq  ;;  %v8119_v37 = vmov 1966171168   ;;  %vm4934_vm0 = vcmask 523264   ;;  %s10644_s1 = inlined_call_operand.vmem [shape: bf16[3136,512], index: 1, kind: input, shape index: {}]   ;;  %s10645_s0 = inlined_call_operand.vmem [shape: bf16[2,3136], index: 0, kind: input, shape index: {}]   ;;  %s10646_s2 = inlined_call_operand.vmem [shape: f32[1,512], index: 2, kind: input, shape index: {}]   ;;  %s10647_s3 = inlined_call_operand.vmem [shape: bf16[2,512], index: 3, kind: output, shape index: {}]  }
   0x1   :  { %v6938_v0 = vld [vmem:[%s10644_s1 + $0x4] ss:$16 sps:$4 sm:$0xff]   ;;  %v6940_v1 = vld [vmem:[%s10644_s1 + $0xc] ss:$16 sps:$4 sm:$0xff]   ;;  %v6942_v2 = vld [vmem:[%s10644_s1] ss:$16 sps:$4 sm:$0xff]   ;;  %v831_v38 = vunpack.c.l.s4 %v8119_v37 }
   0x2   :  { %4938 = vmatprep.subr.bf16.mxu0 %v6938_v0  ;;  %v6943_v3 = vld [vmem:[%s10644_s1 + $0x8] ss:$16 sps:$4 sm:$0xff]   ;;  %5471 = vmatprep.subr.bf16.mxu1 %v6940_v1  ;;  %v6944_v4 = vld [vmem:[%s10644_s1 + $0x24] ss:$16 sps:$4 sm:$0xff]   ;;  %v6946_v5 = vld [vmem:[%s10644_s1 + $0x2c] ss:$16 sps:$4 sm:$0xff]  }
   0x3   :  { %4939 = vmatpush1.bf16.msra.mxu0 %v6942_v2  ;;  %5472 = vmatpush1.bf16.msra.mxu1 %v6943_v3  ;;  %v6948_v6 = vld [vmem:[%s10644_s1 + $0x20] ss:$16 sps:$4 sm:$0xff]   ;;  %v6949_v7 = vld [vmem:[%s10644_s1 + $0x28] ss:$16 sps:$4 sm:$0xff]   ;;  %v6950_v8 = vld [vmem:[%s10644_s1 + $0x44] ss:$16 sps:$4 sm:$0xff]   ;;  %v832_v43 = vunpack.c.0.s8 %v831_v38 }
   0x4   :  { %4940 = vmatprep.subr.bf16.mxu0 %v6944_v4  ;;  %5473 = vmatprep.subr.bf16.mxu1 %v6946_v5  ;;  %v6952_v9 = vld [vmem:[%s10644_s1 + $0x4c] ss:$16 sps:$4 sm:$0xff]   ;;  %v6954_v10 = vld [vmem:[%s10644_s1 + $0x40] ss:$16 sps:$4 sm:$0xff]   ;;  %v6955_v11 = vld [vmem:[%s10644_s1 + $0x48] ss:$16 sps:$4 sm:$0xff]  }
   0x5   :  { %v6956_v12 = vld [vmem:[%s10644_s1 + $0x64] ss:$16 sps:$4 sm:$0xff]   ;;  %v6958_v13 = vld [vmem:[%s10644_s1 + $0x6c] ss:$16 sps:$4 sm:$0xff]   ;;  %v6960_v14 = vld [vmem:[%s10644_s1 + $0x60] ss:$16 sps:$4 sm:$0xff]  }
   0x6   :  { %v6961_v15 = vld [vmem:[%s10644_s1 + $0x68] ss:$16 sps:$4 sm:$0xff]   ;;  %v6962_v16 = vld [vmem:[%s10644_s1 + $0x84] ss:$16 sps:$4 sm:$0xff]   ;;  %v6964_v17 = vld [vmem:[%s10644_s1 + $0x8c] ss:$16 sps:$4 sm:$0xff]  }
   0x7   :  { %4941 = vmatpush1.bf16.msra.mxu0 %v6948_v6  ;;  %5474 = vmatpush1.bf16.msra.mxu1 %v6949_v7  ;;  %v6966_v18 = vld [vmem:[%s10644_s1 + $0x80] ss:$16 sps:$4 sm:$0xff]   ;;  %v6967_v19 = vld [vmem:[%s10644_s1 + $0x88] ss:$16 sps:$4 sm:$0xff]   ;;  %v6968_v20 = vld [vmem:[%s10644_s1 + $0xa4] ss:$16 sps:$4 sm:$0xff]  }
   0x8   :  { %4942 = vmatprep.subr.bf16.mxu0 %v6950_v8  ;;  %5475 = vmatprep.subr.bf16.mxu1 %v6952_v9  ;;  %v6970_v21 = vld [vmem:[%s10644_s1 + $0xac] ss:$16 sps:$4 sm:$0xff]   ;;  %v6972_v22 = vld [vmem:[%s10644_s1 + $0xa0] ss:$16 sps:$4 sm:$0xff]   ;;  %v6973_v23 = vld [vmem:[%s10644_s1 + $0xa8] ss:$16 sps:$4 sm:$0xff]  }
   0x9   :  { %v6974_v24 = vld [vmem:[%s10644_s1 + $0xc4] ss:$16 sps:$4 sm:$0xff]   ;;  %v6976_v25 = vld [vmem:[%s10644_s1 + $0xcc] ss:$16 sps:$4 sm:$0xff]   ;;  %v6978_v26 = vld [vmem:[%s10644_s1 + $0xc0] ss:$16 sps:$4 sm:$0xff]  }
   0xa   :  { %v6979_v27 = vld [vmem:[%s10644_s1 + $0xc8] ss:$16 sps:$4 sm:$0xff]   ;;  %v6980_v28 = vld [vmem:[%s10644_s1 + $0xe4] ss:$16 sps:$4 sm:$0xff]   ;;  %v6982_v29 = vld [vmem:[%s10644_s1 + $0xec] ss:$16 sps:$4 sm:$0xff]  }
   0xb   :  { %4943 = vmatpush1.bf16.msra.mxu0 %v6954_v10  ;;  %5476 = vmatpush1.bf16.msra.mxu1 %v6955_v11  ;;  %v6984_v30 = vld [vmem:[%s10644_s1 + $0xe0] ss:$16 sps:$4 sm:$0xff]   ;;  %v6985_v31 = vld [vmem:[%s10644_s1 + $0xe8] ss:$16 sps:$4 sm:$0xff]   ;;  %v6986_v32 = vld [vmem:[%s10644_s1 + $0x104] ss:$16 sps:$4 sm:$0xff]  }
   0xc   :  { %4944 = vmatprep.subr.bf16.mxu0 %v6956_v12  ;;  %5477 = vmatprep.subr.bf16.mxu1 %v6958_v13  ;;  %v6988_v33 = vld [vmem:[%s10644_s1 + $0x10c] ss:$16 sps:$4 sm:$0xff]   ;;  %v6990_v34 = vld [vmem:[%s10644_s1 + $0x100] ss:$16 sps:$4 sm:$0xff]   ;;  %v6991_v35 = vld [vmem:[%s10644_s1 + $0x108] ss:$16 sps:$4 sm:$0xff]  }
   0xd   :  { %v6992_v39 = vld [vmem:[%s10644_s1 + $0x124] ss:$16 sps:$4 sm:$0xff]   ;;  %v6994_v40 = vld [vmem:[%s10644_s1 + $0x12c] ss:$16 sps:$4 sm:$0xff]   ;;  %v6996_v41 = vld [vmem:[%s10644_s1 + $0x120] ss:$16 sps:$4 sm:$0xff]  }
   0xe   :  { %v8258_v42 = vshrl.u32 %v805_v36, 7  ;;  %v6997_v44 = vld [vmem:[%s10644_s1 + $0x128] ss:$16 sps:$4 sm:$0xff]   ;;  %v6998_v45 = vld [vmem:[%s10644_s1 + $0x144] ss:$16 sps:$4 sm:$0xff]  }
   0xf   :  { %4945 = vmatpush1.bf16.msra.mxu0 %v6960_v14  ;;  %5478 = vmatpush1.bf16.msra.mxu1 %v6961_v15  ;;  %v7000_v46 = vld [vmem:[%s10644_s1 + $0x14c] ss:$16 sps:$4 sm:$0xff]   ;;  %v7002_v47 = vld [vmem:[%s10644_s1 + $0x140] ss:$16 sps:$4 sm:$0xff]   ;;  %v7003_v48 = vld [vmem:[%s10644_s1 + $0x148] ss:$16 sps:$4 sm:$0xff]  }
  0x10   :  { %4946 = vmatprep.subr.bf16.mxu0 %v6962_v16  ;;  %5479 = vmatprep.subr.bf16.mxu1 %v6964_v17  ;;  %v8276_v49 = vsub.s32 %v832_v43, %v8258_v42  ;;  %v7004_v50 = vld [vmem:[%s10644_s1 + $0x164] ss:$16 sps:$4 sm:$0xff]   ;;  %v7006_v51 = vld [vmem:[%s10644_s1 + $0x16c] ss:$16 sps:$4 sm:$0xff]   ;;  %v7008_v53 = vld [vmem:[%s10644_s1 + $0x160] ss:$16 sps:$4 sm:$0xff]  }
  0x11   :  { %v8287_v52 = vld [vmem:[%s10645_s0] sm:$0xff]  ;;  %v7009_v55 = vld [vmem:[%s10644_s1 + $0x168] ss:$16 sps:$4 sm:$0xff]   ;;  %v7012_v57 = vld [vmem:[%s10644_s1 + $0x18c] ss:$16 sps:$4 sm:$0xff]  }
  0x12   :  { %v836_v54 = vrot.slane %v8287_v52, %v8276_v49  ;;  %v7010_v56 = vld [vmem:[%s10644_s1 + $0x184] ss:$16 sps:$4 sm:$0xff]   ;;  %v7014_v59 = vld [vmem:[%s10644_s1 + $0x180] ss:$16 sps:$4 sm:$0xff]   ;;  %v7015_v61 = vld [vmem:[%s10644_s1 + $0x188] ss:$16 sps:$4 sm:$0xff]  }
  0x13   :  { %4947 = vmatpush1.bf16.msra.mxu0 %v6966_v18  ;;  %5480 = vmatpush1.bf16.msra.mxu1 %v6967_v19  ;;  %v7016_v62 = vld [vmem:[%s10644_s1 + $0x1a4] ss:$16 sps:$4 sm:$0xff]   ;;  %v7018_v63 = vld [vmem:[%s10644_s1 + $0x1ac] ss:$16 sps:$4 sm:$0xff]   ;;  %v7020_v0 = vld [vmem:[%s10644_s1 + $0x1a0] ss:$16 sps:$4 sm:$0xff]  }
  0x14   :  { %4948 = vmatprep.subr.bf16.mxu0 %v6968_v20  ;;  %5481 = vmatprep.subr.bf16.mxu1 %v6970_v21  ;;  %v844_v58 = vcombine.high %v836_v54, %v836_v54  ;;  %v7021_v1 = vld [vmem:[%s10644_s1 + $0x1a8] ss:$16 sps:$4 sm:$0xff]   ;;  %v7022_v2 = vld [vmem:[%s10644_s1 + $0x1c4] ss:$16 sps:$4 sm:$0xff]   ;;  %v7024_v3 = vld [vmem:[%s10644_s1 + $0x1cc] ss:$16 sps:$4 sm:$0xff]   ;;  %v8356_v13 = vrot.slane %v836_v54, %v8276_v49 }
  0x15   :  { %v7026_v4 = vld [vmem:[%s10644_s1 + $0x1c0] ss:$16 sps:$4 sm:$0xff]   ;;  %v7027_v5 = vld [vmem:[%s10644_s1 + $0x1c8] ss:$16 sps:$4 sm:$0xff]   ;;  %v7028_v6 = vld [vmem:[%s10644_s1 + $0x1e4] ss:$16 sps:$4 sm:$0xff]  }
  0x16   :  { %v866_v60 = vrot.slane %v844_v58, %v8276_v49  ;;  %v7030_v7 = vld [vmem:[%s10644_s1 + $0x1ec] ss:$16 sps:$4 sm:$0xff]   ;;  %v7032_v8 = vld [vmem:[%s10644_s1 + $0x1e0] ss:$16 sps:$4 sm:$0xff]   ;;  %v7033_v9 = vld [vmem:[%s10644_s1 + $0x1e8] ss:$16 sps:$4 sm:$0xff]  }
  0x17   :  { %4949 = vmatpush1.bf16.msra.mxu0 %v6972_v22  ;;  %5482 = vmatpush1.bf16.msra.mxu1 %v6973_v23  ;;  %v7036_v10 = vld [vmem:[%s10644_s1 + $0x204] ss:$16 sps:$4 sm:$0xff]   ;;  %v7039_v11 = vld [vmem:[%s10644_s1 + $0x20c] ss:$16 sps:$4 sm:$0xff]   ;;  %v7034_v12 = vld [vmem:[%s10644_s1 + $0x200] ss:$16 sps:$4 sm:$0xff]  }
  0x18   :  { %4950 = vmatprep.subr.bf16.mxu0 %v6974_v24  ;;  %5483 = vmatprep.subr.bf16.mxu1 %v6976_v25  ;;  %v7037_v14 = vld [vmem:[%s10644_s1 + $0x208] ss:$16 sps:$4 sm:$0xff]   ;;  %v7042_v15 = vld [vmem:[%s10644_s1 + $0x224] ss:$16 sps:$4 sm:$0xff]   ;;  %v7045_v16 = vld [vmem:[%s10644_s1 + $0x22c] ss:$16 sps:$4 sm:$0xff]   ;;  %v876_v17 = vcombine.high %v866_v60, %v866_v60 }
  0x19   :  { %4970 = vmatprep.mubr.bf16.mxu0 %v866_v60  ;;  %5503 = vmatprep.mubr.bf16.mxu1 %v866_v60  ;;  %v7040_v18 = vld [vmem:[%s10644_s1 + $0x220] ss:$16 sps:$4 sm:$0xff]   ;;  %v7043_v19 = vld [vmem:[%s10644_s1 + $0x228] ss:$16 sps:$4 sm:$0xff]   ;;  %v7048_v20 = vld [vmem:[%s10644_s1 + $0x244] ss:$16 sps:$4 sm:$0xff]  }
  0x1a   :  { %v7051_v21 = vld [vmem:[%s10644_s1 + $0x24c] ss:$16 sps:$4 sm:$0xff]   ;;  %v7046_v22 = vld [vmem:[%s10644_s1 + $0x240] ss:$16 sps:$4 sm:$0xff]   ;;  %v7049_v23 = vld [vmem:[%s10644_s1 + $0x248] ss:$16 sps:$4 sm:$0xff]  }
  0x1b   :  { %4951 = vmatpush1.bf16.msra.mxu0 %v6978_v26  ;;  %5484 = vmatpush1.bf16.msra.mxu1 %v6979_v27  ;;  %v7054_v24 = vld [vmem:[%s10644_s1 + $0x264] ss:$16 sps:$4 sm:$0xff]   ;;  %v7057_v25 = vld [vmem:[%s10644_s1 + $0x26c] ss:$16 sps:$4 sm:$0xff]   ;;  %v7052_v26 = vld [vmem:[%s10644_s1 + $0x260] ss:$16 sps:$4 sm:$0xff]  }
  0x1c   :  { %4952 = vmatprep.subr.bf16.mxu0 %v6980_v28  ;;  %5485 = vmatprep.subr.bf16.mxu1 %v6982_v29  ;;  %v7055_v27 = vld [vmem:[%s10644_s1 + $0x268] ss:$16 sps:$4 sm:$0xff]   ;;  %v7060_v28 = vld [vmem:[%s10644_s1 + $0x284] ss:$16 sps:$4 sm:$0xff]   ;;  %v7063_v29 = vld [vmem:[%s10644_s1 + $0x28c] ss:$16 sps:$4 sm:$0xff]  }
  0x1d   :  { %v7072_v36 = vld [vmem:[%s10644_s1 + $0x2c4] ss:$16 sps:$4 sm:$0xff]   ;;  %v7075_v37 = vld [vmem:[%s10644_s1 + $0x2cc] ss:$16 sps:$4 sm:$0xff]   ;;  %v7070_v38 = vld [vmem:[%s10644_s1 + $0x2c0] ss:$16 sps:$4 sm:$0xff]  }
  0x1e   :  { %v7076_v43 = vld [vmem:[%s10644_s1 + $0x2e0] ss:$16 sps:$4 sm:$0xff]   ;;  %v7091_v54 = vld [vmem:[%s10644_s1 + $0x328] ss:$16 sps:$4 sm:$0xff]   ;;  %v7105_v60 = vld [vmem:[%s10644_s1 + $0x36c] ss:$16 sps:$4 sm:$0xff]  }
  0x1f   :  { %4953 = vmatpush1.bf16.msra.mxu0 %v6984_v30  ;;  %5486 = vmatpush1.bf16.msra.mxu1 %v6985_v31  ;;  %v7058_v30 = vld [vmem:[%s10644_s1 + $0x280] ss:$16 sps:$4 sm:$0xff]   ;;  %v7061_v31 = vld [vmem:[%s10644_s1 + $0x288] ss:$16 sps:$4 sm:$0xff]  }
  0x20   :  { %4954 = vmatprep.subr.bf16.mxu0 %v6986_v32  ;;  %5487 = vmatprep.subr.bf16.mxu1 %v6988_v33  ;;  %v7066_v32 = vld [vmem:[%s10644_s1 + $0x2a4] ss:$16 sps:$4 sm:$0xff]   ;;  %v7069_v33 = vld [vmem:[%s10644_s1 + $0x2ac] ss:$16 sps:$4 sm:$0xff]   ;;  %v7097_v58 = vld [vmem:[%s10644_s1 + $0x348] ss:$16 sps:$4 sm:$0xff]  }
  0x23   :  { %4955 = vmatpush1.bf16.msra.mxu0 %v6990_v34  ;;  %5488 = vmatpush1.bf16.msra.mxu1 %v6991_v35  ;;  %v7064_v34 = vld [vmem:[%s10644_s1 + $0x2a0] ss:$16 sps:$4 sm:$0xff]   ;;  %v7067_v35 = vld [vmem:[%s10644_s1 + $0x2a8] ss:$16 sps:$4 sm:$0xff]  }
  0x24   :  { %4956 = vmatprep.subr.bf16.mxu0 %v6992_v39  ;;  %5489 = vmatprep.subr.bf16.mxu1 %v6994_v40  ;;  %v7073_v39 = vld [vmem:[%s10644_s1 + $0x2c8] ss:$16 sps:$4 sm:$0xff]   ;;  %v7078_v40 = vld [vmem:[%s10644_s1 + $0x2e4] ss:$16 sps:$4 sm:$0xff]  }
  0x27   :  { %4957 = vmatpush1.bf16.msra.mxu0 %v6996_v41  ;;  %5490 = vmatpush1.bf16.msra.mxu1 %v6997_v44  ;;  %v7081_v41 = vld [vmem:[%s10644_s1 + $0x2ec] ss:$16 sps:$4 sm:$0xff]   ;;  %v7079_v44 = vld [vmem:[%s10644_s1 + $0x2e8] ss:$16 sps:$4 sm:$0xff]  }
  0x28   :  { %4958 = vmatprep.subr.bf16.mxu0 %v6998_v45  ;;  %5491 = vmatprep.subr.bf16.mxu1 %v7000_v46  ;;  %v7084_v45 = vld [vmem:[%s10644_s1 + $0x304] ss:$16 sps:$4 sm:$0xff]   ;;  %v7087_v46 = vld [vmem:[%s10644_s1 + $0x30c] ss:$16 sps:$4 sm:$0xff]  }
  0x2b   :  { %4959 = vmatpush1.bf16.msra.mxu0 %v7002_v47  ;;  %5492 = vmatpush1.bf16.msra.mxu1 %v7003_v48  ;;  %v7082_v47 = vld [vmem:[%s10644_s1 + $0x300] ss:$16 sps:$4 sm:$0xff]   ;;  %v7085_v48 = vld [vmem:[%s10644_s1 + $0x308] ss:$16 sps:$4 sm:$0xff]  }
  0x2c   :  { %4960 = vmatprep.subr.bf16.mxu0 %v7004_v50  ;;  %5493 = vmatprep.subr.bf16.mxu1 %v7006_v51  ;;  %v7090_v50 = vld [vmem:[%s10644_s1 + $0x324] ss:$16 sps:$4 sm:$0xff]   ;;  %v7093_v51 = vld [vmem:[%s10644_s1 + $0x32c] ss:$16 sps:$4 sm:$0xff]  }
  0x2f   :  { %4961 = vmatpush1.bf16.msra.mxu0 %v7008_v53  ;;  %5494 = vmatpush1.bf16.msra.mxu1 %v7009_v55  ;;  %v7088_v53 = vld [vmem:[%s10644_s1 + $0x320] ss:$16 sps:$4 sm:$0xff]   ;;  %v7096_v55 = vld [vmem:[%s10644_s1 + $0x344] ss:$16 sps:$4 sm:$0xff]  }
  0x30   :  { %4962 = vmatprep.subr.bf16.mxu0 %v7010_v56  ;;  %5495 = vmatprep.subr.bf16.mxu1 %v7012_v57  ;;  %v7099_v56 = vld [vmem:[%s10644_s1 + $0x34c] ss:$16 sps:$4 sm:$0xff]   ;;  %v7094_v57 = vld [vmem:[%s10644_s1 + $0x340] ss:$16 sps:$4 sm:$0xff]  }
  0x33   :  { %4963 = vmatpush1.bf16.msra.mxu0 %v7014_v59  ;;  %5496 = vmatpush1.bf16.msra.mxu1 %v7015_v61  ;;  %v7102_v59 = vld [vmem:[%s10644_s1 + $0x364] ss:$16 sps:$4 sm:$0xff]   ;;  %v7100_v61 = vld [vmem:[%s10644_s1 + $0x360] ss:$16 sps:$4 sm:$0xff]  }
  0x34   :  { %4964 = vmatprep.subr.bf16.mxu0 %v7016_v62  ;;  %5497 = vmatprep.subr.bf16.mxu1 %v7018_v63  ;;  %v7103_v62 = vld [vmem:[%s10644_s1 + $0x368] ss:$16 sps:$4 sm:$0xff]   ;;  %v7108_v63 = vld [vmem:[%s10644_s1 + $0x384] ss:$16 sps:$4 sm:$0xff]  }
  0x37   :  { %4965 = vmatpush1.bf16.msra.mxu0 %v7020_v0  ;;  %5498 = vmatpush1.bf16.msra.mxu1 %v7021_v1  ;;  %v7111_v0 = vld [vmem:[%s10644_s1 + $0x38c] ss:$16 sps:$4 sm:$0xff]   ;;  %v7106_v1 = vld [vmem:[%s10644_s1 + $0x380] ss:$16 sps:$4 sm:$0xff]  }
  0x38   :  { %4966 = vmatprep.subr.bf16.mxu0 %v7022_v2  ;;  %5499 = vmatprep.subr.bf16.mxu1 %v7024_v3  ;;  %v7109_v2 = vld [vmem:[%s10644_s1 + $0x388] ss:$16 sps:$4 sm:$0xff]   ;;  %v7114_v3 = vld [vmem:[%s10644_s1 + $0x3a4] ss:$16 sps:$4 sm:$0xff]  }
  0x3b   :  { %4967 = vmatpush1.bf16.msra.mxu0 %v7026_v4  ;;  %5500 = vmatpush1.bf16.msra.mxu1 %v7027_v5  ;;  %v7117_v4 = vld [vmem:[%s10644_s1 + $0x3ac] ss:$16 sps:$4 sm:$0xff]   ;;  %v7112_v5 = vld [vmem:[%s10644_s1 + $0x3a0] ss:$16 sps:$4 sm:$0xff]  }
  0x3c   :  { %4968 = vmatprep.subr.bf16.mxu0 %v7028_v6  ;;  %5501 = vmatprep.subr.bf16.mxu1 %v7030_v7  ;;  %v7115_v6 = vld [vmem:[%s10644_s1 + $0x3a8] ss:$16 sps:$4 sm:$0xff]   ;;  %v7120_v7 = vld [vmem:[%s10644_s1 + $0x3c4] ss:$16 sps:$4 sm:$0xff]  }
  0x3f   :  { %4969 = vmatpush1.bf16.msra.mxu0 %v7032_v8  ;;  %5502 = vmatpush1.bf16.msra.mxu1 %v7033_v9  ;;  %v7123_v8 = vld [vmem:[%s10644_s1 + $0x3cc] ss:$16 sps:$4 sm:$0xff]   ;;  %v829_v9 = vcombine.high %v8287_v52, %v8287_v52 }
  0x40   :  { %4979 = vmatprep.subr.bf16.mxu0 %v7036_v10  ;;  %5512 = vmatprep.subr.bf16.mxu1 %v7039_v11  ;;  %v7118_v10 = vld [vmem:[%s10644_s1 + $0x3c0] ss:$16 sps:$4 sm:$0xff]   ;;  %v7121_v11 = vld [vmem:[%s10644_s1 + $0x3c8] ss:$16 sps:$4 sm:$0xff]   ;;  %v7129_v52 = vld [vmem:[%s10644_s1 + $0x3ec] ss:$16 sps:$4 sm:$0xff]  }
  0x42   :  { %4971 = vmatmul.mubr.bf16.vlgmr.msra.gmra.mrb[0].mxu0 %v8356_v13  ;;  %5504 = vmatmul.mubr.bf16.vlgmr.msra.gmra.mrb[0].mxu1 %v8356_v13 }
  0x43   :  { %4980 = vmatpush1.bf16.msra.mxu0 %v7034_v12  ;;  %5513 = vmatpush1.bf16.msra.mxu1 %v7037_v14  ;;  %v7126_v12 = vld [vmem:[%s10644_s1 + $0x3e4] ss:$16 sps:$4 sm:$0xff]   ;;  %v8540_v14 = vrot.slane %v829_v9, %v8276_v49  ;;  %v7205_v9 = vld [vmem:[%s10644_s1 + $0x588] ss:$16 sps:$4 sm:$0xff]  }
  0x44   :  { %4981 = vmatprep.subr.bf16.mxu0 %v7042_v15  ;;  %5514 = vmatprep.subr.bf16.mxu1 %v7045_v16  ;;  %v7124_v15 = vld [vmem:[%s10644_s1 + $0x3e0] ss:$16 sps:$4 sm:$0xff]   ;;  %v7127_v16 = vld [vmem:[%s10644_s1 + $0x3e8] ss:$16 sps:$4 sm:$0xff]  }
  0x45   :  { %5011 = vmatprep.mubr.bf16.mxu0 %v876_v17  ;;  %5544 = vmatprep.mubr.bf16.mxu1 %v876_v17  ;;  %v7132_v17 = vld [vmem:[%s10644_s1 + $0x404] ss:$16 sps:$4 sm:$0xff]  }
  0x47   :  { %4982 = vmatpush1.bf16.msra.mxu0 %v7040_v18  ;;  %5515 = vmatpush1.bf16.msra.mxu1 %v7043_v19  ;;  %v7135_v18 = vld [vmem:[%s10644_s1 + $0x40c] ss:$16 sps:$4 sm:$0xff]   ;;  %v845_v19 = vcombine.high %v8540_v14, %v8540_v14 }
  0x48   :  { %4983 = vmatprep.subr.bf16.mxu0 %v7048_v20  ;;  %5516 = vmatprep.subr.bf16.mxu1 %v7051_v21  ;;  %v7130_v20 = vld [vmem:[%s10644_s1 + $0x400] ss:$16 sps:$4 sm:$0xff]   ;;  %v874_v21 = vcombine.high %v8356_v13, %v8356_v13 }
  0x49   :  { %v7136_v13 = vld [vmem:[%s10644_s1 + $0x420] ss:$16 sps:$4 sm:$0xff]  }
  0x4b   :  { %4984 = vmatpush1.bf16.msra.mxu0 %v7046_v22  ;;  %5517 = vmatpush1.bf16.msra.mxu1 %v7049_v23  ;;  %v7133_v22 = vld [vmem:[%s10644_s1 + $0x408] ss:$16 sps:$4 sm:$0xff]   ;;  %v7138_v23 = vld [vmem:[%s10644_s1 + $0x424] ss:$16 sps:$4 sm:$0xff]  }
  0x4c   :  { %4985 = vmatprep.subr.bf16.mxu0 %v7054_v24  ;;  %5518 = vmatprep.subr.bf16.mxu1 %v7057_v25  ;;  %v7141_v24 = vld [vmem:[%s10644_s1 + $0x42c] ss:$16 sps:$4 sm:$0xff]   ;;  %v8571_v25 = vrot.slane %v845_v19, %v8276_v49  ;;  %v7222_v19 = vld [vmem:[%s10644_s1 + $0x5e4] ss:$16 sps:$4 sm:$0xff]  }
  0x4f   :  { %4986 = vmatpush1.bf16.msra.mxu0 %v7052_v26  ;;  %5519 = vmatpush1.bf16.msra.mxu1 %v7055_v27  ;;  %v7139_v26 = vld [vmem:[%s10644_s1 + $0x428] ss:$16 sps:$4 sm:$0xff]   ;;  %v7144_v27 = vld [vmem:[%s10644_s1 + $0x444] ss:$16 sps:$4 sm:$0xff]  }
  0x50   :  { %4987 = vmatprep.subr.bf16.mxu0 %v7060_v28  ;;  %5520 = vmatprep.subr.bf16.mxu1 %v7063_v29  ;;  %v7147_v28 = vld [vmem:[%s10644_s1 + $0x44c] ss:$16 sps:$4 sm:$0xff]   ;;  %v7142_v29 = vld [vmem:[%s10644_s1 + $0x440] ss:$16 sps:$4 sm:$0xff]  }
  0x53   :  { %4988 = vmatpush1.bf16.msra.mxu0 %v7058_v30  ;;  %5521 = vmatpush1.bf16.msra.mxu1 %v7061_v31  ;;  %v7145_v30 = vld [vmem:[%s10644_s1 + $0x448] ss:$16 sps:$4 sm:$0xff]   ;;  %v7150_v31 = vld [vmem:[%s10644_s1 + $0x464] ss:$16 sps:$4 sm:$0xff]  }
  0x54   :  { %4989 = vmatprep.subr.bf16.mxu0 %v7066_v32  ;;  %5522 = vmatprep.subr.bf16.mxu1 %v7069_v33  ;;  %v7153_v32 = vld [vmem:[%s10644_s1 + $0x46c] ss:$16 sps:$4 sm:$0xff]   ;;  %v7148_v33 = vld [vmem:[%s10644_s1 + $0x460] ss:$16 sps:$4 sm:$0xff]  }
  0x57   :  { %4990 = vmatpush1.bf16.msra.mxu0 %v7064_v34  ;;  %5523 = vmatpush1.bf16.msra.mxu1 %v7067_v35  ;;  %v7151_v34 = vld [vmem:[%s10644_s1 + $0x468] ss:$16 sps:$4 sm:$0xff]   ;;  %v7156_v35 = vld [vmem:[%s10644_s1 + $0x484] ss:$16 sps:$4 sm:$0xff]  }
  0x58   :  { %4991 = vmatprep.subr.bf16.mxu0 %v7072_v36  ;;  %5524 = vmatprep.subr.bf16.mxu1 %v7075_v37  ;;  %v7159_v36 = vld [vmem:[%s10644_s1 + $0x48c] ss:$16 sps:$4 sm:$0xff]   ;;  %v7154_v37 = vld [vmem:[%s10644_s1 + $0x480] ss:$16 sps:$4 sm:$0xff]  }
  0x5b   :  { %4992 = vmatpush1.bf16.msra.mxu0 %v7070_v38  ;;  %5525 = vmatpush1.bf16.msra.mxu1 %v7073_v39  ;;  %v7157_v38 = vld [vmem:[%s10644_s1 + $0x488] ss:$16 sps:$4 sm:$0xff]   ;;  %v7162_v39 = vld [vmem:[%s10644_s1 + $0x4a4] ss:$16 sps:$4 sm:$0xff]  }
  0x5c   :  { %4993 = vmatprep.subr.bf16.mxu0 %v7078_v40  ;;  %5526 = vmatprep.subr.bf16.mxu1 %v7081_v41  ;;  %v7165_v40 = vld [vmem:[%s10644_s1 + $0x4ac] ss:$16 sps:$4 sm:$0xff]   ;;  %v7160_v41 = vld [vmem:[%s10644_s1 + $0x4a0] ss:$16 sps:$4 sm:$0xff]  }
  0x5f   :  { %4994 = vmatpush1.bf16.msra.mxu0 %v7076_v43  ;;  %5527 = vmatpush1.bf16.msra.mxu1 %v7079_v44  ;;  %v7163_v43 = vld [vmem:[%s10644_s1 + $0x4a8] ss:$16 sps:$4 sm:$0xff]   ;;  %v7168_v44 = vld [vmem:[%s10644_s1 + $0x4c4] ss:$16 sps:$4 sm:$0xff]  }
  0x60   :  { %4995 = vmatprep.subr.bf16.mxu0 %v7084_v45  ;;  %5528 = vmatprep.subr.bf16.mxu1 %v7087_v46  ;;  %v7171_v45 = vld [vmem:[%s10644_s1 + $0x4cc] ss:$16 sps:$4 sm:$0xff]   ;;  %v7166_v46 = vld [vmem:[%s10644_s1 + $0x4c0] ss:$16 sps:$4 sm:$0xff]  }
  0x63   :  { %4996 = vmatpush1.bf16.msra.mxu0 %v7082_v47  ;;  %5529 = vmatpush1.bf16.msra.mxu1 %v7085_v48  ;;  %v7169_v47 = vld [vmem:[%s10644_s1 + $0x4c8] ss:$16 sps:$4 sm:$0xff]   ;;  %v7174_v48 = vld [vmem:[%s10644_s1 + $0x4e4] ss:$16 sps:$4 sm:$0xff]  }
  0x64   :  { %4997 = vmatprep.subr.bf16.mxu0 %v7090_v50  ;;  %5530 = vmatprep.subr.bf16.mxu1 %v7093_v51  ;;  %v7177_v50 = vld [vmem:[%s10644_s1 + $0x4ec] ss:$16 sps:$4 sm:$0xff]   ;;  %v7172_v51 = vld [vmem:[%s10644_s1 + $0x4e0] ss:$16 sps:$4 sm:$0xff]  }
  0x67   :  { %4998 = vmatpush1.bf16.msra.mxu0 %v7088_v53  ;;  %5531 = vmatpush1.bf16.msra.mxu1 %v7091_v54  ;;  %v7175_v53 = vld [vmem:[%s10644_s1 + $0x4e8] ss:$16 sps:$4 sm:$0xff]   ;;  %v7180_v54 = vld [vmem:[%s10644_s1 + $0x504] ss:$16 sps:$4 sm:$0xff]  }
  0x68   :  { %4999 = vmatprep.subr.bf16.mxu0 %v7096_v55  ;;  %5532 = vmatprep.subr.bf16.mxu1 %v7099_v56  ;;  %v7183_v55 = vld [vmem:[%s10644_s1 + $0x50c] ss:$16 sps:$4 sm:$0xff]   ;;  %v7178_v56 = vld [vmem:[%s10644_s1 + $0x500] ss:$16 sps:$4 sm:$0xff]  }
  0x6b   :  { %5000 = vmatpush1.bf16.msra.mxu0 %v7094_v57  ;;  %5533 = vmatpush1.bf16.msra.mxu1 %v7097_v58  ;;  %v7181_v57 = vld [vmem:[%s10644_s1 + $0x508] ss:$16 sps:$4 sm:$0xff]   ;;  %v7186_v58 = vld [vmem:[%s10644_s1 + $0x524] ss:$16 sps:$4 sm:$0xff]  }
  0x6c   :  { %5001 = vmatprep.subr.bf16.mxu0 %v7102_v59  ;;  %5534 = vmatprep.subr.bf16.mxu1 %v7105_v60  ;;  %v7189_v59 = vld [vmem:[%s10644_s1 + $0x52c] ss:$16 sps:$4 sm:$0xff]   ;;  %v7184_v60 = vld [vmem:[%s10644_s1 + $0x520] ss:$16 sps:$4 sm:$0xff]  }
  0x6f   :  { %5002 = vmatpush1.bf16.msra.mxu0 %v7100_v61  ;;  %5535 = vmatpush1.bf16.msra.mxu1 %v7103_v62  ;;  %v7187_v61 = vld [vmem:[%s10644_s1 + $0x528] ss:$16 sps:$4 sm:$0xff]   ;;  %v7192_v62 = vld [vmem:[%s10644_s1 + $0x544] ss:$16 sps:$4 sm:$0xff]  }
  0x70   :  { %5003 = vmatprep.subr.bf16.mxu0 %v7108_v63  ;;  %5536 = vmatprep.subr.bf16.mxu1 %v7111_v0  ;;  %v7195_v63 = vld [vmem:[%s10644_s1 + $0x54c] ss:$16 sps:$4 sm:$0xff]   ;;  %v7190_v0 = vld [vmem:[%s10644_s1 + $0x540] ss:$16 sps:$4 sm:$0xff]  }
  0x73   :  { %5004 = vmatpush1.bf16.msra.mxu0 %v7106_v1  ;;  %5537 = vmatpush1.bf16.msra.mxu1 %v7109_v2  ;;  %v7193_v1 = vld [vmem:[%s10644_s1 + $0x548] ss:$16 sps:$4 sm:$0xff]   ;;  %v7198_v2 = vld [vmem:[%s10644_s1 + $0x564] ss:$16 sps:$4 sm:$0xff]  }
  0x74   :  { %5005 = vmatprep.subr.bf16.mxu0 %v7114_v3  ;;  %5538 = vmatprep.subr.bf16.mxu1 %v7117_v4  ;;  %v7201_v3 = vld [vmem:[%s10644_s1 + $0x56c] ss:$16 sps:$4 sm:$0xff]   ;;  %v7196_v4 = vld [vmem:[%s10644_s1 + $0x560] ss:$16 sps:$4 sm:$0xff]  }
  0x77   :  { %5006 = vmatpush1.bf16.msra.mxu0 %v7112_v5  ;;  %5539 = vmatpush1.bf16.msra.mxu1 %v7115_v6  ;;  %v7199_v5 = vld [vmem:[%s10644_s1 + $0x568] ss:$16 sps:$4 sm:$0xff]   ;;  %v7204_v6 = vld [vmem:[%s10644_s1 + $0x584] ss:$16 sps:$4 sm:$0xff]  }
  0x78   :  { %5007 = vmatprep.subr.bf16.mxu0 %v7120_v7  ;;  %5540 = vmatprep.subr.bf16.mxu1 %v7123_v8  ;;  %v7207_v7 = vld [vmem:[%s10644_s1 + $0x58c] ss:$16 sps:$4 sm:$0xff]   ;;  %v7202_v8 = vld [vmem:[%s10644_s1 + $0x580] ss:$16 sps:$4 sm:$0xff]  }
  0x7b   :  { %5008 = vmatpush1.bf16.msra.mxu0 %v7118_v10  ;;  %5541 = vmatpush1.bf16.msra.mxu1 %v7121_v11  ;;  %v7210_v10 = vld [vmem:[%s10644_s1 + $0x5a4] ss:$16 sps:$4 sm:$0xff]   ;;  %v7213_v11 = vld [vmem:[%s10644_s1 + $0x5ac] ss:$16 sps:$4 sm:$0xff]  }
  0x7c   :  { %5009 = vmatprep.subr.bf16.mxu0 %v7126_v12  ;;  %5542 = vmatprep.subr.bf16.mxu1 %v7129_v52  ;;  %v7208_v12 = vld [vmem:[%s10644_s1 + $0x5a0] ss:$16 sps:$4 sm:$0xff]   ;;  %v7211_v52 = vld [vmem:[%s10644_s1 + $0x5a8] ss:$16 sps:$4 sm:$0xff]  }
  0x7f   :  { %5010 = vmatpush1.bf16.msra.mxu0 %v7124_v15  ;;  %5543 = vmatpush1.bf16.msra.mxu1 %v7127_v16  ;;  %v7216_v15 = vld [vmem:[%s10644_s1 + $0x5c4] ss:$16 sps:$4 sm:$0xff]   ;;  %v7219_v16 = vld [vmem:[%s10644_s1 + $0x5cc] ss:$16 sps:$4 sm:$0xff]  }
  0x80   :  { %5020 = vmatprep.subr.bf16.mxu0 %v7132_v17  ;;  %5553 = vmatprep.subr.bf16.mxu1 %v7135_v18  ;;  %v7214_v17 = vld [vmem:[%s10644_s1 + $0x5c0] ss:$16 sps:$4 sm:$0xff]   ;;  %v7217_v18 = vld [vmem:[%s10644_s1 + $0x5c8] ss:$16 sps:$4 sm:$0xff]  }
  0x82   :  { %5012 = vmatmul.mubr.bf16.vlgmr.msra.gmra.mrb[0].mxu0 %v874_v21  ;;  %5545 = vmatmul.mubr.bf16.vlgmr.msra.gmra.mrb[0].mxu1 %v874_v21  ;;  %v7220_v21 = vld [vmem:[%s10644_s1 + $0x5e0] ss:$16 sps:$4 sm:$0xff]  }
  0x83   :  { %5021 = vmatpush1.bf16.msra.mxu0 %v7130_v20  ;;  %5554 = vmatpush1.bf16.msra.mxu1 %v7133_v22  ;;  %v7225_v20 = vld [vmem:[%s10644_s1 + $0x5ec] ss:$16 sps:$4 sm:$0xff]   ;;  %v7223_v22 = vld [vmem:[%s10644_s1 + $0x5e8] ss:$16 sps:$4 sm:$0xff]  }
  0x84   :  { %5022 = vmatprep.subr.bf16.mxu0 %v7138_v23  ;;  %5555 = vmatprep.subr.bf16.mxu1 %v7141_v24  ;;  %v7229_v23 = vld [vmem:[%s10644_s1 + $0x604] ss:$16 sps:$4 sm:$0xff]   ;;  %v7232_v24 = vld [vmem:[%s10644_s1 + $0x60c] ss:$16 sps:$4 sm:$0xff]  }
  0x85   :  { %5052 = vmatprep.mubr.bf16.mxu0 %v8571_v25  ;;  %5585 = vmatprep.mubr.bf16.mxu1 %v8571_v25 }
  0x87   :  { %5023 = vmatpush1.bf16.msra.mxu0 %v7136_v13  ;;  %5556 = vmatpush1.bf16.msra.mxu1 %v7139_v26  ;;  %v7227_v13 = vld [vmem:[%s10644_s1 + $0x600] ss:$16 sps:$4 sm:$0xff]   ;;  %v8760_v26 = vrot.slane %v8540_v14, %v8276_v49  ;;  %v877_v14 = vcombine.high %v8571_v25, %v8571_v25  ;;  %v7241_v25 = vld [vmem:[%s10644_s1 + $0x644] ss:$16 sps:$4 sm:$0xff]  }
  0x88   :  { %5024 = vmatprep.subr.bf16.mxu0 %v7144_v27  ;;  %5557 = vmatprep.subr.bf16.mxu1 %v7147_v28  ;;  %v7230_v27 = vld [vmem:[%s10644_s1 + $0x608] ss:$16 sps:$4 sm:$0xff]   ;;  %v7235_v28 = vld [vmem:[%s10644_s1 + $0x624] ss:$16 sps:$4 sm:$0xff]  }
  0x8b   :  { %5025 = vmatpush1.bf16.msra.mxu0 %v7142_v29  ;;  %5558 = vmatpush1.bf16.msra.mxu1 %v7145_v30  ;;  %v7238_v29 = vld [vmem:[%s10644_s1 + $0x62c] ss:$16 sps:$4 sm:$0xff]   ;;  %v7233_v30 = vld [vmem:[%s10644_s1 + $0x620] ss:$16 sps:$4 sm:$0xff]  }
  0x8c   :  { %5026 = vmatprep.subr.bf16.mxu0 %v7150_v31  ;;  %5559 = vmatprep.subr.bf16.mxu1 %v7153_v32  ;;  %v7236_v31 = vld [vmem:[%s10644_s1 + $0x628] ss:$16 sps:$4 sm:$0xff]   ;;  %v7244_v32 = vld [vmem:[%s10644_s1 + $0x64c] ss:$16 sps:$4 sm:$0xff]  }
  0x8f   :  { %5027 = vmatpush1.bf16.msra.mxu0 %v7148_v33  ;;  %5560 = vmatpush1.bf16.msra.mxu1 %v7151_v34  ;;  %v7239_v33 = vld [vmem:[%s10644_s1 + $0x640] ss:$16 sps:$4 sm:$0xff]   ;;  %v7242_v34 = vld [vmem:[%s10644_s1 + $0x648] ss:$16 sps:$4 sm:$0xff]  }
  0x90   :  { %5028 = vmatprep.subr.bf16.mxu0 %v7156_v35  ;;  %5561 = vmatprep.subr.bf16.mxu1 %v7159_v36  ;;  %v7247_v35 = vld [vmem:[%s10644_s1 + $0x664] ss:$16 sps:$4 sm:$0xff]   ;;  %v7250_v36 = vld [vmem:[%s10644_s1 + $0x66c] ss:$16 sps:$4 sm:$0xff]  }
  0x93   :  { %5029 = vmatpush1.bf16.msra.mxu0 %v7154_v37  ;;  %5562 = vmatpush1.bf16.msra.mxu1 %v7157_v38  ;;  %v7245_v37 = vld [vmem:[%s10644_s1 + $0x660] ss:$16 sps:$4 sm:$0xff]   ;;  %v7248_v38 = vld [vmem:[%s10644_s1 + $0x668] ss:$16 sps:$4 sm:$0xff]  }
  0x94   :  { %5030 = vmatprep.subr.bf16.mxu0 %v7162_v39  ;;  %5563 = vmatprep.subr.bf16.mxu1 %v7165_v40  ;;  %v7253_v39 = vld [vmem:[%s10644_s1 + $0x684] ss:$16 sps:$4 sm:$0xff]   ;;  %v7256_v40 = vld [vmem:[%s10644_s1 + $0x68c] ss:$16 sps:$4 sm:$0xff]  }
  0x97   :  { %5031 = vmatpush1.bf16.msra.mxu0 %v7160_v41  ;;  %5564 = vmatpush1.bf16.msra.mxu1 %v7163_v43  ;;  %v7251_v41 = vld [vmem:[%s10644_s1 + $0x680] ss:$16 sps:$4 sm:$0xff]   ;;  %v7254_v43 = vld [vmem:[%s10644_s1 + $0x688] ss:$16 sps:$4 sm:$0xff]  }
  0x98   :  { %5032 = vmatprep.subr.bf16.mxu0 %v7168_v44  ;;  %5565 = vmatprep.subr.bf16.mxu1 %v7171_v45  ;;  %v7259_v44 = vld [vmem:[%s10644_s1 + $0x6a4] ss:$16 sps:$4 sm:$0xff]   ;;  %v7262_v45 = vld [vmem:[%s10644_s1 + $0x6ac] ss:$16 sps:$4 sm:$0xff]  }
  0x9b   :  { %5033 = vmatpush1.bf16.msra.mxu0 %v7166_v46  ;;  %5566 = vmatpush1.bf16.msra.mxu1 %v7169_v47  ;;  %v7257_v46 = vld [vmem:[%s10644_s1 + $0x6a0] ss:$16 sps:$4 sm:$0xff]   ;;  %v7260_v47 = vld [vmem:[%s10644_s1 + $0x6a8] ss:$16 sps:$4 sm:$0xff]  }
  0x9c   :  { %5034 = vmatprep.subr.bf16.mxu0 %v7174_v48  ;;  %5567 = vmatprep.subr.bf16.mxu1 %v7177_v50  ;;  %v7265_v48 = vld [vmem:[%s10644_s1 + $0x6c4] ss:$16 sps:$4 sm:$0xff]   ;;  %v7268_v50 = vld [vmem:[%s10644_s1 + $0x6cc] ss:$16 sps:$4 sm:$0xff]  }
  0x9f   :  { %5035 = vmatpush1.bf16.msra.mxu0 %v7172_v51  ;;  %5568 = vmatpush1.bf16.msra.mxu1 %v7175_v53  ;;  %v7263_v51 = vld [vmem:[%s10644_s1 + $0x6c0] ss:$16 sps:$4 sm:$0xff]   ;;  %v7266_v53 = vld [vmem:[%s10644_s1 + $0x6c8] ss:$16 sps:$4 sm:$0xff]  }
  0xa0   :  { %5036 = vmatprep.subr.bf16.mxu0 %v7180_v54  ;;  %5569 = vmatprep.subr.bf16.mxu1 %v7183_v55  ;;  %v7271_v54 = vld [vmem:[%s10644_s1 + $0x6e4] ss:$16 sps:$4 sm:$0xff]   ;;  %v7274_v55 = vld [vmem:[%s10644_s1 + $0x6ec] ss:$16 sps:$4 sm:$0xff]  }
  0xa3   :  { %5037 = vmatpush1.bf16.msra.mxu0 %v7178_v56  ;;  %5570 = vmatpush1.bf16.msra.mxu1 %v7181_v57  ;;  %v7269_v56 = vld [vmem:[%s10644_s1 + $0x6e0] ss:$16 sps:$4 sm:$0xff]   ;;  %v7272_v57 = vld [vmem:[%s10644_s1 + $0x6e8] ss:$16 sps:$4 sm:$0xff]  }
  0xa4   :  { %5038 = vmatprep.subr.bf16.mxu0 %v7186_v58  ;;  %5571 = vmatprep.subr.bf16.mxu1 %v7189_v59  ;;  %v7277_v58 = vld [vmem:[%s10644_s1 + $0x704] ss:$16 sps:$4 sm:$0xff]   ;;  %v7280_v59 = vld [vmem:[%s10644_s1 + $0x70c] ss:$16 sps:$4 sm:$0xff]  }
  0xa7   :  { %5039 = vmatpush1.bf16.msra.mxu0 %v7184_v60  ;;  %5572 = vmatpush1.bf16.msra.mxu1 %v7187_v61  ;;  %v7275_v60 = vld [vmem:[%s10644_s1 + $0x700] ss:$16 sps:$4 sm:$0xff]   ;;  %v7278_v61 = vld [vmem:[%s10644_s1 + $0x708] ss:$16 sps:$4 sm:$0xff]  }
  0xa8   :  { %5040 = vmatprep.subr.bf16.mxu0 %v7192_v62  ;;  %5573 = vmatprep.subr.bf16.mxu1 %v7195_v63  ;;  %v7283_v62 = vld [vmem:[%s10644_s1 + $0x724] ss:$16 sps:$4 sm:$0xff]   ;;  %v7286_v63 = vld [vmem:[%s10644_s1 + $0x72c] ss:$16 sps:$4 sm:$0xff]  }
  0xab   :  { %5041 = vmatpush1.bf16.msra.mxu0 %v7190_v0  ;;  %5574 = vmatpush1.bf16.msra.mxu1 %v7193_v1  ;;  %v7281_v0 = vld [vmem:[%s10644_s1 + $0x720] ss:$16 sps:$4 sm:$0xff]   ;;  %v7284_v1 = vld [vmem:[%s10644_s1 + $0x728] ss:$16 sps:$4 sm:$0xff]  }
  0xac   :  { %5042 = vmatprep.subr.bf16.mxu0 %v7198_v2  ;;  %5575 = vmatprep.subr.bf16.mxu1 %v7201_v3  ;;  %v7289_v2 = vld [vmem:[%s10644_s1 + $0x744] ss:$16 sps:$4 sm:$0xff]   ;;  %v7292_v3 = vld [vmem:[%s10644_s1 + $0x74c] ss:$16 sps:$4 sm:$0xff]  }
  0xaf   :  { %5043 = vmatpush1.bf16.msra.mxu0 %v7196_v4  ;;  %5576 = vmatpush1.bf16.msra.mxu1 %v7199_v5  ;;  %v7287_v4 = vld [vmem:[%s10644_s1 + $0x740] ss:$16 sps:$4 sm:$0xff]   ;;  %v7290_v5 = vld [vmem:[%s10644_s1 + $0x748] ss:$16 sps:$4 sm:$0xff]  }
  0xb0   :  { %5044 = vmatprep.subr.bf16.mxu0 %v7204_v6  ;;  %5577 = vmatprep.subr.bf16.mxu1 %v7207_v7  ;;  %v7295_v6 = vld [vmem:[%s10644_s1 + $0x764] ss:$16 sps:$4 sm:$0xff]   ;;  %v7298_v7 = vld [vmem:[%s10644_s1 + $0x76c] ss:$16 sps:$4 sm:$0xff]  }
  0xb3   :  { %5045 = vmatpush1.bf16.msra.mxu0 %v7202_v8  ;;  %5578 = vmatpush1.bf16.msra.mxu1 %v7205_v9  ;;  %v7293_v8 = vld [vmem:[%s10644_s1 + $0x760] ss:$16 sps:$4 sm:$0xff]   ;;  %v7296_v9 = vld [vmem:[%s10644_s1 + $0x768] ss:$16 sps:$4 sm:$0xff]  }
  0xb4   :  { %5046 = vmatprep.subr.bf16.mxu0 %v7210_v10  ;;  %5579 = vmatprep.subr.bf16.mxu1 %v7213_v11  ;;  %v7301_v10 = vld [vmem:[%s10644_s1 + $0x784] ss:$16 sps:$4 sm:$0xff]   ;;  %v7304_v11 = vld [vmem:[%s10644_s1 + $0x78c] ss:$16 sps:$4 sm:$0xff]  }
  0xb7   :  { %5047 = vmatpush1.bf16.msra.mxu0 %v7208_v12  ;;  %5580 = vmatpush1.bf16.msra.mxu1 %v7211_v52  ;;  %v7299_v12 = vld [vmem:[%s10644_s1 + $0x780] ss:$16 sps:$4 sm:$0xff]   ;;  %v7302_v52 = vld [vmem:[%s10644_s1 + $0x788] ss:$16 sps:$4 sm:$0xff]  }
  0xb8   :  { %5048 = vmatprep.subr.bf16.mxu0 %v7216_v15  ;;  %5581 = vmatprep.subr.bf16.mxu1 %v7219_v16  ;;  %v7307_v15 = vld [vmem:[%s10644_s1 + $0x7a4] ss:$16 sps:$4 sm:$0xff]   ;;  %v7310_v16 = vld [vmem:[%s10644_s1 + $0x7ac] ss:$16 sps:$4 sm:$0xff]  }
  0xbb   :  { %5049 = vmatpush1.bf16.msra.mxu0 %v7214_v17  ;;  %5582 = vmatpush1.bf16.msra.mxu1 %v7217_v18  ;;  %v7305_v17 = vld [vmem:[%s10644_s1 + $0x7a0] ss:$16 sps:$4 sm:$0xff]   ;;  %v7308_v18 = vld [vmem:[%s10644_s1 + $0x7a8] ss:$16 sps:$4 sm:$0xff]  }
  0xbc   :  { %5050 = vmatprep.subr.bf16.mxu0 %v7222_v19  ;;  %5583 = vmatprep.subr.bf16.mxu1 %v7225_v20  ;;  %v7313_v19 = vld [vmem:[%s10644_s1 + $0x7c4] ss:$16 sps:$4 sm:$0xff]   ;;  %v7316_v20 = vld [vmem:[%s10644_s1 + $0x7cc] ss:$16 sps:$4 sm:$0xff]  }
  0xbf   :  { %5051 = vmatpush1.bf16.msra.mxu0 %v7220_v21  ;;  %5584 = vmatpush1.bf16.msra.mxu1 %v7223_v22  ;;  %v8934_v21 = vld.sshfl [vmem:[%s10645_s0 + $0x8] sm:$0xff pattern:$0x75316420]  ;;  %v7311_v22 = vld [vmem:[%s10644_s1 + $0x7c0] ss:$16 sps:$4 sm:$0xff]  }
  0xc0   :  { %5061 = vmatprep.subr.bf16.mxu0 %v7229_v23  ;;  %5594 = vmatprep.subr.bf16.mxu1 %v7232_v24  ;;  %v7314_v23 = vld [vmem:[%s10644_s1 + $0x7c8] ss:$16 sps:$4 sm:$0xff]   ;;  %v7319_v24 = vld [vmem:[%s10644_s1 + $0x7e4] ss:$16 sps:$4 sm:$0xff]  }
  0xc2   :  { %5053 = vmatmul.mubr.bf16.vlgmr.msra.gmra.mrb[0].mxu0 %v8760_v26  ;;  %5586 = vmatmul.mubr.bf16.vlgmr.msra.gmra.mrb[0].mxu1 %v8760_v26 }
  0xc3   :  { %5062 = vmatpush1.bf16.msra.mxu0 %v7227_v13  ;;  %5595 = vmatpush1.bf16.msra.mxu1 %v7230_v27  ;;  %v7322_v13 = vld [vmem:[%s10644_s1 + $0x7ec] ss:$16 sps:$4 sm:$0xff]   ;;  %v7317_v27 = vld [vmem:[%s10644_s1 + $0x7e0] ss:$16 sps:$4 sm:$0xff]  }
  0xc4   :  { %5063 = vmatprep.subr.bf16.mxu0 %v7235_v28  ;;  %5596 = vmatprep.subr.bf16.mxu1 %v7238_v29  ;;  %v7320_v28 = vld [vmem:[%s10644_s1 + $0x7e8] ss:$16 sps:$4 sm:$0xff]   ;;  %v7325_v29 = vld [vmem:[%s10644_s1 + $0x804] ss:$16 sps:$4 sm:$0xff]  }
  0xc5   :  { %5093 = vmatprep.mubr.bf16.mxu0 %v877_v14  ;;  %5626 = vmatprep.mubr.bf16.mxu1 %v877_v14  ;;  %v7328_v14 = vld [vmem:[%s10644_s1 + $0x80c] ss:$16 sps:$4 sm:$0xff]  }
  0xc7   :  { %5064 = vmatpush1.bf16.msra.mxu0 %v7233_v30  ;;  %5597 = vmatpush1.bf16.msra.mxu1 %v7236_v31  ;;  %v893_v30 = vcombine.high %v8934_v21, %v8934_v21  ;;  %v875_v31 = vcombine.high %v8760_v26, %v8760_v26  ;;  %v7334_v26 = vld [vmem:[%s10644_s1 + $0x82c] ss:$16 sps:$4 sm:$0xff]  }
  0xc8   :  { %5065 = vmatprep.subr.bf16.mxu0 %v7241_v25  ;;  %5598 = vmatprep.subr.bf16.mxu1 %v7244_v32  ;;  %v7323_v25 = vld [vmem:[%s10644_s1 + $0x800] ss:$16 sps:$4 sm:$0xff]   ;;  %v7326_v32 = vld [vmem:[%s10644_s1 + $0x808] ss:$16 sps:$4 sm:$0xff]  }
  0xcb   :  { %5066 = vmatpush1.bf16.msra.mxu0 %v7239_v33  ;;  %5599 = vmatpush1.bf16.msra.mxu1 %v7242_v34  ;;  %v7331_v33 = vld [vmem:[%s10644_s1 + $0x824] ss:$16 sps:$4 sm:$0xff]   ;;  %v8977_v34 = vrot.slane %v893_v30, %v8276_v49 }
  0xcc   :  { %5067 = vmatprep.subr.bf16.mxu0 %v7247_v35  ;;  %5600 = vmatprep.subr.bf16.mxu1 %v7250_v36  ;;  %v7329_v35 = vld [vmem:[%s10644_s1 + $0x820] ss:$16 sps:$4 sm:$0xff]   ;;  %v7332_v36 = vld [vmem:[%s10644_s1 + $0x828] ss:$16 sps:$4 sm:$0xff]   ;;  %v7415_v30 = vld [vmem:[%s10644_s1 + $0x9e4] ss:$16 sps:$4 sm:$0xff]  }
  0xcf   :  { %5068 = vmatpush1.bf16.msra.mxu0 %v7245_v37  ;;  %5601 = vmatpush1.bf16.msra.mxu1 %v7248_v38  ;;  %v7337_v37 = vld [vmem:[%s10644_s1 + $0x844] ss:$16 sps:$4 sm:$0xff]   ;;  %v7340_v38 = vld [vmem:[%s10644_s1 + $0x84c] ss:$16 sps:$4 sm:$0xff]  }
  0xd0   :  { %5069 = vmatprep.subr.bf16.mxu0 %v7253_v39  ;;  %5602 = vmatprep.subr.bf16.mxu1 %v7256_v40  ;;  %v7335_v39 = vld [vmem:[%s10644_s1 + $0x840] ss:$16 sps:$4 sm:$0xff]   ;;  %v7338_v40 = vld [vmem:[%s10644_s1 + $0x848] ss:$16 sps:$4 sm:$0xff]  }
  0xd3   :  { %5070 = vmatpush1.bf16.msra.mxu0 %v7251_v41  ;;  %5603 = vmatpush1.bf16.msra.mxu1 %v7254_v43  ;;  %v7343_v41 = vld [vmem:[%s10644_s1 + $0x864] ss:$16 sps:$4 sm:$0xff]   ;;  %v7346_v43 = vld [vmem:[%s10644_s1 + $0x86c] ss:$16 sps:$4 sm:$0xff]  }
  0xd4   :  { %5071 = vmatprep.subr.bf16.mxu0 %v7259_v44  ;;  %5604 = vmatprep.subr.bf16.mxu1 %v7262_v45  ;;  %v7341_v44 = vld [vmem:[%s10644_s1 + $0x860] ss:$16 sps:$4 sm:$0xff]   ;;  %v7344_v45 = vld [vmem:[%s10644_s1 + $0x868] ss:$16 sps:$4 sm:$0xff]  }
  0xd7   :  { %5072 = vmatpush1.bf16.msra.mxu0 %v7257_v46  ;;  %5605 = vmatpush1.bf16.msra.mxu1 %v7260_v47  ;;  %v7349_v46 = vld [vmem:[%s10644_s1 + $0x884] ss:$16 sps:$4 sm:$0xff]   ;;  %v7352_v47 = vld [vmem:[%s10644_s1 + $0x88c] ss:$16 sps:$4 sm:$0xff]  }
  0xd8   :  { %5073 = vmatprep.subr.bf16.mxu0 %v7265_v48  ;;  %5606 = vmatprep.subr.bf16.mxu1 %v7268_v50  ;;  %v7347_v48 = vld [vmem:[%s10644_s1 + $0x880] ss:$16 sps:$4 sm:$0xff]   ;;  %v7350_v50 = vld [vmem:[%s10644_s1 + $0x888] ss:$16 sps:$4 sm:$0xff]  }
  0xdb   :  { %5074 = vmatpush1.bf16.msra.mxu0 %v7263_v51  ;;  %5607 = vmatpush1.bf16.msra.mxu1 %v7266_v53  ;;  %v7355_v51 = vld [vmem:[%s10644_s1 + $0x8a4] ss:$16 sps:$4 sm:$0xff]   ;;  %v7358_v53 = vld [vmem:[%s10644_s1 + $0x8ac] ss:$16 sps:$4 sm:$0xff]  }
  0xdc   :  { %5075 = vmatprep.subr.bf16.mxu0 %v7271_v54  ;;  %5608 = vmatprep.subr.bf16.mxu1 %v7274_v55  ;;  %v7353_v54 = vld [vmem:[%s10644_s1 + $0x8a0] ss:$16 sps:$4 sm:$0xff]   ;;  %v7356_v55 = vld [vmem:[%s10644_s1 + $0x8a8] ss:$16 sps:$4 sm:$0xff]  }
  0xdf   :  { %5076 = vmatpush1.bf16.msra.mxu0 %v7269_v56  ;;  %5609 = vmatpush1.bf16.msra.mxu1 %v7272_v57  ;;  %v7361_v56 = vld [vmem:[%s10644_s1 + $0x8c4] ss:$16 sps:$4 sm:$0xff]   ;;  %v7364_v57 = vld [vmem:[%s10644_s1 + $0x8cc] ss:$16 sps:$4 sm:$0xff]  }
  0xe0   :  { %5077 = vmatprep.subr.bf16.mxu0 %v7277_v58  ;;  %5610 = vmatprep.subr.bf16.mxu1 %v7280_v59  ;;  %v7359_v58 = vld [vmem:[%s10644_s1 + $0x8c0] ss:$16 sps:$4 sm:$0xff]   ;;  %v7362_v59 = vld [vmem:[%s10644_s1 + $0x8c8] ss:$16 sps:$4 sm:$0xff]  }
  0xe3   :  { %5078 = vmatpush1.bf16.msra.mxu0 %v7275_v60  ;;  %5611 = vmatpush1.bf16.msra.mxu1 %v7278_v61  ;;  %v7367_v60 = vld [vmem:[%s10644_s1 + $0x8e4] ss:$16 sps:$4 sm:$0xff]   ;;  %v7370_v61 = vld [vmem:[%s10644_s1 + $0x8ec] ss:$16 sps:$4 sm:$0xff]  }
  0xe4   :  { %5079 = vmatprep.subr.bf16.mxu0 %v7283_v62  ;;  %5612 = vmatprep.subr.bf16.mxu1 %v7286_v63  ;;  %v7365_v62 = vld [vmem:[%s10644_s1 + $0x8e0] ss:$16 sps:$4 sm:$0xff]   ;;  %v7368_v63 = vld [vmem:[%s10644_s1 + $0x8e8] ss:$16 sps:$4 sm:$0xff]  }
  0xe7   :  { %5080 = vmatpush1.bf16.msra.mxu0 %v7281_v0  ;;  %5613 = vmatpush1.bf16.msra.mxu1 %v7284_v1  ;;  %v7373_v0 = vld [vmem:[%s10644_s1 + $0x904] ss:$16 sps:$4 sm:$0xff]   ;;  %v7376_v1 = vld [vmem:[%s10644_s1 + $0x90c] ss:$16 sps:$4 sm:$0xff]  }
  0xe8   :  { %5081 = vmatprep.subr.bf16.mxu0 %v7289_v2  ;;  %5614 = vmatprep.subr.bf16.mxu1 %v7292_v3  ;;  %v7371_v2 = vld [vmem:[%s10644_s1 + $0x900] ss:$16 sps:$4 sm:$0xff]   ;;  %v7374_v3 = vld [vmem:[%s10644_s1 + $0x908] ss:$16 sps:$4 sm:$0xff]  }
  0xeb   :  { %5082 = vmatpush1.bf16.msra.mxu0 %v7287_v4  ;;  %5615 = vmatpush1.bf16.msra.mxu1 %v7290_v5  ;;  %v7379_v4 = vld [vmem:[%s10644_s1 + $0x924] ss:$16 sps:$4 sm:$0xff]   ;;  %v7382_v5 = vld [vmem:[%s10644_s1 + $0x92c] ss:$16 sps:$4 sm:$0xff]  }
  0xec   :  { %5083 = vmatprep.subr.bf16.mxu0 %v7295_v6  ;;  %5616 = vmatprep.subr.bf16.mxu1 %v7298_v7  ;;  %v7377_v6 = vld [vmem:[%s10644_s1 + $0x920] ss:$16 sps:$4 sm:$0xff]   ;;  %v7380_v7 = vld [vmem:[%s10644_s1 + $0x928] ss:$16 sps:$4 sm:$0xff]  }
  0xef   :  { %5084 = vmatpush1.bf16.msra.mxu0 %v7293_v8  ;;  %5617 = vmatpush1.bf16.msra.mxu1 %v7296_v9  ;;  %v7385_v8 = vld [vmem:[%s10644_s1 + $0x944] ss:$16 sps:$4 sm:$0xff]   ;;  %v7388_v9 = vld [vmem:[%s10644_s1 + $0x94c] ss:$16 sps:$4 sm:$0xff]  }
  0xf0   :  { %5085 = vmatprep.subr.bf16.mxu0 %v7301_v10  ;;  %5618 = vmatprep.subr.bf16.mxu1 %v7304_v11  ;;  %v7383_v10 = vld [vmem:[%s10644_s1 + $0x940] ss:$16 sps:$4 sm:$0xff]   ;;  %v7386_v11 = vld [vmem:[%s10644_s1 + $0x948] ss:$16 sps:$4 sm:$0xff]  }
  0xf3   :  { %5086 = vmatpush1.bf16.msra.mxu0 %v7299_v12  ;;  %5619 = vmatpush1.bf16.msra.mxu1 %v7302_v52  ;;  %v7391_v12 = vld [vmem:[%s10644_s1 + $0x964] ss:$16 sps:$4 sm:$0xff]   ;;  %v7394_v52 = vld [vmem:[%s10644_s1 + $0x96c] ss:$16 sps:$4 sm:$0xff]  }
  0xf4   :  { %5087 = vmatprep.subr.bf16.mxu0 %v7307_v15  ;;  %5620 = vmatprep.subr.bf16.mxu1 %v7310_v16  ;;  %v7389_v15 = vld [vmem:[%s10644_s1 + $0x960] ss:$16 sps:$4 sm:$0xff]   ;;  %v7392_v16 = vld [vmem:[%s10644_s1 + $0x968] ss:$16 sps:$4 sm:$0xff]  }
  0xf7   :  { %5088 = vmatpush1.bf16.msra.mxu0 %v7305_v17  ;;  %5621 = vmatpush1.bf16.msra.mxu1 %v7308_v18  ;;  %v7397_v17 = vld [vmem:[%s10644_s1 + $0x984] ss:$16 sps:$4 sm:$0xff]   ;;  %v7400_v18 = vld [vmem:[%s10644_s1 + $0x98c] ss:$16 sps:$4 sm:$0xff]  }
  0xf8   :  { %5089 = vmatprep.subr.bf16.mxu0 %v7313_v19  ;;  %5622 = vmatprep.subr.bf16.mxu1 %v7316_v20  ;;  %v7395_v19 = vld [vmem:[%s10644_s1 + $0x980] ss:$16 sps:$4 sm:$0xff]   ;;  %v7398_v20 = vld [vmem:[%s10644_s1 + $0x988] ss:$16 sps:$4 sm:$0xff]  }
  0xfb   :  { %5090 = vmatpush1.bf16.msra.mxu0 %v7311_v22  ;;  %5623 = vmatpush1.bf16.msra.mxu1 %v7314_v23  ;;  %v7403_v22 = vld [vmem:[%s10644_s1 + $0x9a4] ss:$16 sps:$4 sm:$0xff]   ;;  %v7406_v23 = vld [vmem:[%s10644_s1 + $0x9ac] ss:$16 sps:$4 sm:$0xff]  }
  0xfc   :  { %5091 = vmatprep.subr.bf16.mxu0 %v7319_v24  ;;  %5624 = vmatprep.subr.bf16.mxu1 %v7322_v13  ;;  %v7401_v24 = vld [vmem:[%s10644_s1 + $0x9a0] ss:$16 sps:$4 sm:$0xff]   ;;  %v7404_v13 = vld [vmem:[%s10644_s1 + $0x9a8] ss:$16 sps:$4 sm:$0xff]  }
  0xff   :  { %5092 = vmatpush1.bf16.msra.mxu0 %v7317_v27  ;;  %5625 = vmatpush1.bf16.msra.mxu1 %v7320_v28  ;;  %v7409_v27 = vld [vmem:[%s10644_s1 + $0x9c4] ss:$16 sps:$4 sm:$0xff]   ;;  %v7412_v28 = vld [vmem:[%s10644_s1 + $0x9cc] ss:$16 sps:$4 sm:$0xff]  }
 0x100   :  { %5102 = vmatprep.subr.bf16.mxu0 %v7325_v29  ;;  %5635 = vmatprep.subr.bf16.mxu1 %v7328_v14  ;;  %v7407_v29 = vld [vmem:[%s10644_s1 + $0x9c0] ss:$16 sps:$4 sm:$0xff]   ;;  %v7410_v14 = vld [vmem:[%s10644_s1 + $0x9c8] ss:$16 sps:$4 sm:$0xff]  }
 0x102   :  { %5094 = vmatmul.mubr.bf16.vlgmr.msra.gmra.mrb[0].mxu0 %v875_v31  ;;  %5627 = vmatmul.mubr.bf16.vlgmr.msra.gmra.mrb[0].mxu1 %v875_v31  ;;  %v7418_v31 = vld [vmem:[%s10644_s1 + $0x9ec] ss:$16 sps:$4 sm:$0xff]  }
 0x103   :  { %5103 = vmatpush1.bf16.msra.mxu0 %v7323_v25  ;;  %5636 = vmatpush1.bf16.msra.mxu1 %v7326_v32  ;;  %v7413_v25 = vld [vmem:[%s10644_s1 + $0x9e0] ss:$16 sps:$4 sm:$0xff]   ;;  %v7416_v32 = vld [vmem:[%s10644_s1 + $0x9e8] ss:$16 sps:$4 sm:$0xff]  }
 0x104   :  { %5104 = vmatprep.subr.bf16.mxu0 %v7331_v33  ;;  %5637 = vmatprep.subr.bf16.mxu1 %v7334_v26  ;;  %v7421_v33 = vld [vmem:[%s10644_s1 + $0xa04] ss:$16 sps:$4 sm:$0xff]   ;;  %v7424_v26 = vld [vmem:[%s10644_s1 + $0xa0c] ss:$16 sps:$4 sm:$0xff]  }
 0x105   :  { %5134 = vmatprep.mubr.bf16.mxu0 %v8977_v34  ;;  %5667 = vmatprep.mubr.bf16.mxu1 %v8977_v34 }
 0x107   :  { %5105 = vmatpush1.bf16.msra.mxu0 %v7329_v35  ;;  %5638 = vmatpush1.bf16.msra.mxu1 %v7332_v36  ;;  %v9163_v35 = vrot.slane %v8934_v21, %v8276_v49  ;;  %v7419_v36 = vld [vmem:[%s10644_s1 + $0xa00] ss:$16 sps:$4 sm:$0xff]   ;;  %v7430_v21 = vld [vmem:[%s10644_s1 + $0xa2c] ss:$16 sps:$4 sm:$0xff]  }
 0x108   :  { %5106 = vmatprep.subr.bf16.mxu0 %v7337_v37  ;;  %5639 = vmatprep.subr.bf16.mxu1 %v7340_v38  ;;  %v7422_v37 = vld [vmem:[%s10644_s1 + $0xa08] ss:$16 sps:$4 sm:$0xff]   ;;  %v7427_v38 = vld [vmem:[%s10644_s1 + $0xa24] ss:$16 sps:$4 sm:$0xff]  }
 0x10b   :  { %5107 = vmatpush1.bf16.msra.mxu0 %v7335_v39  ;;  %5640 = vmatpush1.bf16.msra.mxu1 %v7338_v40  ;;  %v925_v39 = vcombine.high %v8977_v34, %v8977_v34  ;;  %v7425_v40 = vld [vmem:[%s10644_s1 + $0xa20] ss:$16 sps:$4 sm:$0xff]   ;;  %v7433_v34 = vld [vmem:[%s10644_s1 + $0xa44] ss:$16 sps:$4 sm:$0xff]  }
 0x10c   :  { %5108 = vmatprep.subr.bf16.mxu0 %v7343_v41  ;;  %5641 = vmatprep.subr.bf16.mxu1 %v7346_v43  ;;  %v7428_v41 = vld [vmem:[%s10644_s1 + $0xa28] ss:$16 sps:$4 sm:$0xff]   ;;  %v7436_v43 = vld [vmem:[%s10644_s1 + $0xa4c] ss:$16 sps:$4 sm:$0xff]  }
 0x10f   :  { %5109 = vmatpush1.bf16.msra.mxu0 %v7341_v44  ;;  %5642 = vmatpush1.bf16.msra.mxu1 %v7344_v45  ;;  %v7431_v44 = vld [vmem:[%s10644_s1 + $0xa40] ss:$16 sps:$4 sm:$0xff]   ;;  %v7434_v45 = vld [vmem:[%s10644_s1 + $0xa48] ss:$16 sps:$4 sm:$0xff]  }
 0x110   :  { %5110 = vmatprep.subr.bf16.mxu0 %v7349_v46  ;;  %5643 = vmatprep.subr.bf16.mxu1 %v7352_v47  ;;  %v7439_v46 = vld [vmem:[%s10644_s1 + $0xa64] ss:$16 sps:$4 sm:$0xff]   ;;  %v7442_v47 = vld [vmem:[%s10644_s1 + $0xa6c] ss:$16 sps:$4 sm:$0xff]  }
 0x113   :  { %5111 = vmatpush1.bf16.msra.mxu0 %v7347_v48  ;;  %5644 = vmatpush1.bf16.msra.mxu1 %v7350_v50  ;;  %v7437_v48 = vld [vmem:[%s10644_s1 + $0xa60] ss:$16 sps:$4 sm:$0xff]   ;;  %v7440_v50 = vld [vmem:[%s10644_s1 + $0xa68] ss:$16 sps:$4 sm:$0xff]  }
 0x114   :  { %5112 = vmatprep.subr.bf16.mxu0 %v7355_v51  ;;  %5645 = vmatprep.subr.bf16.mxu1 %v7358_v53  ;;  %v7445_v51 = vld [vmem:[%s10644_s1 + $0xa84] ss:$16 sps:$4 sm:$0xff]   ;;  %v7448_v53 = vld [vmem:[%s10644_s1 + $0xa8c] ss:$16 sps:$4 sm:$0xff]  }
 0x117   :  { %5113 = vmatpush1.bf16.msra.mxu0 %v7353_v54  ;;  %5646 = vmatpush1.bf16.msra.mxu1 %v7356_v55  ;;  %v7443_v54 = vld [vmem:[%s10644_s1 + $0xa80] ss:$16 sps:$4 sm:$0xff]   ;;  %v7446_v55 = vld [vmem:[%s10644_s1 + $0xa88] ss:$16 sps:$4 sm:$0xff]  }
 0x118   :  { %5114 = vmatprep.subr.bf16.mxu0 %v7361_v56  ;;  %5647 = vmatprep.subr.bf16.mxu1 %v7364_v57  ;;  %v7451_v56 = vld [vmem:[%s10644_s1 + $0xaa4] ss:$16 sps:$4 sm:$0xff]   ;;  %v7454_v57 = vld [vmem:[%s10644_s1 + $0xaac] ss:$16 sps:$4 sm:$0xff]  }
 0x11b   :  { %5115 = vmatpush1.bf16.msra.mxu0 %v7359_v58  ;;  %5648 = vmatpush1.bf16.msra.mxu1 %v7362_v59  ;;  %v7449_v58 = vld [vmem:[%s10644_s1 + $0xaa0] ss:$16 sps:$4 sm:$0xff]   ;;  %v7452_v59 = vld [vmem:[%s10644_s1 + $0xaa8] ss:$16 sps:$4 sm:$0xff]  }
 0x11c   :  { %5116 = vmatprep.subr.bf16.mxu0 %v7367_v60  ;;  %5649 = vmatprep.subr.bf16.mxu1 %v7370_v61  ;;  %v7457_v60 = vld [vmem:[%s10644_s1 + $0xac4] ss:$16 sps:$4 sm:$0xff]   ;;  %v7460_v61 = vld [vmem:[%s10644_s1 + $0xacc] ss:$16 sps:$4 sm:$0xff]  }
 0x11f   :  { %5117 = vmatpush1.bf16.msra.mxu0 %v7365_v62  ;;  %5650 = vmatpush1.bf16.msra.mxu1 %v7368_v63  ;;  %v7455_v62 = vld [vmem:[%s10644_s1 + $0xac0] ss:$16 sps:$4 sm:$0xff]   ;;  %v7458_v63 = vld [vmem:[%s10644_s1 + $0xac8] ss:$16 sps:$4 sm:$0xff]  }
 0x120   :  { %5118 = vmatprep.subr.bf16.mxu0 %v7373_v0  ;;  %5651 = vmatprep.subr.bf16.mxu1 %v7376_v1  ;;  %v7463_v0 = vld [vmem:[%s10644_s1 + $0xae4] ss:$16 sps:$4 sm:$0xff]   ;;  %v7466_v1 = vld [vmem:[%s10644_s1 + $0xaec] ss:$16 sps:$4 sm:$0xff]  }
 0x123   :  { %5119 = vmatpush1.bf16.msra.mxu0 %v7371_v2  ;;  %5652 = vmatpush1.bf16.msra.mxu1 %v7374_v3  ;;  %v7461_v2 = vld [vmem:[%s10644_s1 + $0xae0] ss:$16 sps:$4 sm:$0xff]   ;;  %v7464_v3 = vld [vmem:[%s10644_s1 + $0xae8] ss:$16 sps:$4 sm:$0xff]  }
 0x124   :  { %5120 = vmatprep.subr.bf16.mxu0 %v7379_v4  ;;  %5653 = vmatprep.subr.bf16.mxu1 %v7382_v5  ;;  %v7469_v4 = vld [vmem:[%s10644_s1 + $0xb04] ss:$16 sps:$4 sm:$0xff]   ;;  %v7472_v5 = vld [vmem:[%s10644_s1 + $0xb0c] ss:$16 sps:$4 sm:$0xff]  }
 0x127   :  { %5121 = vmatpush1.bf16.msra.mxu0 %v7377_v6  ;;  %5654 = vmatpush1.bf16.msra.mxu1 %v7380_v7  ;;  %v7467_v6 = vld [vmem:[%s10644_s1 + $0xb00] ss:$16 sps:$4 sm:$0xff]   ;;  %v7470_v7 = vld [vmem:[%s10644_s1 + $0xb08] ss:$16 sps:$4 sm:$0xff]  }
 0x128   :  { %5122 = vmatprep.subr.bf16.mxu0 %v7385_v8  ;;  %5655 = vmatprep.subr.bf16.mxu1 %v7388_v9  ;;  %v7475_v8 = vld [vmem:[%s10644_s1 + $0xb24] ss:$16 sps:$4 sm:$0xff]   ;;  %v7478_v9 = vld [vmem:[%s10644_s1 + $0xb2c] ss:$16 sps:$4 sm:$0xff]  }
 0x12b   :  { %5123 = vmatpush1.bf16.msra.mxu0 %v7383_v10  ;;  %5656 = vmatpush1.bf16.msra.mxu1 %v7386_v11  ;;  %v7473_v10 = vld [vmem:[%s10644_s1 + $0xb20] ss:$16 sps:$4 sm:$0xff]   ;;  %v7476_v11 = vld [vmem:[%s10644_s1 + $0xb28] ss:$16 sps:$4 sm:$0xff]  }
 0x12c   :  { %5124 = vmatprep.subr.bf16.mxu0 %v7391_v12  ;;  %5657 = vmatprep.subr.bf16.mxu1 %v7394_v52  ;;  %v7481_v12 = vld [vmem:[%s10644_s1 + $0xb44] ss:$16 sps:$4 sm:$0xff]   ;;  %v7484_v52 = vld [vmem:[%s10644_s1 + $0xb4c] ss:$16 sps:$4 sm:$0xff]  }
 0x12f   :  { %5125 = vmatpush1.bf16.msra.mxu0 %v7389_v15  ;;  %5658 = vmatpush1.bf16.msra.mxu1 %v7392_v16  ;;  %v7479_v15 = vld [vmem:[%s10644_s1 + $0xb40] ss:$16 sps:$4 sm:$0xff]   ;;  %v7482_v16 = vld [vmem:[%s10644_s1 + $0xb48] ss:$16 sps:$4 sm:$0xff]  }
 0x130   :  { %5126 = vmatprep.subr.bf16.mxu0 %v7397_v17  ;;  %5659 = vmatprep.subr.bf16.mxu1 %v7400_v18  ;;  %v7487_v17 = vld [vmem:[%s10644_s1 + $0xb64] ss:$16 sps:$4 sm:$0xff]   ;;  %v7490_v18 = vld [vmem:[%s10644_s1 + $0xb6c] ss:$16 sps:$4 sm:$0xff]  }
 0x133   :  { %5127 = vmatpush1.bf16.msra.mxu0 %v7395_v19  ;;  %5660 = vmatpush1.bf16.msra.mxu1 %v7398_v20  ;;  %v7485_v19 = vld [vmem:[%s10644_s1 + $0xb60] ss:$16 sps:$4 sm:$0xff]   ;;  %v7488_v20 = vld [vmem:[%s10644_s1 + $0xb68] ss:$16 sps:$4 sm:$0xff]  }
 0x134   :  { %5128 = vmatprep.subr.bf16.mxu0 %v7403_v22  ;;  %5661 = vmatprep.subr.bf16.mxu1 %v7406_v23  ;;  %v7493_v22 = vld [vmem:[%s10644_s1 + $0xb84] ss:$16 sps:$4 sm:$0xff]   ;;  %v7496_v23 = vld [vmem:[%s10644_s1 + $0xb8c] ss:$16 sps:$4 sm:$0xff]  }
 0x137   :  { %5129 = vmatpush1.bf16.msra.mxu0 %v7401_v24  ;;  %5662 = vmatpush1.bf16.msra.mxu1 %v7404_v13  ;;  %v7491_v24 = vld [vmem:[%s10644_s1 + $0xb80] ss:$16 sps:$4 sm:$0xff]   ;;  %v7494_v13 = vld [vmem:[%s10644_s1 + $0xb88] ss:$16 sps:$4 sm:$0xff]  }
 0x138   :  { %5130 = vmatprep.subr.bf16.mxu0 %v7409_v27  ;;  %5663 = vmatprep.subr.bf16.mxu1 %v7412_v28  ;;  %v7499_v27 = vld [vmem:[%s10644_s1 + $0xba4] ss:$16 sps:$4 sm:$0xff]   ;;  %v7502_v28 = vld [vmem:[%s10644_s1 + $0xbac] ss:$16 sps:$4 sm:$0xff]  }
 0x13b   :  { %5131 = vmatpush1.bf16.msra.mxu0 %v7407_v29  ;;  %5664 = vmatpush1.bf16.msra.mxu1 %v7410_v14  ;;  %v7497_v29 = vld [vmem:[%s10644_s1 + $0xba0] ss:$16 sps:$4 sm:$0xff]   ;;  %v7500_v14 = vld [vmem:[%s10644_s1 + $0xba8] ss:$16 sps:$4 sm:$0xff]  }
 0x13c   :  { %5132 = vmatprep.subr.bf16.mxu0 %v7415_v30  ;;  %5665 = vmatprep.subr.bf16.mxu1 %v7418_v31  ;;  %v7505_v30 = vld [vmem:[%s10644_s1 + $0xbc4] ss:$16 sps:$4 sm:$0xff]   ;;  %v7508_v31 = vld [vmem:[%s10644_s1 + $0xbcc] ss:$16 sps:$4 sm:$0xff]  }
 0x13f   :  { %5133 = vmatpush1.bf16.msra.mxu0 %v7413_v25  ;;  %5666 = vmatpush1.bf16.msra.mxu1 %v7416_v32  ;;  %v8117_v25 = vld [vmem:[%s10645_s0 + $0x8] sm:$0xff] }
 0x140   :  { %5143 = vmatprep.subr.bf16.mxu0 %v7421_v33  ;;  %5676 = vmatprep.subr.bf16.mxu1 %v7424_v26  ;;  %v878_v32 = vcombine.high %v8117_v25, %v8117_v25  ;;  %v7503_v33 = vld [vmem:[%s10644_s1 + $0xbc0] ss:$16 sps:$4 sm:$0xff]   ;;  %v7506_v26 = vld [vmem:[%s10644_s1 + $0xbc8] ss:$16 sps:$4 sm:$0xff]  }
 0x141   :  { %v7587_v25 = vld [vmem:[%s10644_s1 + $0xd80] ss:$16 sps:$4 sm:$0xff]  }
 0x142   :  { %5135 = vmatmul.mubr.bf16.vlgmr.msra.gmra.mrb[0].mxu0 %v9163_v35  ;;  %5668 = vmatmul.mubr.bf16.vlgmr.msra.gmra.mrb[0].mxu1 %v9163_v35 }
 0x143   :  { %5144 = vmatpush1.bf16.msra.mxu0 %v7419_v36  ;;  %5677 = vmatpush1.bf16.msra.mxu1 %v7422_v37  ;;  %v7511_v36 = vld [vmem:[%s10644_s1 + $0xbe4] ss:$16 sps:$4 sm:$0xff]   ;;  %v7514_v37 = vld [vmem:[%s10644_s1 + $0xbec] ss:$16 sps:$4 sm:$0xff]  }
 0x144   :  { %5145 = vmatprep.subr.bf16.mxu0 %v7427_v38  ;;  %5678 = vmatprep.subr.bf16.mxu1 %v7430_v21  ;;  %v9353_v38 = vrot.slane %v878_v32, %v8276_v49  ;;  %v7509_v21 = vld [vmem:[%s10644_s1 + $0xbe0] ss:$16 sps:$4 sm:$0xff]   ;;  %v7590_v32 = vld [vmem:[%s10644_s1 + $0xd88] ss:$16 sps:$4 sm:$0xff]  }
 0x145   :  { %5175 = vmatprep.mubr.bf16.mxu0 %v925_v39  ;;  %5708 = vmatprep.mubr.bf16.mxu1 %v925_v39  ;;  %v7512_v39 = vld [vmem:[%s10644_s1 + $0xbe8] ss:$16 sps:$4 sm:$0xff]  }
 0x147   :  { %5146 = vmatpush1.bf16.msra.mxu0 %v7425_v40  ;;  %5679 = vmatpush1.bf16.msra.mxu1 %v7428_v41  ;;  %v7517_v40 = vld [vmem:[%s10644_s1 + $0xc04] ss:$16 sps:$4 sm:$0xff]   ;;  %v7520_v41 = vld [vmem:[%s10644_s1 + $0xc0c] ss:$16 sps:$4 sm:$0xff]  }
 0x148   :  { %5147 = vmatprep.subr.bf16.mxu0 %v7433_v34  ;;  %5680 = vmatprep.subr.bf16.mxu1 %v7436_v43  ;;  %v894_v34 = vcombine.high %v9353_v38, %v9353_v38  ;;  %v923_v43 = vcombine.high %v9163_v35, %v9163_v35  ;;  %v7526_v35 = vld [vmem:[%s10644_s1 + $0xc2c] ss:$16 sps:$4 sm:$0xff]  }
 0x14b   :  { %5148 = vmatpush1.bf16.msra.mxu0 %v7431_v44  ;;  %5681 = vmatpush1.bf16.msra.mxu1 %v7434_v45  ;;  %v7515_v44 = vld [vmem:[%s10644_s1 + $0xc00] ss:$16 sps:$4 sm:$0xff]   ;;  %v7518_v45 = vld [vmem:[%s10644_s1 + $0xc08] ss:$16 sps:$4 sm:$0xff]  }
 0x14c   :  { %5149 = vmatprep.subr.bf16.mxu0 %v7439_v46  ;;  %5682 = vmatprep.subr.bf16.mxu1 %v7442_v47  ;;  %v7523_v46 = vld [vmem:[%s10644_s1 + $0xc24] ss:$16 sps:$4 sm:$0xff]   ;;  %v9384_v47 = vrot.slane %v894_v34, %v8276_v49 }
 0x14d   :  { %v7607_v34 = vld [vmem:[%s10644_s1 + $0xde4] ss:$16 sps:$4 sm:$0xff]  }
 0x14f   :  { %5150 = vmatpush1.bf16.msra.mxu0 %v7437_v48  ;;  %5683 = vmatpush1.bf16.msra.mxu1 %v7440_v50  ;;  %v7521_v48 = vld [vmem:[%s10644_s1 + $0xc20] ss:$16 sps:$4 sm:$0xff]   ;;  %v7524_v50 = vld [vmem:[%s10644_s1 + $0xc28] ss:$16 sps:$4 sm:$0xff]  }
 0x150   :  { %5151 = vmatprep.subr.bf16.mxu0 %v7445_v51  ;;  %5684 = vmatprep.subr.bf16.mxu1 %v7448_v53  ;;  %v7529_v51 = vld [vmem:[%s10644_s1 + $0xc44] ss:$16 sps:$4 sm:$0xff]   ;;  %v7532_v53 = vld [vmem:[%s10644_s1 + $0xc4c] ss:$16 sps:$4 sm:$0xff]  }
 0x153   :  { %5152 = vmatpush1.bf16.msra.mxu0 %v7443_v54  ;;  %5685 = vmatpush1.bf16.msra.mxu1 %v7446_v55  ;;  %v7527_v54 = vld [vmem:[%s10644_s1 + $0xc40] ss:$16 sps:$4 sm:$0xff]   ;;  %v7530_v55 = vld [vmem:[%s10644_s1 + $0xc48] ss:$16 sps:$4 sm:$0xff]  }
 0x154   :  { %5153 = vmatprep.subr.bf16.mxu0 %v7451_v56  ;;  %5686 = vmatprep.subr.bf16.mxu1 %v7454_v57  ;;  %v7535_v56 = vld [vmem:[%s10644_s1 + $0xc64] ss:$16 sps:$4 sm:$0xff]   ;;  %v7538_v57 = vld [vmem:[%s10644_s1 + $0xc6c] ss:$16 sps:$4 sm:$0xff]  }
 0x157   :  { %5154 = vmatpush1.bf16.msra.mxu0 %v7449_v58  ;;  %5687 = vmatpush1.bf16.msra.mxu1 %v7452_v59  ;;  %v7533_v58 = vld [vmem:[%s10644_s1 + $0xc60] ss:$16 sps:$4 sm:$0xff]   ;;  %v7536_v59 = vld [vmem:[%s10644_s1 + $0xc68] ss:$16 sps:$4 sm:$0xff]  }
 0x158   :  { %5155 = vmatprep.subr.bf16.mxu0 %v7457_v60  ;;  %5688 = vmatprep.subr.bf16.mxu1 %v7460_v61  ;;  %v7541_v60 = vld [vmem:[%s10644_s1 + $0xc84] ss:$16 sps:$4 sm:$0xff]   ;;  %v7544_v61 = vld [vmem:[%s10644_s1 + $0xc8c] ss:$16 sps:$4 sm:$0xff]  }
 0x15b   :  { %5156 = vmatpush1.bf16.msra.mxu0 %v7455_v62  ;;  %5689 = vmatpush1.bf16.msra.mxu1 %v7458_v63  ;;  %v7539_v62 = vld [vmem:[%s10644_s1 + $0xc80] ss:$16 sps:$4 sm:$0xff]   ;;  %v7542_v63 = vld [vmem:[%s10644_s1 + $0xc88] ss:$16 sps:$4 sm:$0xff]  }
 0x15c   :  { %5157 = vmatprep.subr.bf16.mxu0 %v7463_v0  ;;  %5690 = vmatprep.subr.bf16.mxu1 %v7466_v1  ;;  %v7547_v0 = vld [vmem:[%s10644_s1 + $0xca4] ss:$16 sps:$4 sm:$0xff]   ;;  %v7550_v1 = vld [vmem:[%s10644_s1 + $0xcac] ss:$16 sps:$4 sm:$0xff]  }
 0x15f   :  { %5158 = vmatpush1.bf16.msra.mxu0 %v7461_v2  ;;  %5691 = vmatpush1.bf16.msra.mxu1 %v7464_v3  ;;  %v7545_v2 = vld [vmem:[%s10644_s1 + $0xca0] ss:$16 sps:$4 sm:$0xff]   ;;  %v7548_v3 = vld [vmem:[%s10644_s1 + $0xca8] ss:$16 sps:$4 sm:$0xff]  }
 0x160   :  { %5159 = vmatprep.subr.bf16.mxu0 %v7469_v4  ;;  %5692 = vmatprep.subr.bf16.mxu1 %v7472_v5  ;;  %v7553_v4 = vld [vmem:[%s10644_s1 + $0xcc4] ss:$16 sps:$4 sm:$0xff]   ;;  %v7556_v5 = vld [vmem:[%s10644_s1 + $0xccc] ss:$16 sps:$4 sm:$0xff]  }
 0x163   :  { %5160 = vmatpush1.bf16.msra.mxu0 %v7467_v6  ;;  %5693 = vmatpush1.bf16.msra.mxu1 %v7470_v7  ;;  %v7551_v6 = vld [vmem:[%s10644_s1 + $0xcc0] ss:$16 sps:$4 sm:$0xff]   ;;  %v7554_v7 = vld [vmem:[%s10644_s1 + $0xcc8] ss:$16 sps:$4 sm:$0xff]  }
 0x164   :  { %5161 = vmatprep.subr.bf16.mxu0 %v7475_v8  ;;  %5694 = vmatprep.subr.bf16.mxu1 %v7478_v9  ;;  %v7559_v8 = vld [vmem:[%s10644_s1 + $0xce4] ss:$16 sps:$4 sm:$0xff]   ;;  %v7562_v9 = vld [vmem:[%s10644_s1 + $0xcec] ss:$16 sps:$4 sm:$0xff]  }
 0x167   :  { %5162 = vmatpush1.bf16.msra.mxu0 %v7473_v10  ;;  %5695 = vmatpush1.bf16.msra.mxu1 %v7476_v11  ;;  %v7557_v10 = vld [vmem:[%s10644_s1 + $0xce0] ss:$16 sps:$4 sm:$0xff]   ;;  %v7560_v11 = vld [vmem:[%s10644_s1 + $0xce8] ss:$16 sps:$4 sm:$0xff]  }
 0x168   :  { %5163 = vmatprep.subr.bf16.mxu0 %v7481_v12  ;;  %5696 = vmatprep.subr.bf16.mxu1 %v7484_v52  ;;  %v7565_v12 = vld [vmem:[%s10644_s1 + $0xd04] ss:$16 sps:$4 sm:$0xff]   ;;  %v7568_v52 = vld [vmem:[%s10644_s1 + $0xd0c] ss:$16 sps:$4 sm:$0xff]  }
 0x16b   :  { %5164 = vmatpush1.bf16.msra.mxu0 %v7479_v15  ;;  %5697 = vmatpush1.bf16.msra.mxu1 %v7482_v16  ;;  %v7563_v15 = vld [vmem:[%s10644_s1 + $0xd00] ss:$16 sps:$4 sm:$0xff]   ;;  %v7566_v16 = vld [vmem:[%s10644_s1 + $0xd08] ss:$16 sps:$4 sm:$0xff]  }
 0x16c   :  { %5165 = vmatprep.subr.bf16.mxu0 %v7487_v17  ;;  %5698 = vmatprep.subr.bf16.mxu1 %v7490_v18  ;;  %v7571_v17 = vld [vmem:[%s10644_s1 + $0xd24] ss:$16 sps:$4 sm:$0xff]   ;;  %v7574_v18 = vld [vmem:[%s10644_s1 + $0xd2c] ss:$16 sps:$4 sm:$0xff]  }
 0x16f   :  { %5166 = vmatpush1.bf16.msra.mxu0 %v7485_v19  ;;  %5699 = vmatpush1.bf16.msra.mxu1 %v7488_v20  ;;  %v7569_v19 = vld [vmem:[%s10644_s1 + $0xd20] ss:$16 sps:$4 sm:$0xff]   ;;  %v7572_v20 = vld [vmem:[%s10644_s1 + $0xd28] ss:$16 sps:$4 sm:$0xff]  }
 0x170   :  { %5167 = vmatprep.subr.bf16.mxu0 %v7493_v22  ;;  %5700 = vmatprep.subr.bf16.mxu1 %v7496_v23  ;;  %v7577_v22 = vld [vmem:[%s10644_s1 + $0xd44] ss:$16 sps:$4 sm:$0xff]   ;;  %v7580_v23 = vld [vmem:[%s10644_s1 + $0xd4c] ss:$16 sps:$4 sm:$0xff]  }
 0x173   :  { %5168 = vmatpush1.bf16.msra.mxu0 %v7491_v24  ;;  %5701 = vmatpush1.bf16.msra.mxu1 %v7494_v13  ;;  %v7575_v24 = vld [vmem:[%s10644_s1 + $0xd40] ss:$16 sps:$4 sm:$0xff]   ;;  %v7578_v13 = vld [vmem:[%s10644_s1 + $0xd48] ss:$16 sps:$4 sm:$0xff]  }
 0x174   :  { %5169 = vmatprep.subr.bf16.mxu0 %v7499_v27  ;;  %5702 = vmatprep.subr.bf16.mxu1 %v7502_v28  ;;  %v7583_v27 = vld [vmem:[%s10644_s1 + $0xd64] ss:$16 sps:$4 sm:$0xff]   ;;  %v7586_v28 = vld [vmem:[%s10644_s1 + $0xd6c] ss:$16 sps:$4 sm:$0xff]  }
 0x177   :  { %5170 = vmatpush1.bf16.msra.mxu0 %v7497_v29  ;;  %5703 = vmatpush1.bf16.msra.mxu1 %v7500_v14  ;;  %v7581_v29 = vld [vmem:[%s10644_s1 + $0xd60] ss:$16 sps:$4 sm:$0xff]   ;;  %v7584_v14 = vld [vmem:[%s10644_s1 + $0xd68] ss:$16 sps:$4 sm:$0xff]  }
 0x178   :  { %5171 = vmatprep.subr.bf16.mxu0 %v7505_v30  ;;  %5704 = vmatprep.subr.bf16.mxu1 %v7508_v31  ;;  %v7589_v30 = vld [vmem:[%s10644_s1 + $0xd84] ss:$16 sps:$4 sm:$0xff]   ;;  %v7592_v31 = vld [vmem:[%s10644_s1 + $0xd8c] ss:$16 sps:$4 sm:$0xff]  }
 0x17b   :  { %5172 = vmatpush1.bf16.msra.mxu0 %v7503_v33  ;;  %5705 = vmatpush1.bf16.msra.mxu1 %v7506_v26  ;;  %v7595_v33 = vld [vmem:[%s10644_s1 + $0xda4] ss:$16 sps:$4 sm:$0xff]   ;;  %v7598_v26 = vld [vmem:[%s10644_s1 + $0xdac] ss:$16 sps:$4 sm:$0xff]  }
 0x17c   :  { %5173 = vmatprep.subr.bf16.mxu0 %v7511_v36  ;;  %5706 = vmatprep.subr.bf16.mxu1 %v7514_v37  ;;  %v7593_v36 = vld [vmem:[%s10644_s1 + $0xda0] ss:$16 sps:$4 sm:$0xff]   ;;  %v7596_v37 = vld [vmem:[%s10644_s1 + $0xda8] ss:$16 sps:$4 sm:$0xff]  }
 0x17f   :  { %5174 = vmatpush1.bf16.msra.mxu0 %v7509_v21  ;;  %5707 = vmatpush1.bf16.msra.mxu1 %v7512_v39  ;;  %v7601_v21 = vld [vmem:[%s10644_s1 + $0xdc4] ss:$16 sps:$4 sm:$0xff]   ;;  %v7604_v39 = vld [vmem:[%s10644_s1 + $0xdcc] ss:$16 sps:$4 sm:$0xff]  }
 0x180   :  { %5184 = vmatprep.subr.bf16.mxu0 %v7517_v40  ;;  %5717 = vmatprep.subr.bf16.mxu1 %v7520_v41  ;;  %v7599_v40 = vld [vmem:[%s10644_s1 + $0xdc0] ss:$16 sps:$4 sm:$0xff]   ;;  %v7602_v41 = vld [vmem:[%s10644_s1 + $0xdc8] ss:$16 sps:$4 sm:$0xff]  }
 0x182   :  { %5176 = vmatmul.mubr.bf16.vlgmr.msra.gmra.mrb[0].mxu0 %v923_v43  ;;  %5709 = vmatmul.mubr.bf16.vlgmr.msra.gmra.mrb[0].mxu1 %v923_v43  ;;  %v7610_v43 = vld [vmem:[%s10644_s1 + $0xdec] ss:$16 sps:$4 sm:$0xff]  }
 0x183   :  { %5185 = vmatpush1.bf16.msra.mxu0 %v7515_v44  ;;  %5718 = vmatpush1.bf16.msra.mxu1 %v7518_v45  ;;  %v7605_v44 = vld [vmem:[%s10644_s1 + $0xde0] ss:$16 sps:$4 sm:$0xff]   ;;  %v7608_v45 = vld [vmem:[%s10644_s1 + $0xde8] ss:$16 sps:$4 sm:$0xff]  }
 0x184   :  { %5186 = vmatprep.subr.bf16.mxu0 %v7523_v46  ;;  %5719 = vmatprep.subr.bf16.mxu1 %v7526_v35  ;;  %v7614_v46 = vld [vmem:[%s10644_s1 + $0xe04] ss:$16 sps:$4 sm:$0xff]   ;;  %v7617_v35 = vld [vmem:[%s10644_s1 + $0xe0c] ss:$16 sps:$4 sm:$0xff]  }
 0x185   :  { %5216 = vmatprep.mubr.bf16.mxu0 %v9384_v47  ;;  %5749 = vmatprep.mubr.bf16.mxu1 %v9384_v47 }
 0x187   :  { %5187 = vmatpush1.bf16.msra.mxu0 %v7521_v48  ;;  %5720 = vmatpush1.bf16.msra.mxu1 %v7524_v50  ;;  %v9570_v48 = vrot.slane %v9353_v38, %v8276_v49  ;;  %v7612_v50 = vld [vmem:[%s10644_s1 + $0xe00] ss:$16 sps:$4 sm:$0xff]   ;;  %v7623_v38 = vld [vmem:[%s10644_s1 + $0xe2c] ss:$16 sps:$4 sm:$0xff]  }
 0x188   :  { %5188 = vmatprep.subr.bf16.mxu0 %v7529_v51  ;;  %5721 = vmatprep.subr.bf16.mxu1 %v7532_v53  ;;  %v7615_v51 = vld [vmem:[%s10644_s1 + $0xe08] ss:$16 sps:$4 sm:$0xff]   ;;  %v7620_v53 = vld [vmem:[%s10644_s1 + $0xe24] ss:$16 sps:$4 sm:$0xff]  }
 0x18b   :  { %5189 = vmatpush1.bf16.msra.mxu0 %v7527_v54  ;;  %5722 = vmatpush1.bf16.msra.mxu1 %v7530_v55  ;;  %v926_v54 = vcombine.high %v9384_v47, %v9384_v47  ;;  %v7618_v55 = vld [vmem:[%s10644_s1 + $0xe20] ss:$16 sps:$4 sm:$0xff]   ;;  %v7626_v47 = vld [vmem:[%s10644_s1 + $0xe44] ss:$16 sps:$4 sm:$0xff]  }
 0x18c   :  { %5190 = vmatprep.subr.bf16.mxu0 %v7535_v56  ;;  %5723 = vmatprep.subr.bf16.mxu1 %v7538_v57  ;;  %v7621_v56 = vld [vmem:[%s10644_s1 + $0xe28] ss:$16 sps:$4 sm:$0xff]   ;;  %v7629_v57 = vld [vmem:[%s10644_s1 + $0xe4c] ss:$16 sps:$4 sm:$0xff]  }
 0x18f   :  { %5191 = vmatpush1.bf16.msra.mxu0 %v7533_v58  ;;  %5724 = vmatpush1.bf16.msra.mxu1 %v7536_v59  ;;  %v7624_v58 = vld [vmem:[%s10644_s1 + $0xe40] ss:$16 sps:$4 sm:$0xff]   ;;  %v7627_v59 = vld [vmem:[%s10644_s1 + $0xe48] ss:$16 sps:$4 sm:$0xff]  }
 0x190   :  { %5192 = vmatprep.subr.bf16.mxu0 %v7541_v60  ;;  %5725 = vmatprep.subr.bf16.mxu1 %v7544_v61  ;;  %v7632_v60 = vld [vmem:[%s10644_s1 + $0xe64] ss:$16 sps:$4 sm:$0xff]   ;;  %v7635_v61 = vld [vmem:[%s10644_s1 + $0xe6c] ss:$16 sps:$4 sm:$0xff]  }
 0x193   :  { %5193 = vmatpush1.bf16.msra.mxu0 %v7539_v62  ;;  %5726 = vmatpush1.bf16.msra.mxu1 %v7542_v63  ;;  %v7630_v62 = vld [vmem:[%s10644_s1 + $0xe60] ss:$16 sps:$4 sm:$0xff]   ;;  %v7633_v63 = vld [vmem:[%s10644_s1 + $0xe68] ss:$16 sps:$4 sm:$0xff]  }
 0x194   :  { %5194 = vmatprep.subr.bf16.mxu0 %v7547_v0  ;;  %5727 = vmatprep.subr.bf16.mxu1 %v7550_v1  ;;  %v7638_v0 = vld [vmem:[%s10644_s1 + $0xe84] ss:$16 sps:$4 sm:$0xff]   ;;  %v7641_v1 = vld [vmem:[%s10644_s1 + $0xe8c] ss:$16 sps:$4 sm:$0xff]  }
 0x197   :  { %5195 = vmatpush1.bf16.msra.mxu0 %v7545_v2  ;;  %5728 = vmatpush1.bf16.msra.mxu1 %v7548_v3  ;;  %v7636_v2 = vld [vmem:[%s10644_s1 + $0xe80] ss:$16 sps:$4 sm:$0xff]   ;;  %v7639_v3 = vld [vmem:[%s10644_s1 + $0xe88] ss:$16 sps:$4 sm:$0xff]  }
 0x198   :  { %5196 = vmatprep.subr.bf16.mxu0 %v7553_v4  ;;  %5729 = vmatprep.subr.bf16.mxu1 %v7556_v5  ;;  %v7644_v4 = vld [vmem:[%s10644_s1 + $0xea4] ss:$16 sps:$4 sm:$0xff]   ;;  %v7647_v5 = vld [vmem:[%s10644_s1 + $0xeac] ss:$16 sps:$4 sm:$0xff]  }
 0x19b   :  { %5197 = vmatpush1.bf16.msra.mxu0 %v7551_v6  ;;  %5730 = vmatpush1.bf16.msra.mxu1 %v7554_v7  ;;  %v7642_v6 = vld [vmem:[%s10644_s1 + $0xea0] ss:$16 sps:$4 sm:$0xff]   ;;  %v7645_v7 = vld [vmem:[%s10644_s1 + $0xea8] ss:$16 sps:$4 sm:$0xff]  }
 0x19c   :  { %5198 = vmatprep.subr.bf16.mxu0 %v7559_v8  ;;  %5731 = vmatprep.subr.bf16.mxu1 %v7562_v9  ;;  %v7650_v8 = vld [vmem:[%s10644_s1 + $0xec4] ss:$16 sps:$4 sm:$0xff]   ;;  %v7653_v9 = vld [vmem:[%s10644_s1 + $0xecc] ss:$16 sps:$4 sm:$0xff]  }
 0x19f   :  { %5199 = vmatpush1.bf16.msra.mxu0 %v7557_v10  ;;  %5732 = vmatpush1.bf16.msra.mxu1 %v7560_v11  ;;  %v7648_v10 = vld [vmem:[%s10644_s1 + $0xec0] ss:$16 sps:$4 sm:$0xff]   ;;  %v7651_v11 = vld [vmem:[%s10644_s1 + $0xec8] ss:$16 sps:$4 sm:$0xff]  }
 0x1a0   :  { %5200 = vmatprep.subr.bf16.mxu0 %v7565_v12  ;;  %5733 = vmatprep.subr.bf16.mxu1 %v7568_v52  ;;  %v7656_v12 = vld [vmem:[%s10644_s1 + $0xee4] ss:$16 sps:$4 sm:$0xff]   ;;  %v7659_v52 = vld [vmem:[%s10644_s1 + $0xeec] ss:$16 sps:$4 sm:$0xff]  }
 0x1a3   :  { %5201 = vmatpush1.bf16.msra.mxu0 %v7563_v15  ;;  %5734 = vmatpush1.bf16.msra.mxu1 %v7566_v16  ;;  %v7654_v15 = vld [vmem:[%s10644_s1 + $0xee0] ss:$16 sps:$4 sm:$0xff]   ;;  %v7657_v16 = vld [vmem:[%s10644_s1 + $0xee8] ss:$16 sps:$4 sm:$0xff]  }
 0x1a4   :  { %5202 = vmatprep.subr.bf16.mxu0 %v7571_v17  ;;  %5735 = vmatprep.subr.bf16.mxu1 %v7574_v18  ;;  %v7662_v17 = vld [vmem:[%s10644_s1 + $0xf04] ss:$16 sps:$4 sm:$0xff]   ;;  %v7665_v18 = vld [vmem:[%s10644_s1 + $0xf0c] ss:$16 sps:$4 sm:$0xff]  }
 0x1a7   :  { %5203 = vmatpush1.bf16.msra.mxu0 %v7569_v19  ;;  %5736 = vmatpush1.bf16.msra.mxu1 %v7572_v20  ;;  %v7660_v19 = vld [vmem:[%s10644_s1 + $0xf00] ss:$16 sps:$4 sm:$0xff]   ;;  %v7663_v20 = vld [vmem:[%s10644_s1 + $0xf08] ss:$16 sps:$4 sm:$0xff]  }
 0x1a8   :  { %5204 = vmatprep.subr.bf16.mxu0 %v7577_v22  ;;  %5737 = vmatprep.subr.bf16.mxu1 %v7580_v23  ;;  %v7668_v22 = vld [vmem:[%s10644_s1 + $0xf24] ss:$16 sps:$4 sm:$0xff]   ;;  %v7671_v23 = vld [vmem:[%s10644_s1 + $0xf2c] ss:$16 sps:$4 sm:$0xff]  }
 0x1ab   :  { %5205 = vmatpush1.bf16.msra.mxu0 %v7575_v24  ;;  %5738 = vmatpush1.bf16.msra.mxu1 %v7578_v13  ;;  %v7666_v24 = vld [vmem:[%s10644_s1 + $0xf20] ss:$16 sps:$4 sm:$0xff]   ;;  %v7669_v13 = vld [vmem:[%s10644_s1 + $0xf28] ss:$16 sps:$4 sm:$0xff]  }
 0x1ac   :  { %5206 = vmatprep.subr.bf16.mxu0 %v7583_v27  ;;  %5739 = vmatprep.subr.bf16.mxu1 %v7586_v28  ;;  %v7674_v27 = vld [vmem:[%s10644_s1 + $0xf44] ss:$16 sps:$4 sm:$0xff]   ;;  %v7677_v28 = vld [vmem:[%s10644_s1 + $0xf4c] ss:$16 sps:$4 sm:$0xff]  }
 0x1af   :  { %5207 = vmatpush1.bf16.msra.mxu0 %v7581_v29  ;;  %5740 = vmatpush1.bf16.msra.mxu1 %v7584_v14  ;;  %v7672_v29 = vld [vmem:[%s10644_s1 + $0xf40] ss:$16 sps:$4 sm:$0xff]   ;;  %v7675_v14 = vld [vmem:[%s10644_s1 + $0xf48] ss:$16 sps:$4 sm:$0xff]  }
 0x1b0   :  { %5208 = vmatprep.subr.bf16.mxu0 %v7589_v30  ;;  %5741 = vmatprep.subr.bf16.mxu1 %v7592_v31  ;;  %v7680_v30 = vld [vmem:[%s10644_s1 + $0xf64] ss:$16 sps:$4 sm:$0xff]   ;;  %v7683_v31 = vld [vmem:[%s10644_s1 + $0xf6c] ss:$16 sps:$4 sm:$0xff]  }
 0x1b3   :  { %5209 = vmatpush1.bf16.msra.mxu0 %v7587_v25  ;;  %5742 = vmatpush1.bf16.msra.mxu1 %v7590_v32  ;;  %v7678_v25 = vld [vmem:[%s10644_s1 + $0xf60] ss:$16 sps:$4 sm:$0xff]   ;;  %v7681_v32 = vld [vmem:[%s10644_s1 + $0xf68] ss:$16 sps:$4 sm:$0xff]  }
 0x1b4   :  { %5210 = vmatprep.subr.bf16.mxu0 %v7595_v33  ;;  %5743 = vmatprep.subr.bf16.mxu1 %v7598_v26  ;;  %v7686_v33 = vld [vmem:[%s10644_s1 + $0xf84] ss:$16 sps:$4 sm:$0xff]   ;;  %v7689_v26 = vld [vmem:[%s10644_s1 + $0xf8c] ss:$16 sps:$4 sm:$0xff]  }
 0x1b7   :  { %5211 = vmatpush1.bf16.msra.mxu0 %v7593_v36  ;;  %5744 = vmatpush1.bf16.msra.mxu1 %v7596_v37  ;;  %v7684_v36 = vld [vmem:[%s10644_s1 + $0xf80] ss:$16 sps:$4 sm:$0xff]   ;;  %v7687_v37 = vld [vmem:[%s10644_s1 + $0xf88] ss:$16 sps:$4 sm:$0xff]  }
 0x1b8   :  { %5212 = vmatprep.subr.bf16.mxu0 %v7601_v21  ;;  %5745 = vmatprep.subr.bf16.mxu1 %v7604_v39  ;;  %v7692_v21 = vld [vmem:[%s10644_s1 + $0xfa4] ss:$16 sps:$4 sm:$0xff]   ;;  %v7695_v39 = vld [vmem:[%s10644_s1 + $0xfac] ss:$16 sps:$4 sm:$0xff]  }
 0x1bb   :  { %5213 = vmatpush1.bf16.msra.mxu0 %v7599_v40  ;;  %5746 = vmatpush1.bf16.msra.mxu1 %v7602_v41  ;;  %v7690_v40 = vld [vmem:[%s10644_s1 + $0xfa0] ss:$16 sps:$4 sm:$0xff]   ;;  %v7693_v41 = vld [vmem:[%s10644_s1 + $0xfa8] ss:$16 sps:$4 sm:$0xff]  }
 0x1bc   :  { %5214 = vmatprep.subr.bf16.mxu0 %v7607_v34  ;;  %5747 = vmatprep.subr.bf16.mxu1 %v7610_v43  ;;  %v7698_v34 = vld [vmem:[%s10644_s1 + $0xfc4] ss:$16 sps:$4 sm:$0xff]   ;;  %v7701_v43 = vld [vmem:[%s10644_s1 + $0xfcc] ss:$16 sps:$4 sm:$0xff]  }
 0x1bf   :  { %5215 = vmatpush1.bf16.msra.mxu0 %v7605_v44  ;;  %5748 = vmatpush1.bf16.msra.mxu1 %v7608_v45  ;;  %v9747_v44 = vld [vmem:[%s10645_s0 + $0x10] sm:$0xff] }
 0x1c0   :  { %5225 = vmatprep.subr.bf16.mxu0 %v7614_v46  ;;  %5758 = vmatprep.subr.bf16.mxu1 %v7617_v35  ;;  %v7696_v45 = vld [vmem:[%s10644_s1 + $0xfc0] ss:$16 sps:$4 sm:$0xff]   ;;  %v7699_v46 = vld [vmem:[%s10644_s1 + $0xfc8] ss:$16 sps:$4 sm:$0xff]   ;;  %v7704_v35 = vld [vmem:[%s10644_s1 + $0xfe4] ss:$16 sps:$4 sm:$0xff]  }
 0x1c2   :  { %5217 = vmatmul.mubr.bf16.vlgmr.msra.gmra.mrb[0].mxu0 %v9570_v48  ;;  %5750 = vmatmul.mubr.bf16.vlgmr.msra.gmra.mrb[0].mxu1 %v9570_v48 }
 0x1c3   :  { %5226 = vmatpush1.bf16.msra.mxu0 %v7612_v50  ;;  %5759 = vmatpush1.bf16.msra.mxu1 %v7615_v51  ;;  %v7707_v50 = vld [vmem:[%s10644_s1 + $0xfec] ss:$16 sps:$4 sm:$0xff]   ;;  %v9763_v51 = vrot.slane %v9747_v44, %v8276_v49 }
 0x1c4   :  { %5227 = vmatprep.subr.bf16.mxu0 %v7620_v53  ;;  %5760 = vmatprep.subr.bf16.mxu1 %v7623_v38  ;;  %v7702_v53 = vld [vmem:[%s10644_s1 + $0xfe0] ss:$16 sps:$4 sm:$0xff]   ;;  %v7705_v38 = vld [vmem:[%s10644_s1 + $0xfe8] ss:$16 sps:$4 sm:$0xff]  }
 0x1c5   :  { %5257 = vmatprep.mubr.bf16.mxu0 %v926_v54  ;;  %5790 = vmatprep.mubr.bf16.mxu1 %v926_v54  ;;  %v7710_v54 = vld [vmem:[%s10644_s1 + $0x1004] ss:$16 sps:$4 sm:$0xff]  }
 0x1c7   :  { %5228 = vmatpush1.bf16.msra.mxu0 %v7618_v55  ;;  %5761 = vmatpush1.bf16.msra.mxu1 %v7621_v56  ;;  %v7713_v55 = vld [vmem:[%s10644_s1 + $0x100c] ss:$16 sps:$4 sm:$0xff]   ;;  %v942_v56 = vcombine.high %v9763_v51, %v9763_v51 }
 0x1c8   :  { %5229 = vmatprep.subr.bf16.mxu0 %v7626_v47  ;;  %5762 = vmatprep.subr.bf16.mxu1 %v7629_v57  ;;  %v924_v47 = vcombine.high %v9570_v48, %v9570_v48  ;;  %v7708_v57 = vld [vmem:[%s10644_s1 + $0x1000] ss:$16 sps:$4 sm:$0xff]   ;;  %v7719_v48 = vld [vmem:[%s10644_s1 + $0x102c] ss:$16 sps:$4 sm:$0xff]  }
 0x1cb   :  { %5230 = vmatpush1.bf16.msra.mxu0 %v7624_v58  ;;  %5763 = vmatpush1.bf16.msra.mxu1 %v7627_v59  ;;  %v7711_v58 = vld [vmem:[%s10644_s1 + $0x1008] ss:$16 sps:$4 sm:$0xff]   ;;  %v7716_v59 = vld [vmem:[%s10644_s1 + $0x1024] ss:$16 sps:$4 sm:$0xff]  }
 0x1cc   :  { %5231 = vmatprep.subr.bf16.mxu0 %v7632_v60  ;;  %5764 = vmatprep.subr.bf16.mxu1 %v7635_v61  ;;  %v9794_v60 = vrot.slane %v942_v56, %v8276_v49  ;;  %v7714_v61 = vld [vmem:[%s10644_s1 + $0x1020] ss:$16 sps:$4 sm:$0xff]   ;;  %v7795_v56 = vld [vmem:[%s10644_s1 + $0x11c8] ss:$16 sps:$4 sm:$0xff]  }
 0x1cf   :  { %5232 = vmatpush1.bf16.msra.mxu0 %v7630_v62  ;;  %5765 = vmatpush1.bf16.msra.mxu1 %v7633_v63  ;;  %v7717_v62 = vld [vmem:[%s10644_s1 + $0x1028] ss:$16 sps:$4 sm:$0xff]   ;;  %v7722_v63 = vld [vmem:[%s10644_s1 + $0x1044] ss:$16 sps:$4 sm:$0xff]  }
 0x1d0   :  { %5233 = vmatprep.subr.bf16.mxu0 %v7638_v0  ;;  %5766 = vmatprep.subr.bf16.mxu1 %v7641_v1  ;;  %v7725_v0 = vld [vmem:[%s10644_s1 + $0x104c] ss:$16 sps:$4 sm:$0xff]   ;;  %v7720_v1 = vld [vmem:[%s10644_s1 + $0x1040] ss:$16 sps:$4 sm:$0xff]  }
 0x1d3   :  { %5234 = vmatpush1.bf16.msra.mxu0 %v7636_v2  ;;  %5767 = vmatpush1.bf16.msra.mxu1 %v7639_v3  ;;  %v7723_v2 = vld [vmem:[%s10644_s1 + $0x1048] ss:$16 sps:$4 sm:$0xff]   ;;  %v7728_v3 = vld [vmem:[%s10644_s1 + $0x1064] ss:$16 sps:$4 sm:$0xff]  }
 0x1d4   :  { %5235 = vmatprep.subr.bf16.mxu0 %v7644_v4  ;;  %5768 = vmatprep.subr.bf16.mxu1 %v7647_v5  ;;  %v7731_v4 = vld [vmem:[%s10644_s1 + $0x106c] ss:$16 sps:$4 sm:$0xff]   ;;  %v7726_v5 = vld [vmem:[%s10644_s1 + $0x1060] ss:$16 sps:$4 sm:$0xff]  }
 0x1d7   :  { %5236 = vmatpush1.bf16.msra.mxu0 %v7642_v6  ;;  %5769 = vmatpush1.bf16.msra.mxu1 %v7645_v7  ;;  %v7729_v6 = vld [vmem:[%s10644_s1 + $0x1068] ss:$16 sps:$4 sm:$0xff]   ;;  %v7734_v7 = vld [vmem:[%s10644_s1 + $0x1084] ss:$16 sps:$4 sm:$0xff]  }
 0x1d8   :  { %5237 = vmatprep.subr.bf16.mxu0 %v7650_v8  ;;  %5770 = vmatprep.subr.bf16.mxu1 %v7653_v9  ;;  %v7737_v8 = vld [vmem:[%s10644_s1 + $0x108c] ss:$16 sps:$4 sm:$0xff]   ;;  %v7732_v9 = vld [vmem:[%s10644_s1 + $0x1080] ss:$16 sps:$4 sm:$0xff]  }
 0x1db   :  { %5238 = vmatpush1.bf16.msra.mxu0 %v7648_v10  ;;  %5771 = vmatpush1.bf16.msra.mxu1 %v7651_v11  ;;  %v7735_v10 = vld [vmem:[%s10644_s1 + $0x1088] ss:$16 sps:$4 sm:$0xff]   ;;  %v7740_v11 = vld [vmem:[%s10644_s1 + $0x10a4] ss:$16 sps:$4 sm:$0xff]  }
 0x1dc   :  { %5239 = vmatprep.subr.bf16.mxu0 %v7656_v12  ;;  %5772 = vmatprep.subr.bf16.mxu1 %v7659_v52  ;;  %v7743_v12 = vld [vmem:[%s10644_s1 + $0x10ac] ss:$16 sps:$4 sm:$0xff]   ;;  %v7738_v52 = vld [vmem:[%s10644_s1 + $0x10a0] ss:$16 sps:$4 sm:$0xff]  }
 0x1df   :  { %5240 = vmatpush1.bf16.msra.mxu0 %v7654_v15  ;;  %5773 = vmatpush1.bf16.msra.mxu1 %v7657_v16  ;;  %v7741_v15 = vld [vmem:[%s10644_s1 + $0x10a8] ss:$16 sps:$4 sm:$0xff]   ;;  %v7746_v16 = vld [vmem:[%s10644_s1 + $0x10c4] ss:$16 sps:$4 sm:$0xff]  }
 0x1e0   :  { %5241 = vmatprep.subr.bf16.mxu0 %v7662_v17  ;;  %5774 = vmatprep.subr.bf16.mxu1 %v7665_v18  ;;  %v7749_v17 = vld [vmem:[%s10644_s1 + $0x10cc] ss:$16 sps:$4 sm:$0xff]   ;;  %v7744_v18 = vld [vmem:[%s10644_s1 + $0x10c0] ss:$16 sps:$4 sm:$0xff]  }
 0x1e3   :  { %5242 = vmatpush1.bf16.msra.mxu0 %v7660_v19  ;;  %5775 = vmatpush1.bf16.msra.mxu1 %v7663_v20  ;;  %v7747_v19 = vld [vmem:[%s10644_s1 + $0x10c8] ss:$16 sps:$4 sm:$0xff]   ;;  %v7752_v20 = vld [vmem:[%s10644_s1 + $0x10e4] ss:$16 sps:$4 sm:$0xff]  }
 0x1e4   :  { %5243 = vmatprep.subr.bf16.mxu0 %v7668_v22  ;;  %5776 = vmatprep.subr.bf16.mxu1 %v7671_v23  ;;  %v7755_v22 = vld [vmem:[%s10644_s1 + $0x10ec] ss:$16 sps:$4 sm:$0xff]   ;;  %v7750_v23 = vld [vmem:[%s10644_s1 + $0x10e0] ss:$16 sps:$4 sm:$0xff]  }
 0x1e7   :  { %5244 = vmatpush1.bf16.msra.mxu0 %v7666_v24  ;;  %5777 = vmatpush1.bf16.msra.mxu1 %v7669_v13  ;;  %v7753_v24 = vld [vmem:[%s10644_s1 + $0x10e8] ss:$16 sps:$4 sm:$0xff]   ;;  %v7758_v13 = vld [vmem:[%s10644_s1 + $0x1104] ss:$16 sps:$4 sm:$0xff]  }
 0x1e8   :  { %5245 = vmatprep.subr.bf16.mxu0 %v7674_v27  ;;  %5778 = vmatprep.subr.bf16.mxu1 %v7677_v28  ;;  %v7761_v27 = vld [vmem:[%s10644_s1 + $0x110c] ss:$16 sps:$4 sm:$0xff]   ;;  %v7756_v28 = vld [vmem:[%s10644_s1 + $0x1100] ss:$16 sps:$4 sm:$0xff]  }
 0x1eb   :  { %5246 = vmatpush1.bf16.msra.mxu0 %v7672_v29  ;;  %5779 = vmatpush1.bf16.msra.mxu1 %v7675_v14  ;;  %v7759_v29 = vld [vmem:[%s10644_s1 + $0x1108] ss:$16 sps:$4 sm:$0xff]   ;;  %v7764_v14 = vld [vmem:[%s10644_s1 + $0x1124] ss:$16 sps:$4 sm:$0xff]  }
 0x1ec   :  { %5247 = vmatprep.subr.bf16.mxu0 %v7680_v30  ;;  %5780 = vmatprep.subr.bf16.mxu1 %v7683_v31  ;;  %v7767_v30 = vld [vmem:[%s10644_s1 + $0x112c] ss:$16 sps:$4 sm:$0xff]   ;;  %v7762_v31 = vld [vmem:[%s10644_s1 + $0x1120] ss:$16 sps:$4 sm:$0xff]  }
 0x1ef   :  { %5248 = vmatpush1.bf16.msra.mxu0 %v7678_v25  ;;  %5781 = vmatpush1.bf16.msra.mxu1 %v7681_v32  ;;  %v7765_v25 = vld [vmem:[%s10644_s1 + $0x1128] ss:$16 sps:$4 sm:$0xff]   ;;  %v7770_v32 = vld [vmem:[%s10644_s1 + $0x1144] ss:$16 sps:$4 sm:$0xff]  }
 0x1f0   :  { %5249 = vmatprep.subr.bf16.mxu0 %v7686_v33  ;;  %5782 = vmatprep.subr.bf16.mxu1 %v7689_v26  ;;  %v7773_v33 = vld [vmem:[%s10644_s1 + $0x114c] ss:$16 sps:$4 sm:$0xff]   ;;  %v7768_v26 = vld [vmem:[%s10644_s1 + $0x1140] ss:$16 sps:$4 sm:$0xff]  }
 0x1f3   :  { %5250 = vmatpush1.bf16.msra.mxu0 %v7684_v36  ;;  %5783 = vmatpush1.bf16.msra.mxu1 %v7687_v37  ;;  %v7771_v36 = vld [vmem:[%s10644_s1 + $0x1148] ss:$16 sps:$4 sm:$0xff]   ;;  %v7776_v37 = vld [vmem:[%s10644_s1 + $0x1164] ss:$16 sps:$4 sm:$0xff]  }
 0x1f4   :  { %5251 = vmatprep.subr.bf16.mxu0 %v7692_v21  ;;  %5784 = vmatprep.subr.bf16.mxu1 %v7695_v39  ;;  %v7779_v21 = vld [vmem:[%s10644_s1 + $0x116c] ss:$16 sps:$4 sm:$0xff]   ;;  %v7774_v39 = vld [vmem:[%s10644_s1 + $0x1160] ss:$16 sps:$4 sm:$0xff]  }
 0x1f7   :  { %5252 = vmatpush1.bf16.msra.mxu0 %v7690_v40  ;;  %5785 = vmatpush1.bf16.msra.mxu1 %v7693_v41  ;;  %v7777_v40 = vld [vmem:[%s10644_s1 + $0x1168] ss:$16 sps:$4 sm:$0xff]   ;;  %v7782_v41 = vld [vmem:[%s10644_s1 + $0x1184] ss:$16 sps:$4 sm:$0xff]  }
 0x1f8   :  { %5253 = vmatprep.subr.bf16.mxu0 %v7698_v34  ;;  %5786 = vmatprep.subr.bf16.mxu1 %v7701_v43  ;;  %v7785_v34 = vld [vmem:[%s10644_s1 + $0x118c] ss:$16 sps:$4 sm:$0xff]   ;;  %v7780_v43 = vld [vmem:[%s10644_s1 + $0x1180] ss:$16 sps:$4 sm:$0xff]  }
 0x1fb   :  { %5254 = vmatpush1.bf16.msra.mxu0 %v7696_v45  ;;  %5787 = vmatpush1.bf16.msra.mxu1 %v7699_v46  ;;  %v7783_v45 = vld [vmem:[%s10644_s1 + $0x1188] ss:$16 sps:$4 sm:$0xff]   ;;  %v7788_v46 = vld [vmem:[%s10644_s1 + $0x11a4] ss:$16 sps:$4 sm:$0xff]  }
 0x1fc   :  { %5255 = vmatprep.subr.bf16.mxu0 %v7704_v35  ;;  %5788 = vmatprep.subr.bf16.mxu1 %v7707_v50  ;;  %v7791_v35 = vld [vmem:[%s10644_s1 + $0x11ac] ss:$16 sps:$4 sm:$0xff]   ;;  %v7786_v50 = vld [vmem:[%s10644_s1 + $0x11a0] ss:$16 sps:$4 sm:$0xff]  }
 0x1ff   :  { %5256 = vmatpush1.bf16.msra.mxu0 %v7702_v53  ;;  %5789 = vmatpush1.bf16.msra.mxu1 %v7705_v38  ;;  %v7789_v53 = vld [vmem:[%s10644_s1 + $0x11a8] ss:$16 sps:$4 sm:$0xff]   ;;  %v7794_v38 = vld [vmem:[%s10644_s1 + $0x11c4] ss:$16 sps:$4 sm:$0xff]  }
 0x200   :  { %5266 = vmatprep.subr.bf16.mxu0 %v7710_v54  ;;  %5799 = vmatprep.subr.bf16.mxu1 %v7713_v55  ;;  %v7797_v54 = vld [vmem:[%s10644_s1 + $0x11cc] ss:$16 sps:$4 sm:$0xff]   ;;  %v7792_v55 = vld [vmem:[%s10644_s1 + $0x11c0] ss:$16 sps:$4 sm:$0xff]  }
 0x202   :  { %5258 = vmatmul.mubr.bf16.vlgmr.msra.gmra.mrb[0].mxu0 %v924_v47  ;;  %5791 = vmatmul.mubr.bf16.vlgmr.msra.gmra.mrb[0].mxu1 %v924_v47  ;;  %v7800_v47 = vld [vmem:[%s10644_s1 + $0x11e4] ss:$16 sps:$4 sm:$0xff]  }
 0x203   :  { %5267 = vmatpush1.bf16.msra.mxu0 %v7708_v57  ;;  %5800 = vmatpush1.bf16.msra.mxu1 %v7711_v58  ;;  %v7803_v57 = vld [vmem:[%s10644_s1 + $0x11ec] ss:$16 sps:$4 sm:$0xff]   ;;  %v7798_v58 = vld [vmem:[%s10644_s1 + $0x11e0] ss:$16 sps:$4 sm:$0xff]  }
 0x204   :  { %5268 = vmatprep.subr.bf16.mxu0 %v7716_v59  ;;  %5801 = vmatprep.subr.bf16.mxu1 %v7719_v48  ;;  %v7801_v59 = vld [vmem:[%s10644_s1 + $0x11e8] ss:$16 sps:$4 sm:$0xff]   ;;  %v7806_v48 = vld [vmem:[%s10644_s1 + $0x1204] ss:$16 sps:$4 sm:$0xff]  }
 0x205   :  { %5298 = vmatprep.mubr.bf16.mxu0 %v9794_v60  ;;  %5831 = vmatprep.mubr.bf16.mxu1 %v9794_v60 }
 0x207   :  { %5269 = vmatpush1.bf16.msra.mxu0 %v7714_v61  ;;  %5802 = vmatpush1.bf16.msra.mxu1 %v7717_v62  ;;  %v7809_v61 = vld [vmem:[%s10644_s1 + $0x120c] ss:$16 sps:$4 sm:$0xff]   ;;  %v9980_v62 = vrot.slane %v9763_v51, %v8276_v49 }
 0x208   :  { %5270 = vmatprep.subr.bf16.mxu0 %v7722_v63  ;;  %5803 = vmatprep.subr.bf16.mxu1 %v7725_v0  ;;  %v7804_v63 = vld [vmem:[%s10644_s1 + $0x1200] ss:$16 sps:$4 sm:$0xff]   ;;  %v7807_v0 = vld [vmem:[%s10644_s1 + $0x1208] ss:$16 sps:$4 sm:$0xff]   ;;  %v7815_v51 = vld [vmem:[%s10644_s1 + $0x122c] ss:$16 sps:$4 sm:$0xff]  }
 0x20b   :  { %5271 = vmatpush1.bf16.msra.mxu0 %v7720_v1  ;;  %5804 = vmatpush1.bf16.msra.mxu1 %v7723_v2  ;;  %v7812_v1 = vld [vmem:[%s10644_s1 + $0x1224] ss:$16 sps:$4 sm:$0xff]   ;;  %v974_v2 = vcombine.high %v9794_v60, %v9794_v60 }
 0x20c   :  { %5272 = vmatprep.subr.bf16.mxu0 %v7728_v3  ;;  %5805 = vmatprep.subr.bf16.mxu1 %v7731_v4  ;;  %v7810_v3 = vld [vmem:[%s10644_s1 + $0x1220] ss:$16 sps:$4 sm:$0xff]   ;;  %v7813_v4 = vld [vmem:[%s10644_s1 + $0x1228] ss:$16 sps:$4 sm:$0xff]   ;;  %v7818_v60 = vld [vmem:[%s10644_s1 + $0x1244] ss:$16 sps:$4 sm:$0xff]  }
 0x20f   :  { %5273 = vmatpush1.bf16.msra.mxu0 %v7726_v5  ;;  %5806 = vmatpush1.bf16.msra.mxu1 %v7729_v6  ;;  %v7821_v5 = vld [vmem:[%s10644_s1 + $0x124c] ss:$16 sps:$4 sm:$0xff]   ;;  %v7816_v6 = vld [vmem:[%s10644_s1 + $0x1240] ss:$16 sps:$4 sm:$0xff]  }
 0x210   :  { %5274 = vmatprep.subr.bf16.mxu0 %v7734_v7  ;;  %5807 = vmatprep.subr.bf16.mxu1 %v7737_v8  ;;  %v7819_v7 = vld [vmem:[%s10644_s1 + $0x1248] ss:$16 sps:$4 sm:$0xff]   ;;  %v7824_v8 = vld [vmem:[%s10644_s1 + $0x1264] ss:$16 sps:$4 sm:$0xff]  }
 0x213   :  { %5275 = vmatpush1.bf16.msra.mxu0 %v7732_v9  ;;  %5808 = vmatpush1.bf16.msra.mxu1 %v7735_v10  ;;  %v7827_v9 = vld [vmem:[%s10644_s1 + $0x126c] ss:$16 sps:$4 sm:$0xff]   ;;  %v7822_v10 = vld [vmem:[%s10644_s1 + $0x1260] ss:$16 sps:$4 sm:$0xff]  }
 0x214   :  { %5276 = vmatprep.subr.bf16.mxu0 %v7740_v11  ;;  %5809 = vmatprep.subr.bf16.mxu1 %v7743_v12  ;;  %v7825_v11 = vld [vmem:[%s10644_s1 + $0x1268] ss:$16 sps:$4 sm:$0xff]   ;;  %v7830_v12 = vld [vmem:[%s10644_s1 + $0x1284] ss:$16 sps:$4 sm:$0xff]  }
 0x217   :  { %5277 = vmatpush1.bf16.msra.mxu0 %v7738_v52  ;;  %5810 = vmatpush1.bf16.msra.mxu1 %v7741_v15  ;;  %v7833_v52 = vld [vmem:[%s10644_s1 + $0x128c] ss:$16 sps:$4 sm:$0xff]   ;;  %v7828_v15 = vld [vmem:[%s10644_s1 + $0x1280] ss:$16 sps:$4 sm:$0xff]  }
 0x218   :  { %5278 = vmatprep.subr.bf16.mxu0 %v7746_v16  ;;  %5811 = vmatprep.subr.bf16.mxu1 %v7749_v17  ;;  %v7831_v16 = vld [vmem:[%s10644_s1 + $0x1288] ss:$16 sps:$4 sm:$0xff]   ;;  %v7836_v17 = vld [vmem:[%s10644_s1 + $0x12a4] ss:$16 sps:$4 sm:$0xff]  }
 0x21b   :  { %5279 = vmatpush1.bf16.msra.mxu0 %v7744_v18  ;;  %5812 = vmatpush1.bf16.msra.mxu1 %v7747_v19  ;;  %v7839_v18 = vld [vmem:[%s10644_s1 + $0x12ac] ss:$16 sps:$4 sm:$0xff]   ;;  %v7834_v19 = vld [vmem:[%s10644_s1 + $0x12a0] ss:$16 sps:$4 sm:$0xff]  }
 0x21c   :  { %5280 = vmatprep.subr.bf16.mxu0 %v7752_v20  ;;  %5813 = vmatprep.subr.bf16.mxu1 %v7755_v22  ;;  %v7837_v20 = vld [vmem:[%s10644_s1 + $0x12a8] ss:$16 sps:$4 sm:$0xff]   ;;  %v7842_v22 = vld [vmem:[%s10644_s1 + $0x12c4] ss:$16 sps:$4 sm:$0xff]  }
 0x21f   :  { %5281 = vmatpush1.bf16.msra.mxu0 %v7750_v23  ;;  %5814 = vmatpush1.bf16.msra.mxu1 %v7753_v24  ;;  %v7845_v23 = vld [vmem:[%s10644_s1 + $0x12cc] ss:$16 sps:$4 sm:$0xff]   ;;  %v7840_v24 = vld [vmem:[%s10644_s1 + $0x12c0] ss:$16 sps:$4 sm:$0xff]  }
 0x220   :  { %5282 = vmatprep.subr.bf16.mxu0 %v7758_v13  ;;  %5815 = vmatprep.subr.bf16.mxu1 %v7761_v27  ;;  %v7843_v13 = vld [vmem:[%s10644_s1 + $0x12c8] ss:$16 sps:$4 sm:$0xff]   ;;  %v7848_v27 = vld [vmem:[%s10644_s1 + $0x12e4] ss:$16 sps:$4 sm:$0xff]  }
 0x223   :  { %5283 = vmatpush1.bf16.msra.mxu0 %v7756_v28  ;;  %5816 = vmatpush1.bf16.msra.mxu1 %v7759_v29  ;;  %v7851_v28 = vld [vmem:[%s10644_s1 + $0x12ec] ss:$16 sps:$4 sm:$0xff]   ;;  %v7846_v29 = vld [vmem:[%s10644_s1 + $0x12e0] ss:$16 sps:$4 sm:$0xff]  }
 0x224   :  { %5284 = vmatprep.subr.bf16.mxu0 %v7764_v14  ;;  %5817 = vmatprep.subr.bf16.mxu1 %v7767_v30  ;;  %v7849_v14 = vld [vmem:[%s10644_s1 + $0x12e8] ss:$16 sps:$4 sm:$0xff]   ;;  %v7854_v30 = vld [vmem:[%s10644_s1 + $0x1304] ss:$16 sps:$4 sm:$0xff]  }
 0x227   :  { %5285 = vmatpush1.bf16.msra.mxu0 %v7762_v31  ;;  %5818 = vmatpush1.bf16.msra.mxu1 %v7765_v25  ;;  %v7857_v31 = vld [vmem:[%s10644_s1 + $0x130c] ss:$16 sps:$4 sm:$0xff]   ;;  %v7852_v25 = vld [vmem:[%s10644_s1 + $0x1300] ss:$16 sps:$4 sm:$0xff]  }
 0x228   :  { %5286 = vmatprep.subr.bf16.mxu0 %v7770_v32  ;;  %5819 = vmatprep.subr.bf16.mxu1 %v7773_v33  ;;  %v7855_v32 = vld [vmem:[%s10644_s1 + $0x1308] ss:$16 sps:$4 sm:$0xff]   ;;  %v7860_v33 = vld [vmem:[%s10644_s1 + $0x1324] ss:$16 sps:$4 sm:$0xff]  }
 0x22b   :  { %5287 = vmatpush1.bf16.msra.mxu0 %v7768_v26  ;;  %5820 = vmatpush1.bf16.msra.mxu1 %v7771_v36  ;;  %v7863_v26 = vld [vmem:[%s10644_s1 + $0x132c] ss:$16 sps:$4 sm:$0xff]   ;;  %v7858_v36 = vld [vmem:[%s10644_s1 + $0x1320] ss:$16 sps:$4 sm:$0xff]  }
 0x22c   :  { %5288 = vmatprep.subr.bf16.mxu0 %v7776_v37  ;;  %5821 = vmatprep.subr.bf16.mxu1 %v7779_v21  ;;  %v7861_v37 = vld [vmem:[%s10644_s1 + $0x1328] ss:$16 sps:$4 sm:$0xff]   ;;  %v7866_v21 = vld [vmem:[%s10644_s1 + $0x1344] ss:$16 sps:$4 sm:$0xff]  }
 0x22f   :  { %5289 = vmatpush1.bf16.msra.mxu0 %v7774_v39  ;;  %5822 = vmatpush1.bf16.msra.mxu1 %v7777_v40  ;;  %v7869_v39 = vld [vmem:[%s10644_s1 + $0x134c] ss:$16 sps:$4 sm:$0xff]   ;;  %v7864_v40 = vld [vmem:[%s10644_s1 + $0x1340] ss:$16 sps:$4 sm:$0xff]  }
 0x230   :  { %5290 = vmatprep.subr.bf16.mxu0 %v7782_v41  ;;  %5823 = vmatprep.subr.bf16.mxu1 %v7785_v34  ;;  %v7867_v41 = vld [vmem:[%s10644_s1 + $0x1348] ss:$16 sps:$4 sm:$0xff]   ;;  %v7872_v34 = vld [vmem:[%s10644_s1 + $0x1364] ss:$16 sps:$4 sm:$0xff]  }
 0x233   :  { %5291 = vmatpush1.bf16.msra.mxu0 %v7780_v43  ;;  %5824 = vmatpush1.bf16.msra.mxu1 %v7783_v45  ;;  %v7875_v43 = vld [vmem:[%s10644_s1 + $0x136c] ss:$16 sps:$4 sm:$0xff]   ;;  %v7870_v45 = vld [vmem:[%s10644_s1 + $0x1360] ss:$16 sps:$4 sm:$0xff]  }
 0x234   :  { %5292 = vmatprep.subr.bf16.mxu0 %v7788_v46  ;;  %5825 = vmatprep.subr.bf16.mxu1 %v7791_v35  ;;  %v7873_v46 = vld [vmem:[%s10644_s1 + $0x1368] ss:$16 sps:$4 sm:$0xff]   ;;  %v7878_v35 = vld [vmem:[%s10644_s1 + $0x1384] ss:$16 sps:$4 sm:$0xff]  }
 0x237   :  { %5293 = vmatpush1.bf16.msra.mxu0 %v7786_v50  ;;  %5826 = vmatpush1.bf16.msra.mxu1 %v7789_v53  ;;  %v7881_v50 = vld [vmem:[%s10644_s1 + $0x138c] ss:$16 sps:$4 sm:$0xff]   ;;  %v7876_v53 = vld [vmem:[%s10644_s1 + $0x1380] ss:$16 sps:$4 sm:$0xff]  }
 0x238   :  { %5294 = vmatprep.subr.bf16.mxu0 %v7794_v38  ;;  %5827 = vmatprep.subr.bf16.mxu1 %v7797_v54  ;;  %v7879_v38 = vld [vmem:[%s10644_s1 + $0x1388] ss:$16 sps:$4 sm:$0xff]   ;;  %v7884_v54 = vld [vmem:[%s10644_s1 + $0x13a4] ss:$16 sps:$4 sm:$0xff]  }
 0x23b   :  { %5295 = vmatpush1.bf16.msra.mxu0 %v7792_v55  ;;  %5828 = vmatpush1.bf16.msra.mxu1 %v7795_v56  ;;  %v7887_v55 = vld [vmem:[%s10644_s1 + $0x13ac] ss:$16 sps:$4 sm:$0xff]   ;;  %v7882_v56 = vld [vmem:[%s10644_s1 + $0x13a0] ss:$16 sps:$4 sm:$0xff]  }
 0x23c   :  { %5296 = vmatprep.subr.bf16.mxu0 %v7800_v47  ;;  %5829 = vmatprep.subr.bf16.mxu1 %v7803_v57  ;;  %v7885_v47 = vld [vmem:[%s10644_s1 + $0x13a8] ss:$16 sps:$4 sm:$0xff]   ;;  %v7890_v57 = vld [vmem:[%s10644_s1 + $0x13c4] ss:$16 sps:$4 sm:$0xff]  }
 0x23f   :  { %5297 = vmatpush1.bf16.msra.mxu0 %v7798_v58  ;;  %5830 = vmatpush1.bf16.msra.mxu1 %v7801_v59  ;;  %v7893_v58 = vld [vmem:[%s10644_s1 + $0x13cc] ss:$16 sps:$4 sm:$0xff]   ;;  %v927_v59 = vcombine.high %v9747_v44, %v9747_v44 }
 0x240   :  { %5307 = vmatprep.subr.bf16.mxu0 %v7806_v48  ;;  %5840 = vmatprep.subr.bf16.mxu1 %v7809_v61  ;;  %v7888_v48 = vld [vmem:[%s10644_s1 + $0x13c0] ss:$16 sps:$4 sm:$0xff]   ;;  %v7891_v61 = vld [vmem:[%s10644_s1 + $0x13c8] ss:$16 sps:$4 sm:$0xff]   ;;  %v7899_v44 = vld [vmem:[%s10644_s1 + $0x13ec] ss:$16 sps:$4 sm:$0xff]  }
 0x242   :  { %5299 = vmatmul.mubr.bf16.vlgmr.msra.gmra.mrb[0].mxu0 %v9980_v62  ;;  %5832 = vmatmul.mubr.bf16.vlgmr.msra.gmra.mrb[0].mxu1 %v9980_v62 }
 0x243   :  { %5308 = vmatpush1.bf16.msra.mxu0 %v7804_v63  ;;  %5841 = vmatpush1.bf16.msra.mxu1 %v7807_v0  ;;  %v7896_v63 = vld [vmem:[%s10644_s1 + $0x13e4] ss:$16 sps:$4 sm:$0xff]   ;;  %v10169_v0 = vrot.slane %v927_v59, %v8276_v49  ;;  %v7975_v59 = vld [vmem:[%s10644_s1 + $0x1588] ss:$16 sps:$4 sm:$0xff]  }
 0x244   :  { %5309 = vmatprep.subr.bf16.mxu0 %v7812_v1  ;;  %5842 = vmatprep.subr.bf16.mxu1 %v7815_v51  ;;  %v7894_v1 = vld [vmem:[%s10644_s1 + $0x13e0] ss:$16 sps:$4 sm:$0xff]   ;;  %v7897_v51 = vld [vmem:[%s10644_s1 + $0x13e8] ss:$16 sps:$4 sm:$0xff]  }
 0x245   :  { %5339 = vmatprep.mubr.bf16.mxu0 %v974_v2  ;;  %5872 = vmatprep.mubr.bf16.mxu1 %v974_v2  ;;  %v7902_v2 = vld [vmem:[%s10644_s1 + $0x1404] ss:$16 sps:$4 sm:$0xff]  }
 0x247   :  { %5310 = vmatpush1.bf16.msra.mxu0 %v7810_v3  ;;  %5843 = vmatpush1.bf16.msra.mxu1 %v7813_v4  ;;  %v7905_v3 = vld [vmem:[%s10644_s1 + $0x140c] ss:$16 sps:$4 sm:$0xff]   ;;  %v943_v4 = vcombine.high %v10169_v0, %v10169_v0 }
 0x248   :  { %5311 = vmatprep.subr.bf16.mxu0 %v7818_v60  ;;  %5844 = vmatprep.subr.bf16.mxu1 %v7821_v5  ;;  %v972_v60 = vcombine.high %v9980_v62, %v9980_v62  ;;  %v7900_v5 = vld [vmem:[%s10644_s1 + $0x1400] ss:$16 sps:$4 sm:$0xff]   ;;  %v7911_v62 = vld [vmem:[%s10644_s1 + $0x142c] ss:$16 sps:$4 sm:$0xff]  }
 0x24b   :  { %5312 = vmatpush1.bf16.msra.mxu0 %v7816_v6  ;;  %5845 = vmatpush1.bf16.msra.mxu1 %v7819_v7  ;;  %v7903_v6 = vld [vmem:[%s10644_s1 + $0x1408] ss:$16 sps:$4 sm:$0xff]   ;;  %v7908_v7 = vld [vmem:[%s10644_s1 + $0x1424] ss:$16 sps:$4 sm:$0xff]  }
 0x24c   :  { %5313 = vmatprep.subr.bf16.mxu0 %v7824_v8  ;;  %5846 = vmatprep.subr.bf16.mxu1 %v7827_v9  ;;  %v10200_v8 = vrot.slane %v943_v4, %v8276_v49  ;;  %v7906_v9 = vld [vmem:[%s10644_s1 + $0x1420] ss:$16 sps:$4 sm:$0xff]   ;;  %v7992_v4 = vld [vmem:[%s10644_s1 + $0x15e4] ss:$16 sps:$4 sm:$0xff]  }
 0x24f   :  { %5314 = vmatpush1.bf16.msra.mxu0 %v7822_v10  ;;  %5847 = vmatpush1.bf16.msra.mxu1 %v7825_v11  ;;  %v7909_v10 = vld [vmem:[%s10644_s1 + $0x1428] ss:$16 sps:$4 sm:$0xff]   ;;  %v7914_v11 = vld [vmem:[%s10644_s1 + $0x1444] ss:$16 sps:$4 sm:$0xff]  }
 0x250   :  { %5315 = vmatprep.subr.bf16.mxu0 %v7830_v12  ;;  %5848 = vmatprep.subr.bf16.mxu1 %v7833_v52  ;;  %v7917_v12 = vld [vmem:[%s10644_s1 + $0x144c] ss:$16 sps:$4 sm:$0xff]   ;;  %v7912_v52 = vld [vmem:[%s10644_s1 + $0x1440] ss:$16 sps:$4 sm:$0xff]  }
 0x253   :  { %5316 = vmatpush1.bf16.msra.mxu0 %v7828_v15  ;;  %5849 = vmatpush1.bf16.msra.mxu1 %v7831_v16  ;;  %v7915_v15 = vld [vmem:[%s10644_s1 + $0x1448] ss:$16 sps:$4 sm:$0xff]   ;;  %v7920_v16 = vld [vmem:[%s10644_s1 + $0x1464] ss:$16 sps:$4 sm:$0xff]  }
 0x254   :  { %5317 = vmatprep.subr.bf16.mxu0 %v7836_v17  ;;  %5850 = vmatprep.subr.bf16.mxu1 %v7839_v18  ;;  %v7923_v17 = vld [vmem:[%s10644_s1 + $0x146c] ss:$16 sps:$4 sm:$0xff]   ;;  %v7918_v18 = vld [vmem:[%s10644_s1 + $0x1460] ss:$16 sps:$4 sm:$0xff]  }
 0x257   :  { %5318 = vmatpush1.bf16.msra.mxu0 %v7834_v19  ;;  %5851 = vmatpush1.bf16.msra.mxu1 %v7837_v20  ;;  %v7921_v19 = vld [vmem:[%s10644_s1 + $0x1468] ss:$16 sps:$4 sm:$0xff]   ;;  %v7926_v20 = vld [vmem:[%s10644_s1 + $0x1484] ss:$16 sps:$4 sm:$0xff]  }
 0x258   :  { %5319 = vmatprep.subr.bf16.mxu0 %v7842_v22  ;;  %5852 = vmatprep.subr.bf16.mxu1 %v7845_v23  ;;  %v7929_v22 = vld [vmem:[%s10644_s1 + $0x148c] ss:$16 sps:$4 sm:$0xff]   ;;  %v7924_v23 = vld [vmem:[%s10644_s1 + $0x1480] ss:$16 sps:$4 sm:$0xff]  }
 0x25b   :  { %5320 = vmatpush1.bf16.msra.mxu0 %v7840_v24  ;;  %5853 = vmatpush1.bf16.msra.mxu1 %v7843_v13  ;;  %v7927_v24 = vld [vmem:[%s10644_s1 + $0x1488] ss:$16 sps:$4 sm:$0xff]   ;;  %v7932_v13 = vld [vmem:[%s10644_s1 + $0x14a4] ss:$16 sps:$4 sm:$0xff]  }
 0x25c   :  { %5321 = vmatprep.subr.bf16.mxu0 %v7848_v27  ;;  %5854 = vmatprep.subr.bf16.mxu1 %v7851_v28  ;;  %v7935_v27 = vld [vmem:[%s10644_s1 + $0x14ac] ss:$16 sps:$4 sm:$0xff]   ;;  %v7930_v28 = vld [vmem:[%s10644_s1 + $0x14a0] ss:$16 sps:$4 sm:$0xff]  }
 0x25f   :  { %5322 = vmatpush1.bf16.msra.mxu0 %v7846_v29  ;;  %5855 = vmatpush1.bf16.msra.mxu1 %v7849_v14  ;;  %v7933_v29 = vld [vmem:[%s10644_s1 + $0x14a8] ss:$16 sps:$4 sm:$0xff]   ;;  %v7938_v14 = vld [vmem:[%s10644_s1 + $0x14c4] ss:$16 sps:$4 sm:$0xff]  }
 0x260   :  { %5323 = vmatprep.subr.bf16.mxu0 %v7854_v30  ;;  %5856 = vmatprep.subr.bf16.mxu1 %v7857_v31  ;;  %v7941_v30 = vld [vmem:[%s10644_s1 + $0x14cc] ss:$16 sps:$4 sm:$0xff]   ;;  %v7936_v31 = vld [vmem:[%s10644_s1 + $0x14c0] ss:$16 sps:$4 sm:$0xff]  }
 0x263   :  { %5324 = vmatpush1.bf16.msra.mxu0 %v7852_v25  ;;  %5857 = vmatpush1.bf16.msra.mxu1 %v7855_v32  ;;  %v7939_v25 = vld [vmem:[%s10644_s1 + $0x14c8] ss:$16 sps:$4 sm:$0xff]   ;;  %v7944_v32 = vld [vmem:[%s10644_s1 + $0x14e4] ss:$16 sps:$4 sm:$0xff]  }
 0x264   :  { %5325 = vmatprep.subr.bf16.mxu0 %v7860_v33  ;;  %5858 = vmatprep.subr.bf16.mxu1 %v7863_v26  ;;  %v7947_v33 = vld [vmem:[%s10644_s1 + $0x14ec] ss:$16 sps:$4 sm:$0xff]   ;;  %v7942_v26 = vld [vmem:[%s10644_s1 + $0x14e0] ss:$16 sps:$4 sm:$0xff]  }
 0x267   :  { %5326 = vmatpush1.bf16.msra.mxu0 %v7858_v36  ;;  %5859 = vmatpush1.bf16.msra.mxu1 %v7861_v37  ;;  %v7945_v36 = vld [vmem:[%s10644_s1 + $0x14e8] ss:$16 sps:$4 sm:$0xff]   ;;  %v7950_v37 = vld [vmem:[%s10644_s1 + $0x1504] ss:$16 sps:$4 sm:$0xff]  }
 0x268   :  { %5327 = vmatprep.subr.bf16.mxu0 %v7866_v21  ;;  %5860 = vmatprep.subr.bf16.mxu1 %v7869_v39  ;;  %v7953_v21 = vld [vmem:[%s10644_s1 + $0x150c] ss:$16 sps:$4 sm:$0xff]   ;;  %v7948_v39 = vld [vmem:[%s10644_s1 + $0x1500] ss:$16 sps:$4 sm:$0xff]  }
 0x26b   :  { %5328 = vmatpush1.bf16.msra.mxu0 %v7864_v40  ;;  %5861 = vmatpush1.bf16.msra.mxu1 %v7867_v41  ;;  %v7951_v40 = vld [vmem:[%s10644_s1 + $0x1508] ss:$16 sps:$4 sm:$0xff]   ;;  %v7956_v41 = vld [vmem:[%s10644_s1 + $0x1524] ss:$16 sps:$4 sm:$0xff]  }
 0x26c   :  { %5329 = vmatprep.subr.bf16.mxu0 %v7872_v34  ;;  %5862 = vmatprep.subr.bf16.mxu1 %v7875_v43  ;;  %v7959_v34 = vld [vmem:[%s10644_s1 + $0x152c] ss:$16 sps:$4 sm:$0xff]   ;;  %v7954_v43 = vld [vmem:[%s10644_s1 + $0x1520] ss:$16 sps:$4 sm:$0xff]  }
 0x26f   :  { %5330 = vmatpush1.bf16.msra.mxu0 %v7870_v45  ;;  %5863 = vmatpush1.bf16.msra.mxu1 %v7873_v46  ;;  %v7957_v45 = vld [vmem:[%s10644_s1 + $0x1528] ss:$16 sps:$4 sm:$0xff]   ;;  %v7962_v46 = vld [vmem:[%s10644_s1 + $0x1544] ss:$16 sps:$4 sm:$0xff]  }
 0x270   :  { %5331 = vmatprep.subr.bf16.mxu0 %v7878_v35  ;;  %5864 = vmatprep.subr.bf16.mxu1 %v7881_v50  ;;  %v7965_v35 = vld [vmem:[%s10644_s1 + $0x154c] ss:$16 sps:$4 sm:$0xff]   ;;  %v7960_v50 = vld [vmem:[%s10644_s1 + $0x1540] ss:$16 sps:$4 sm:$0xff]  }
 0x273   :  { %5332 = vmatpush1.bf16.msra.mxu0 %v7876_v53  ;;  %5865 = vmatpush1.bf16.msra.mxu1 %v7879_v38  ;;  %v7963_v53 = vld [vmem:[%s10644_s1 + $0x1548] ss:$16 sps:$4 sm:$0xff]   ;;  %v7968_v38 = vld [vmem:[%s10644_s1 + $0x1564] ss:$16 sps:$4 sm:$0xff]  }
 0x274   :  { %5333 = vmatprep.subr.bf16.mxu0 %v7884_v54  ;;  %5866 = vmatprep.subr.bf16.mxu1 %v7887_v55  ;;  %v7971_v54 = vld [vmem:[%s10644_s1 + $0x156c] ss:$16 sps:$4 sm:$0xff]   ;;  %v7966_v55 = vld [vmem:[%s10644_s1 + $0x1560] ss:$16 sps:$4 sm:$0xff]  }
 0x277   :  { %5334 = vmatpush1.bf16.msra.mxu0 %v7882_v56  ;;  %5867 = vmatpush1.bf16.msra.mxu1 %v7885_v47  ;;  %v7969_v56 = vld [vmem:[%s10644_s1 + $0x1568] ss:$16 sps:$4 sm:$0xff]   ;;  %v7974_v47 = vld [vmem:[%s10644_s1 + $0x1584] ss:$16 sps:$4 sm:$0xff]  }
 0x278   :  { %5335 = vmatprep.subr.bf16.mxu0 %v7890_v57  ;;  %5868 = vmatprep.subr.bf16.mxu1 %v7893_v58  ;;  %v7977_v57 = vld [vmem:[%s10644_s1 + $0x158c] ss:$16 sps:$4 sm:$0xff]   ;;  %v7972_v58 = vld [vmem:[%s10644_s1 + $0x1580] ss:$16 sps:$4 sm:$0xff]  }
 0x27b   :  { %5336 = vmatpush1.bf16.msra.mxu0 %v7888_v48  ;;  %5869 = vmatpush1.bf16.msra.mxu1 %v7891_v61  ;;  %v7980_v48 = vld [vmem:[%s10644_s1 + $0x15a4] ss:$16 sps:$4 sm:$0xff]   ;;  %v7983_v61 = vld [vmem:[%s10644_s1 + $0x15ac] ss:$16 sps:$4 sm:$0xff]  }
 0x27c   :  { %5337 = vmatprep.subr.bf16.mxu0 %v7896_v63  ;;  %5870 = vmatprep.subr.bf16.mxu1 %v7899_v44  ;;  %v7978_v63 = vld [vmem:[%s10644_s1 + $0x15a0] ss:$16 sps:$4 sm:$0xff]   ;;  %v7981_v44 = vld [vmem:[%s10644_s1 + $0x15a8] ss:$16 sps:$4 sm:$0xff]  }
 0x27f   :  { %5338 = vmatpush1.bf16.msra.mxu0 %v7894_v1  ;;  %5871 = vmatpush1.bf16.msra.mxu1 %v7897_v51  ;;  %v7986_v1 = vld [vmem:[%s10644_s1 + $0x15c4] ss:$16 sps:$4 sm:$0xff]   ;;  %v7989_v51 = vld [vmem:[%s10644_s1 + $0x15cc] ss:$16 sps:$4 sm:$0xff]  }
 0x280   :  { %5348 = vmatprep.subr.bf16.mxu0 %v7902_v2  ;;  %5881 = vmatprep.subr.bf16.mxu1 %v7905_v3  ;;  %v7984_v2 = vld [vmem:[%s10644_s1 + $0x15c0] ss:$16 sps:$4 sm:$0xff]   ;;  %v7987_v3 = vld [vmem:[%s10644_s1 + $0x15c8] ss:$16 sps:$4 sm:$0xff]  }
 0x282   :  { %5340 = vmatmul.mubr.bf16.vlgmr.msra.gmra.mrb[0].mxu0 %v972_v60  ;;  %5873 = vmatmul.mubr.bf16.vlgmr.msra.gmra.mrb[0].mxu1 %v972_v60  ;;  %v7995_v60 = vld [vmem:[%s10644_s1 + $0x15ec] ss:$16 sps:$4 sm:$0xff]  }
 0x283   :  { %5349 = vmatpush1.bf16.msra.mxu0 %v7900_v5  ;;  %5882 = vmatpush1.bf16.msra.mxu1 %v7903_v6  ;;  %v7990_v5 = vld [vmem:[%s10644_s1 + $0x15e0] ss:$16 sps:$4 sm:$0xff]   ;;  %v7993_v6 = vld [vmem:[%s10644_s1 + $0x15e8] ss:$16 sps:$4 sm:$0xff]  }
 0x284   :  { %5350 = vmatprep.subr.bf16.mxu0 %v7908_v7  ;;  %5883 = vmatprep.subr.bf16.mxu1 %v7911_v62  ;;  %v7999_v7 = vld [vmem:[%s10644_s1 + $0x1604] ss:$16 sps:$4 sm:$0xff]   ;;  %v8002_v62 = vld [vmem:[%s10644_s1 + $0x160c] ss:$16 sps:$4 sm:$0xff]  }
 0x285   :  { %5380 = vmatprep.mubr.bf16.mxu0 %v10200_v8  ;;  %5913 = vmatprep.mubr.bf16.mxu1 %v10200_v8 }
 0x287   :  { %5351 = vmatpush1.bf16.msra.mxu0 %v7906_v9  ;;  %5884 = vmatpush1.bf16.msra.mxu1 %v7909_v10  ;;  %v10386_v9 = vrot.slane %v10169_v0, %v8276_v49  ;;  %v7997_v10 = vld [vmem:[%s10644_s1 + $0x1600] ss:$16 sps:$4 sm:$0xff]   ;;  %v8008_v0 = vld [vmem:[%s10644_s1 + $0x162c] ss:$16 sps:$4 sm:$0xff]  }
 0x288   :  { %5352 = vmatprep.subr.bf16.mxu0 %v7914_v11  ;;  %5885 = vmatprep.subr.bf16.mxu1 %v7917_v12  ;;  %v8000_v11 = vld [vmem:[%s10644_s1 + $0x1608] ss:$16 sps:$4 sm:$0xff]   ;;  %v8005_v12 = vld [vmem:[%s10644_s1 + $0x1624] ss:$16 sps:$4 sm:$0xff]  }
 0x28b   :  { %5353 = vmatpush1.bf16.msra.mxu0 %v7912_v52  ;;  %5886 = vmatpush1.bf16.msra.mxu1 %v7915_v15  ;;  %v975_v52 = vcombine.high %v10200_v8, %v10200_v8  ;;  %v8003_v15 = vld [vmem:[%s10644_s1 + $0x1620] ss:$16 sps:$4 sm:$0xff]   ;;  %v8011_v8 = vld [vmem:[%s10644_s1 + $0x1644] ss:$16 sps:$4 sm:$0xff]  }
 0x28c   :  { %5354 = vmatprep.subr.bf16.mxu0 %v7920_v16  ;;  %5887 = vmatprep.subr.bf16.mxu1 %v7923_v17  ;;  %v8006_v16 = vld [vmem:[%s10644_s1 + $0x1628] ss:$16 sps:$4 sm:$0xff]   ;;  %v8014_v17 = vld [vmem:[%s10644_s1 + $0x164c] ss:$16 sps:$4 sm:$0xff]  }
 0x28f   :  { %5355 = vmatpush1.bf16.msra.mxu0 %v7918_v18  ;;  %5888 = vmatpush1.bf16.msra.mxu1 %v7921_v19  ;;  %v8009_v18 = vld [vmem:[%s10644_s1 + $0x1640] ss:$16 sps:$4 sm:$0xff]   ;;  %v8012_v19 = vld [vmem:[%s10644_s1 + $0x1648] ss:$16 sps:$4 sm:$0xff]  }
 0x290   :  { %5356 = vmatprep.subr.bf16.mxu0 %v7926_v20  ;;  %5889 = vmatprep.subr.bf16.mxu1 %v7929_v22  ;;  %v8017_v20 = vld [vmem:[%s10644_s1 + $0x1664] ss:$16 sps:$4 sm:$0xff]   ;;  %v8020_v22 = vld [vmem:[%s10644_s1 + $0x166c] ss:$16 sps:$4 sm:$0xff]  }
 0x293   :  { %5357 = vmatpush1.bf16.msra.mxu0 %v7924_v23  ;;  %5890 = vmatpush1.bf16.msra.mxu1 %v7927_v24  ;;  %v8015_v23 = vld [vmem:[%s10644_s1 + $0x1660] ss:$16 sps:$4 sm:$0xff]   ;;  %v8018_v24 = vld [vmem:[%s10644_s1 + $0x1668] ss:$16 sps:$4 sm:$0xff]  }
 0x294   :  { %5358 = vmatprep.subr.bf16.mxu0 %v7932_v13  ;;  %5891 = vmatprep.subr.bf16.mxu1 %v7935_v27  ;;  %v8023_v13 = vld [vmem:[%s10644_s1 + $0x1684] ss:$16 sps:$4 sm:$0xff]   ;;  %v8026_v27 = vld [vmem:[%s10644_s1 + $0x168c] ss:$16 sps:$4 sm:$0xff]  }
 0x297   :  { %5359 = vmatpush1.bf16.msra.mxu0 %v7930_v28  ;;  %5892 = vmatpush1.bf16.msra.mxu1 %v7933_v29  ;;  %v8021_v28 = vld [vmem:[%s10644_s1 + $0x1680] ss:$16 sps:$4 sm:$0xff]   ;;  %v8024_v29 = vld [vmem:[%s10644_s1 + $0x1688] ss:$16 sps:$4 sm:$0xff]  }
 0x298   :  { %5360 = vmatprep.subr.bf16.mxu0 %v7938_v14  ;;  %5893 = vmatprep.subr.bf16.mxu1 %v7941_v30  ;;  %v8029_v14 = vld [vmem:[%s10644_s1 + $0x16a4] ss:$16 sps:$4 sm:$0xff]   ;;  %v8032_v30 = vld [vmem:[%s10644_s1 + $0x16ac] ss:$16 sps:$4 sm:$0xff]  }
 0x29b   :  { %5361 = vmatpush1.bf16.msra.mxu0 %v7936_v31  ;;  %5894 = vmatpush1.bf16.msra.mxu1 %v7939_v25  ;;  %v8027_v31 = vld [vmem:[%s10644_s1 + $0x16a0] ss:$16 sps:$4 sm:$0xff]   ;;  %v8030_v25 = vld [vmem:[%s10644_s1 + $0x16a8] ss:$16 sps:$4 sm:$0xff]  }
 0x29c   :  { %5362 = vmatprep.subr.bf16.mxu0 %v7944_v32  ;;  %5895 = vmatprep.subr.bf16.mxu1 %v7947_v33  ;;  %v8035_v32 = vld [vmem:[%s10644_s1 + $0x16c4] ss:$16 sps:$4 sm:$0xff]   ;;  %v8038_v33 = vld [vmem:[%s10644_s1 + $0x16cc] ss:$16 sps:$4 sm:$0xff]  }
 0x29f   :  { %5363 = vmatpush1.bf16.msra.mxu0 %v7942_v26  ;;  %5896 = vmatpush1.bf16.msra.mxu1 %v7945_v36  ;;  %v8033_v26 = vld [vmem:[%s10644_s1 + $0x16c0] ss:$16 sps:$4 sm:$0xff]   ;;  %v8036_v36 = vld [vmem:[%s10644_s1 + $0x16c8] ss:$16 sps:$4 sm:$0xff]  }
 0x2a0   :  { %5364 = vmatprep.subr.bf16.mxu0 %v7950_v37  ;;  %5897 = vmatprep.subr.bf16.mxu1 %v7953_v21  ;;  %v8041_v37 = vld [vmem:[%s10644_s1 + $0x16e4] ss:$16 sps:$4 sm:$0xff]   ;;  %v8044_v21 = vld [vmem:[%s10644_s1 + $0x16ec] ss:$16 sps:$4 sm:$0xff]  }
 0x2a3   :  { %5365 = vmatpush1.bf16.msra.mxu0 %v7948_v39  ;;  %5898 = vmatpush1.bf16.msra.mxu1 %v7951_v40  ;;  %v8039_v39 = vld [vmem:[%s10644_s1 + $0x16e0] ss:$16 sps:$4 sm:$0xff]   ;;  %v8042_v40 = vld [vmem:[%s10644_s1 + $0x16e8] ss:$16 sps:$4 sm:$0xff]  }
 0x2a4   :  { %5366 = vmatprep.subr.bf16.mxu0 %v7956_v41  ;;  %5899 = vmatprep.subr.bf16.mxu1 %v7959_v34  ;;  %v8047_v41 = vld [vmem:[%s10644_s1 + $0x1704] ss:$16 sps:$4 sm:$0xff]   ;;  %v8050_v34 = vld [vmem:[%s10644_s1 + $0x170c] ss:$16 sps:$4 sm:$0xff]  }
 0x2a7   :  { %5367 = vmatpush1.bf16.msra.mxu0 %v7954_v43  ;;  %5900 = vmatpush1.bf16.msra.mxu1 %v7957_v45  ;;  %v8045_v43 = vld [vmem:[%s10644_s1 + $0x1700] ss:$16 sps:$4 sm:$0xff]   ;;  %v8048_v45 = vld [vmem:[%s10644_s1 + $0x1708] ss:$16 sps:$4 sm:$0xff]  }
 0x2a8   :  { %5368 = vmatprep.subr.bf16.mxu0 %v7962_v46  ;;  %5901 = vmatprep.subr.bf16.mxu1 %v7965_v35  ;;  %v8053_v46 = vld [vmem:[%s10644_s1 + $0x1724] ss:$16 sps:$4 sm:$0xff]   ;;  %v8056_v35 = vld [vmem:[%s10644_s1 + $0x172c] ss:$16 sps:$4 sm:$0xff]  }
 0x2ab   :  { %5369 = vmatpush1.bf16.msra.mxu0 %v7960_v50  ;;  %5902 = vmatpush1.bf16.msra.mxu1 %v7963_v53  ;;  %v8051_v50 = vld [vmem:[%s10644_s1 + $0x1720] ss:$16 sps:$4 sm:$0xff]   ;;  %v8054_v53 = vld [vmem:[%s10644_s1 + $0x1728] ss:$16 sps:$4 sm:$0xff]  }
 0x2ac   :  { %5370 = vmatprep.subr.bf16.mxu0 %v7968_v38  ;;  %5903 = vmatprep.subr.bf16.mxu1 %v7971_v54  ;;  %v8059_v38 = vld [vmem:[%s10644_s1 + $0x1744] ss:$16 sps:$4 sm:$0xff]   ;;  %v8062_v54 = vld [vmem:[%s10644_s1 + $0x174c] ss:$16 sps:$4 sm:$0xff]  }
 0x2af   :  { %5371 = vmatpush1.bf16.msra.mxu0 %v7966_v55  ;;  %5904 = vmatpush1.bf16.msra.mxu1 %v7969_v56  ;;  %v8057_v55 = vld [vmem:[%s10644_s1 + $0x1740] ss:$16 sps:$4 sm:$0xff]   ;;  %v8060_v56 = vld [vmem:[%s10644_s1 + $0x1748] ss:$16 sps:$4 sm:$0xff]  }
 0x2b0   :  { %5372 = vmatprep.subr.bf16.mxu0 %v7974_v47  ;;  %5905 = vmatprep.subr.bf16.mxu1 %v7977_v57  ;;  %v8065_v47 = vld [vmem:[%s10644_s1 + $0x1764] ss:$16 sps:$4 sm:$0xff]   ;;  %v8068_v57 = vld [vmem:[%s10644_s1 + $0x176c] ss:$16 sps:$4 sm:$0xff]  }
 0x2b3   :  { %5373 = vmatpush1.bf16.msra.mxu0 %v7972_v58  ;;  %5906 = vmatpush1.bf16.msra.mxu1 %v7975_v59  ;;  %v8063_v58 = vld [vmem:[%s10644_s1 + $0x1760] ss:$16 sps:$4 sm:$0xff]   ;;  %v8066_v59 = vld [vmem:[%s10644_s1 + $0x1768] ss:$16 sps:$4 sm:$0xff]  }
 0x2b4   :  { %5374 = vmatprep.subr.bf16.mxu0 %v7980_v48  ;;  %5907 = vmatprep.subr.bf16.mxu1 %v7983_v61  ;;  %v8071_v48 = vld [vmem:[%s10644_s1 + $0x1784] ss:$16 sps:$4 sm:$0xff]   ;;  %v8074_v61 = vld [vmem:[%s10644_s1 + $0x178c] ss:$16 sps:$4 sm:$0xff]  }
 0x2b7   :  { %5375 = vmatpush1.bf16.msra.mxu0 %v7978_v63  ;;  %5908 = vmatpush1.bf16.msra.mxu1 %v7981_v44  ;;  %v8069_v63 = vld [vmem:[%s10644_s1 + $0x1780] ss:$16 sps:$4 sm:$0xff]   ;;  %v8072_v44 = vld [vmem:[%s10644_s1 + $0x1788] ss:$16 sps:$4 sm:$0xff]  }
 0x2b8   :  { %5376 = vmatprep.subr.bf16.mxu0 %v7986_v1  ;;  %5909 = vmatprep.subr.bf16.mxu1 %v7989_v51  ;;  %v8077_v1 = vld [vmem:[%s10644_s1 + $0x17a4] ss:$16 sps:$4 sm:$0xff]   ;;  %v8080_v51 = vld [vmem:[%s10644_s1 + $0x17ac] ss:$16 sps:$4 sm:$0xff]  }
 0x2bb   :  { %5377 = vmatpush1.bf16.msra.mxu0 %v7984_v2  ;;  %5910 = vmatpush1.bf16.msra.mxu1 %v7987_v3  ;;  %v8075_v2 = vld [vmem:[%s10644_s1 + $0x17a0] ss:$16 sps:$4 sm:$0xff]   ;;  %v8078_v3 = vld [vmem:[%s10644_s1 + $0x17a8] ss:$16 sps:$4 sm:$0xff]  }
 0x2bc   :  { %5378 = vmatprep.subr.bf16.mxu0 %v7992_v4  ;;  %5911 = vmatprep.subr.bf16.mxu1 %v7995_v60  ;;  %v8083_v4 = vld [vmem:[%s10644_s1 + $0x17c4] ss:$16 sps:$4 sm:$0xff]   ;;  %v8086_v60 = vld [vmem:[%s10644_s1 + $0x17cc] ss:$16 sps:$4 sm:$0xff]  }
 0x2bf   :  { %5379 = vmatpush1.bf16.msra.mxu0 %v7990_v5  ;;  %5912 = vmatpush1.bf16.msra.mxu1 %v7993_v6  ;;  %v8081_v5 = vld [vmem:[%s10644_s1 + $0x17c0] ss:$16 sps:$4 sm:$0xff]   ;;  %v8084_v6 = vld [vmem:[%s10644_s1 + $0x17c8] ss:$16 sps:$4 sm:$0xff]  }
 0x2c0   :  { %5389 = vmatprep.subr.bf16.mxu0 %v7999_v7  ;;  %5922 = vmatprep.subr.bf16.mxu1 %v8002_v62  ;;  %v8089_v7 = vld [vmem:[%s10644_s1 + $0x17e4] ss:$16 sps:$4 sm:$0xff]   ;;  %v8092_v62 = vld [vmem:[%s10644_s1 + $0x17ec] ss:$16 sps:$4 sm:$0xff]  }
 0x2c2   :  { %5381 = vmatmul.mubr.bf16.vlgmr.msra.gmra.mrb[0].mxu0 %v10386_v9  ;;  %5914 = vmatmul.mubr.bf16.vlgmr.msra.gmra.mrb[0].mxu1 %v10386_v9 }
 0x2c3   :  { %5390 = vmatpush1.bf16.msra.mxu0 %v7997_v10  ;;  %5923 = vmatpush1.bf16.msra.mxu1 %v8000_v11  ;;  %v8087_v10 = vld [vmem:[%s10644_s1 + $0x17e0] ss:$16 sps:$4 sm:$0xff]   ;;  %v8090_v11 = vld [vmem:[%s10644_s1 + $0x17e8] ss:$16 sps:$4 sm:$0xff]  }
 0x2c4   :  { %5391 = vmatprep.subr.bf16.mxu0 %v8005_v12  ;;  %5924 = vmatprep.subr.bf16.mxu1 %v8008_v0  ;;  %v8095_v12 = vld [vmem:[%s10644_s1 + $0x1804] ss:$16 sps:$4 sm:$0xff]   ;;  %v8098_v0 = vld [vmem:[%s10644_s1 + $0x180c] ss:$16 sps:$4 sm:$0xff]  }
 0x2c5   :  { %5421 = vmatprep.mubr.bf16.mxu0 %v975_v52  ;;  %5954 = vmatprep.mubr.bf16.mxu1 %v975_v52  ;;  %v973_v52 = vcombine.high %v10386_v9, %v10386_v9  ;;  %v8104_v9 = vld [vmem:[%s10644_s1 + $0x182c] ss:$16 sps:$4 sm:$0xff]  }
 0x2c7   :  { %5392 = vmatpush1.bf16.msra.mxu0 %v8003_v15  ;;  %5925 = vmatpush1.bf16.msra.mxu1 %v8006_v16  ;;  %v8093_v15 = vld [vmem:[%s10644_s1 + $0x1800] ss:$16 sps:$4 sm:$0xff]   ;;  %v8096_v16 = vld [vmem:[%s10644_s1 + $0x1808] ss:$16 sps:$4 sm:$0xff]  }
 0x2c8   :  { %5393 = vmatprep.subr.bf16.mxu0 %v8011_v8  ;;  %5926 = vmatprep.subr.bf16.mxu1 %v8014_v17  ;;  %v8101_v8 = vld [vmem:[%s10644_s1 + $0x1824] ss:$16 sps:$4 sm:$0xff]   ;;  %v8099_v17 = vld [vmem:[%s10644_s1 + $0x1820] ss:$16 sps:$4 sm:$0xff]  }
 0x2cb   :  { %5394 = vmatpush1.bf16.msra.mxu0 %v8009_v18  ;;  %5927 = vmatpush1.bf16.msra.mxu1 %v8012_v19  ;;  %v8102_v18 = vld [vmem:[%s10644_s1 + $0x1828] ss:$16 sps:$4 sm:$0xff]   ;;  %v8107_v19 = vld [vmem:[%s10644_s1 + $0x1844] ss:$16 sps:$4 sm:$0xff]  }
 0x2cc   :  { %5395 = vmatprep.subr.bf16.mxu0 %v8017_v20  ;;  %5928 = vmatprep.subr.bf16.mxu1 %v8020_v22  ;;  %v8110_v20 = vld [vmem:[%s10644_s1 + $0x184c] ss:$16 sps:$4 sm:$0xff]   ;;  %v8120_v22 = vmov 0  }
 0x2cf   :  { %5396 = vmatpush1.bf16.msra.mxu0 %v8015_v23  ;;  %5929 = vmatpush1.bf16.msra.mxu1 %v8018_v24  ;;  %v8105_v23 = vld [vmem:[%s10644_s1 + $0x1840] ss:$16 sps:$4 sm:$0xff]   ;;  %v8108_v24 = vld [vmem:[%s10644_s1 + $0x1848] ss:$16 sps:$4 sm:$0xff]  }
 0x2d0   :  { %5397 = vmatprep.subr.bf16.mxu0 %v8023_v13  ;;  %5930 = vmatprep.subr.bf16.mxu1 %v8026_v27  ;;  %v8113_v13 = vld [vmem:[%s10644_s1 + $0x1864] ss:$16 sps:$4 sm:$0xff]   ;;  %v8116_v27 = vld [vmem:[%s10644_s1 + $0x186c] ss:$16 sps:$4 sm:$0xff]  }
 0x2d3   :  { %5398 = vmatpush1.bf16.msra.mxu0 %v8021_v28  ;;  %5931 = vmatpush1.bf16.msra.mxu1 %v8024_v29  ;;  %v8111_v28 = vld [vmem:[%s10644_s1 + $0x1860] ss:$16 sps:$4 sm:$0xff]   ;;  %v8114_v29 = vld [vmem:[%s10644_s1 + $0x1868] ss:$16 sps:$4 sm:$0xff]  }
 0x2d4   :  { %5399 = vmatprep.subr.bf16.mxu0 %v8029_v14  ;;  %5932 = vmatprep.subr.bf16.mxu1 %v8032_v30  ;;  %v6046_v14 = vld.sshfl [vmem:[%s10645_s0 + $0x18] sm:$0x1 pattern:$0x75316420] }
 0x2d5   :  { %v989_v30 = vrot.slane %v6046_v14, %v8276_v49 }
 0x2d7   :  { %5400 = vmatpush1.bf16.msra.mxu0 %v8027_v31  ;;  %5933 = vmatpush1.bf16.msra.mxu1 %v8030_v25  ;;  %v807_v31 = vsub.s32 0, %v8258_v42  ;;  %v815_v25 = vsub.s32 2, %v8258_v42 }
 0x2d8   :  { %5401 = vmatprep.subr.bf16.mxu0 %v8035_v32  ;;  %5934 = vmatprep.subr.bf16.mxu1 %v8038_v33  ;;  %v803_v32 = vld [vmem:[%s10646_s2] sm:$0xf]  ;;  %v811_v33 = vsub.s32 1, %v8258_v42 }
 0x2db   :  { %5402 = vmatpush1.bf16.msra.mxu0 %v8033_v26  ;;  %5935 = vmatpush1.bf16.msra.mxu1 %v8036_v36  ;;  %v819_v26 = vsub.s32 3, %v8258_v42  ;;  %v808_v36 = vrot.slane %v803_v32, %v807_v31 }
 0x2dc   :  { %5403 = vmatprep.subr.bf16.mxu0 %v8041_v37  ;;  %5936 = vmatprep.subr.bf16.mxu1 %v8044_v21  ;;  %v816_v37 = vrot.slane %v803_v32, %v815_v25  ;;  %v812_v21 = vrot.slane %v803_v32, %v811_v33 }
 0x2df   :  { %5404 = vmatpush1.bf16.msra.mxu0 %v8039_v39  ;;  %5937 = vmatpush1.bf16.msra.mxu1 %v8042_v40  ;;  %v820_v39 = vrot.slane %v803_v32, %v819_v26 }
 0x2e0   :  { %5405 = vmatprep.subr.bf16.mxu0 %v8047_v41  ;;  %5938 = vmatprep.subr.bf16.mxu1 %v8050_v34 }
 0x2e3   :  { %5406 = vmatpush1.bf16.msra.mxu0 %v8045_v43  ;;  %5939 = vmatpush1.bf16.msra.mxu1 %v8048_v45 }
 0x2e4   :  { %5407 = vmatprep.subr.bf16.mxu0 %v8053_v46  ;;  %5940 = vmatprep.subr.bf16.mxu1 %v8056_v35 }
 0x2e7   :  { %5408 = vmatpush1.bf16.msra.mxu0 %v8051_v50  ;;  %5941 = vmatpush1.bf16.msra.mxu1 %v8054_v53 }
 0x2e8   :  { %5409 = vmatprep.subr.bf16.mxu0 %v8059_v38  ;;  %5942 = vmatprep.subr.bf16.mxu1 %v8062_v54 }
 0x2eb   :  { %5410 = vmatpush1.bf16.msra.mxu0 %v8057_v55  ;;  %5943 = vmatpush1.bf16.msra.mxu1 %v8060_v56 }
 0x2ec   :  { %5411 = vmatprep.subr.bf16.mxu0 %v8065_v47  ;;  %5944 = vmatprep.subr.bf16.mxu1 %v8068_v57 }
 0x2ef   :  { %5412 = vmatpush1.bf16.msra.mxu0 %v8063_v58  ;;  %5945 = vmatpush1.bf16.msra.mxu1 %v8066_v59 }
 0x2f0   :  { %5413 = vmatprep.subr.bf16.mxu0 %v8071_v48  ;;  %5946 = vmatprep.subr.bf16.mxu1 %v8074_v61 }
 0x2f3   :  { %5414 = vmatpush1.bf16.msra.mxu0 %v8069_v63  ;;  %5947 = vmatpush1.bf16.msra.mxu1 %v8072_v44 }
 0x2f4   :  { %5415 = vmatprep.subr.bf16.mxu0 %v8077_v1  ;;  %5948 = vmatprep.subr.bf16.mxu1 %v8080_v51 }
 0x2f7   :  { %5416 = vmatpush1.bf16.msra.mxu0 %v8075_v2  ;;  %5949 = vmatpush1.bf16.msra.mxu1 %v8078_v3 }
 0x2f8   :  { %5417 = vmatprep.subr.bf16.mxu0 %v8083_v4  ;;  %5950 = vmatprep.subr.bf16.mxu1 %v8086_v60 }
 0x2fb   :  { %5418 = vmatpush1.bf16.msra.mxu0 %v8081_v5  ;;  %5951 = vmatpush1.bf16.msra.mxu1 %v8084_v6 }
 0x2fc   :  { %5419 = vmatprep.subr.bf16.mxu0 %v8089_v7  ;;  %5952 = vmatprep.subr.bf16.mxu1 %v8092_v62 }
 0x2ff   :  { %5420 = vmatpush1.bf16.msra.mxu0 %v8087_v10  ;;  %5953 = vmatpush1.bf16.msra.mxu1 %v8090_v11 }
 0x300   :  { %5430 = vmatprep.subr.bf16.mxu0 %v8095_v12  ;;  %5963 = vmatprep.subr.bf16.mxu1 %v8098_v0 }
 0x302   :  { %5422 = vmatmul.mubr.bf16.vlgmr.msra.gmra.mrb[0].mxu0 %v973_v52  ;;  %5955 = vmatmul.mubr.bf16.vlgmr.msra.gmra.mrb[0].mxu1 %v973_v52 }
 0x303   :  { %5431 = vmatpush1.bf16.msra.mxu0 %v8093_v15  ;;  %5964 = vmatpush1.bf16.msra.mxu1 %v8096_v16 }
 0x304   :  { %5432 = vmatprep.subr.bf16.mxu0 %v8101_v8  ;;  %5965 = vmatprep.subr.bf16.mxu1 %v8104_v9 }
 0x305   :  { %5462 = vmatprep.mubr.bf16.mxu0 %v8120_v22  ;;  %5995 = vmatprep.mubr.bf16.mxu1 %v8120_v22 }
 0x307   :  { %5433 = vmatpush1.bf16.msra.mxu0 %v8099_v17  ;;  %5966 = vmatpush1.bf16.msra.mxu1 %v8102_v18 }
 0x308   :  { %5434 = vmatprep.subr.bf16.mxu0 %v8107_v19  ;;  %5967 = vmatprep.subr.bf16.mxu1 %v8110_v20 }
 0x30b   :  { %5435 = vmatpush1.bf16.msra.mxu0 %v8105_v23  ;;  %5968 = vmatpush1.bf16.msra.mxu1 %v8108_v24 }
 0x30c   :  { %5436 = vmatprep.subr.bf16.mxu0 %v8113_v13  ;;  %5969 = vmatprep.subr.bf16.mxu1 %v8116_v27 }
 0x30f   :  { %5437 = vmatpush1.bf16.msra.mxu0 %v8111_v28  ;;  %5970 = vmatpush1.bf16.msra.mxu1 %v8114_v29 }
 0x312   :  { %6831 = vmatmul.mubr.msk.bf16.vlgmr.msra.gmra.mrb[0].mxu0 %vm4934_vm0, %v989_v30  ;;  %6832 = vmatmul.mubr.msk.bf16.vlgmr.msra.gmra.mrb[0].mxu1 %vm4934_vm0, %v989_v30 }
 0x3e5   :  { %v5464_v40 = vpop.f32.mrb[0].mxu0  ;;  %v5997_v41 = vpop.f32.mrb[0].mxu1 }
 0x3e6   :  { %v6836_v34 = vadd.f32 %v5464_v40, %v808_v36  ;;  %v6838_v43 = vadd.f32 %v5997_v41, %v816_v37  ;;  %v5466_v45 = vpop.f32.mrb[1].mxu0  ;;  %v5999_v46 = vpop.f32.mrb[1].mxu1 }
 0x3e7   :  { %v6837_v35 = vadd.f32 %v5466_v45, %v812_v21  ;;  %v6839_v50 = vadd.f32 %v5999_v46, %v820_v39  ;;  %v5468_v53 = vpop.f32.mrb[2].mxu0  ;;  %v6001_v38 = vpop.f32.mrb[2].mxu1 }
 0x3e8   :  { %v6004_v54 = vmax.f32 %v6836_v34, 0.0  ;;  %v6006_v55 = vmax.f32 %v6838_v43, 0.0  ;;  %v5469_v56 = vpop.f32.mrb[3].mxu0  ;;  %v6002_v47 = vpop.f32.mrb[3].mxu1 }
 0x3e9   :  { %v6005_v57 = vmax.f32 %v6837_v35, 0.0  ;;  %v6007_v42 = vmax.f32 %v6839_v50, 0.0 }
 0x3eb   :  { %v6833_v58 = vpack.c.bf16 %v6005_v57, %v6004_v54  ;;  %v6834_v59 = vpack.c.bf16 %v6007_v42, %v6006_v55 }
 0x3ed   :  { %v6024_v48 = vrot.slane %v6833_v58, %v8276_v49  ;;  %v6031_v61 = vrot.slane %v6834_v59, %v8276_v49 }
 0x3ef   :  { %v6032_v63 = vcombine.low %v6024_v48, %v6031_v61 }
 0x3f1   :  { %6835 = vst.sshfl [vmem:[%s10647_s3] sm:$0x55 pattern:$0x73625140] %v6032_v63 }

</bundles_post_ra>
